<compile_context>
chip_gen: v5e
topology: v5e:2x2
jax: 0.10.0
libtpu: 0.0.40
codegen_flags: <defaults>
</compile_context>

<pallas_src>
import jax
import jax.numpy as jnp
from jax.experimental import pallas as pl
from jax.experimental.pallas import tpu as pltpu

BN_EPS = 1e-5        # PyTorch BatchNorm2d default
NEG_SLOPE = 0.2      # LeakyReLU slope
LANE = 128           # TPU lane width
VMEM_LIMIT = 48 * 1024 * 1024


def _round_up(x, m):
    return (x + m - 1) // m * m


def _leaky_relu(y):
    return jnp.where(y > 0, y, NEG_SLOPE * y)


def _fold_bn(w, gamma, beta, mean, var):
    """Fold eval-mode BatchNorm into the conv weight (scale) and a bias."""
    inv = gamma / jnp.sqrt(var + BN_EPS)
    return w * inv, beta - mean * inv


def _pad_merge_s2(x):
    """Zero-pad (spatial pad=1 for a 3x3/s2 window, channels to a lane
    multiple) and merge W column *pairs* into the channel axis.

    (N, H, W, C) -> (N, Ho+1, 2, Wo+1, 2*Cp) with
        out[n, i, e, j, f*Cp + c] = x_pad[n, 2i + e, 2j + f, c]

    This is a single jnp.pad plus a *free* row-major reshape (no transpose),
    so stride-2 consumers see only static, unstrided, lane-aligned slices.
    """
    N, H, W, C = x.shape
    Ho = (H - 1) // 2 + 1
    Wo = (W - 1) // 2 + 1
    Hp, Wp = 2 * (Ho + 1), 2 * (Wo + 1)
    Cp = _round_up(C, LANE)
    xp = jnp.pad(x, ((0, 0), (1, Hp - H - 1), (1, Wp - W - 1), (0, Cp - C)))
    return xp.reshape(N, Hp // 2, 2, Wp // 2, 2 * Cp)


def _prep_weights(params, cinp, coutp, stride, pw):
    """Fold BN and lay the 3x3 weights out as (3, n_groups*pw, coutp) matching
    the fused-K operand built in the kernel (group = kernel row kh)."""
    w, gamma, beta, mean, var = params
    assert w.shape[:2] == (3, 3)
    cin_r, cout = w.shape[2], w.shape[3]
    w_f, b_f = _fold_bn(w, gamma, beta, mean, var)
    # Pad real Cin up to the (possibly lane-padded) input channel count and
    # Cout up to the (possibly lane-padded) output channel count with zeros.
    w_c = jnp.pad(w_f, ((0, 0), (0, 0), (0, cinp - cin_r), (0, coutp - cout)))
    if stride == 1:
        # operand group kh = [kw0 | kw1 | kw2] columns of the shifted slab
        groups = [w_c[:, kw] for kw in range(3)]                 # (3, cinp, coutp)
    else:
        # operand group kh, piece0 = column-pair c   -> [kw0 | kw1]
        #               piece1 = column-pair c+1 -> [kw2 | unused(=0)]
        g0 = jnp.concatenate([w_c[:, 0], w_c[:, 1]], axis=1)     # (3, 2cinp, coutp)
        g1 = jnp.concatenate([w_c[:, 2], jnp.zeros_like(w_c[:, 2])], axis=1)
        groups = [g0, g1]
    groups = [jnp.pad(g, ((0, 0), (0, pw - g.shape[1]), (0, 0))) for g in groups]
    w_arr = jnp.concatenate(groups, axis=1).astype(jnp.bfloat16)  # (3, KG, coutp)
    b_arr = jnp.pad(b_f, (0, coutp - cout)).reshape(1, coutp).astype(jnp.float32)
    return w_arr, b_arr


# ---------------------------------------------------------------------------
# Pallas kernels
# ---------------------------------------------------------------------------
def _gemm_bias_lrelu_kernel(x_ref, w_ref, b_ref, o_ref):
    """1x1 conv: (tm, Cin) @ (Cin, Cout) + bias -> LeakyReLU (BN folded).
    The f32->bf16 cast happens in-kernel (no wrapper-side cast pass)."""
    x = x_ref[...].astype(jnp.bfloat16)
    acc = jnp.dot(x, w_ref[...], preferred_element_type=jnp.float32)
    o_ref[...] = _leaky_relu(acc + b_ref[...]).astype(o_ref.dtype)


def _make_conv3x3_kernel(stride, Ho, Wo, pw):
    """3x3 conv (pad=1, stride 1 or 2), BN folded, LeakyReLU epilogue.

    grid = (image n, output-channel tile c).  At c == 0 the fused-K operand
    (one (M, n_groups*pw) bf16 slab per kernel row kh) is built into a VMEM
    scratch from the image block; every channel tile then does 3 MXU dots
    accumulated in vregs, adds the bias, applies LeakyReLU and stores once.
    """
    M = Ho * Wo

    def kernel(x_ref, w_ref, b_ref, o_ref, op_ref):
        piece_w = x_ref.shape[-1]            # Cin (s1) or 2*Cin (s2), static

        @pl.when(pl.program_id(1) == 0)
        def _build():
            if pw != piece_w:                # statically dead when lane-padded
                op_ref[...] = jnp.zeros_like(op_ref)
            for kh in range(3):
                if stride == 1:
                    pieces = [x_ref[0, kh:kh + Ho, kw:kw + Wo, :]
                              for kw in range(3)]
                else:
                    rh0, eh = kh // 2, kh % 2
                    pieces = [x_ref[0, rh0:rh0 + Ho, eh, 0:Wo, :],
                              x_ref[0, rh0:rh0 + Ho, eh, 1:1 + Wo, :]]
                for g, piece in enumerate(pieces):
                    op_ref[kh, :, g * pw:g * pw + piece_w] = (
                        piece.reshape(M, piece_w).astype(op_ref.dtype))

        acc = jnp.dot(op_ref[0], w_ref[0], preferred_element_type=jnp.float32)
        acc = acc + jnp.dot(op_ref[1], w_ref[1],
                            preferred_element_type=jnp.float32)
        acc = acc + jnp.dot(op_ref[2], w_ref[2],
                            preferred_element_type=jnp.float32)
        o_ref[0] = _leaky_relu(acc + b_ref[...]).astype(o_ref.dtype)

    return kernel


def _make_maxpool_kernel(H, W, Ho, Wo, C, Cp):
    """MaxPool 3x3 / s2 / pad-1 on the shared zero-padded merged view.
    Padded border positions are masked to -max (channel-chunked, pure VPU)."""
    def kernel(x_ref, o_ref):
        for c0 in range(0, C, LANE):
            cc = min(LANE, C - c0)
            m = None
            for kh in range(3):
                rh0, eh = kh // 2, kh % 2
                row_pad = (kh == 0) or (2 * (Ho - 1) + kh > H)
                for kw in range(3):
                    cw0, ew = kw // 2, kw % 2
                    col_pad = (kw == 0) or (2 * (Wo - 1) + kw > W)
                    lo = ew * Cp + c0
                    v = x_ref[0, rh0:rh0 + Ho, eh, cw0:cw0 + Wo, lo:lo + cc]
                    if row_pad or col_pad:
                        mask = None
                        if row_pad:
                            rid = jax.lax.broadcasted_iota(jnp.int32, v.shape, 0)
                            pr = 2 * rid + kh
                            mask = (pr >= 1) & (pr <= H)
                        if col_pad:
                            cid = jax.lax.broadcasted_iota(jnp.int32, v.shape, 1)
                            pc = 2 * cid + kw
                            cm = (pc >= 1) & (pc <= W)
                            mask = cm if mask is None else (mask & cm)
                        v = jnp.where(mask, v, jnp.finfo(v.dtype).min)
                    m = v if m is None else jnp.maximum(m, v)
            o_ref[0, :, :, c0:c0 + cc] = m.astype(o_ref.dtype)

    return kernel


# ---------------------------------------------------------------------------
# Wrappers (BN folding, lane padding, pallas_call plumbing)
# ---------------------------------------------------------------------------
def conv1x1_bn_lrelu(x, params, *, out_dtype):
    """1x1 Conv(bias=False) + folded BN + LeakyReLU as a fused GEMM. x: NHWC."""
    w = params[0]
    cin, cout = w.shape[2], w.shape[3]
    N, H, W, C = x.shape
    assert C == cin
    coutp = _round_up(cout, LANE)                       # lane-dense output

    w_f, b_f = _fold_bn(w.reshape(cin, cout), *params[1:])
    w_p = jnp.pad(w_f, ((0, 0), (0, coutp - cout))).astype(jnp.bfloat16)
    b_p = jnp.pad(b_f, (0, coutp - cout)).reshape(1, coutp).astype(jnp.float32)

    M = N * H * W
    tm = None
    for cand in (1024, 512, 256, 128, 64, 32, 16, 8):
        if M % cand == 0 and M // cand >= 2:
            tm = cand
            break
    xm = x.reshape(M, cin)
    if tm is None:            # ragged / tiny M: pad rows (sliced off below)
        tm = min(512, _round_up(M, 8))
        Mp = _round_up(M, tm)
        xm = jnp.pad(xm, ((0, Mp - M), (0, 0)))
    else:
        Mp = M

    out = pl.pallas_call(
        _gemm_bias_lrelu_kernel,
        out_shape=jax.ShapeDtypeStruct((Mp, coutp), out_dtype),
        grid=(Mp // tm,),
        in_specs=[
            pl.BlockSpec((tm, cin), lambda i: (i, 0)),
            pl.BlockSpec((cin, coutp), lambda i: (0, 0)),
            pl.BlockSpec((1, coutp), lambda i: (0, 0)),
        ],
        out_specs=pl.BlockSpec((tm, coutp), lambda i: (i, 0)),
        compiler_params=pltpu.CompilerParams(
            dimension_semantics=("parallel",),
            vmem_limit_bytes=VMEM_LIMIT),
    )(xm, w_p, b_p)
    return out[:M].reshape(N, H, W, coutp)


def conv3x3_s1_bn_lrelu(x, params, *, out_dtype, pad_out):
    """3x3 / stride-1 / pad-1 Conv(bias=False) + folded BN + LeakyReLU.
    Input may carry zero lane-padded channels (matching weight rows are 0)."""
    N, H, W, cinp = x.shape
    cout = params[0].shape[-1]
    coutp = _round_up(cout, LANE) if pad_out else cout
    ctile = LANE if coutp % LANE == 0 else coutp
    nct = coutp // ctile
    pw = _round_up(cinp, LANE)
    KG = 3 * pw
    M = H * W

    w_arr, b_arr = _prep_weights(params, cinp, coutp, 1, pw)
    xin = jnp.pad(x, ((0, 0), (1, 1), (1, 1), (0, 0)))

    out = pl.pallas_call(
        _make_conv3x3_kernel(1, H, W, pw),
        out_shape=jax.ShapeDtypeStruct((N, M, coutp), out_dtype),
        grid=(N, nct),
        in_specs=[
            pl.BlockSpec((1, H + 2, W + 2, cinp), lambda n, c: (n, 0, 0, 0)),
            pl.BlockSpec((3, KG, ctile), lambda n, c: (0, 0, c)),
            pl.BlockSpec((1, ctile), lambda n, c: (0, c)),
        ],
        out_specs=pl.BlockSpec((1, M, ctile), lambda n, c: (n, 0, c)),
        scratch_shapes=[pltpu.VMEM((3, M, KG), jnp.bfloat16)],
        compiler_params=pltpu.CompilerParams(
            dimension_semantics=("parallel", "arbitrary"),
            vmem_limit_bytes=VMEM_LIMIT),
    )(xin, w_arr, b_arr)
    return out.reshape(N, H, W, coutp)


def conv3x3_s2_bn_lrelu(xs2, params, *, out_dtype, pad_out=False):
    """3x3 / stride-2 / pad-1 Conv(bias=False) + folded BN + LeakyReLU,
    consuming the shared zero-padded column-pair-merged view (_pad_merge_s2)."""
    N, Hh, _, Wq, twoC = xs2.shape
    cinp = twoC // 2
    Ho, Wo = Hh - 1, Wq - 1
    cout = params[0].shape[-1]
    coutp = _round_up(cout, LANE) if pad_out else cout
    ctile = LANE if coutp % LANE == 0 else coutp
    nct = coutp // ctile
    pw = _round_up(2 * cinp, LANE)
    KG = 2 * pw
    M = Ho * Wo

    w_arr, b_arr = _prep_weights(params, cinp, coutp, 2, pw)

    out = pl.pallas_call(
        _make_conv3x3_kernel(2, Ho, Wo, pw),
        out_shape=jax.ShapeDtypeStruct((N, M, coutp), out_dtype),
        grid=(N, nct),
        in_specs=[
            pl.BlockSpec((1, Hh, 2, Wq, twoC), lambda n, c: (n, 0, 0, 0, 0)),
            pl.BlockSpec((3, KG, ctile), lambda n, c: (0, 0, c)),
            pl.BlockSpec((1, ctile), lambda n, c: (0, c)),
        ],
        out_specs=pl.BlockSpec((1, M, ctile), lambda n, c: (n, 0, c)),
        scratch_shapes=[pltpu.VMEM((3, M, KG), jnp.bfloat16)],
        compiler_params=pltpu.CompilerParams(
            dimension_semantics=("parallel", "arbitrary"),
            vmem_limit_bytes=VMEM_LIMIT),
    )(xs2, w_arr, b_arr)
    return out.reshape(N, Ho, Wo, coutp)


def maxpool_3x3_s2_p1(xs2, orig_hwc, *, out_dtype):
    """MaxPool2d(kernel=3, stride=2, padding=1) on the shared merged view."""
    H, W, C = orig_hwc
    N, Hh, _, Wq, twoCp = xs2.shape
    Cp = twoCp // 2
    Ho, Wo = Hh - 1, Wq - 1
    return pl.pallas_call(
        _make_maxpool_kernel(H, W, Ho, Wo, C, Cp),
        out_shape=jax.ShapeDtypeStruct((N, Ho, Wo, C), out_dtype),
        grid=(N,),
        in_specs=[pl.BlockSpec((1, Hh, 2, Wq, twoCp),
                               lambda n: (n, 0, 0, 0, 0))],
        out_specs=pl.BlockSpec((1, Ho, Wo, C), lambda n: (n, 0, 0, 0)),
        compiler_params=pltpu.CompilerParams(
            dimension_semantics=("parallel",),
            vmem_limit_bytes=VMEM_LIMIT),
    )(xs2)


# ---------------------------------------------------------------------------
# InceptionModuleD forward
# ---------------------------------------------------------------------------
def inception_module_d(x_nchw, params):
    # NCHW in / NCHW out (PyTorch convention), NHWC inside the kernels.
    x = jnp.transpose(x_nchw, (0, 2, 3, 1))
    out_dt = x.dtype
    N, H, W, C = x.shape

    # Single shared zero-padded + pair-merged view of x feeds both stride-2
    # consumers of the raw input (branch-1 conv and the maxpool branch).
    xs2 = _pad_merge_s2(x)

    # Branch 1: 3x3 / stride 2 -> 384 channels (lane-exact, no slicing).
    b1 = conv3x3_s2_bn_lrelu(xs2, params["b3x3"], out_dtype=out_dt,
                             pad_out=False)

    # Branch 2: 1x1 -> 3x3 -> 3x3/s2.  Intermediates stay bf16 and 128-channel
    # zero-padded (lane-dense stores; padded channels are exactly 0).
    y = conv1x1_bn_lrelu(x, params["b_dbl_1"], out_dtype=jnp.bfloat16)
    y = conv3x3_s1_bn_lrelu(y, params["b_dbl_2"], out_dtype=jnp.bfloat16,
                            pad_out=True)
    b2 = conv3x3_s2_bn_lrelu(_pad_merge_s2(y), params["b_dbl_3"],
                             out_dtype=out_dt, pad_out=False)

    # Branch 3: MaxPool 3x3 / stride 2 / pad 1 (exact, f32).
    b3 = maxpool_3x3_s2_p1(xs2, (H, W, C), out_dtype=out_dt)

    out = jnp.concatenate([b1, b2, b3], axis=-1)
    return jnp.transpose(out, (0, 3, 1, 2))


# ---------------------------------------------------------------------------
# Deterministic parameter init (synthetic; shapes from the module __init__)
# ---------------------------------------------------------------------------
def init_conv_bn(key, cin, cout, kh, kw):
    k1, k2, k3, k4, k5 = jax.random.split(key, 5)
    w = 0.05 * jax.random.normal(k1, (kh, kw, cin, cout), jnp.float32)
    gamma = 1.0 + 0.1 * jax.random.normal(k2, (cout,), jnp.float32)
    beta = 0.1 * jax.random.normal(k3, (cout,), jnp.float32)
    mean = 0.1 * jax.random.normal(k4, (cout,), jnp.float32)
    var = 0.5 + jax.random.uniform(k5, (cout,), jnp.float32)
    return (w, gamma, beta, mean, var)


# ---------------------------------------------------------------------------
# Pure-JAX reference (f32) for a sanity check
# ---------------------------------------------------------------------------
def _ref_conv_bn_lrelu(x, params, stride, padding):
    w, gamma, beta, mean, var = params
    y = jax.lax.conv_general_dilated(
        x, w, window_strides=(stride, stride),
        padding=[(padding, padding), (padding, padding)],
        dimension_numbers=("NHWC", "HWIO", "NHWC"))
    inv = gamma / jnp.sqrt(var + BN_EPS)
    y = y * inv + (beta - mean * inv)
    return jnp.where(y > 0, y, NEG_SLOPE * y)


def _ref_module(x_nchw, params):
    x = jnp.transpose(x_nchw, (0, 2, 3, 1))
    b1 = _ref_conv_bn_lrelu(x, params["b3x3"], 2, 1)
    y = _ref_conv_bn_lrelu(x, params["b_dbl_1"], 1, 0)
    y = _ref_conv_bn_lrelu(y, params["b_dbl_2"], 1, 1)
    b2 = _ref_conv_bn_lrelu(y, params["b_dbl_3"], 2, 1)
    neg = jnp.finfo(x.dtype).min
    xp = jnp.pad(x, ((0, 0), (1, 1), (1, 1), (0, 0)), constant_values=neg)
    b3 = jax.lax.reduce_window(xp, neg, jax.lax.max,
                               (1, 3, 3, 1), (1, 2, 2, 1), "VALID")
    out = jnp.concatenate([b1, b2, b3], axis=-1)
    return jnp.transpose(out, (0, 3, 1, 2))


if __name__ == "__main__":
    in_channels = 4
    key = jax.random.PRNGKey(0)
    kx, k1, k2, k3, k4 = jax.random.split(key, 5)

    x = jax.random.normal(kx, (2, in_channels, 16, 16), jnp.float32)

    params = {
        "b3x3":    init_conv_bn(k1, in_channels, 384, 3, 3),
        "b_dbl_1": init_conv_bn(k2, in_channels, 64, 1, 1),
        "b_dbl_2": init_conv_bn(k3, 64, 96, 3, 3),
        "b_dbl_3": init_conv_bn(k4, 96, 96, 3, 3),
    }

    out = jax.jit(inception_module_d)(x, params)
    out = jax.block_until_ready(out)

    assert out.shape == (2, 384 + 96 + in_channels, 8, 8), out.shape
    assert bool(jnp.isfinite(out).all())

    # Loose tolerance: kernels use bf16 MXU inputs, reference is pure f32.
    ref = _ref_module(x, params)
    assert bool(jnp.allclose(out, ref, rtol=5e-2, atol=5e-2)), (
        float(jnp.max(jnp.abs(out - ref))))

    print("KERNEL_OK")
</pallas_src>

<mosaic_0001>
module attributes {stable_mosaic.version = 11 : i64} {
  func.func @_gemm_bias_lrelu_kernel(%arg0: i32, %arg1: memref<256x4xf32, #tpu.memory_space<vmem>>, %arg2: memref<4x128xbf16, #tpu.memory_space<vmem>>, %arg3: memref<1x128xf32, #tpu.memory_space<vmem>>, %arg4: memref<256x128xbf16, #tpu.memory_space<vmem>>) attributes {dimension_semantics = [#tpu.dimension_semantics<parallel>], iteration_bounds = array<i64: 2>, scalar_prefetch = 0 : i64, scratch_operands = 0 : i64, tpu.core_type = #tpu.core_type<tc>, window_params = [{transform_indices = @transform_0, window_bounds = array<i64: 256, 4>}, {pipeline_mode = #tpu.pipeline_mode<synchronous>, transform_indices = @transform_1, window_bounds = array<i64: 4, 128>}, {pipeline_mode = #tpu.pipeline_mode<synchronous>, transform_indices = @transform_2, window_bounds = array<i64: 1, 128>}, {transform_indices = @transform_3, window_bounds = array<i64: 256, 128>}]} {
    %c0 = arith.constant 0 : index
    %c0_0 = arith.constant 0 : index
    %0 = vector.load %arg1[%c0, %c0_0] : memref<256x4xf32, #tpu.memory_space<vmem>>, vector<256x4xf32>
    %1 = arith.truncf %0 : vector<256x4xf32> to vector<256x4xbf16>
    %c0_1 = arith.constant 0 : index
    %c0_2 = arith.constant 0 : index
    %2 = vector.load %arg2[%c0_1, %c0_2] : memref<4x128xbf16, #tpu.memory_space<vmem>>, vector<4x128xbf16>
    %cst = arith.constant dense<0.000000e+00> : vector<256x128xf32>
    %3 = tpu.matmul %1, %2, %cst {dimension_numbers = #tpu.dot_dimension_numbers<[1], [0], [0], [1], [0, 0, 1, 1], [], []>} : vector<256x4xbf16>, vector<4x128xbf16>, vector<256x128xf32> -> vector<256x128xf32>
    %c0_3 = arith.constant 0 : index
    %c0_4 = arith.constant 0 : index
    %4 = vector.load %arg3[%c0_3, %c0_4] : memref<1x128xf32, #tpu.memory_space<vmem>>, vector<1x128xf32>
    %5 = vector.broadcast %4 : vector<1x128xf32> to vector<256x128xf32>
    %6 = arith.addf %3, %5 : vector<256x128xf32>
    %cst_5 = arith.constant 0.000000e+00 : f32
    %7 = vector.broadcast %cst_5 : f32 to vector<256x128xf32>
    %8 = arith.cmpf ogt, %6, %7 : vector<256x128xf32>
    %cst_6 = arith.constant 2.000000e-01 : f32
    %9 = vector.broadcast %cst_6 : f32 to vector<256x128xf32>
    %10 = arith.mulf %9, %6 : vector<256x128xf32>
    %11 = arith.select %8, %6, %10 : vector<256x128xi1>, vector<256x128xf32>
    %12 = arith.truncf %11 : vector<256x128xf32> to vector<256x128xbf16>
    %c0_7 = arith.constant 0 : index
    %c0_8 = arith.constant 0 : index
    %13 = vector.load %arg4[%c0_7, %c0_8] : memref<256x128xbf16, #tpu.memory_space<vmem>>, vector<256x128xbf16>
    tpu.vector_store %arg4[%c0_7, %c0_8], %12 {strides = array<i32>} : memref<256x128xbf16, #tpu.memory_space<vmem>>, vector<256x128xbf16>,
    return
  }
  func.func @transform_0(%arg0: i32) -> (i32, i32) {
    %c0_i32 = arith.constant 0 : i32
    %c0_i32_0 = arith.constant 0 : i32
    return %arg0, %c0_i32 : i32, i32
  }
  func.func @transform_1(%arg0: i32) -> (i32, i32) {
    %c0_i32 = arith.constant 0 : i32
    %c0_i32_0 = arith.constant 0 : i32
    %c0_i32_1 = arith.constant 0 : i32
    return %c0_i32, %c0_i32_0 : i32, i32
  }
  func.func @transform_2(%arg0: i32) -> (i32, i32) {
    %c0_i32 = arith.constant 0 : i32
    %c0_i32_0 = arith.constant 0 : i32
    %c0_i32_1 = arith.constant 0 : i32
    return %c0_i32, %c0_i32_0 : i32, i32
  }
  func.func @transform_3(%arg0: i32) -> (i32, i32) {
    %c0_i32 = arith.constant 0 : i32
    %c0_i32_0 = arith.constant 0 : i32
    return %arg0, %c0_i32 : i32, i32
  }
}

module attributes {stable_mosaic.version = 11 : i64} {
  func.func @kernel(%arg0: i32, %arg1: i32, %arg2: memref<1x18x18x128xbf16, #tpu.memory_space<vmem>>, %arg3: memref<3x384x128xbf16, #tpu.memory_space<vmem>>, %arg4: memref<1x128xf32, #tpu.memory_space<vmem>>, %arg5: memref<1x256x128xbf16, #tpu.memory_space<vmem>>, %arg6: memref<3x256x384xbf16, #tpu.memory_space<vmem>>) attributes {dimension_semantics = [#tpu.dimension_semantics<parallel>, #tpu.dimension_semantics<arbitrary>], iteration_bounds = array<i64: 2, 1>, scalar_prefetch = 0 : i64, scratch_operands = 1 : i64, tpu.core_type = #tpu.core_type<tc>, window_params = [{transform_indices = @transform_0, window_bounds = array<i64: 1, 18, 18, 128>}, {transform_indices = @transform_1, window_bounds = array<i64: 3, 384, 128>}, {transform_indices = @transform_2, window_bounds = array<i64: 1, 128>}, {transform_indices = @transform_3, window_bounds = array<i64: 1, 256, 128>}]} {
    %c0_i32 = arith.constant 0 : i32
    %0 = arith.cmpi eq, %arg1, %c0_i32 : i32
    %1 = arith.extui %0 : i1 to i32
    %c0_i32_0 = arith.constant 0 : i32
    %2 = arith.cmpi ne, %1, %c0_i32_0 : i32
    scf.if %2 {
      %c0_25 = arith.constant 0 : index
      %c0_26 = arith.constant 0 : index
      %c0_27 = arith.constant 0 : index
      %c0_28 = arith.constant 0 : index
      %32 = vector.load %arg2[%c0_25, %c0_26, %c0_27, %c0_28] : memref<1x18x18x128xbf16, #tpu.memory_space<vmem>>, vector<1x16x16x128xbf16>
      %33 = vector.shape_cast %32 : vector<1x16x16x128xbf16> to vector<16x16x128xbf16>
      %c0_29 = arith.constant 0 : index
      %c0_30 = arith.constant 0 : index
      %c1_31 = arith.constant 1 : index
      %c0_32 = arith.constant 0 : index
      %34 = vector.load %arg2[%c0_29, %c0_30, %c1_31, %c0_32] : memref<1x18x18x128xbf16, #tpu.memory_space<vmem>>, vector<1x16x16x128xbf16>
      %35 = vector.shape_cast %34 : vector<1x16x16x128xbf16> to vector<16x16x128xbf16>
      %c0_33 = arith.constant 0 : index
      %c0_34 = arith.constant 0 : index
      %c2_35 = arith.constant 2 : index
      %c0_36 = arith.constant 0 : index
      %36 = vector.load %arg2[%c0_33, %c0_34, %c2_35, %c0_36] : memref<1x18x18x128xbf16, #tpu.memory_space<vmem>>, vector<1x16x16x128xbf16>
      %37 = vector.shape_cast %36 : vector<1x16x16x128xbf16> to vector<16x16x128xbf16>
      %38 = vector.shape_cast %33 : vector<16x16x128xbf16> to vector<256x128xbf16>
      %c0_37 = arith.constant 0 : index
      %c0_38 = arith.constant 0 : index
      %c0_39 = arith.constant 0 : index
      %39 = vector.load %arg6[%c0_37, %c0_38, %c0_39] : memref<3x256x384xbf16, #tpu.memory_space<vmem>>, vector<1x256x128xbf16>
      %40 = vector.shape_cast %39 : vector<1x256x128xbf16> to vector<256x128xbf16>
      %41 = vector.shape_cast %38 : vector<256x128xbf16> to vector<1x256x128xbf16>
      tpu.vector_store %arg6[%c0_37, %c0_38, %c0_39], %41 {strides = array<i32>} : memref<3x256x384xbf16, #tpu.memory_space<vmem>>, vector<1x256x128xbf16>,
      %42 = vector.shape_cast %35 : vector<16x16x128xbf16> to vector<256x128xbf16>
      %c0_40 = arith.constant 0 : index
      %c0_41 = arith.constant 0 : index
      %c128 = arith.constant 128 : index
      %43 = vector.load %arg6[%c0_40, %c0_41, %c128] : memref<3x256x384xbf16, #tpu.memory_space<vmem>>, vector<1x256x128xbf16>
      %44 = vector.shape_cast %43 : vector<1x256x128xbf16> to vector<256x128xbf16>
      %45 = vector.shape_cast %42 : vector<256x128xbf16> to vector<1x256x128xbf16>
      tpu.vector_store %arg6[%c0_40, %c0_41, %c128], %45 {strides = array<i32>} : memref<3x256x384xbf16, #tpu.memory_space<vmem>>, vector<1x256x128xbf16>,
      %46 = vector.shape_cast %37 : vector<16x16x128xbf16> to vector<256x128xbf16>
      %c0_42 = arith.constant 0 : index
      %c0_43 = arith.constant 0 : index
      %c256 = arith.constant 256 : index
      %47 = vector.load %arg6[%c0_42, %c0_43, %c256] : memref<3x256x384xbf16, #tpu.memory_space<vmem>>, vector<1x256x128xbf16>
      %48 = vector.shape_cast %47 : vector<1x256x128xbf16> to vector<256x128xbf16>
      %49 = vector.shape_cast %46 : vector<256x128xbf16> to vector<1x256x128xbf16>
      tpu.vector_store %arg6[%c0_42, %c0_43, %c256], %49 {strides = array<i32>} : memref<3x256x384xbf16, #tpu.memory_space<vmem>>, vector<1x256x128xbf16>,
      %c0_44 = arith.constant 0 : index
      %c1_45 = arith.constant 1 : index
      %c0_46 = arith.constant 0 : index
      %c0_47 = arith.constant 0 : index
      %50 = vector.load %arg2[%c0_44, %c1_45, %c0_46, %c0_47] : memref<1x18x18x128xbf16, #tpu.memory_space<vmem>>, vector<1x16x16x128xbf16>
      %51 = vector.shape_cast %50 : vector<1x16x16x128xbf16> to vector<16x16x128xbf16>
      %c0_48 = arith.constant 0 : index
      %c1_49 = arith.constant 1 : index
      %c1_50 = arith.constant 1 : index
      %c0_51 = arith.constant 0 : index
      %52 = vector.load %arg2[%c0_48, %c1_49, %c1_50, %c0_51] : memref<1x18x18x128xbf16, #tpu.memory_space<vmem>>, vector<1x16x16x128xbf16>
      %53 = vector.shape_cast %52 : vector<1x16x16x128xbf16> to vector<16x16x128xbf16>
      %c0_52 = arith.constant 0 : index
      %c1_53 = arith.constant 1 : index
      %c2_54 = arith.constant 2 : index
      %c0_55 = arith.constant 0 : index
      %54 = vector.load %arg2[%c0_52, %c1_53, %c2_54, %c0_55] : memref<1x18x18x128xbf16, #tpu.memory_space<vmem>>, vector<1x16x16x128xbf16>
      %55 = vector.shape_cast %54 : vector<1x16x16x128xbf16> to vector<16x16x128xbf16>
      %56 = vector.shape_cast %51 : vector<16x16x128xbf16> to vector<256x128xbf16>
      %c1_56 = arith.constant 1 : index
      %c0_57 = arith.constant 0 : index
      %c0_58 = arith.constant 0 : index
      %57 = vector.load %arg6[%c1_56, %c0_57, %c0_58] : memref<3x256x384xbf16, #tpu.memory_space<vmem>>, vector<1x256x128xbf16>
      %58 = vector.shape_cast %57 : vector<1x256x128xbf16> to vector<256x128xbf16>
      %59 = vector.shape_cast %56 : vector<256x128xbf16> to vector<1x256x128xbf16>
      tpu.vector_store %arg6[%c1_56, %c0_57, %c0_58], %59 {strides = array<i32>} : memref<3x256x384xbf16, #tpu.memory_space<vmem>>, vector<1x256x128xbf16>,
      %60 = vector.shape_cast %53 : vector<16x16x128xbf16> to vector<256x128xbf16>
      %c1_59 = arith.constant 1 : index
      %c0_60 = arith.constant 0 : index
      %c128_61 = arith.constant 128 : index
      %61 = vector.load %arg6[%c1_59, %c0_60, %c128_61] : memref<3x256x384xbf16, #tpu.memory_space<vmem>>, vector<1x256x128xbf16>
      %62 = vector.shape_cast %61 : vector<1x256x128xbf16> to vector<256x128xbf16>
      %63 = vector.shape_cast %60 : vector<256x128xbf16> to vector<1x256x128xbf16>
      tpu.vector_store %arg6[%c1_59, %c0_60, %c128_61], %63 {strides = array<i32>} : memref<3x256x384xbf16, #tpu.memory_space<vmem>>, vector<1x256x128xbf16>,
      %64 = vector.shape_cast %55 : vector<16x16x128xbf16> to vector<256x128xbf16>
      %c1_62 = arith.constant 1 : index
      %c0_63 = arith.constant 0 : index
      %c256_64 = arith.constant 256 : index
      %65 = vector.load %arg6[%c1_62, %c0_63, %c256_64] : memref<3x256x384xbf16, #tpu.memory_space<vmem>>, vector<1x256x128xbf16>
      %66 = vector.shape_cast %65 : vector<1x256x128xbf16> to vector<256x128xbf16>
      %67 = vector.shape_cast %64 : vector<256x128xbf16> to vector<1x256x128xbf16>
      tpu.vector_store %arg6[%c1_62, %c0_63, %c256_64], %67 {strides = array<i32>} : memref<3x256x384xbf16, #tpu.memory_space<vmem>>, vector<1x256x128xbf16>,
      %c0_65 = arith.constant 0 : index
      %c2_66 = arith.constant 2 : index
      %c0_67 = arith.constant 0 : index
      %c0_68 = arith.constant 0 : index
      %68 = vector.load %arg2[%c0_65, %c2_66, %c0_67, %c0_68] : memref<1x18x18x128xbf16, #tpu.memory_space<vmem>>, vector<1x16x16x128xbf16>
      %69 = vector.shape_cast %68 : vector<1x16x16x128xbf16> to vector<16x16x128xbf16>
      %c0_69 = arith.constant 0 : index
      %c2_70 = arith.constant 2 : index
      %c1_71 = arith.constant 1 : index
      %c0_72 = arith.constant 0 : index
      %70 = vector.load %arg2[%c0_69, %c2_70, %c1_71, %c0_72] : memref<1x18x18x128xbf16, #tpu.memory_space<vmem>>, vector<1x16x16x128xbf16>
      %71 = vector.shape_cast %70 : vector<1x16x16x128xbf16> to vector<16x16x128xbf16>
      %c0_73 = arith.constant 0 : index
      %c2_74 = arith.constant 2 : index
      %c2_75 = arith.constant 2 : index
      %c0_76 = arith.constant 0 : index
      %72 = vector.load %arg2[%c0_73, %c2_74, %c2_75, %c0_76] : memref<1x18x18x128xbf16, #tpu.memory_space<vmem>>, vector<1x16x16x128xbf16>
      %73 = vector.shape_cast %72 : vector<1x16x16x128xbf16> to vector<16x16x128xbf16>
      %74 = vector.shape_cast %69 : vector<16x16x128xbf16> to vector<256x128xbf16>
      %c2_77 = arith.constant 2 : index
      %c0_78 = arith.constant 0 : index
      %c0_79 = arith.constant 0 : index
      %75 = vector.load %arg6[%c2_77, %c0_78, %c0_79] : memref<3x256x384xbf16, #tpu.memory_space<vmem>>, vector<1x256x128xbf16>
      %76 = vector.shape_cast %75 : vector<1x256x128xbf16> to vector<256x128xbf16>
      %77 = vector.shape_cast %74 : vector<256x128xbf16> to vector<1x256x128xbf16>
      tpu.vector_store %arg6[%c2_77, %c0_78, %c0_79], %77 {strides = array<i32>} : memref<3x256x384xbf16, #tpu.memory_space<vmem>>, vector<1x256x128xbf16>,
      %78 = vector.shape_cast %71 : vector<16x16x128xbf16> to vector<256x128xbf16>
      %c2_80 = arith.constant 2 : index
      %c0_81 = arith.constant 0 : index
      %c128_82 = arith.constant 128 : index
      %79 = vector.load %arg6[%c2_80, %c0_81, %c128_82] : memref<3x256x384xbf16, #tpu.memory_space<vmem>>, vector<1x256x128xbf16>
      %80 = vector.shape_cast %79 : vector<1x256x128xbf16> to vector<256x128xbf16>
      %81 = vector.shape_cast %78 : vector<256x128xbf16> to vector<1x256x128xbf16>
      tpu.vector_store %arg6[%c2_80, %c0_81, %c128_82], %81 {strides = array<i32>} : memref<3x256x384xbf16, #tpu.memory_space<vmem>>, vector<1x256x128xbf16>,
      %82 = vector.shape_cast %73 : vector<16x16x128xbf16> to vector<256x128xbf16>
      %c2_83 = arith.constant 2 : index
      %c0_84 = arith.constant 0 : index
      %c256_85 = arith.constant 256 : index
      %83 = vector.load %arg6[%c2_83, %c0_84, %c256_85] : memref<3x256x384xbf16, #tpu.memory_space<vmem>>, vector<1x256x128xbf16>
      %84 = vector.shape_cast %83 : vector<1x256x128xbf16> to vector<256x128xbf16>
      %85 = vector.shape_cast %82 : vector<256x128xbf16> to vector<1x256x128xbf16>
      tpu.vector_store %arg6[%c2_83, %c0_84, %c256_85], %85 {strides = array<i32>} : memref<3x256x384xbf16, #tpu.memory_space<vmem>>, vector<1x256x128xbf16>,
    } else {
    }
    %c0 = arith.constant 0 : index
    %c0_1 = arith.constant 0 : index
    %c0_2 = arith.constant 0 : index
    %3 = vector.load %arg6[%c0, %c0_1, %c0_2] : memref<3x256x384xbf16, #tpu.memory_space<vmem>>, vector<1x256x384xbf16>
    %4 = vector.shape_cast %3 : vector<1x256x384xbf16> to vector<256x384xbf16>
    %c0_3 = arith.constant 0 : index
    %c0_4 = arith.constant 0 : index
    %c0_5 = arith.constant 0 : index
    %5 = vector.load %arg3[%c0_3, %c0_4, %c0_5] : memref<3x384x128xbf16, #tpu.memory_space<vmem>>, vector<1x384x128xbf16>
    %6 = vector.shape_cast %5 : vector<1x384x128xbf16> to vector<384x128xbf16>
    %cst = arith.constant dense<0.000000e+00> : vector<256x128xf32>
    %7 = tpu.matmul %4, %6, %cst {dimension_numbers = #tpu.dot_dimension_numbers<[1], [0], [0], [1], [0, 0, 1, 1], [], []>} : vector<256x384xbf16>, vector<384x128xbf16>, vector<256x128xf32> -> vector<256x128xf32>
    %c1 = arith.constant 1 : index
    %c0_6 = arith.constant 0 : index
    %c0_7 = arith.constant 0 : index
    %8 = vector.load %arg6[%c1, %c0_6, %c0_7] : memref<3x256x384xbf16, #tpu.memory_space<vmem>>, vector<1x256x384xbf16>
    %9 = vector.shape_cast %8 : vector<1x256x384xbf16> to vector<256x384xbf16>
    %c1_8 = arith.constant 1 : index
    %c0_9 = arith.constant 0 : index
    %c0_10 = arith.constant 0 : index
    %10 = vector.load %arg3[%c1_8, %c0_9, %c0_10] : memref<3x384x128xbf16, #tpu.memory_space<vmem>>, vector<1x384x128xbf16>
    %11 = vector.shape_cast %10 : vector<1x384x128xbf16> to vector<384x128xbf16>
    %cst_11 = arith.constant dense<0.000000e+00> : vector<256x128xf32>
    %12 = tpu.matmul %9, %11, %cst_11 {dimension_numbers = #tpu.dot_dimension_numbers<[1], [0], [0], [1], [0, 0, 1, 1], [], []>} : vector<256x384xbf16>, vector<384x128xbf16>, vector<256x128xf32> -> vector<256x128xf32>
    %13 = arith.addf %7, %12 : vector<256x128xf32>
    %c2 = arith.constant 2 : index
    %c0_12 = arith.constant 0 : index
    %c0_13 = arith.constant 0 : index
    %14 = vector.load %arg6[%c2, %c0_12, %c0_13] : memref<3x256x384xbf16, #tpu.memory_space<vmem>>, vector<1x256x384xbf16>
    %15 = vector.shape_cast %14 : vector<1x256x384xbf16> to vector<256x384xbf16>
    %c2_14 = arith.constant 2 : index
    %c0_15 = arith.constant 0 : index
    %c0_16 = arith.constant 0 : index
    %16 = vector.load %arg3[%c2_14, %c0_15, %c0_16] : memref<3x384x128xbf16, #tpu.memory_space<vmem>>, vector<1x384x128xbf16>
    %17 = vector.shape_cast %16 : vector<1x384x128xbf16> to vector<384x128xbf16>
    %cst_17 = arith.constant dense<0.000000e+00> : vector<256x128xf32>
    %18 = tpu.matmul %15, %17, %cst_17 {dimension_numbers = #tpu.dot_dimension_numbers<[1], [0], [0], [1], [0, 0, 1, 1], [], []>} : vector<256x384xbf16>, vector<384x128xbf16>, vector<256x128xf32> -> vector<256x128xf32>
    %19 = arith.addf %13, %18 : vector<256x128xf32>
    %c0_18 = arith.constant 0 : index
    %c0_19 = arith.constant 0 : index
    %20 = vector.load %arg4[%c0_18, %c0_19] : memref<1x128xf32, #tpu.memory_space<vmem>>, vector<1x128xf32>
    %21 = vector.broadcast %20 : vector<1x128xf32> to vector<256x128xf32>
    %22 = arith.addf %19, %21 : vector<256x128xf32>
    %cst_20 = arith.constant 0.000000e+00 : f32
    %23 = vector.broadcast %cst_20 : f32 to vector<256x128xf32>
    %24 = arith.cmpf ogt, %22, %23 : vector<256x128xf32>
    %cst_21 = arith.constant 2.000000e-01 : f32
    %25 = vector.broadcast %cst_21 : f32 to vector<256x128xf32>
    %26 = arith.mulf %25, %22 : vector<256x128xf32>
    %27 = arith.select %24, %22, %26 : vector<256x128xi1>, vector<256x128xf32>
    %28 = arith.truncf %27 : vector<256x128xf32> to vector<256x128xbf16>
    %c0_22 = arith.constant 0 : index
    %c0_23 = arith.constant 0 : index
    %c0_24 = arith.constant 0 : index
    %29 = vector.load %arg5[%c0_22, %c0_23, %c0_24] : memref<1x256x128xbf16, #tpu.memory_space<vmem>>, vector<1x256x128xbf16>
    %30 = vector.shape_cast %29 : vector<1x256x128xbf16> to vector<256x128xbf16>
    %31 = vector.shape_cast %28 : vector<256x128xbf16> to vector<1x256x128xbf16>
    tpu.vector_store %arg5[%c0_22, %c0_23, %c0_24], %31 {strides = array<i32>} : memref<1x256x128xbf16, #tpu.memory_space<vmem>>, vector<1x256x128xbf16>,
    return
  }
  func.func @transform_0(%arg0: i32, %arg1: i32) -> (i32, i32, i32, i32) {
    %c0_i32 = arith.constant 0 : i32
    %c0_i32_0 = arith.constant 0 : i32
    %c0_i32_1 = arith.constant 0 : i32
    %c0_i32_2 = arith.constant 0 : i32
    return %arg0, %c0_i32, %c0_i32_0, %c0_i32_1 : i32, i32, i32, i32
  }
  func.func @transform_1(%arg0: i32, %arg1: i32) -> (i32, i32, i32) {
    %c0_i32 = arith.constant 0 : i32
    %c0_i32_0 = arith.constant 0 : i32
    %c0_i32_1 = arith.constant 0 : i32
    return %c0_i32, %c0_i32_0, %arg1 : i32, i32, i32
  }
  func.func @transform_2(%arg0: i32, %arg1: i32) -> (i32, i32) {
    %c0_i32 = arith.constant 0 : i32
    %c0_i32_0 = arith.constant 0 : i32
    return %c0_i32, %arg1 : i32, i32
  }
  func.func @transform_3(%arg0: i32, %arg1: i32) -> (i32, i32, i32) {
    %c0_i32 = arith.constant 0 : i32
    %c0_i32_0 = arith.constant 0 : i32
    return %arg0, %c0_i32, %arg1 : i32, i32, i32
  }
}

module attributes {stable_mosaic.version = 11 : i64} {
  func.func @kernel(%arg0: i32, %arg1: i32, %arg2: memref<1x9x2x9x256xbf16, #tpu.memory_space<vmem>>, %arg3: memref<3x512x96xbf16, #tpu.memory_space<vmem>>, %arg4: memref<1x96xf32, #tpu.memory_space<vmem>>, %arg5: memref<1x64x96xf32, #tpu.memory_space<vmem>>, %arg6: memref<3x64x512xbf16, #tpu.memory_space<vmem>>) attributes {dimension_semantics = [#tpu.dimension_semantics<parallel>, #tpu.dimension_semantics<arbitrary>], iteration_bounds = array<i64: 2, 1>, scalar_prefetch = 0 : i64, scratch_operands = 1 : i64, tpu.core_type = #tpu.core_type<tc>, window_params = [{transform_indices = @transform_0, window_bounds = array<i64: 1, 9, 2, 9, 256>}, {transform_indices = @transform_1, window_bounds = array<i64: 3, 512, 96>}, {transform_indices = @transform_2, window_bounds = array<i64: 1, 96>}, {transform_indices = @transform_3, window_bounds = array<i64: 1, 64, 96>}]} {
    %c0_i32 = arith.constant 0 : i32
    %0 = arith.cmpi eq, %arg1, %c0_i32 : i32
    %1 = arith.extui %0 : i1 to i32
    %c0_i32_0 = arith.constant 0 : i32
    %2 = arith.cmpi ne, %1, %c0_i32_0 : i32
    scf.if %2 {
      %c0_25 = arith.constant 0 : index
      %c0_26 = arith.constant 0 : index
      %c0_27 = arith.constant 0 : index
      %c0_28 = arith.constant 0 : index
      %c0_29 = arith.constant 0 : index
      %31 = vector.load %arg2[%c0_25, %c0_26, %c0_27, %c0_28, %c0_29] : memref<1x9x2x9x256xbf16, #tpu.memory_space<vmem>>, vector<1x8x1x8x256xbf16>
      %32 = vector.shape_cast %31 : vector<1x8x1x8x256xbf16> to vector<8x8x256xbf16>
      %c0_30 = arith.constant 0 : index
      %c0_31 = arith.constant 0 : index
      %c0_32 = arith.constant 0 : index
      %c1_33 = arith.constant 1 : index
      %c0_34 = arith.constant 0 : index
      %33 = vector.load %arg2[%c0_30, %c0_31, %c0_32, %c1_33, %c0_34] : memref<1x9x2x9x256xbf16, #tpu.memory_space<vmem>>, vector<1x8x1x8x256xbf16>
      %34 = vector.shape_cast %33 : vector<1x8x1x8x256xbf16> to vector<8x8x256xbf16>
      %35 = vector.shape_cast %32 : vector<8x8x256xbf16> to vector<64x256xbf16>
      %c0_35 = arith.constant 0 : index
      %c0_36 = arith.constant 0 : index
      %c0_37 = arith.constant 0 : index
      %36 = vector.load %arg6[%c0_35, %c0_36, %c0_37] : memref<3x64x512xbf16, #tpu.memory_space<vmem>>, vector<1x64x256xbf16>
      %37 = vector.shape_cast %36 : vector<1x64x256xbf16> to vector<64x256xbf16>
      %38 = vector.shape_cast %35 : vector<64x256xbf16> to vector<1x64x256xbf16>
      tpu.vector_store %arg6[%c0_35, %c0_36, %c0_37], %38 {strides = array<i32>} : memref<3x64x512xbf16, #tpu.memory_space<vmem>>, vector<1x64x256xbf16>,
      %39 = vector.shape_cast %34 : vector<8x8x256xbf16> to vector<64x256xbf16>
      %c0_38 = arith.constant 0 : index
      %c0_39 = arith.constant 0 : index
      %c256 = arith.constant 256 : index
      %40 = vector.load %arg6[%c0_38, %c0_39, %c256] : memref<3x64x512xbf16, #tpu.memory_space<vmem>>, vector<1x64x256xbf16>
      %41 = vector.shape_cast %40 : vector<1x64x256xbf16> to vector<64x256xbf16>
      %42 = vector.shape_cast %39 : vector<64x256xbf16> to vector<1x64x256xbf16>
      tpu.vector_store %arg6[%c0_38, %c0_39, %c256], %42 {strides = array<i32>} : memref<3x64x512xbf16, #tpu.memory_space<vmem>>, vector<1x64x256xbf16>,
      %c0_40 = arith.constant 0 : index
      %c0_41 = arith.constant 0 : index
      %c1_42 = arith.constant 1 : index
      %c0_43 = arith.constant 0 : index
      %c0_44 = arith.constant 0 : index
      %43 = vector.load %arg2[%c0_40, %c0_41, %c1_42, %c0_43, %c0_44] : memref<1x9x2x9x256xbf16, #tpu.memory_space<vmem>>, vector<1x8x1x8x256xbf16>
      %44 = vector.shape_cast %43 : vector<1x8x1x8x256xbf16> to vector<8x8x256xbf16>
      %c0_45 = arith.constant 0 : index
      %c0_46 = arith.constant 0 : index
      %c1_47 = arith.constant 1 : index
      %c1_48 = arith.constant 1 : index
      %c0_49 = arith.constant 0 : index
      %45 = vector.load %arg2[%c0_45, %c0_46, %c1_47, %c1_48, %c0_49] : memref<1x9x2x9x256xbf16, #tpu.memory_space<vmem>>, vector<1x8x1x8x256xbf16>
      %46 = vector.shape_cast %45 : vector<1x8x1x8x256xbf16> to vector<8x8x256xbf16>
      %47 = vector.shape_cast %44 : vector<8x8x256xbf16> to vector<64x256xbf16>
      %c1_50 = arith.constant 1 : index
      %c0_51 = arith.constant 0 : index
      %c0_52 = arith.constant 0 : index
      %48 = vector.load %arg6[%c1_50, %c0_51, %c0_52] : memref<3x64x512xbf16, #tpu.memory_space<vmem>>, vector<1x64x256xbf16>
      %49 = vector.shape_cast %48 : vector<1x64x256xbf16> to vector<64x256xbf16>
      %50 = vector.shape_cast %47 : vector<64x256xbf16> to vector<1x64x256xbf16>
      tpu.vector_store %arg6[%c1_50, %c0_51, %c0_52], %50 {strides = array<i32>} : memref<3x64x512xbf16, #tpu.memory_space<vmem>>, vector<1x64x256xbf16>,
      %51 = vector.shape_cast %46 : vector<8x8x256xbf16> to vector<64x256xbf16>
      %c1_53 = arith.constant 1 : index
      %c0_54 = arith.constant 0 : index
      %c256_55 = arith.constant 256 : index
      %52 = vector.load %arg6[%c1_53, %c0_54, %c256_55] : memref<3x64x512xbf16, #tpu.memory_space<vmem>>, vector<1x64x256xbf16>
      %53 = vector.shape_cast %52 : vector<1x64x256xbf16> to vector<64x256xbf16>
      %54 = vector.shape_cast %51 : vector<64x256xbf16> to vector<1x64x256xbf16>
      tpu.vector_store %arg6[%c1_53, %c0_54, %c256_55], %54 {strides = array<i32>} : memref<3x64x512xbf16, #tpu.memory_space<vmem>>, vector<1x64x256xbf16>,
      %c0_56 = arith.constant 0 : index
      %c1_57 = arith.constant 1 : index
      %c0_58 = arith.constant 0 : index
      %c0_59 = arith.constant 0 : index
      %c0_60 = arith.constant 0 : index
      %55 = vector.load %arg2[%c0_56, %c1_57, %c0_58, %c0_59, %c0_60] : memref<1x9x2x9x256xbf16, #tpu.memory_space<vmem>>, vector<1x8x1x8x256xbf16>
      %56 = vector.shape_cast %55 : vector<1x8x1x8x256xbf16> to vector<8x8x256xbf16>
      %c0_61 = arith.constant 0 : index
      %c1_62 = arith.constant 1 : index
      %c0_63 = arith.constant 0 : index
      %c1_64 = arith.constant 1 : index
      %c0_65 = arith.constant 0 : index
      %57 = vector.load %arg2[%c0_61, %c1_62, %c0_63, %c1_64, %c0_65] : memref<1x9x2x9x256xbf16, #tpu.memory_space<vmem>>, vector<1x8x1x8x256xbf16>
      %58 = vector.shape_cast %57 : vector<1x8x1x8x256xbf16> to vector<8x8x256xbf16>
      %59 = vector.shape_cast %56 : vector<8x8x256xbf16> to vector<64x256xbf16>
      %c2_66 = arith.constant 2 : index
      %c0_67 = arith.constant 0 : index
      %c0_68 = arith.constant 0 : index
      %60 = vector.load %arg6[%c2_66, %c0_67, %c0_68] : memref<3x64x512xbf16, #tpu.memory_space<vmem>>, vector<1x64x256xbf16>
      %61 = vector.shape_cast %60 : vector<1x64x256xbf16> to vector<64x256xbf16>
      %62 = vector.shape_cast %59 : vector<64x256xbf16> to vector<1x64x256xbf16>
      tpu.vector_store %arg6[%c2_66, %c0_67, %c0_68], %62 {strides = array<i32>} : memref<3x64x512xbf16, #tpu.memory_space<vmem>>, vector<1x64x256xbf16>,
      %63 = vector.shape_cast %58 : vector<8x8x256xbf16> to vector<64x256xbf16>
      %c2_69 = arith.constant 2 : index
      %c0_70 = arith.constant 0 : index
      %c256_71 = arith.constant 256 : index
      %64 = vector.load %arg6[%c2_69, %c0_70, %c256_71] : memref<3x64x512xbf16, #tpu.memory_space<vmem>>, vector<1x64x256xbf16>
      %65 = vector.shape_cast %64 : vector<1x64x256xbf16> to vector<64x256xbf16>
      %66 = vector.shape_cast %63 : vector<64x256xbf16> to vector<1x64x256xbf16>
      tpu.vector_store %arg6[%c2_69, %c0_70, %c256_71], %66 {strides = array<i32>} : memref<3x64x512xbf16, #tpu.memory_space<vmem>>, vector<1x64x256xbf16>,
    } else {
    }
    %c0 = arith.constant 0 : index
    %c0_1 = arith.constant 0 : index
    %c0_2 = arith.constant 0 : index
    %3 = vector.load %arg6[%c0, %c0_1, %c0_2] : memref<3x64x512xbf16, #tpu.memory_space<vmem>>, vector<1x64x512xbf16>
    %4 = vector.shape_cast %3 : vector<1x64x512xbf16> to vector<64x512xbf16>
    %c0_3 = arith.constant 0 : index
    %c0_4 = arith.constant 0 : index
    %c0_5 = arith.constant 0 : index
    %5 = vector.load %arg3[%c0_3, %c0_4, %c0_5] : memref<3x512x96xbf16, #tpu.memory_space<vmem>>, vector<1x512x96xbf16>
    %6 = vector.shape_cast %5 : vector<1x512x96xbf16> to vector<512x96xbf16>
    %cst = arith.constant dense<0.000000e+00> : vector<64x96xf32>
    %7 = tpu.matmul %4, %6, %cst {dimension_numbers = #tpu.dot_dimension_numbers<[1], [0], [0], [1], [0, 0, 1, 1], [], []>} : vector<64x512xbf16>, vector<512x96xbf16>, vector<64x96xf32> -> vector<64x96xf32>
    %c1 = arith.constant 1 : index
    %c0_6 = arith.constant 0 : index
    %c0_7 = arith.constant 0 : index
    %8 = vector.load %arg6[%c1, %c0_6, %c0_7] : memref<3x64x512xbf16, #tpu.memory_space<vmem>>, vector<1x64x512xbf16>
    %9 = vector.shape_cast %8 : vector<1x64x512xbf16> to vector<64x512xbf16>
    %c1_8 = arith.constant 1 : index
    %c0_9 = arith.constant 0 : index
    %c0_10 = arith.constant 0 : index
    %10 = vector.load %arg3[%c1_8, %c0_9, %c0_10] : memref<3x512x96xbf16, #tpu.memory_space<vmem>>, vector<1x512x96xbf16>
    %11 = vector.shape_cast %10 : vector<1x512x96xbf16> to vector<512x96xbf16>
    %cst_11 = arith.constant dense<0.000000e+00> : vector<64x96xf32>
    %12 = tpu.matmul %9, %11, %cst_11 {dimension_numbers = #tpu.dot_dimension_numbers<[1], [0], [0], [1], [0, 0, 1, 1], [], []>} : vector<64x512xbf16>, vector<512x96xbf16>, vector<64x96xf32> -> vector<64x96xf32>
    %13 = arith.addf %7, %12 : vector<64x96xf32>
    %c2 = arith.constant 2 : index
    %c0_12 = arith.constant 0 : index
    %c0_13 = arith.constant 0 : index
    %14 = vector.load %arg6[%c2, %c0_12, %c0_13] : memref<3x64x512xbf16, #tpu.memory_space<vmem>>, vector<1x64x512xbf16>
    %15 = vector.shape_cast %14 : vector<1x64x512xbf16> to vector<64x512xbf16>
    %c2_14 = arith.constant 2 : index
    %c0_15 = arith.constant 0 : index
    %c0_16 = arith.constant 0 : index
    %16 = vector.load %arg3[%c2_14, %c0_15, %c0_16] : memref<3x512x96xbf16, #tpu.memory_space<vmem>>, vector<1x512x96xbf16>
    %17 = vector.shape_cast %16 : vector<1x512x96xbf16> to vector<512x96xbf16>
    %cst_17 = arith.constant dense<0.000000e+00> : vector<64x96xf32>
    %18 = tpu.matmul %15, %17, %cst_17 {dimension_numbers = #tpu.dot_dimension_numbers<[1], [0], [0], [1], [0, 0, 1, 1], [], []>} : vector<64x512xbf16>, vector<512x96xbf16>, vector<64x96xf32> -> vector<64x96xf32>
    %19 = arith.addf %13, %18 : vector<64x96xf32>
    %c0_18 = arith.constant 0 : index
    %c0_19 = arith.constant 0 : index
    %20 = vector.load %arg4[%c0_18, %c0_19] : memref<1x96xf32, #tpu.memory_space<vmem>>, vector<1x96xf32>
    %21 = vector.broadcast %20 : vector<1x96xf32> to vector<64x96xf32>
    %22 = arith.addf %19, %21 : vector<64x96xf32>
    %cst_20 = arith.constant 0.000000e+00 : f32
    %23 = vector.broadcast %cst_20 : f32 to vector<64x96xf32>
    %24 = arith.cmpf ogt, %22, %23 : vector<64x96xf32>
    %cst_21 = arith.constant 2.000000e-01 : f32
    %25 = vector.broadcast %cst_21 : f32 to vector<64x96xf32>
    %26 = arith.mulf %25, %22 : vector<64x96xf32>
    %27 = arith.select %24, %22, %26 : vector<64x96xi1>, vector<64x96xf32>
    %c0_22 = arith.constant 0 : index
    %c0_23 = arith.constant 0 : index
    %c0_24 = arith.constant 0 : index
    %28 = vector.load %arg5[%c0_22, %c0_23, %c0_24] : memref<1x64x96xf32, #tpu.memory_space<vmem>>, vector<1x64x96xf32>
    %29 = vector.shape_cast %28 : vector<1x64x96xf32> to vector<64x96xf32>
    %30 = vector.shape_cast %27 : vector<64x96xf32> to vector<1x64x96xf32>
    tpu.vector_store %arg5[%c0_22, %c0_23, %c0_24], %30 {strides = array<i32>} : memref<1x64x96xf32, #tpu.memory_space<vmem>>, vector<1x64x96xf32>,
    return
  }
  func.func @transform_0(%arg0: i32, %arg1: i32) -> (i32, i32, i32, i32, i32) {
    %c0_i32 = arith.constant 0 : i32
    %c0_i32_0 = arith.constant 0 : i32
    %c0_i32_1 = arith.constant 0 : i32
    %c0_i32_2 = arith.constant 0 : i32
    %c0_i32_3 = arith.constant 0 : i32
    return %arg0, %c0_i32, %c0_i32_0, %c0_i32_1, %c0_i32_2 : i32, i32, i32, i32, i32
  }
  func.func @transform_1(%arg0: i32, %arg1: i32) -> (i32, i32, i32) {
    %c0_i32 = arith.constant 0 : i32
    %c0_i32_0 = arith.constant 0 : i32
    %c0_i32_1 = arith.constant 0 : i32
    return %c0_i32, %c0_i32_0, %arg1 : i32, i32, i32
  }
  func.func @transform_2(%arg0: i32, %arg1: i32) -> (i32, i32) {
    %c0_i32 = arith.constant 0 : i32
    %c0_i32_0 = arith.constant 0 : i32
    return %c0_i32, %arg1 : i32, i32
  }
  func.func @transform_3(%arg0: i32, %arg1: i32) -> (i32, i32, i32) {
    %c0_i32 = arith.constant 0 : i32
    %c0_i32_0 = arith.constant 0 : i32
    return %arg0, %c0_i32, %arg1 : i32, i32, i32
  }
}

module attributes {stable_mosaic.version = 11 : i64} {
  func.func @kernel(%arg0: i32, %arg1: i32, %arg2: memref<1x9x2x9x256xf32, #tpu.memory_space<vmem>>, %arg3: memref<3x512x128xbf16, #tpu.memory_space<vmem>>, %arg4: memref<1x128xf32, #tpu.memory_space<vmem>>, %arg5: memref<1x64x128xf32, #tpu.memory_space<vmem>>, %arg6: memref<3x64x512xbf16, #tpu.memory_space<vmem>>) attributes {dimension_semantics = [#tpu.dimension_semantics<parallel>, #tpu.dimension_semantics<arbitrary>], iteration_bounds = array<i64: 2, 3>, scalar_prefetch = 0 : i64, scratch_operands = 1 : i64, tpu.core_type = #tpu.core_type<tc>, window_params = [{transform_indices = @transform_0, window_bounds = array<i64: 1, 9, 2, 9, 256>}, {transform_indices = @transform_1, window_bounds = array<i64: 3, 512, 128>}, {transform_indices = @transform_2, window_bounds = array<i64: 1, 128>}, {transform_indices = @transform_3, window_bounds = array<i64: 1, 64, 128>}]} {
    %c0_i32 = arith.constant 0 : i32
    %0 = arith.cmpi eq, %arg1, %c0_i32 : i32
    %1 = arith.extui %0 : i1 to i32
    %c0_i32_0 = arith.constant 0 : i32
    %2 = arith.cmpi ne, %1, %c0_i32_0 : i32
    scf.if %2 {
      %c0_25 = arith.constant 0 : index
      %c0_26 = arith.constant 0 : index
      %c0_27 = arith.constant 0 : index
      %c0_28 = arith.constant 0 : index
      %c0_29 = arith.constant 0 : index
      %31 = vector.load %arg2[%c0_25, %c0_26, %c0_27, %c0_28, %c0_29] : memref<1x9x2x9x256xf32, #tpu.memory_space<vmem>>, vector<1x8x1x8x256xf32>
      %32 = vector.shape_cast %31 : vector<1x8x1x8x256xf32> to vector<8x8x256xf32>
      %c0_30 = arith.constant 0 : index
      %c0_31 = arith.constant 0 : index
      %c0_32 = arith.constant 0 : index
      %c1_33 = arith.constant 1 : index
      %c0_34 = arith.constant 0 : index
      %33 = vector.load %arg2[%c0_30, %c0_31, %c0_32, %c1_33, %c0_34] : memref<1x9x2x9x256xf32, #tpu.memory_space<vmem>>, vector<1x8x1x8x256xf32>
      %34 = vector.shape_cast %33 : vector<1x8x1x8x256xf32> to vector<8x8x256xf32>
      %35 = vector.shape_cast %32 : vector<8x8x256xf32> to vector<64x256xf32>
      %36 = arith.truncf %35 : vector<64x256xf32> to vector<64x256xbf16>
      %c0_35 = arith.constant 0 : index
      %c0_36 = arith.constant 0 : index
      %c0_37 = arith.constant 0 : index
      %37 = vector.load %arg6[%c0_35, %c0_36, %c0_37] : memref<3x64x512xbf16, #tpu.memory_space<vmem>>, vector<1x64x256xbf16>
      %38 = vector.shape_cast %37 : vector<1x64x256xbf16> to vector<64x256xbf16>
      %39 = vector.shape_cast %36 : vector<64x256xbf16> to vector<1x64x256xbf16>
      tpu.vector_store %arg6[%c0_35, %c0_36, %c0_37], %39 {strides = array<i32>} : memref<3x64x512xbf16, #tpu.memory_space<vmem>>, vector<1x64x256xbf16>,
      %40 = vector.shape_cast %34 : vector<8x8x256xf32> to vector<64x256xf32>
      %41 = arith.truncf %40 : vector<64x256xf32> to vector<64x256xbf16>
      %c0_38 = arith.constant 0 : index
      %c0_39 = arith.constant 0 : index
      %c256 = arith.constant 256 : index
      %42 = vector.load %arg6[%c0_38, %c0_39, %c256] : memref<3x64x512xbf16, #tpu.memory_space<vmem>>, vector<1x64x256xbf16>
      %43 = vector.shape_cast %42 : vector<1x64x256xbf16> to vector<64x256xbf16>
      %44 = vector.shape_cast %41 : vector<64x256xbf16> to vector<1x64x256xbf16>
      tpu.vector_store %arg6[%c0_38, %c0_39, %c256], %44 {strides = array<i32>} : memref<3x64x512xbf16, #tpu.memory_space<vmem>>, vector<1x64x256xbf16>,
      %c0_40 = arith.constant 0 : index
      %c0_41 = arith.constant 0 : index
      %c1_42 = arith.constant 1 : index
      %c0_43 = arith.constant 0 : index
      %c0_44 = arith.constant 0 : index
      %45 = vector.load %arg2[%c0_40, %c0_41, %c1_42, %c0_43, %c0_44] : memref<1x9x2x9x256xf32, #tpu.memory_space<vmem>>, vector<1x8x1x8x256xf32>
      %46 = vector.shape_cast %45 : vector<1x8x1x8x256xf32> to vector<8x8x256xf32>
      %c0_45 = arith.constant 0 : index
      %c0_46 = arith.constant 0 : index
      %c1_47 = arith.constant 1 : index
      %c1_48 = arith.constant 1 : index
      %c0_49 = arith.constant 0 : index
      %47 = vector.load %arg2[%c0_45, %c0_46, %c1_47, %c1_48, %c0_49] : memref<1x9x2x9x256xf32, #tpu.memory_space<vmem>>, vector<1x8x1x8x256xf32>
      %48 = vector.shape_cast %47 : vector<1x8x1x8x256xf32> to vector<8x8x256xf32>
      %49 = vector.shape_cast %46 : vector<8x8x256xf32> to vector<64x256xf32>
      %50 = arith.truncf %49 : vector<64x256xf32> to vector<64x256xbf16>
      %c1_50 = arith.constant 1 : index
      %c0_51 = arith.constant 0 : index
      %c0_52 = arith.constant 0 : index
      %51 = vector.load %arg6[%c1_50, %c0_51, %c0_52] : memref<3x64x512xbf16, #tpu.memory_space<vmem>>, vector<1x64x256xbf16>
      %52 = vector.shape_cast %51 : vector<1x64x256xbf16> to vector<64x256xbf16>
      %53 = vector.shape_cast %50 : vector<64x256xbf16> to vector<1x64x256xbf16>
      tpu.vector_store %arg6[%c1_50, %c0_51, %c0_52], %53 {strides = array<i32>} : memref<3x64x512xbf16, #tpu.memory_space<vmem>>, vector<1x64x256xbf16>,
      %54 = vector.shape_cast %48 : vector<8x8x256xf32> to vector<64x256xf32>
      %55 = arith.truncf %54 : vector<64x256xf32> to vector<64x256xbf16>
      %c1_53 = arith.constant 1 : index
      %c0_54 = arith.constant 0 : index
      %c256_55 = arith.constant 256 : index
      %56 = vector.load %arg6[%c1_53, %c0_54, %c256_55] : memref<3x64x512xbf16, #tpu.memory_space<vmem>>, vector<1x64x256xbf16>
      %57 = vector.shape_cast %56 : vector<1x64x256xbf16> to vector<64x256xbf16>
      %58 = vector.shape_cast %55 : vector<64x256xbf16> to vector<1x64x256xbf16>
      tpu.vector_store %arg6[%c1_53, %c0_54, %c256_55], %58 {strides = array<i32>} : memref<3x64x512xbf16, #tpu.memory_space<vmem>>, vector<1x64x256xbf16>,
      %c0_56 = arith.constant 0 : index
      %c1_57 = arith.constant 1 : index
      %c0_58 = arith.constant 0 : index
      %c0_59 = arith.constant 0 : index
      %c0_60 = arith.constant 0 : index
      %59 = vector.load %arg2[%c0_56, %c1_57, %c0_58, %c0_59, %c0_60] : memref<1x9x2x9x256xf32, #tpu.memory_space<vmem>>, vector<1x8x1x8x256xf32>
      %60 = vector.shape_cast %59 : vector<1x8x1x8x256xf32> to vector<8x8x256xf32>
      %c0_61 = arith.constant 0 : index
      %c1_62 = arith.constant 1 : index
      %c0_63 = arith.constant 0 : index
      %c1_64 = arith.constant 1 : index
      %c0_65 = arith.constant 0 : index
      %61 = vector.load %arg2[%c0_61, %c1_62, %c0_63, %c1_64, %c0_65] : memref<1x9x2x9x256xf32, #tpu.memory_space<vmem>>, vector<1x8x1x8x256xf32>
      %62 = vector.shape_cast %61 : vector<1x8x1x8x256xf32> to vector<8x8x256xf32>
      %63 = vector.shape_cast %60 : vector<8x8x256xf32> to vector<64x256xf32>
      %64 = arith.truncf %63 : vector<64x256xf32> to vector<64x256xbf16>
      %c2_66 = arith.constant 2 : index
      %c0_67 = arith.constant 0 : index
      %c0_68 = arith.constant 0 : index
      %65 = vector.load %arg6[%c2_66, %c0_67, %c0_68] : memref<3x64x512xbf16, #tpu.memory_space<vmem>>, vector<1x64x256xbf16>
      %66 = vector.shape_cast %65 : vector<1x64x256xbf16> to vector<64x256xbf16>
      %67 = vector.shape_cast %64 : vector<64x256xbf16> to vector<1x64x256xbf16>
      tpu.vector_store %arg6[%c2_66, %c0_67, %c0_68], %67 {strides = array<i32>} : memref<3x64x512xbf16, #tpu.memory_space<vmem>>, vector<1x64x256xbf16>,
      %68 = vector.shape_cast %62 : vector<8x8x256xf32> to vector<64x256xf32>
      %69 = arith.truncf %68 : vector<64x256xf32> to vector<64x256xbf16>
      %c2_69 = arith.constant 2 : index
      %c0_70 = arith.constant 0 : index
      %c256_71 = arith.constant 256 : index
      %70 = vector.load %arg6[%c2_69, %c0_70, %c256_71] : memref<3x64x512xbf16, #tpu.memory_space<vmem>>, vector<1x64x256xbf16>
      %71 = vector.shape_cast %70 : vector<1x64x256xbf16> to vector<64x256xbf16>
      %72 = vector.shape_cast %69 : vector<64x256xbf16> to vector<1x64x256xbf16>
      tpu.vector_store %arg6[%c2_69, %c0_70, %c256_71], %72 {strides = array<i32>} : memref<3x64x512xbf16, #tpu.memory_space<vmem>>, vector<1x64x256xbf16>,
    } else {
    }
    %c0 = arith.constant 0 : index
    %c0_1 = arith.constant 0 : index
    %c0_2 = arith.constant 0 : index
    %3 = vector.load %arg6[%c0, %c0_1, %c0_2] : memref<3x64x512xbf16, #tpu.memory_space<vmem>>, vector<1x64x512xbf16>
    %4 = vector.shape_cast %3 : vector<1x64x512xbf16> to vector<64x512xbf16>
    %c0_3 = arith.constant 0 : index
    %c0_4 = arith.constant 0 : index
    %c0_5 = arith.constant 0 : index
    %5 = vector.load %arg3[%c0_3, %c0_4, %c0_5] : memref<3x512x128xbf16, #tpu.memory_space<vmem>>, vector<1x512x128xbf16>
    %6 = vector.shape_cast %5 : vector<1x512x128xbf16> to vector<512x128xbf16>
    %cst = arith.constant dense<0.000000e+00> : vector<64x128xf32>
    %7 = tpu.matmul %4, %6, %cst {dimension_numbers = #tpu.dot_dimension_numbers<[1], [0], [0], [1], [0, 0, 1, 1], [], []>} : vector<64x512xbf16>, vector<512x128xbf16>, vector<64x128xf32> -> vector<64x128xf32>
    %c1 = arith.constant 1 : index
    %c0_6 = arith.constant 0 : index
    %c0_7 = arith.constant 0 : index
    %8 = vector.load %arg6[%c1, %c0_6, %c0_7] : memref<3x64x512xbf16, #tpu.memory_space<vmem>>, vector<1x64x512xbf16>
    %9 = vector.shape_cast %8 : vector<1x64x512xbf16> to vector<64x512xbf16>
    %c1_8 = arith.constant 1 : index
    %c0_9 = arith.constant 0 : index
    %c0_10 = arith.constant 0 : index
    %10 = vector.load %arg3[%c1_8, %c0_9, %c0_10] : memref<3x512x128xbf16, #tpu.memory_space<vmem>>, vector<1x512x128xbf16>
    %11 = vector.shape_cast %10 : vector<1x512x128xbf16> to vector<512x128xbf16>
    %cst_11 = arith.constant dense<0.000000e+00> : vector<64x128xf32>
    %12 = tpu.matmul %9, %11, %cst_11 {dimension_numbers = #tpu.dot_dimension_numbers<[1], [0], [0], [1], [0, 0, 1, 1], [], []>} : vector<64x512xbf16>, vector<512x128xbf16>, vector<64x128xf32> -> vector<64x128xf32>
    %13 = arith.addf %7, %12 : vector<64x128xf32>
    %c2 = arith.constant 2 : index
    %c0_12 = arith.constant 0 : index
    %c0_13 = arith.constant 0 : index
    %14 = vector.load %arg6[%c2, %c0_12, %c0_13] : memref<3x64x512xbf16, #tpu.memory_space<vmem>>, vector<1x64x512xbf16>
    %15 = vector.shape_cast %14 : vector<1x64x512xbf16> to vector<64x512xbf16>
    %c2_14 = arith.constant 2 : index
    %c0_15 = arith.constant 0 : index
    %c0_16 = arith.constant 0 : index
    %16 = vector.load %arg3[%c2_14, %c0_15, %c0_16] : memref<3x512x128xbf16, #tpu.memory_space<vmem>>, vector<1x512x128xbf16>
    %17 = vector.shape_cast %16 : vector<1x512x128xbf16> to vector<512x128xbf16>
    %cst_17 = arith.constant dense<0.000000e+00> : vector<64x128xf32>
    %18 = tpu.matmul %15, %17, %cst_17 {dimension_numbers = #tpu.dot_dimension_numbers<[1], [0], [0], [1], [0, 0, 1, 1], [], []>} : vector<64x512xbf16>, vector<512x128xbf16>, vector<64x128xf32> -> vector<64x128xf32>
    %19 = arith.addf %13, %18 : vector<64x128xf32>
    %c0_18 = arith.constant 0 : index
    %c0_19 = arith.constant 0 : index
    %20 = vector.load %arg4[%c0_18, %c0_19] : memref<1x128xf32, #tpu.memory_space<vmem>>, vector<1x128xf32>
    %21 = vector.broadcast %20 : vector<1x128xf32> to vector<64x128xf32>
    %22 = arith.addf %19, %21 : vector<64x128xf32>
    %cst_20 = arith.constant 0.000000e+00 : f32
    %23 = vector.broadcast %cst_20 : f32 to vector<64x128xf32>
    %24 = arith.cmpf ogt, %22, %23 : vector<64x128xf32>
    %cst_21 = arith.constant 2.000000e-01 : f32
    %25 = vector.broadcast %cst_21 : f32 to vector<64x128xf32>
    %26 = arith.mulf %25, %22 : vector<64x128xf32>
    %27 = arith.select %24, %22, %26 : vector<64x128xi1>, vector<64x128xf32>
    %c0_22 = arith.constant 0 : index
    %c0_23 = arith.constant 0 : index
    %c0_24 = arith.constant 0 : index
    %28 = vector.load %arg5[%c0_22, %c0_23, %c0_24] : memref<1x64x128xf32, #tpu.memory_space<vmem>>, vector<1x64x128xf32>
    %29 = vector.shape_cast %28 : vector<1x64x128xf32> to vector<64x128xf32>
    %30 = vector.shape_cast %27 : vector<64x128xf32> to vector<1x64x128xf32>
    tpu.vector_store %arg5[%c0_22, %c0_23, %c0_24], %30 {strides = array<i32>} : memref<1x64x128xf32, #tpu.memory_space<vmem>>, vector<1x64x128xf32>,
    return
  }
  func.func @transform_0(%arg0: i32, %arg1: i32) -> (i32, i32, i32, i32, i32) {
    %c0_i32 = arith.constant 0 : i32
    %c0_i32_0 = arith.constant 0 : i32
    %c0_i32_1 = arith.constant 0 : i32
    %c0_i32_2 = arith.constant 0 : i32
    %c0_i32_3 = arith.constant 0 : i32
    return %arg0, %c0_i32, %c0_i32_0, %c0_i32_1, %c0_i32_2 : i32, i32, i32, i32, i32
  }
  func.func @transform_1(%arg0: i32, %arg1: i32) -> (i32, i32, i32) {
    %c0_i32 = arith.constant 0 : i32
    %c0_i32_0 = arith.constant 0 : i32
    %c0_i32_1 = arith.constant 0 : i32
    return %c0_i32, %c0_i32_0, %arg1 : i32, i32, i32
  }
  func.func @transform_2(%arg0: i32, %arg1: i32) -> (i32, i32) {
    %c0_i32 = arith.constant 0 : i32
    %c0_i32_0 = arith.constant 0 : i32
    return %c0_i32, %arg1 : i32, i32
  }
  func.func @transform_3(%arg0: i32, %arg1: i32) -> (i32, i32, i32) {
    %c0_i32 = arith.constant 0 : i32
    %c0_i32_0 = arith.constant 0 : i32
    return %arg0, %c0_i32, %arg1 : i32, i32, i32
  }
}

module attributes {stable_mosaic.version = 11 : i64} {
  func.func @kernel(%arg0: i32, %arg1: memref<1x9x2x9x256xf32, #tpu.memory_space<vmem>>, %arg2: memref<1x8x8x4xf32, #tpu.memory_space<vmem>>) attributes {dimension_semantics = [#tpu.dimension_semantics<parallel>], iteration_bounds = array<i64: 2>, scalar_prefetch = 0 : i64, scratch_operands = 0 : i64, tpu.core_type = #tpu.core_type<tc>, window_params = [{transform_indices = @transform_0, window_bounds = array<i64: 1, 9, 2, 9, 256>}, {transform_indices = @transform_1, window_bounds = array<i64: 1, 8, 8, 4>}]} {
    %c0 = arith.constant 0 : index
    %c0_0 = arith.constant 0 : index
    %c0_1 = arith.constant 0 : index
    %c0_2 = arith.constant 0 : index
    %c0_3 = arith.constant 0 : index
    %0 = vector.load %arg1[%c0, %c0_0, %c0_1, %c0_2, %c0_3] : memref<1x9x2x9x256xf32, #tpu.memory_space<vmem>>, vector<1x8x1x8x4xf32>
    %1 = vector.shape_cast %0 : vector<1x8x1x8x4xf32> to vector<8x8x4xf32>
    %2 = tpu.iota {dimensions = array<i32: 0>} : vector<8x8x4xi32>
    %c2_i32 = arith.constant 2 : i32
    %3 = vector.broadcast %c2_i32 : i32 to vector<8x8x4xi32>
    %4 = arith.muli %3, %2 : vector<8x8x4xi32>
    %c0_i32 = arith.constant 0 : i32
    %5 = vector.broadcast %c0_i32 : i32 to vector<8x8x4xi32>
    %6 = arith.addi %4, %5 : vector<8x8x4xi32>
    %c1_i32 = arith.constant 1 : i32
    %7 = vector.broadcast %c1_i32 : i32 to vector<8x8x4xi32>
    %8 = arith.cmpi sge, %6, %7 : vector<8x8x4xi32>
    %c16_i32 = arith.constant 16 : i32
    %9 = vector.broadcast %c16_i32 : i32 to vector<8x8x4xi32>
    %10 = arith.cmpi sle, %6, %9 : vector<8x8x4xi32>
    %11 = arith.andi %8, %10 : vector<8x8x4xi1>
    %12 = tpu.iota {dimensions = array<i32: 1>} : vector<8x8x4xi32>
    %c2_i32_4 = arith.constant 2 : i32
    %13 = vector.broadcast %c2_i32_4 : i32 to vector<8x8x4xi32>
    %14 = arith.muli %13, %12 : vector<8x8x4xi32>
    %c0_i32_5 = arith.constant 0 : i32
    %15 = vector.broadcast %c0_i32_5 : i32 to vector<8x8x4xi32>
    %16 = arith.addi %14, %15 : vector<8x8x4xi32>
    %c1_i32_6 = arith.constant 1 : i32
    %17 = vector.broadcast %c1_i32_6 : i32 to vector<8x8x4xi32>
    %18 = arith.cmpi sge, %16, %17 : vector<8x8x4xi32>
    %c16_i32_7 = arith.constant 16 : i32
    %19 = vector.broadcast %c16_i32_7 : i32 to vector<8x8x4xi32>
    %20 = arith.cmpi sle, %16, %19 : vector<8x8x4xi32>
    %21 = arith.andi %18, %20 : vector<8x8x4xi1>
    %22 = arith.andi %11, %21 : vector<8x8x4xi1>
    %cst = arith.constant -3.40282347E+38 : f32
    %23 = vector.broadcast %cst : f32 to vector<8x8x4xf32>
    %24 = arith.select %22, %1, %23 : vector<8x8x4xi1>, vector<8x8x4xf32>
    %c0_8 = arith.constant 0 : index
    %c0_9 = arith.constant 0 : index
    %c0_10 = arith.constant 0 : index
    %c0_11 = arith.constant 0 : index
    %c128 = arith.constant 128 : index
    %25 = vector.load %arg1[%c0_8, %c0_9, %c0_10, %c0_11, %c128] : memref<1x9x2x9x256xf32, #tpu.memory_space<vmem>>, vector<1x8x1x8x4xf32>
    %26 = vector.shape_cast %25 : vector<1x8x1x8x4xf32> to vector<8x8x4xf32>
    %27 = tpu.iota {dimensions = array<i32: 0>} : vector<8x8x4xi32>
    %c2_i32_12 = arith.constant 2 : i32
    %28 = vector.broadcast %c2_i32_12 : i32 to vector<8x8x4xi32>
    %29 = arith.muli %28, %27 : vector<8x8x4xi32>
    %c0_i32_13 = arith.constant 0 : i32
    %30 = vector.broadcast %c0_i32_13 : i32 to vector<8x8x4xi32>
    %31 = arith.addi %29, %30 : vector<8x8x4xi32>
    %c1_i32_14 = arith.constant 1 : i32
    %32 = vector.broadcast %c1_i32_14 : i32 to vector<8x8x4xi32>
    %33 = arith.cmpi sge, %31, %32 : vector<8x8x4xi32>
    %c16_i32_15 = arith.constant 16 : i32
    %34 = vector.broadcast %c16_i32_15 : i32 to vector<8x8x4xi32>
    %35 = arith.cmpi sle, %31, %34 : vector<8x8x4xi32>
    %36 = arith.andi %33, %35 : vector<8x8x4xi1>
    %cst_16 = arith.constant -3.40282347E+38 : f32
    %37 = vector.broadcast %cst_16 : f32 to vector<8x8x4xf32>
    %38 = arith.select %36, %26, %37 : vector<8x8x4xi1>, vector<8x8x4xf32>
    %39 = arith.maximumf %24, %38 : vector<8x8x4xf32>
    %c0_17 = arith.constant 0 : index
    %c0_18 = arith.constant 0 : index
    %c0_19 = arith.constant 0 : index
    %c1 = arith.constant 1 : index
    %c0_20 = arith.constant 0 : index
    %40 = vector.load %arg1[%c0_17, %c0_18, %c0_19, %c1, %c0_20] : memref<1x9x2x9x256xf32, #tpu.memory_space<vmem>>, vector<1x8x1x8x4xf32>
    %41 = vector.shape_cast %40 : vector<1x8x1x8x4xf32> to vector<8x8x4xf32>
    %42 = tpu.iota {dimensions = array<i32: 0>} : vector<8x8x4xi32>
    %c2_i32_21 = arith.constant 2 : i32
    %43 = vector.broadcast %c2_i32_21 : i32 to vector<8x8x4xi32>
    %44 = arith.muli %43, %42 : vector<8x8x4xi32>
    %c0_i32_22 = arith.constant 0 : i32
    %45 = vector.broadcast %c0_i32_22 : i32 to vector<8x8x4xi32>
    %46 = arith.addi %44, %45 : vector<8x8x4xi32>
    %c1_i32_23 = arith.constant 1 : i32
    %47 = vector.broadcast %c1_i32_23 : i32 to vector<8x8x4xi32>
    %48 = arith.cmpi sge, %46, %47 : vector<8x8x4xi32>
    %c16_i32_24 = arith.constant 16 : i32
    %49 = vector.broadcast %c16_i32_24 : i32 to vector<8x8x4xi32>
    %50 = arith.cmpi sle, %46, %49 : vector<8x8x4xi32>
    %51 = arith.andi %48, %50 : vector<8x8x4xi1>
    %cst_25 = arith.constant -3.40282347E+38 : f32
    %52 = vector.broadcast %cst_25 : f32 to vector<8x8x4xf32>
    %53 = arith.select %51, %41, %52 : vector<8x8x4xi1>, vector<8x8x4xf32>
    %54 = arith.maximumf %39, %53 : vector<8x8x4xf32>
    %c0_26 = arith.constant 0 : index
    %c0_27 = arith.constant 0 : index
    %c1_28 = arith.constant 1 : index
    %c0_29 = arith.constant 0 : index
    %c0_30 = arith.constant 0 : index
    %55 = vector.load %arg1[%c0_26, %c0_27, %c1_28, %c0_29, %c0_30] : memref<1x9x2x9x256xf32, #tpu.memory_space<vmem>>, vector<1x8x1x8x4xf32>
    %56 = vector.shape_cast %55 : vector<1x8x1x8x4xf32> to vector<8x8x4xf32>
    %57 = tpu.iota {dimensions = array<i32: 1>} : vector<8x8x4xi32>
    %c2_i32_31 = arith.constant 2 : i32
    %58 = vector.broadcast %c2_i32_31 : i32 to vector<8x8x4xi32>
    %59 = arith.muli %58, %57 : vector<8x8x4xi32>
    %c0_i32_32 = arith.constant 0 : i32
    %60 = vector.broadcast %c0_i32_32 : i32 to vector<8x8x4xi32>
    %61 = arith.addi %59, %60 : vector<8x8x4xi32>
    %c1_i32_33 = arith.constant 1 : i32
    %62 = vector.broadcast %c1_i32_33 : i32 to vector<8x8x4xi32>
    %63 = arith.cmpi sge, %61, %62 : vector<8x8x4xi32>
    %c16_i32_34 = arith.constant 16 : i32
    %64 = vector.broadcast %c16_i32_34 : i32 to vector<8x8x4xi32>
    %65 = arith.cmpi sle, %61, %64 : vector<8x8x4xi32>
    %66 = arith.andi %63, %65 : vector<8x8x4xi1>
    %cst_35 = arith.constant -3.40282347E+38 : f32
    %67 = vector.broadcast %cst_35 : f32 to vector<8x8x4xf32>
    %68 = arith.select %66, %56, %67 : vector<8x8x4xi1>, vector<8x8x4xf32>
    %69 = arith.maximumf %54, %68 : vector<8x8x4xf32>
    %c0_36 = arith.constant 0 : index
    %c0_37 = arith.constant 0 : index
    %c1_38 = arith.constant 1 : index
    %c0_39 = arith.constant 0 : index
    %c128_40 = arith.constant 128 : index
    %70 = vector.load %arg1[%c0_36, %c0_37, %c1_38, %c0_39, %c128_40] : memref<1x9x2x9x256xf32, #tpu.memory_space<vmem>>, vector<1x8x1x8x4xf32>
    %71 = vector.shape_cast %70 : vector<1x8x1x8x4xf32> to vector<8x8x4xf32>
    %72 = arith.maximumf %69, %71 : vector<8x8x4xf32>
    %c0_41 = arith.constant 0 : index
    %c0_42 = arith.constant 0 : index
    %c1_43 = arith.constant 1 : index
    %c1_44 = arith.constant 1 : index
    %c0_45 = arith.constant 0 : index
    %73 = vector.load %arg1[%c0_41, %c0_42, %c1_43, %c1_44, %c0_45] : memref<1x9x2x9x256xf32, #tpu.memory_space<vmem>>, vector<1x8x1x8x4xf32>
    %74 = vector.shape_cast %73 : vector<1x8x1x8x4xf32> to vector<8x8x4xf32>
    %75 = arith.maximumf %72, %74 : vector<8x8x4xf32>
    %c0_46 = arith.constant 0 : index
    %c1_47 = arith.constant 1 : index
    %c0_48 = arith.constant 0 : index
    %c0_49 = arith.constant 0 : index
    %c0_50 = arith.constant 0 : index
    %76 = vector.load %arg1[%c0_46, %c1_47, %c0_48, %c0_49, %c0_50] : memref<1x9x2x9x256xf32, #tpu.memory_space<vmem>>, vector<1x8x1x8x4xf32>
    %77 = vector.shape_cast %76 : vector<1x8x1x8x4xf32> to vector<8x8x4xf32>
    %78 = tpu.iota {dimensions = array<i32: 1>} : vector<8x8x4xi32>
    %c2_i32_51 = arith.constant 2 : i32
    %79 = vector.broadcast %c2_i32_51 : i32 to vector<8x8x4xi32>
    %80 = arith.muli %79, %78 : vector<8x8x4xi32>
    %c0_i32_52 = arith.constant 0 : i32
    %81 = vector.broadcast %c0_i32_52 : i32 to vector<8x8x4xi32>
    %82 = arith.addi %80, %81 : vector<8x8x4xi32>
    %c1_i32_53 = arith.constant 1 : i32
    %83 = vector.broadcast %c1_i32_53 : i32 to vector<8x8x4xi32>
    %84 = arith.cmpi sge, %82, %83 : vector<8x8x4xi32>
    %c16_i32_54 = arith.constant 16 : i32
    %85 = vector.broadcast %c16_i32_54 : i32 to vector<8x8x4xi32>
    %86 = arith.cmpi sle, %82, %85 : vector<8x8x4xi32>
    %87 = arith.andi %84, %86 : vector<8x8x4xi1>
    %cst_55 = arith.constant -3.40282347E+38 : f32
    %88 = vector.broadcast %cst_55 : f32 to vector<8x8x4xf32>
    %89 = arith.select %87, %77, %88 : vector<8x8x4xi1>, vector<8x8x4xf32>
    %90 = arith.maximumf %75, %89 : vector<8x8x4xf32>
    %c0_56 = arith.constant 0 : index
    %c1_57 = arith.constant 1 : index
    %c0_58 = arith.constant 0 : index
    %c0_59 = arith.constant 0 : index
    %c128_60 = arith.constant 128 : index
    %91 = vector.load %arg1[%c0_56, %c1_57, %c0_58, %c0_59, %c128_60] : memref<1x9x2x9x256xf32, #tpu.memory_space<vmem>>, vector<1x8x1x8x4xf32>
    %92 = vector.shape_cast %91 : vector<1x8x1x8x4xf32> to vector<8x8x4xf32>
    %93 = arith.maximumf %90, %92 : vector<8x8x4xf32>
    %c0_61 = arith.constant 0 : index
    %c1_62 = arith.constant 1 : index
    %c0_63 = arith.constant 0 : index
    %c1_64 = arith.constant 1 : index
    %c0_65 = arith.constant 0 : index
    %94 = vector.load %arg1[%c0_61, %c1_62, %c0_63, %c1_64, %c0_65] : memref<1x9x2x9x256xf32, #tpu.memory_space<vmem>>, vector<1x8x1x8x4xf32>
    %95 = vector.shape_cast %94 : vector<1x8x1x8x4xf32> to vector<8x8x4xf32>
    %96 = arith.maximumf %93, %95 : vector<8x8x4xf32>
    %c0_66 = arith.constant 0 : index
    %c0_67 = arith.constant 0 : index
    %c0_68 = arith.constant 0 : index
    %c0_69 = arith.constant 0 : index
    %97 = vector.load %arg2[%c0_66, %c0_67, %c0_68, %c0_69] : memref<1x8x8x4xf32, #tpu.memory_space<vmem>>, vector<1x8x8x4xf32>
    %98 = vector.shape_cast %97 : vector<1x8x8x4xf32> to vector<8x8x4xf32>
    %99 = vector.shape_cast %96 : vector<8x8x4xf32> to vector<1x8x8x4xf32>
    tpu.vector_store %arg2[%c0_66, %c0_67, %c0_68, %c0_69], %99 {strides = array<i32>} : memref<1x8x8x4xf32, #tpu.memory_space<vmem>>, vector<1x8x8x4xf32>,
    return
  }
  func.func @transform_0(%arg0: i32) -> (i32, i32, i32, i32, i32) {
    %c0_i32 = arith.constant 0 : i32
    %c0_i32_0 = arith.constant 0 : i32
    %c0_i32_1 = arith.constant 0 : i32
    %c0_i32_2 = arith.constant 0 : i32
    %c0_i32_3 = arith.constant 0 : i32
    return %arg0, %c0_i32, %c0_i32_0, %c0_i32_1, %c0_i32_2 : i32, i32, i32, i32, i32
  }
  func.func @transform_1(%arg0: i32) -> (i32, i32, i32, i32) {
    %c0_i32 = arith.constant 0 : i32
    %c0_i32_0 = arith.constant 0 : i32
    %c0_i32_1 = arith.constant 0 : i32
    %c0_i32_2 = arith.constant 0 : i32
    return %arg0, %c0_i32, %c0_i32_0, %c0_i32_1 : i32, i32, i32, i32
  }
}

</mosaic_0001>

<bundles_post_ra>
// kernel: inception_module_d.6
= control target key start
LH: loop header
LB: loop body
LE: loop exit
PB: predicated region body
PF: predicated region fallthrough
CT: control target
= control target key end

     0   :  { %s748_s12 = smov 0   ;;  %s877_s0 = inlined_call_operand.vmem [shape: f32[512,4], index: 0, kind: input, shape index: {}]   ;;  %s878_s1 = inlined_call_operand.vmem [shape: bf16[4,128], index: 1, kind: input, shape index: {}]   ;;  %s879_s2 = inlined_call_operand.vmem [shape: f32[1,128], index: 2, kind: input, shape index: {}]   ;;  %s880_s3 = inlined_call_operand.vmem [shape: bf16[512,128], index: 3, kind: output, shape index: {}]  }
   0x1 LB: > { %s586_s13 = sadd.s32 4294967295, %s726_s12   ;;  %p590_p0 = scmp.ge.s32.totalorder %s726_s12, 1  ;;  %s726_s12 = sphi %s748_s12, %s13_s12  }
   0x2   : > { %p138_p1 = scmp.lt.s32.totalorder %s726_s12, 3 }
   0x4   : > { %p139_p2 = pnand %p590_p0, %p138_p1 }
   0x5   : > { %s591_s16 = sshll.u32 (!%p139_p2), %s586_s13, 5 }
   0x6   : > { %142 = sbr.rel (%p139_p2) target bundleno = 216 (0xd8), region = 32  ;;  %p163_p3 = scmp.lt.s32.totalorder (!%p139_p2), %s591_s16, 63 }
   0xb   : > { %v223_v0 = vld [vmem:[%s878_s1] sm:$0x3]  ;;  %vm277_vm0 = vcmask 1041408   ;;  %s882_s16 = smov (!%p163_p3, %s591_s16), 63  ;;  %vm228_vm1 = vcmask 31744  }
   0xc   : > { %v279_v1 = vsel %vm277_vm0, %v223_v0, 0  ;;  %s592_s17 = sshll.u32 %s882_s16, 3  ;;  %v818_v51 = vld [vmem:[%s879_s2] ss:$0 sm:$0xff]  ;;  %s594_s23 = sshll.u32 %s882_s16, 2 }
   0xd   : > { %288 = vmatpush.bf16.msra.mxu0 %v279_v1  ;;  %708 = vmatpush.bf16.msra.mxu1 %v279_v1  ;;  %s765_s20 = scalar_lea.vmem %s877_s0, %s592_s17  ;;  %s830_s26 = scalar_lea.vmem %s880_s3, %s594_s23 }
   0xe   : > { %709 = vmatpush.bf16.msra.mxu2 %v279_v1  ;;  %710 = vmatpush.bf16.msra.mxu3 %v279_v1  ;;  %v175_v2 = vld [vmem:[%s765_s20] sm:$0xff]  ;;  %v176_v3 = vld [vmem:[%s765_s20 + $0x8] sm:$0xff]  ;;  %v177_v14 = vld [vmem:[%s765_s20 + $0x10] sm:$0xff] }
   0xf   : > { %v183_v4 = vld [vmem:[%s765_s20 + $0x40] sm:$0xff]  ;;  %v207_v5 = vpack.c.bf16 %v176_v3, %v175_v2  ;;  %v184_v6 = vld [vmem:[%s765_s20 + $0x48] sm:$0xff]  ;;  %v178_v15 = vld [vmem:[%s765_s20 + $0x18] sm:$0xff] }
  0x10   : > { %v191_v7 = vld [vmem:[%s765_s20 + $0x80] sm:$0xff]  ;;  %v192_v8 = vld [vmem:[%s765_s20 + $0x88] sm:$0xff]  ;;  %v211_v9 = vpack.c.bf16 %v184_v6, %v183_v4  ;;  %v185_v16 = vld [vmem:[%s765_s20 + $0x50] sm:$0xff]  ;;  %v208_v22 = vpack.c.bf16 %v178_v15, %v177_v14 }
  0x11   : > { %v215_v10 = vpack.c.bf16 %v192_v8, %v191_v7  ;;  %v199_v11 = vld [vmem:[%s765_s20 + $0xc0] sm:$0xff]  ;;  %v200_v12 = vld [vmem:[%s765_s20 + $0xc8] sm:$0xff]  ;;  %595 = vmatmul.msk.bf16.vlgmr.msra.gmra.mxu0 %vm228_vm1, %v207_v5  ;;  %v186_v17 = vld [vmem:[%s765_s20 + $0x58] sm:$0xff] }
  0x12   : > { %v219_v13 = vpack.c.bf16 %v200_v12, %v199_v11  ;;  %599 = vmatmul.msk.bf16.vlgmr.msra.gmra.mxu1 %vm228_vm1, %v211_v9  ;;  %v193_v18 = vld [vmem:[%s765_s20 + $0x90] sm:$0xff]  ;;  %v194_v19 = vld [vmem:[%s765_s20 + $0x98] sm:$0xff]  ;;  %v212_v23 = vpack.c.bf16 %v186_v17, %v185_v16  ;;  %v179_v26 = vld [vmem:[%s765_s20 + $0x20] sm:$0xff] }
  0x13   : > { %603 = vmatmul.msk.bf16.vlgmr.msra.gmra.mxu2 %vm228_vm1, %v215_v10  ;;  %v201_v20 = vld [vmem:[%s765_s20 + $0xd0] sm:$0xff]  ;;  %v202_v21 = vld [vmem:[%s765_s20 + $0xd8] sm:$0xff]  ;;  %v216_v24 = vpack.c.bf16 %v194_v19, %v193_v18  ;;  %v180_v27 = vld [vmem:[%s765_s20 + $0x28] sm:$0xff] }
  0x14   : > { %607 = vmatmul.msk.bf16.vlgmr.msra.gmra.mxu3 %vm228_vm1, %v219_v13  ;;  %v220_v25 = vpack.c.bf16 %v202_v21, %v201_v20  ;;  %v187_v28 = vld [vmem:[%s765_s20 + $0x60] sm:$0xff]  ;;  %v188_v29 = vld [vmem:[%s765_s20 + $0x68] sm:$0xff]  ;;  %v209_v34 = vpack.c.bf16 %v180_v27, %v179_v26  ;;  %v181_v38 = vld [vmem:[%s765_s20 + $0x30] sm:$0xff] }
  0x15   : > { %v195_v30 = vld [vmem:[%s765_s20 + $0xa0] sm:$0xff]  ;;  %v196_v31 = vld [vmem:[%s765_s20 + $0xa8] sm:$0xff]  ;;  %v213_v35 = vpack.c.bf16 %v188_v29, %v187_v28  ;;  %v182_v39 = vld [vmem:[%s765_s20 + $0x38] sm:$0xff] }
  0x16   : > { %v203_v32 = vld [vmem:[%s765_s20 + $0xe0] sm:$0xff]  ;;  %v204_v33 = vld [vmem:[%s765_s20 + $0xe8] sm:$0xff]  ;;  %v217_v36 = vpack.c.bf16 %v196_v31, %v195_v30  ;;  %v189_v40 = vld [vmem:[%s765_s20 + $0x70] sm:$0xff]  ;;  %v210_v46 = vpack.c.bf16 %v182_v39, %v181_v38 }
  0x17   : > { %v221_v37 = vpack.c.bf16 %v204_v33, %v203_v32  ;;  %v190_v41 = vld [vmem:[%s765_s20 + $0x78] sm:$0xff]  ;;  %v197_v42 = vld [vmem:[%s765_s20 + $0xb0] sm:$0xff] }
  0x18   : > { %v198_v43 = vld [vmem:[%s765_s20 + $0xb8] sm:$0xff]  ;;  %v205_v44 = vld [vmem:[%s765_s20 + $0xf0] sm:$0xff]  ;;  %v214_v47 = vpack.c.bf16 %v190_v41, %v189_v40 }
  0x19   : > { %v206_v45 = vld [vmem:[%s765_s20 + $0xf8] sm:$0xff]  ;;  %v218_v48 = vpack.c.bf16 %v198_v43, %v197_v42 }
  0x1a   : > { %v222_v49 = vpack.c.bf16 %v206_v45, %v205_v44 }
  0x21   : > { %596 = vmatmul.msk.bf16.gmra.mxu0 %vm228_vm1, %v208_v22 }
  0x22   : > { %600 = vmatmul.msk.bf16.gmra.mxu1 %vm228_vm1, %v212_v23 }
  0x23   : > { %604 = vmatmul.msk.bf16.gmra.mxu2 %vm228_vm1, %v216_v24 }
  0x24   : > { %608 = vmatmul.msk.bf16.gmra.mxu3 %vm228_vm1, %v220_v25 }
  0x31   : > { %597 = vmatmul.msk.bf16.gmra.mxu0 %vm228_vm1, %v209_v34 }
  0x32   : > { %601 = vmatmul.msk.bf16.gmra.mxu1 %vm228_vm1, %v213_v35 }
  0x33   : > { %605 = vmatmul.msk.bf16.gmra.mxu2 %vm228_vm1, %v217_v36 }
  0x34   : > { %609 = vmatmul.msk.bf16.gmra.mxu3 %vm228_vm1, %v221_v37 }
  0x41   : > { %598 = vmatmul.msk.bf16.gmra.mxu0 %vm228_vm1, %v210_v46 }
  0x42   : > { %602 = vmatmul.msk.bf16.gmra.mxu1 %vm228_vm1, %v214_v47 }
  0x43   : > { %606 = vmatmul.msk.bf16.gmra.mxu2 %vm228_vm1, %v218_v48 }
  0x44   : > { %610 = vmatmul.msk.bf16.gmra.mxu3 %vm228_vm1, %v222_v49 }
  0x8e   : > { %v290_v50 = vpop.f32.mrf.mxu0 }
  0x8f   : > { %v310_v52 = vpop.f32.mrf.mxu1  ;;  %v291_v53 = vadd.f32 %v818_v51, %v290_v50 }
  0x90   : > { %v311_v54 = vadd.f32 %v818_v51, %v310_v52 }
  0x91   : > { %v402_v58 = vmul.f32 0.2, %v291_v53  ;;  %vm370_vm2 = vcmp.gt.f32.partialorder %v291_v53, 0.0 }
  0x92   : > { %v410_v61 = vmul.f32 0.2, %v311_v54  ;;  %vm378_vm3 = vcmp.gt.f32.partialorder %v311_v54, 0.0 }
  0x93   : > { %v434_v2 = vsel %vm370_vm2, %v291_v53, %v402_v58 }
  0x94   : > { %v442_v5 = vsel %vm378_vm3, %v311_v54, %v410_v61 }
  0x96   : > { %v330_v55 = vpop.f32.mrf.mxu2  ;;  %v292_v57 = vpop.f32.mrf.mxu0 }
  0x97   : > { %v350_v56 = vpop.f32.mrf.mxu3  ;;  %v293_v59 = vadd.f32 %v818_v51, %v292_v57  ;;  %v312_v60 = vpop.f32.mrf.mxu1  ;;  %v331_v0 = vadd.f32 %v818_v51, %v330_v55 }
  0x98   : > { %v313_v62 = vadd.f32 %v818_v51, %v312_v60  ;;  %v351_v3 = vadd.f32 %v818_v51, %v350_v56 }
  0x99   : > { %vm371_vm4 = vcmp.gt.f32.partialorder %v293_v59, 0.0  ;;  %v403_v63 = vmul.f32 0.2, %v293_v59  ;;  %v418_v10 = vmul.f32 0.2, %v331_v0  ;;  %vm386_vm6 = vcmp.gt.f32.partialorder %v331_v0, 0.0 }
  0x9a   : > { %vm379_vm5 = vcmp.gt.f32.partialorder %v313_v62, 0.0  ;;  %v411_v1 = vmul.f32 0.2, %v313_v62  ;;  %v426_v14 = vmul.f32 0.2, %v351_v3  ;;  %vm394_vm7 = vcmp.gt.f32.partialorder %v351_v3, 0.0 }
  0x9b   : > { %v435_v4 = vsel %vm371_vm4, %v293_v59, %v403_v63  ;;  %v450_v19 = vsel %vm386_vm6, %v331_v0, %v418_v10 }
  0x9c   : > { %v616_v6 = vpack.c.bf16 %v435_v4, %v434_v2  ;;  %v443_v7 = vsel %vm379_vm5, %v313_v62, %v411_v1  ;;  %v458_v21 = vsel %vm394_vm7, %v351_v3, %v426_v14 }
  0x9d   : > { %v636_v8 = vpack.c.bf16 %v443_v7, %v442_v5 }
  0x9e   : > { %v332_v9 = vpop.f32.mrf.mxu2  ;;  %617 = vst [vmem:[%s830_s26] sm:$0xff] %v616_v6   ;;  %v295_v13 = vpop.f32.mrf.mxu0 }
  0x9f   : > { %v333_v11 = vadd.f32 %v818_v51, %v332_v9  ;;  %v352_v12 = vpop.f32.mrf.mxu3  ;;  %696 = vst [vmem:[%s830_s26 + $0x20] sm:$0xff] %v636_v8   ;;  %v315_v16 = vpop.f32.mrf.mxu1  ;;  %v296_v24 = vadd.f32 %v818_v51, %v295_v13 }
  0xa0   : > { %v353_v15 = vadd.f32 %v818_v51, %v352_v12  ;;  %v316_v26 = vadd.f32 %v818_v51, %v315_v16 }
  0xa1   : > { %vm387_vm8 = vcmp.gt.f32.partialorder %v333_v11, 0.0  ;;  %v419_v17 = vmul.f32 0.2, %v333_v11  ;;  %v404_v30 = vmul.f32 0.2, %v296_v24  ;;  %vm372_vm10 = vcmp.gt.f32.partialorder %v296_v24, 0.0 }
  0xa2   : > { %vm395_vm9 = vcmp.gt.f32.partialorder %v353_v15, 0.0  ;;  %v427_v18 = vmul.f32 0.2, %v353_v15  ;;  %v412_v33 = vmul.f32 0.2, %v316_v26  ;;  %vm380_vm11 = vcmp.gt.f32.partialorder %v316_v26, 0.0 }
  0xa3   : > { %v451_v20 = vsel %vm387_vm8, %v333_v11, %v419_v17  ;;  %v436_v38 = vsel %vm372_vm10, %v296_v24, %v404_v30 }
  0xa4   : > { %v656_v22 = vpack.c.bf16 %v451_v20, %v450_v19  ;;  %v459_v23 = vsel %vm395_vm9, %v353_v15, %v427_v18  ;;  %v444_v41 = vsel %vm380_vm11, %v316_v26, %v412_v33 }
  0xa5   : > { %v676_v25 = vpack.c.bf16 %v459_v23, %v458_v21 }
  0xa6   : > { %700 = vst [vmem:[%s830_s26 + $0x40] sm:$0xff] %v656_v22   ;;  %v335_v27 = vpop.f32.mrf.mxu2  ;;  %v297_v29 = vpop.f32.mrf.mxu0 }
  0xa7   : > { %704 = vst [vmem:[%s830_s26 + $0x60] sm:$0xff] %v676_v25   ;;  %v355_v28 = vpop.f32.mrf.mxu3  ;;  %v298_v31 = vadd.f32 %v818_v51, %v297_v29  ;;  %v317_v32 = vpop.f32.mrf.mxu1  ;;  %v336_v36 = vadd.f32 %v818_v51, %v335_v27 }
  0xa8   : > { %v318_v34 = vadd.f32 %v818_v51, %v317_v32  ;;  %v356_v39 = vadd.f32 %v818_v51, %v355_v28 }
  0xa9   : > { %vm373_vm12 = vcmp.gt.f32.partialorder %v298_v31, 0.0  ;;  %v405_v35 = vmul.f32 0.2, %v298_v31  ;;  %v420_v46 = vmul.f32 0.2, %v336_v36  ;;  %vm388_vm14 = vcmp.gt.f32.partialorder %v336_v36, 0.0 }
  0xaa   : > { %vm381_vm13 = vcmp.gt.f32.partialorder %v318_v34, 0.0  ;;  %v413_v37 = vmul.f32 0.2, %v318_v34  ;;  %v428_v50 = vmul.f32 0.2, %v356_v39  ;;  %vm396_vm15 = vcmp.gt.f32.partialorder %v356_v39, 0.0 }
  0xab   : > { %v437_v40 = vsel %vm373_vm12, %v298_v31, %v405_v35  ;;  %v452_v56 = vsel %vm388_vm14, %v336_v36, %v420_v46 }
  0xac   : > { %v621_v42 = vpack.c.bf16 %v437_v40, %v436_v38  ;;  %v445_v43 = vsel %vm381_vm13, %v318_v34, %v413_v37  ;;  %v460_v58 = vsel %vm396_vm15, %v356_v39, %v428_v50 }
  0xad   : > { %v641_v44 = vpack.c.bf16 %v445_v43, %v444_v41 }
  0xae   : > { %v337_v45 = vpop.f32.mrf.mxu2  ;;  %693 = vst [vmem:[%s830_s26 + $0x8] sm:$0xff] %v621_v42   ;;  %v300_v49 = vpop.f32.mrf.mxu0 }
  0xaf   : > { %v338_v47 = vadd.f32 %v818_v51, %v337_v45  ;;  %v357_v48 = vpop.f32.mrf.mxu3  ;;  %697 = vst [vmem:[%s830_s26 + $0x28] sm:$0xff] %v641_v44   ;;  %v320_v53 = vpop.f32.mrf.mxu1  ;;  %v301_v61 = vadd.f32 %v818_v51, %v300_v49 }
  0xb0   : > { %v358_v52 = vadd.f32 %v818_v51, %v357_v48  ;;  %v321_v63 = vadd.f32 %v818_v51, %v320_v53 }
  0xb1   : > { %vm389_vm0 = vcmp.gt.f32.partialorder %v338_v47, 0.0  ;;  %v421_v54 = vmul.f32 0.2, %v338_v47  ;;  %v406_v3 = vmul.f32 0.2, %v301_v61  ;;  %vm374_vm2 = vcmp.gt.f32.partialorder %v301_v61, 0.0 }
  0xb2   : > { %vm397_vm1 = vcmp.gt.f32.partialorder %v358_v52, 0.0  ;;  %v429_v55 = vmul.f32 0.2, %v358_v52  ;;  %v414_v6 = vmul.f32 0.2, %v321_v63  ;;  %vm382_vm3 = vcmp.gt.f32.partialorder %v321_v63, 0.0 }
  0xb3   : > { %v453_v57 = vsel %vm389_vm0, %v338_v47, %v421_v54  ;;  %v438_v11 = vsel %vm374_vm2, %v301_v61, %v406_v3 }
  0xb4   : > { %v661_v59 = vpack.c.bf16 %v453_v57, %v452_v56  ;;  %v461_v60 = vsel %vm397_vm1, %v358_v52, %v429_v55  ;;  %v446_v14 = vsel %vm382_vm3, %v321_v63, %v414_v6 }
  0xb5   : > { %v681_v62 = vpack.c.bf16 %v461_v60, %v460_v58 }
  0xb6   : > { %701 = vst [vmem:[%s830_s26 + $0x48] sm:$0xff] %v661_v59   ;;  %v340_v0 = vpop.f32.mrf.mxu2  ;;  %v302_v2 = vpop.f32.mrf.mxu0 }
  0xb7   : > { %705 = vst [vmem:[%s830_s26 + $0x68] sm:$0xff] %v681_v62   ;;  %v360_v1 = vpop.f32.mrf.mxu3  ;;  %v303_v4 = vadd.f32 %v818_v51, %v302_v2  ;;  %v322_v5 = vpop.f32.mrf.mxu1  ;;  %v341_v9 = vadd.f32 %v818_v51, %v340_v0 }
  0xb8   : > { %v323_v7 = vadd.f32 %v818_v51, %v322_v5  ;;  %v361_v12 = vadd.f32 %v818_v51, %v360_v1 }
  0xb9   : > { %vm375_vm4 = vcmp.gt.f32.partialorder %v303_v4, 0.0  ;;  %v407_v8 = vmul.f32 0.2, %v303_v4  ;;  %v422_v19 = vmul.f32 0.2, %v341_v9  ;;  %vm390_vm6 = vcmp.gt.f32.partialorder %v341_v9, 0.0 }
  0xba   : > { %vm383_vm5 = vcmp.gt.f32.partialorder %v323_v7, 0.0  ;;  %v415_v10 = vmul.f32 0.2, %v323_v7  ;;  %v430_v23 = vmul.f32 0.2, %v361_v12  ;;  %vm398_vm7 = vcmp.gt.f32.partialorder %v361_v12, 0.0 }
  0xbb   : > { %v439_v13 = vsel %vm375_vm4, %v303_v4, %v407_v8  ;;  %v454_v28 = vsel %vm390_vm6, %v341_v9, %v422_v19 }
  0xbc   : > { %v626_v15 = vpack.c.bf16 %v439_v13, %v438_v11  ;;  %v447_v16 = vsel %vm383_vm5, %v323_v7, %v415_v10  ;;  %v462_v30 = vsel %vm398_vm7, %v361_v12, %v430_v23 }
  0xbd   : > { %v646_v17 = vpack.c.bf16 %v447_v16, %v446_v14 }
  0xbe   : > { %v342_v18 = vpop.f32.mrf.mxu2  ;;  %694 = vst [vmem:[%s830_s26 + $0x10] sm:$0xff] %v626_v15   ;;  %v305_v22 = vpop.f32.mrf.mxu0 }
  0xbf   : > { %v343_v20 = vadd.f32 %v818_v51, %v342_v18  ;;  %v362_v21 = vpop.f32.mrf.mxu3  ;;  %698 = vst [vmem:[%s830_s26 + $0x30] sm:$0xff] %v646_v17   ;;  %v325_v25 = vpop.f32.mrf.mxu1  ;;  %v306_v33 = vadd.f32 %v818_v51, %v305_v22 }
  0xc0   : > { %v363_v24 = vadd.f32 %v818_v51, %v362_v21  ;;  %v326_v35 = vadd.f32 %v818_v51, %v325_v25 }
  0xc1   : > { %vm391_vm8 = vcmp.gt.f32.partialorder %v343_v20, 0.0  ;;  %v423_v26 = vmul.f32 0.2, %v343_v20  ;;  %v408_v39 = vmul.f32 0.2, %v306_v33  ;;  %vm376_vm10 = vcmp.gt.f32.partialorder %v306_v33, 0.0 }
  0xc2   : > { %vm399_vm9 = vcmp.gt.f32.partialorder %v363_v24, 0.0  ;;  %v431_v27 = vmul.f32 0.2, %v363_v24  ;;  %v416_v42 = vmul.f32 0.2, %v326_v35  ;;  %vm384_vm11 = vcmp.gt.f32.partialorder %v326_v35, 0.0 }
  0xc3   : > { %v455_v29 = vsel %vm391_vm8, %v343_v20, %v423_v26  ;;  %v440_v47 = vsel %vm376_vm10, %v306_v33, %v408_v39 }
  0xc4   : > { %v666_v31 = vpack.c.bf16 %v455_v29, %v454_v28  ;;  %v463_v32 = vsel %vm399_vm9, %v363_v24, %v431_v27  ;;  %v448_v50 = vsel %vm384_vm11, %v326_v35, %v416_v42 }
  0xc5   : > { %v686_v34 = vpack.c.bf16 %v463_v32, %v462_v30 }
  0xc6   : > { %702 = vst [vmem:[%s830_s26 + $0x50] sm:$0xff] %v666_v31   ;;  %v345_v36 = vpop.f32.mrf.mxu2  ;;  %v307_v38 = vpop.f32.mrf.mxu0 }
  0xc7   : > { %706 = vst [vmem:[%s830_s26 + $0x70] sm:$0xff] %v686_v34   ;;  %v365_v37 = vpop.f32.mrf.mxu3  ;;  %v308_v40 = vadd.f32 %v818_v51, %v307_v38  ;;  %v327_v41 = vpop.f32.mrf.mxu1  ;;  %v346_v45 = vadd.f32 %v818_v51, %v345_v36 }
  0xc8   : > { %v328_v43 = vadd.f32 %v818_v51, %v327_v41  ;;  %v366_v48 = vadd.f32 %v818_v51, %v365_v37 }
  0xc9   : > { %vm377_vm12 = vcmp.gt.f32.partialorder %v308_v40, 0.0  ;;  %v409_v44 = vmul.f32 0.2, %v308_v40  ;;  %v424_v56 = vmul.f32 0.2, %v346_v45  ;;  %vm392_vm14 = vcmp.gt.f32.partialorder %v346_v45, 0.0 }
  0xca   : > { %vm385_vm13 = vcmp.gt.f32.partialorder %v328_v43, 0.0  ;;  %v417_v46 = vmul.f32 0.2, %v328_v43  ;;  %v432_v59 = vmul.f32 0.2, %v366_v48  ;;  %vm400_vm15 = vcmp.gt.f32.partialorder %v366_v48, 0.0 }
  0xcb   : > { %v441_v49 = vsel %vm377_vm12, %v308_v40, %v409_v44  ;;  %v456_v63 = vsel %vm392_vm14, %v346_v45, %v424_v56 }
  0xcc   : > { %v631_v52 = vpack.c.bf16 %v441_v49, %v440_v47  ;;  %v449_v53 = vsel %vm385_vm13, %v328_v43, %v417_v46  ;;  %v464_v1 = vsel %vm400_vm15, %v366_v48, %v432_v59 }
  0xcd   : > { %v651_v54 = vpack.c.bf16 %v449_v53, %v448_v50 }
  0xce   : > { %v347_v55 = vpop.f32.mrf.mxu2  ;;  %695 = vst [vmem:[%s830_s26 + $0x18] sm:$0xff] %v631_v52  }
  0xcf   : > { %v348_v57 = vadd.f32 %v818_v51, %v347_v55  ;;  %v367_v58 = vpop.f32.mrf.mxu3  ;;  %699 = vst [vmem:[%s830_s26 + $0x38] sm:$0xff] %v651_v54  }
  0xd0   : > { %v368_v60 = vadd.f32 %v818_v51, %v367_v58 }
  0xd1   : > { %vm393_vm0 = vcmp.gt.f32.partialorder %v348_v57, 0.0  ;;  %v425_v61 = vmul.f32 0.2, %v348_v57 }
  0xd2   : > { %vm401_vm1 = vcmp.gt.f32.partialorder %v368_v60, 0.0  ;;  %v433_v62 = vmul.f32 0.2, %v368_v60 }
  0xd3   : > { %v457_v0 = vsel %vm393_vm0, %v348_v57, %v425_v61 }
  0xd4   : > { %v671_v2 = vpack.c.bf16 %v457_v0, %v456_v63  ;;  %v465_v3 = vsel %vm401_vm1, %v368_v60, %v433_v62 }
  0xd5   : > { %v691_v4 = vpack.c.bf16 %v465_v3, %v464_v1 }
  0xd6   : > { %703 = vst [vmem:[%s830_s26 + $0x58] sm:$0xff] %v671_v2  }
  0xd7   : > { %707 = vst [vmem:[%s830_s26 + $0x78] sm:$0xff] %v691_v4  }
  0xd8 PF: > { %s13_s12 = sadd.s32 1, %s726_s12  }
  0xd9   : > { %p10_p4 = scmp.ge.s32.totalorder %s13_s12, 4  }
  0xdb   :  { %12 = sbr.rel (!%p10_p4) target bundleno = 1 (0x1), region = 62 }

// kernel: inception_module_d.8
= control target key start
LH: loop header
LB: loop body
LE: loop exit
PB: predicated region body
PF: predicated region fallthrough
CT: control target
= control target key end

     0   :  { %s3218_s12 = smov 0   ;;  %s3220_s13 = smov 0   ;;  %s3741_s0 = inlined_call_operand.vmem [shape: bf16[2,9,2,9,256], index: 0, kind: input, shape index: {}]   ;;  %s3742_s1 = inlined_call_operand.vmem [shape: bf16[3,512,96], index: 1, kind: input, shape index: {}]   ;;  %s3743_s2 = inlined_call_operand.vmem [shape: f32[1,96], index: 2, kind: input, shape index: {}]   ;;  %s3744_s3 = inlined_call_operand.vmem [shape: f32[2,64,96], index: 3, kind: output, shape index: {}]  }
   0x1   :  { %s3222_s14 = smov 0  }
   0x2 LB: > { %s25_s15 = sadd.s32 1, %s3192_s13  ;;  %p2261_p0 = scmp.ge.s32.totalorder %s3196_s14, 1  ;;  %s3196_s14 = sphi %s3222_s14, %s13_s14   ;;  %s3192_s13 = sphi %s3220_s13, %s3748_s13   ;;  %s3188_s12 = sphi %s3218_s12, %s3747_s12  }
   0x3   : > { %p27_p1 = scmp.ge.s32.totalorder %s25_s15, 2  ;;  %p168_p2 = scmp.lt.s32.totalorder %s3196_s14, 3 }
   0x5   : > { %s3750_s15 = smov (%p27_p1, %s25_s15), 0  ;;  %p169_p3 = pnand %p2261_p0, %p168_p2 }
   0x6   : > { %p202_p4 = scmp.lt.s32.totalorder (!%p169_p3), %s3188_s12, 1 }
   0x7   : > { %172 = sbr.rel (%p169_p3) target bundleno = 374 (0x176), region = 32 }
   0xc   : > { %v3075_v0 = vld [vmem:[%s3742_s1 + $0x138] sm:$0xff]  ;;  %v3074_v4 = vld [vmem:[%s3742_s1 + $0x130] sm:$0xff]  ;;  %s3752_s12 = smov (!%p202_p4, %s3188_s12), 1  ;;  %v3073_v8 = vld [vmem:[%s3742_s1 + $0x128] sm:$0xff]  ;;  %vm250_vm0 = vsmask.f32 3328 }
   0xd   : > { %v3083_v1 = vld [vmem:[%s3742_s1 + $0x178] sm:$0xff]  ;;  %1123 = vmatpush.bf16.msra.mxu0 %v3075_v0  ;;  %v3082_v5 = vld [vmem:[%s3742_s1 + $0x170] sm:$0xff]  ;;  %s3148_s5 = smul.u32 288, %s3752_s12  ;;  %v3081_v9 = vld [vmem:[%s3742_s1 + $0x168] sm:$0xff]  ;;  %vm251_vm1 = vsmask.f32 7440 }
   0xe   : > { %v3091_v2 = vld [vmem:[%s3742_s1 + $0x1b8] sm:$0xff]  ;;  %1152 = vmatpush.bf16.msra.mxu1 %v3083_v1  ;;  %v3090_v6 = vld [vmem:[%s3742_s1 + $0x1b0] sm:$0xff]  ;;  %v3089_v10 = vld [vmem:[%s3742_s1 + $0x1a8] sm:$0xff]  ;;  %s3003_s9 = sshll.u32 %s3752_s12, 6  ;;  %vm2141_vm4 = vcmask 785408  }
   0xf   : > { %v3099_v3 = vld [vmem:[%s3742_s1 + $0x1f8] sm:$0xff]  ;;  %1181 = vmatpush.bf16.msra.mxu2 %v3091_v2  ;;  %v3098_v7 = vld [vmem:[%s3742_s1 + $0x1f0] sm:$0xff]  ;;  %v3097_v11 = vld [vmem:[%s3742_s1 + $0x1e8] sm:$0xff]  ;;  %s3278_s20 = scalar_lea.vmem %s3741_s0, %s3148_s5  ;;  %s3700_s16 = scalar_lea.vmem %s3744_s3, %s3003_s9 }
  0x10   : > { %1210 = vmatpush.bf16.msra.mxu3 %v3099_v3  ;;  %v3072_v12 = vld [vmem:[%s3742_s1 + $0x120] sm:$0xff]  ;;  %v2265_v16 = vld [vmem:[%s3278_s20 + $0x10] sm:$0xff]  ;;  %v2273_v20 = vld [vmem:[%s3278_s20 + $0x18] sm:$0x11] }
  0x11   : > { %1124 = vmatpush.bf16.msra.mxu0 %v3074_v4  ;;  %v3080_v13 = vld [vmem:[%s3742_s1 + $0x160] sm:$0xff]  ;;  %v2266_v17 = vld [vmem:[%s3278_s20 + $0x30] sm:$0xff]  ;;  %399 = vst [vmem:[#allocation2 + $0x80] sm:$0xff] %v2265_v16  ;;  %v408_v18 = vshrl.u32 %v2265_v16, 16  ;;  %v411_v19 = vshll.u32 %v2265_v16, 16  ;;  %v417_v24 = vshll.u32 %v2273_v20, 16  ;;  %vm3311_vm2 = vmor %vm250_vm0, %vm251_vm1 }
  0x12   : > { %1153 = vmatpush.bf16.msra.mxu1 %v3082_v5  ;;  %v3088_v14 = vld [vmem:[%s3742_s1 + $0x1a0] sm:$0xff]  ;;  %400 = vst [vmem:[#allocation2 + $0x90] sm:$0xff] %v2266_v17  ;;  %v422_v21 = vshrl.u32 %v2266_v17, 16  ;;  %v425_v22 = vshll.u32 %v2266_v17, 16  ;;  %v2274_v23 = vld [vmem:[%s3278_s20 + $0x38] sm:$0x11] }
  0x13   : > { %1182 = vmatpush.bf16.msra.mxu2 %v3090_v6  ;;  %v3096_v15 = vld [vmem:[%s3742_s1 + $0x1e0] sm:$0xff]  ;;  %v410_v25 = vrot.slane %v408_v18, 4  ;;  %v413_v26 = vrot.slane %v411_v19, 5  ;;  %v431_v27 = vshll.u32 %v2274_v23, 16  ;;  %v3071_v28 = vld [vmem:[%s3742_s1 + $0x118] sm:$0xff]  ;;  %v419_v35 = vrot.slane %v417_v24, 5 }
  0x14   : > { %1211 = vmatpush.bf16.msra.mxu3 %v3098_v7  ;;  %v3079_v29 = vld [vmem:[%s3742_s1 + $0x158] sm:$0xff]  ;;  %v424_v30 = vrot.slane %v422_v21, 4  ;;  %v427_v31 = vrot.slane %v425_v22, 5  ;;  %v2267_v36 = vld [vmem:[%s3278_s20 + $0x50] sm:$0xff]  ;;  %v3069_v62 = vld [vmem:[%s3742_s1 + $0x108] sm:$0xff] }
  0x15   : > { %1125 = vmatpush.bf16.msra.mxu0 %v3073_v8  ;;  %v3087_v32 = vld [vmem:[%s3742_s1 + $0x198] sm:$0xff]  ;;  %v414_v34 = vor.u32 %v413_v26, %v410_v25  ;;  %v433_v39 = vrot.slane %v431_v27, 5  ;;  %v2268_v40 = vld [vmem:[%s3278_s20 + $0x70] sm:$0xff]  ;;  %401 = vst [vmem:[#allocation2 + $0xa0] sm:$0xff] %v2267_v36  ;;  %v436_v41 = vshrl.u32 %v2267_v36, 16  ;;  %v439_v42 = vshll.u32 %v2267_v36, 16 }
  0x16   : > { %1154 = vmatpush.bf16.msra.mxu1 %v3081_v9  ;;  %v3095_v33 = vld [vmem:[%s3742_s1 + $0x1d8] sm:$0xff]  ;;  %v428_v38 = vor.u32 %v427_v31, %v424_v30  ;;  %v3070_v43 = vld [vmem:[%s3742_s1 + $0x110] sm:$0xff]  ;;  %402 = vst [vmem:[#allocation2 + $0xb0] sm:$0xff] %v2268_v40  ;;  %v450_v46 = vshrl.u32 %v2268_v40, 16  ;;  %v453_v47 = vshll.u32 %v2268_v40, 16  ;;  %v3077_v63 = vld [vmem:[%s3742_s1 + $0x148] sm:$0xff] }
  0x17   : > { %1183 = vmatpush.bf16.msra.mxu2 %v3089_v10  ;;  %v3078_v44 = vld [vmem:[%s3742_s1 + $0x150] sm:$0xff]  ;;  %v415_v45 = vrot.slane %v414_v34, 4  ;;  %v438_v49 = vrot.slane %v436_v41, 4  ;;  %v2275_v50 = vld [vmem:[%s3278_s20 + $0x58] sm:$0x11]  ;;  %v441_v55 = vrot.slane %v439_v42, 5 }
  0x18   : > { %1212 = vmatpush.bf16.msra.mxu3 %v3097_v11  ;;  %v429_v48 = vrot.slane %v428_v38, 4  ;;  %v2276_v51 = vld [vmem:[%s3278_s20 + $0x78] sm:$0x11]  ;;  %v3086_v52 = vld [vmem:[%s3742_s1 + $0x190] sm:$0xff]  ;;  %v452_v56 = vrot.slane %v450_v46, 4  ;;  %v455_v58 = vrot.slane %v453_v47, 5 }
  0x19   : > { %1126 = vmatpush.bf16.msra.mxu0 %v3072_v12  ;;  %v3094_v53 = vld [vmem:[%s3742_s1 + $0x1d0] sm:$0xff]  ;;  %v420_v54 = vsel %vm3311_vm2, %v415_v45, %v419_v35  ;;  %v442_v59 = vor.u32 %v441_v55, %v438_v49  ;;  %v445_v60 = vshll.u32 %v2275_v50, 16  ;;  %v459_v61 = vshll.u32 %v2276_v51, 16  ;;  %v3085_v2 = vld [vmem:[%s3742_s1 + $0x188] sm:$0xff]  ;;  %v3347_v4 = vld [vmem:[#allocation2 + $0x80] sm:$0xf] }
  0x1a   : > { %1155 = vmatpush.bf16.msra.mxu1 %v3080_v13  ;;  %v434_v57 = vsel %vm3311_vm2, %v429_v48, %v433_v39  ;;  %527 = vst [vmem:[#allocation2 + $0x88] sm:$0xff] %v420_v54  ;;  %v456_v0 = vor.u32 %v455_v58, %v452_v56  ;;  %v2269_v1 = vld [vmem:[%s3278_s20 + $0x90] sm:$0xff]  ;;  %v3093_v3 = vld [vmem:[%s3742_s1 + $0x1c8] sm:$0xff]  ;;  %v3068_v7 = vld [vmem:[%s3742_s1 + $0x100] sm:$0xff] }
  0x1b   : > { %1184 = vmatpush.bf16.msra.mxu2 %v3088_v14  ;;  %528 = vst [vmem:[#allocation2 + $0x98] sm:$0xff] %v434_v57  ;;  %v443_v5 = vrot.slane %v442_v59, 4  ;;  %v447_v6 = vrot.slane %v445_v60, 5  ;;  %v3076_v8 = vld [vmem:[%s3742_s1 + $0x140] sm:$0xff]  ;;  %v3054_v9 = vld [vmem:[#allocation2 + $0x8c] sm:$0xf0] }
  0x1c   : > { %1213 = vmatpush.bf16.msra.mxu3 %v3096_v15  ;;  %v3052_v10 = vld [vmem:[#allocation2 + $0x84] sm:$0xf]  ;;  %v2365_v11 = vld [vmem:[#allocation2 + $0x90] sm:$0xf0]  ;;  %v457_v12 = vrot.slane %v456_v0, 4  ;;  %v461_v13 = vrot.slane %v459_v61, 5  ;;  %v2364_v30 = vor.u32 %v3054_v9, %v3347_v4 }
  0x1d   : > { %1127 = vmatpush.bf16.msra.mxu0 %v3071_v28  ;;  %v3084_v14 = vld [vmem:[%s3742_s1 + $0x180] sm:$0xff]  ;;  %v448_v16 = vsel %vm3311_vm2, %v443_v5, %v447_v6  ;;  %v2270_v17 = vld [vmem:[%s3278_s20 + $0xb0] sm:$0xff]  ;;  %403 = vst [vmem:[#allocation2 + $0xc0] sm:$0xff] %v2269_v1  ;;  %v464_v18 = vshrl.u32 %v2269_v1, 16  ;;  %v2277_v19 = vld [vmem:[%s3278_s20 + $0x98] sm:$0x11]  ;;  %v2368_v34 = vor.u32 %v3052_v10, %v2365_v11 }
  0x1e   : > { %1156 = vmatpush.bf16.msra.mxu1 %v3079_v29  ;;  %v3092_v15 = vld [vmem:[%s3742_s1 + $0x1c0] sm:$0xff]  ;;  %v3043_v20 = vld [vmem:[%s3742_s1 + $0xb8] sm:$0xff]  ;;  %v462_v22 = vsel %vm3311_vm2, %v457_v12, %v461_v13  ;;  %529 = vst [vmem:[#allocation2 + $0xa8] sm:$0xff] %v448_v16  ;;  %v467_v23 = vshll.u32 %v2269_v1, 16  ;;  %v478_v24 = vshrl.u32 %v2270_v17, 16  ;;  %v481_v25 = vshll.u32 %v2270_v17, 16 }
  0x1f   : > { %1185 = vmatpush.bf16.msra.mxu2 %v3087_v32  ;;  %v3051_v21 = vld [vmem:[%s3742_s1 + $0xf8] sm:$0xff]  ;;  %530 = vst [vmem:[#allocation2 + $0xb8] sm:$0xff] %v462_v22  ;;  %v466_v29 = vrot.slane %v464_v18, 4  ;;  %v473_v41 = vshll.u32 %v2277_v19, 16  ;;  %v3042_v48 = vld [vmem:[%s3742_s1 + $0xb0] sm:$0xff]  ;;  %v3041_v61 = vld [vmem:[%s3742_s1 + $0xa8] sm:$0xff] }
  0x20   : > { %1214 = vmatpush.bf16.msra.mxu3 %v3095_v33  ;;  %v2278_v26 = vld [vmem:[%s3278_s20 + $0xb8] sm:$0x11]  ;;  %404 = vst [vmem:[#allocation2 + $0xd0] sm:$0xff] %v2270_v17  ;;  %v469_v33 = vrot.slane %v467_v23, 5  ;;  %v480_v36 = vrot.slane %v478_v24, 4  ;;  %v483_v38 = vrot.slane %v481_v25, 5 }
  0x21   : > { %1128 = vmatpush.bf16.msra.mxu0 %v3070_v43  ;;  %v2371_v27 = vld [vmem:[#allocation2 + $0x88] sm:$0xf]  ;;  %v3053_v28 = vld [vmem:[#allocation2 + $0x8c] sm:$0xf]  ;;  %v487_v42 = vshll.u32 %v2278_v26, 16  ;;  %v2271_v43 = vld [vmem:[%s3278_s20 + $0xd0] sm:$0xff] }
  0x22   : > { %1157 = vmatpush.bf16.msra.mxu1 %v3078_v44  ;;  %v3055_v31 = vld [vmem:[#allocation2 + $0x94] sm:$0xf0]  ;;  %v2373_v32 = vld [vmem:[#allocation2 + $0x98] sm:$0xf0]  ;;  %v470_v40 = vor.u32 %v469_v33, %v466_v29  ;;  %v2272_v44 = vld [vmem:[%s3278_s20 + $0xf0] sm:$0xff]  ;;  %v484_v47 = vor.u32 %v483_v38, %v480_v36  ;;  %405 = vst [vmem:[#allocation2 + $0xe0] sm:$0xff] %v2271_v43 }
  0x23   : > { %1186 = vmatpush.bf16.msra.mxu2 %v3086_v52  ;;  %v2372_v35 = vor.u32 %v3055_v31, %v2371_v27  ;;  %v2376_v39 = vor.u32 %v3053_v28, %v2373_v32  ;;  %v3027_v45 = vld [vmem:[%s3742_s1 + $0x38] sm:$0xff]  ;;  %v3050_v49 = vld [vmem:[%s3742_s1 + $0xf0] sm:$0xff]  ;;  %v475_v51 = vrot.slane %v473_v41, 5  ;;  %v492_v52 = vshrl.u32 %v2271_v43, 16  ;;  %406 = vst [vmem:[#allocation2 + $0xf0] sm:$0xff] %v2272_v44  ;;  %v3025_v6 = vld [vmem:[%s3742_s1 + $0x28] sm:$0xff] }
  0x24   : > { %1215 = vmatpush.bf16.msra.mxu3 %v3094_v53  ;;  %v3035_v46 = vld [vmem:[%s3742_s1 + $0x78] sm:$0xff]  ;;  %v471_v50 = vrot.slane %v470_v40, 4  ;;  %v495_v53 = vshll.u32 %v2271_v43, 16  ;;  %v485_v54 = vrot.slane %v484_v47, 4  ;;  %v489_v55 = vrot.slane %v487_v42, 5  ;;  %v3026_v58 = vld [vmem:[%s3742_s1 + $0x30] sm:$0xff] }
  0x25   : > { %1129 = vmatpush.bf16.msra.mxu0 %v3069_v62  ;;  %v506_v56 = vshrl.u32 %v2272_v44, 16  ;;  %v3034_v59 = vld [vmem:[%s3742_s1 + $0x70] sm:$0xff]  ;;  %v3049_v62 = vld [vmem:[%s3742_s1 + $0xe8] sm:$0xff]  ;;  %v2280_v4 = vld [vmem:[%s3278_s20 + $0xf8] sm:$0x11] }
  0x26   : > { %1158 = vmatpush.bf16.msra.mxu1 %v3077_v63  ;;  %v476_v57 = vsel %vm3311_vm2, %v471_v50, %v475_v51  ;;  %v490_v60 = vsel %vm3311_vm2, %v485_v54, %v489_v55  ;;  %v494_v63 = vrot.slane %v492_v52, 4  ;;  %v497_v0 = vrot.slane %v495_v53, 5  ;;  %v2379_v11 = vld [vmem:[#allocation2 + $0xa0] sm:$0xf]  ;;  %v3056_v16 = vld [vmem:[#allocation2 + $0xa4] sm:$0xf] }
  0x27   : > { %1187 = vmatpush.bf16.msra.mxu2 %v3085_v2  ;;  %531 = vst [vmem:[#allocation2 + $0xc8] sm:$0xff] %v476_v57  ;;  %v508_v1 = vrot.slane %v506_v56, 4  ;;  %v509_v2 = vshll.u32 %v2272_v44, 16  ;;  %v515_v10 = vshll.u32 %v2280_v4, 16  ;;  %v3040_v12 = vld [vmem:[%s3742_s1 + $0xa0] sm:$0xff]  ;;  %v3039_v29 = vld [vmem:[%s3742_s1 + $0x98] sm:$0xff] }
  0x28   : > { %1216 = vmatpush.bf16.msra.mxu3 %v3093_v3  ;;  %532 = vst [vmem:[#allocation2 + $0xd8] sm:$0xff] %v490_v60  ;;  %v2279_v3 = vld [vmem:[%s3278_s20 + $0xd8] sm:$0x11]  ;;  %v498_v5 = vor.u32 %v497_v0, %v494_v63  ;;  %v3048_v13 = vld [vmem:[%s3742_s1 + $0xe0] sm:$0xff]  ;;  %v2387_v22 = vld [vmem:[#allocation2 + $0xa8] sm:$0xf] }
  0x29   : > { %1130 = vmatpush.bf16.msra.mxu0 %v3068_v7  ;;  %v3033_v7 = vld [vmem:[%s3742_s1 + $0x68] sm:$0xff]  ;;  %v501_v9 = vshll.u32 %v2279_v3, 16  ;;  %v3024_v17 = vld [vmem:[%s3742_s1 + $0x20] sm:$0xff]  ;;  %v3059_v24 = vld [vmem:[#allocation2 + $0xb4] sm:$0xf0] }
  0x2a   : > { %1159 = vmatpush.bf16.msra.mxu1 %v3076_v8  ;;  %v511_v8 = vrot.slane %v509_v2, 5  ;;  %v3057_v23 = vld [vmem:[#allocation2 + $0xac] sm:$0xf]  ;;  %v2389_v25 = vld [vmem:[#allocation2 + $0xb8] sm:$0xf0]  ;;  %v3032_v26 = vld [vmem:[%s3742_s1 + $0x60] sm:$0xff] }
  0x2b   : > { %1188 = vmatpush.bf16.msra.mxu2 %v3084_v14  ;;  %v499_v14 = vrot.slane %v498_v5, 4  ;;  %v503_v18 = vrot.slane %v501_v9, 5  ;;  %v226_v36 = vld [vmem:[%s3278_s20] sm:$0xff]  ;;  %v3031_v40 = vld [vmem:[%s3742_s1 + $0x58] sm:$0xff]  ;;  %v3038_v42 = vld [vmem:[%s3742_s1 + $0x90] sm:$0xff] }
  0x2c   : > { %1217 = vmatpush.bf16.msra.mxu3 %v3092_v15  ;;  %1131 = vmatmul.bf16.vlgmr.msra.gmra.mxu0 %v2364_v30  ;;  %v3058_v15 = vld [vmem:[#allocation2 + $0xac] sm:$0xf0]  ;;  %v512_v19 = vor.u32 %v511_v8, %v508_v1  ;;  %v3047_v30 = vld [vmem:[%s3742_s1 + $0xd8] sm:$0xff]  ;;  %v227_v38 = vld [vmem:[%s3278_s20 + $0x20] sm:$0xff]  ;;  %242 = vst [vmem:[#allocation2] sm:$0xff] %v226_v36  ;;  %v254_v41 = vshrl.u32 %v226_v36, 16 }
  0x2d   : > { %1160 = vmatmul.bf16.vlgmr.msra.gmra.mxu1 %v2368_v34  ;;  %1511 = vmatpush.bf16.msrb.mxu0 %v3027_v45  ;;  %v504_v27 = vsel %vm3311_vm2, %v499_v14, %v503_v18  ;;  %v2380_v31 = vor.u32 %v3058_v15, %v2379_v11  ;;  %v2388_v34 = vor.u32 %v3059_v24, %v2387_v22  ;;  %v3046_v43 = vld [vmem:[%s3742_s1 + $0xd0] sm:$0xff]  ;;  %v257_v44 = vshll.u32 %v226_v36, 16  ;;  %v3037_v53 = vld [vmem:[%s3742_s1 + $0x88] sm:$0xff]  ;;  %v2395_v1 = vld [vmem:[#allocation2 + $0xc0] sm:$0xf] }
  0x2e   : > { %1189 = vmatmul.bf16.vlgmr.msra.gmra.mxu2 %v2372_v35  ;;  %1540 = vmatpush.bf16.msrb.mxu1 %v3035_v46  ;;  %v513_v28 = vrot.slane %v512_v19, 4  ;;  %533 = vst [vmem:[#allocation2 + $0xe8] sm:$0xff] %v504_v27  ;;  %v2392_v35 = vor.u32 %v3057_v23, %v2389_v25  ;;  %v268_v45 = vshrl.u32 %v227_v38, 16  ;;  %v271_v46 = vshll.u32 %v227_v38, 16  ;;  %v3022_v51 = vld [vmem:[%s3742_s1 + $0x10] sm:$0xff]  ;;  %v3045_v54 = vld [vmem:[%s3742_s1 + $0xc8] sm:$0xff] }
  0x2f   : > { %1569 = vmatpush.bf16.msrb.mxu2 %v3043_v20  ;;  %1218 = vmatmul.bf16.vlgmr.msra.gmra.mxu3 %v2376_v39  ;;  %v517_v20 = vrot.slane %v515_v10, 5  ;;  %v3023_v39 = vld [vmem:[%s3742_s1 + $0x18] sm:$0xff]  ;;  %243 = vst [vmem:[#allocation2 + $0x10] sm:$0xff] %v227_v38  ;;  %v256_v47 = vrot.slane %v254_v41, 4  ;;  %v3030_v52 = vld [vmem:[%s3742_s1 + $0x50] sm:$0xff]  ;;  %v3029_v60 = vld [vmem:[%s3742_s1 + $0x48] sm:$0xff] }
  0x30   : > { %1598 = vmatpush.bf16.msrb.mxu3 %v3051_v21  ;;  %v2381_v21 = vld [vmem:[#allocation2 + $0xb0] sm:$0xf0]  ;;  %553 = vst [vmem:[#allocation2 + $0x100] sm:$0xff] %v227_v38  ;;  %v273_v50 = vrot.slane %v271_v46, 5  ;;  %v234_v57 = vld [vmem:[%s3278_s20 + $0x8] sm:$0x11] }
  0x31   : > { %1512 = vmatpush.bf16.msrb.mxu0 %v3026_v58  ;;  %v2384_v32 = vor.u32 %v3056_v16, %v2381_v21  ;;  %v518_v33 = vsel %vm3311_vm2, %v513_v28, %v517_v20  ;;  %v235_v58 = vld [vmem:[%s3278_s20 + $0x28] sm:$0x11]  ;;  %v3060_v2 = vld [vmem:[#allocation2 + $0xc4] sm:$0xf]  ;;  %v3062_v5 = vld [vmem:[#allocation2 + $0xcc] sm:$0xf0] }
  0x32   : > { %1541 = vmatpush.bf16.msrb.mxu1 %v3034_v59  ;;  %534 = vst [vmem:[#allocation2 + $0xf8] sm:$0xff] %v518_v33  ;;  %v3021_v59 = vld [vmem:[%s3742_s1 + $0x8] sm:$0xff]  ;;  %v277_v0 = vshll.u32 %v235_v58, 16  ;;  %v3036_v3 = vld [vmem:[%s3742_s1 + $0x80] sm:$0xff]  ;;  %v3063_v10 = vld [vmem:[#allocation2 + $0xd4] sm:$0xf0] }
  0x33   : > { %1570 = vmatpush.bf16.msrb.mxu2 %v3042_v48  ;;  %v259_v48 = vrot.slane %v257_v44, 5  ;;  %v3044_v4 = vld [vmem:[%s3742_s1 + $0xc0] sm:$0xff]  ;;  %v2403_v9 = vld [vmem:[#allocation2 + $0xc8] sm:$0xf]  ;;  %v3061_v11 = vld [vmem:[#allocation2 + $0xcc] sm:$0xf] }
  0x34   : > { %1599 = vmatpush.bf16.msrb.mxu3 %v3050_v49  ;;  %v270_v49 = vrot.slane %v268_v45, 4  ;;  %v279_v8 = vrot.slane %v277_v0, 5  ;;  %v3028_v14 = vld [vmem:[%s3742_s1 + $0x40] sm:$0xff]  ;;  %v2404_v19 = vor.u32 %v3063_v10, %v2403_v9  ;;  %v3139_v28 = vld [vmem:[%s3742_s1 + $0x2b8] sm:$0xff]  ;;  %v3130_v41 = vld [vmem:[%s3742_s1 + $0x270] sm:$0xff] }
  0x35   : > { %1513 = vmatpush.bf16.msrb.mxu0 %v3025_v6  ;;  %v260_v55 = vor.u32 %v259_v48, %v256_v47  ;;  %v2397_v6 = vld [vmem:[#allocation2 + $0xd0] sm:$0xf0]  ;;  %v228_v21 = vld [vmem:[%s3278_s20 + $0x40] sm:$0xff]  ;;  %v3145_v9 = vld [vmem:[%s3742_s1 + $0x2e8] sm:$0xff] }
  0x36   : > { %1542 = vmatpush.bf16.msrb.mxu1 %v3033_v7  ;;  %v274_v56 = vor.u32 %v273_v50, %v270_v49  ;;  %v2400_v18 = vor.u32 %v3060_v2, %v2397_v6  ;;  %v229_v22 = vld [vmem:[%s3278_s20 + $0x60] sm:$0xff]  ;;  %244 = vst [vmem:[#allocation2 + $0x20] sm:$0xff] %v228_v21  ;;  %v282_v23 = vshrl.u32 %v228_v21, 16  ;;  %v285_v24 = vshll.u32 %v228_v21, 16  ;;  %v3066_v49 = vld [vmem:[#allocation2 + $0xec] sm:$0xf0] }
  0x37   : > { %1571 = vmatpush.bf16.msrb.mxu2 %v3041_v61  ;;  %v261_v61 = vrot.slane %v260_v55, 4  ;;  %245 = vst [vmem:[#allocation2 + $0x30] sm:$0xff] %v229_v22  ;;  %v296_v25 = vshrl.u32 %v229_v22, 16  ;;  %v2411_v48 = vld [vmem:[#allocation2 + $0xe0] sm:$0xf]  ;;  %v3121_v10 = vld [vmem:[%s3742_s1 + $0x228] sm:$0xff] }
  0x38   : > { %1600 = vmatpush.bf16.msrb.mxu3 %v3049_v62  ;;  %v263_v62 = vshll.u32 %v234_v57, 16  ;;  %v3469_v63 = vrot.slane %v274_v56, 4  ;;  %v284_v27 = vrot.slane %v282_v23, 4  ;;  %554 = vst [vmem:[#allocation2 + $0x110] sm:$0xff] %v228_v21  ;;  %v3065_v56 = vld [vmem:[#allocation2 + $0xec] sm:$0xf] }
  0x39   : > { %1514 = vmatpush.bf16.msrb.mxu0 %v3024_v17  ;;  %v2396_v17 = vor.u32 %v3062_v5, %v2395_v1  ;;  %555 = vst [vmem:[#allocation2 + $0x120] sm:$0xff] %v229_v22  ;;  %v3067_v55 = vld [vmem:[#allocation2 + $0xf4] sm:$0xf0]  ;;  %v2421_v57 = vld [vmem:[#allocation2 + $0xf8] sm:$0xf0]  ;;  %v230_v1 = vld [vmem:[%s3278_s20 + $0x80] sm:$0xff] }
  0x3a   : > { %1543 = vmatpush.bf16.msrb.mxu1 %v3032_v26  ;;  %v265_v7 = vrot.slane %v263_v62, 5  ;;  %v280_v16 = vsel %vm3311_vm2, %v3469_v63, %v279_v8  ;;  %v299_v26 = vshll.u32 %v229_v22, 16  ;;  %v2424_v0 = vor.u32 %v3065_v56, %v2421_v57  ;;  %v231_v2 = vld [vmem:[%s3278_s20 + $0xa0] sm:$0xff]  ;;  %246 = vst [vmem:[#allocation2 + $0x40] sm:$0xff] %v230_v1  ;;  %v3137_v8 = vld [vmem:[%s3742_s1 + $0x2a8] sm:$0xff] }
  0x3b   : > { %1572 = vmatpush.bf16.msrb.mxu2 %v3040_v12  ;;  %v2405_v12 = vld [vmem:[#allocation2 + $0xd8] sm:$0xf0]  ;;  %374 = vst [vmem:[#allocation2 + $0x18] sm:$0xff] %v280_v16  ;;  %v324_v5 = vshrl.u32 %v231_v2, 16  ;;  %v327_v6 = vshll.u32 %v231_v2, 16 }
  0x3c   : > { %1601 = vmatpush.bf16.msrb.mxu3 %v3048_v13  ;;  %1136 = vmatmul.bf16.gmra.mxu0 %v2380_v31  ;;  %v3020_v13 = vld [vmem:[%s3742_s1] sm:$0xff]  ;;  %v266_v15 = vsel %vm3311_vm2, %v261_v61, %v265_v7  ;;  %v2408_v20 = vor.u32 %v3061_v11, %v2405_v12  ;;  %v287_v31 = vrot.slane %v285_v24, 5  ;;  %v301_v33 = vrot.slane %v299_v26, 5  ;;  %247 = vst [vmem:[#allocation2 + $0x50] sm:$0xff] %v231_v2  ;;  %v238_v21 = vld [vmem:[%s3278_s20 + $0x88] sm:$0x11] }
  0x3d   : > { %1165 = vmatmul.bf16.gmra.mxu1 %v2384_v32  ;;  %1515 = vmatpush.bf16.msrb.mxu0 %v3023_v39  ;;  %373 = vst [vmem:[#allocation2 + $0x8] sm:$0xff] %v266_v15  ;;  %v298_v32 = vrot.slane %v296_v25, 4  ;;  %v3146_v39 = vld [vmem:[%s3742_s1 + $0x2f0] sm:$0xff]  ;;  %v326_v12 = vrot.slane %v324_v5, 4  ;;  %v3136_v15 = vld [vmem:[%s3742_s1 + $0x2a0] sm:$0xff]  ;;  %v319_v24 = vshll.u32 %v238_v21, 16 }
  0x3e   : > { %1194 = vmatmul.bf16.gmra.mxu2 %v2388_v34  ;;  %1544 = vmatpush.bf16.msrb.mxu1 %v3031_v40  ;;  %v3131_v34 = vld [vmem:[%s3742_s1 + $0x278] sm:$0xff]  ;;  %v288_v36 = vor.u32 %v287_v31, %v284_v27  ;;  %v3122_v40 = vld [vmem:[%s3742_s1 + $0x230] sm:$0xff]  ;;  %556 = vst [vmem:[#allocation2 + $0x130] sm:$0xff] %v230_v1  ;;  %v239_v22 = vld [vmem:[%s3278_s20 + $0xa8] sm:$0x11] }
  0x3f   : > { %1573 = vmatpush.bf16.msrb.mxu2 %v3039_v29  ;;  %1223 = vmatmul.bf16.gmra.mxu3 %v2392_v35  ;;  %v3147_v29 = vld [vmem:[%s3742_s1 + $0x2f8] sm:$0xff]  ;;  %v3138_v35 = vld [vmem:[%s3742_s1 + $0x2b0] sm:$0xff]  ;;  %v302_v38 = vor.u32 %v301_v33, %v298_v32  ;;  %557 = vst [vmem:[#allocation2 + $0x140] sm:$0xff] %v231_v2  ;;  %v333_v26 = vshll.u32 %v239_v22, 16  ;;  %v2555_v27 = vld [vmem:[#allocation2] sm:$0xf] }
  0x40   : > { %1602 = vmatpush.bf16.msrb.mxu3 %v3047_v30  ;;  %v3123_v30 = vld [vmem:[%s3742_s1 + $0x238] sm:$0xff]  ;;  %v3516_v44 = vrot.slane %v288_v36, 4  ;;  %v3004_v31 = vld [vmem:[#allocation2 + $0x4] sm:$0xf]  ;;  %v2557_v32 = vld [vmem:[#allocation2 + $0x10] sm:$0xf0] }
  0x41   : > { %1516 = vmatpush.bf16.msrb.mxu0 %v3022_v51  ;;  %v3518_v46 = vrot.slane %v302_v38, 4  ;;  %v3126_v2 = vld [vmem:[%s3742_s1 + $0x250] sm:$0xff] }
  0x42   : > { %1545 = vmatpush.bf16.msrb.mxu1 %v3030_v52  ;;  %v3064_v52 = vld [vmem:[#allocation2 + $0xe4] sm:$0xf]  ;;  %v2565_v36 = vld [vmem:[#allocation2 + $0x18] sm:$0xf0] }
  0x43   : > { %1574 = vmatpush.bf16.msrb.mxu2 %v3038_v42  ;;  %v236_v42 = vld [vmem:[%s3278_s20 + $0x48] sm:$0x11] }
  0x44   : > { %1603 = vmatpush.bf16.msrb.mxu3 %v3046_v43  ;;  %v237_v43 = vld [vmem:[%s3278_s20 + $0x68] sm:$0x11]  ;;  %v291_v45 = vshll.u32 %v236_v42, 16 }
  0x45   : > { %1517 = vmatpush.bf16.msrb.mxu0 %v3021_v59  ;;  %v305_v47 = vshll.u32 %v237_v43, 16  ;;  %v2563_v33 = vld [vmem:[#allocation2 + $0x8] sm:$0xf] }
  0x46   : > { %1546 = vmatpush.bf16.msrb.mxu1 %v3029_v60  ;;  %v293_v50 = vrot.slane %v291_v45, 5  ;;  %v2412_v60 = vor.u32 %v3066_v49, %v2411_v48  ;;  %v232_v45 = vld [vmem:[%s3278_s20 + $0xc0] sm:$0xff] }
  0x47   : > { %1575 = vmatpush.bf16.msrb.mxu2 %v3037_v53  ;;  %v307_v51 = vrot.slane %v305_v47, 5  ;;  %v2413_v53 = vld [vmem:[#allocation2 + $0xf0] sm:$0xf0]  ;;  %v233_v47 = vld [vmem:[%s3278_s20 + $0xe0] sm:$0xff]  ;;  %248 = vst [vmem:[#allocation2 + $0x60] sm:$0xff] %v232_v45  ;;  %v338_v48 = vshrl.u32 %v232_v45, 16 }
  0x48   : > { %1604 = vmatpush.bf16.msrb.mxu3 %v3045_v54  ;;  %v2419_v54 = vld [vmem:[#allocation2 + $0xe8] sm:$0xf]  ;;  %v294_v58 = vsel %vm3311_vm2, %v3516_v44, %v293_v50  ;;  %v2416_v61 = vor.u32 %v3064_v52, %v2413_v53  ;;  %249 = vst [vmem:[#allocation2 + $0x70] sm:$0xff] %v233_v47  ;;  %v341_v49 = vshll.u32 %v232_v45, 16  ;;  %v352_v50 = vshrl.u32 %v233_v47, 16  ;;  %v3135_v53 = vld [vmem:[%s3742_s1 + $0x298] sm:$0xff] }
  0x49   : > { %1518 = vmatpush.bf16.msrb.mxu0 %v3020_v13  ;;  %v308_v59 = vsel %vm3311_vm2, %v3518_v46, %v307_v51  ;;  %375 = vst [vmem:[#allocation2 + $0x28] sm:$0xff] %v294_v58  ;;  %v2420_v62 = vor.u32 %v3067_v55, %v2419_v54  ;;  %v329_v13 = vrot.slane %v327_v6, 5  ;;  %v355_v51 = vshll.u32 %v233_v47, 16  ;;  %v3143_v54 = vld [vmem:[%s3742_s1 + $0x2d8] sm:$0xff] }
  0x4a   : > { %1547 = vmatpush.bf16.msrb.mxu1 %v3028_v14  ;;  %376 = vst [vmem:[#allocation2 + $0x38] sm:$0xff] %v308_v59  ;;  %v3129_v14 = vld [vmem:[%s3742_s1 + $0x268] sm:$0xff]  ;;  %v340_v52 = vrot.slane %v338_v48, 4  ;;  %v3119_v55 = vld [vmem:[%s3742_s1 + $0x218] sm:$0xff]  ;;  %v343_v56 = vrot.slane %v341_v49, 5  ;;  %v354_v57 = vrot.slane %v352_v50, 4 }
  0x4b   : > { %1576 = vmatpush.bf16.msrb.mxu2 %v3036_v3  ;;  %v310_v3 = vshrl.u32 %v230_v1, 16  ;;  %558 = vst [vmem:[#allocation2 + $0x150] sm:$0xff] %v232_v45  ;;  %v357_v58 = vrot.slane %v355_v51, 5  ;;  %v3127_v59 = vld [vmem:[%s3742_s1 + $0x258] sm:$0xff]  ;;  %v3012_v45 = vld [vmem:[#allocation2 + $0x44] sm:$0xf] }
  0x4c   : > { %1605 = vmatpush.bf16.msrb.mxu3 %v3044_v4  ;;  %1141 = vmatmul.bf16.gmra.mxu0 %v2396_v17  ;;  %v313_v4 = vshll.u32 %v230_v1, 16  ;;  %v330_v17 = vor.u32 %v329_v13, %v326_v12  ;;  %559 = vst [vmem:[#allocation2 + $0x160] sm:$0xff] %v233_v47  ;;  %v3118_v1 = vld [vmem:[%s3742_s1 + $0x210] sm:$0xff]  ;;  %v3008_v13 = vld [vmem:[#allocation2 + $0x24] sm:$0xf] }
  0x4d   : > { %1170 = vmatmul.bf16.gmra.mxu1 %v2400_v18  ;;  %1981 = vmatpush.bf16.msra.mxu0 %v3123_v30  ;;  %v312_v7 = vrot.slane %v310_v3, 4  ;;  %v3144_v18 = vld [vmem:[%s3742_s1 + $0x2e0] sm:$0xff]  ;;  %v335_v30 = vrot.slane %v333_v26, 5  ;;  %v240_v3 = vld [vmem:[%s3278_s20 + $0xc8] sm:$0x11] }
  0x4e   : > { %1199 = vmatmul.bf16.gmra.mxu2 %v2404_v19  ;;  %2010 = vmatpush.bf16.msra.mxu1 %v3131_v34  ;;  %v315_v11 = vrot.slane %v313_v4, 5  ;;  %v3120_v19 = vld [vmem:[%s3742_s1 + $0x220] sm:$0xff]  ;;  %v3556_v25 = vrot.slane %v330_v17, 4  ;;  %v3007_v34 = vld [vmem:[#allocation2 + $0x14] sm:$0xf0]  ;;  %v347_v6 = vshll.u32 %v240_v3, 16 }
  0x4f   : > { %1228 = vmatmul.bf16.gmra.mxu3 %v2408_v20  ;;  %2039 = vmatpush.bf16.msra.mxu2 %v3139_v28  ;;  %v3128_v20 = vld [vmem:[%s3742_s1 + $0x260] sm:$0xff]  ;;  %v3006_v28 = vld [vmem:[#allocation2 + $0xc] sm:$0xf0]  ;;  %v2564_v42 = vor.u32 %v3007_v34, %v2563_v33  ;;  %v241_v4 = vld [vmem:[%s3278_s20 + $0xe8] sm:$0x11] }
  0x50   : > { %2068 = vmatpush.bf16.msra.mxu3 %v3147_v29  ;;  %v316_v16 = vor.u32 %v315_v11, %v312_v7  ;;  %v321_v29 = vrot.slane %v319_v24, 5  ;;  %v349_v11 = vrot.slane %v347_v6, 5  ;;  %v3009_v17 = vld [vmem:[#allocation2 + $0x2c] sm:$0xf]  ;;  %v3116_v33 = vld [vmem:[%s3742_s1 + $0x200] sm:$0xff] }
  0x51   : > { %1982 = vmatpush.bf16.msra.mxu0 %v3122_v40  ;;  %v2556_v40 = vor.u32 %v3006_v28, %v2555_v27  ;;  %v3133_v27 = vld [vmem:[%s3742_s1 + $0x288] sm:$0xff]  ;;  %v3124_v34 = vld [vmem:[%s3742_s1 + $0x240] sm:$0xff]  ;;  %v2589_v47 = vld [vmem:[#allocation2 + $0x50] sm:$0xf0] }
  0x52   : > { %2011 = vmatpush.bf16.msra.mxu1 %v3130_v41  ;;  %v3554_v23 = vrot.slane %v316_v16, 4  ;;  %v2560_v41 = vor.u32 %v3004_v31, %v2557_v32  ;;  %v3011_v16 = vld [vmem:[#allocation2 + $0x34] sm:$0xf0]  ;;  %v3141_v28 = vld [vmem:[%s3742_s1 + $0x2c8] sm:$0xff]  ;;  %v3132_v31 = vld [vmem:[%s3742_s1 + $0x280] sm:$0xff] }
  0x53   : > { %2040 = vmatpush.bf16.msra.mxu2 %v3138_v35  ;;  %v3005_v35 = vld [vmem:[#allocation2 + $0xc] sm:$0xf]  ;;  %v3140_v32 = vld [vmem:[%s3742_s1 + $0x2c0] sm:$0xff] }
  0x54   : > { %2069 = vmatpush.bf16.msra.mxu3 %v3146_v39  ;;  %v322_v38 = vsel %vm3311_vm2, %v3554_v23, %v321_v29  ;;  %v336_v39 = vsel %vm3311_vm2, %v3556_v25, %v335_v30  ;;  %v2568_v43 = vor.u32 %v3005_v35, %v2565_v36  ;;  %v3117_v29 = vld [vmem:[%s3742_s1 + $0x208] sm:$0xff]  ;;  %v3016_v3 = vld [vmem:[#allocation2 + $0x64] sm:$0xf] }
  0x55   : > { %1983 = vmatpush.bf16.msra.mxu0 %v3121_v10  ;;  %377 = vst [vmem:[#allocation2 + $0x48] sm:$0xff] %v322_v38  ;;  %v3010_v10 = vld [vmem:[#allocation2 + $0x2c] sm:$0xf0]  ;;  %v3125_v30 = vld [vmem:[%s3742_s1 + $0x248] sm:$0xff] }
  0x56   : > { %2012 = vmatpush.bf16.msra.mxu1 %v3129_v14  ;;  %378 = vst [vmem:[#allocation2 + $0x58] sm:$0xff] %v336_v39  ;;  %v2573_v14 = vld [vmem:[#allocation2 + $0x30] sm:$0xf0]  ;;  %v2289_v35 = vld [vmem:[%s3278_s20 + $0x28] sm:$0x11] }
  0x57   : > { %2041 = vmatpush.bf16.msra.mxu2 %v3137_v8  ;;  %v361_v8 = vshll.u32 %v241_v4, 16  ;;  %v2576_v22 = vor.u32 %v3008_v13, %v2573_v14  ;;  %v2290_v36 = vld [vmem:[%s3278_s20 + $0x48] sm:$0x11]  ;;  %v571_v38 = vshll.u32 %v2289_v35, 16  ;;  %v2605_v4 = vld [vmem:[#allocation2 + $0x70] sm:$0xf0] }
  0x58   : > { %2070 = vmatpush.bf16.msra.mxu3 %v3145_v9  ;;  %v2571_v9 = vld [vmem:[#allocation2 + $0x20] sm:$0xf]  ;;  %v585_v39 = vshll.u32 %v2290_v36, 16  ;;  %v2294_v14 = vld [vmem:[%s3278_s20 + $0xc8] sm:$0x11] }
  0x59   : > { %1984 = vmatpush.bf16.msra.mxu0 %v3120_v19  ;;  %v363_v12 = vrot.slane %v361_v8, 5  ;;  %v2572_v21 = vor.u32 %v3010_v10, %v2571_v9 }
  0x5a   : > { %2013 = vmatpush.bf16.msra.mxu1 %v3128_v20 }
  0x5b   : > { %2042 = vmatpush.bf16.msra.mxu2 %v3136_v15  ;;  %v2579_v15 = vld [vmem:[#allocation2 + $0x28] sm:$0xf] }
  0x5c   : > { %1146 = vmatmul.bf16.gmra.mxu0 %v2412_v60  ;;  %2071 = vmatpush.bf16.msra.mxu3 %v3144_v18  ;;  %v3134_v60 = vld [vmem:[%s3742_s1 + $0x290] sm:$0xff]  ;;  %v2581_v18 = vld [vmem:[#allocation2 + $0x38] sm:$0xf0]  ;;  %v2580_v24 = vor.u32 %v3011_v16, %v2579_v15  ;;  %v2595_v48 = vld [vmem:[#allocation2 + $0x48] sm:$0xf]  ;;  %v641_v16 = vshll.u32 %v2294_v14, 16 }
  0x5d   : > { %1175 = vmatmul.bf16.gmra.mxu1 %v2416_v61  ;;  %v344_v61 = vor.u32 %v343_v56, %v340_v52  ;;  %1985 = vmatpush.bf16.msra.mxu0 %v3119_v55  ;;  %v2584_v26 = vor.u32 %v3009_v17, %v2581_v18  ;;  %v3015_v49 = vld [vmem:[#allocation2 + $0x54] sm:$0xf0]  ;;  %v3013_v50 = vld [vmem:[#allocation2 + $0x4c] sm:$0xf]  ;;  %v2597_v51 = vld [vmem:[#allocation2 + $0x58] sm:$0xf0]  ;;  %v2592_v55 = vor.u32 %v3012_v45, %v2589_v47 }
  0x5e   : > { %1204 = vmatmul.bf16.gmra.mxu2 %v2420_v62  ;;  %v358_v62 = vor.u32 %v357_v58, %v354_v57  ;;  %2014 = vmatpush.bf16.msra.mxu1 %v3127_v59  ;;  %v2596_v56 = vor.u32 %v3015_v49, %v2595_v48  ;;  %v2600_v57 = vor.u32 %v3013_v50, %v2597_v51  ;;  %v2291_v58 = vld [vmem:[%s3278_s20 + $0x68] sm:$0x11]  ;;  %v643_v18 = vrot.slane %v641_v16, 5 }
  0x5f   : > { %1233 = vmatmul.bf16.gmra.mxu3 %v2424_v0  ;;  %2043 = vmatpush.bf16.msra.mxu2 %v3135_v53  ;;  %v3142_v0 = vld [vmem:[%s3742_s1 + $0x2d0] sm:$0xff]  ;;  %v3592_v5 = vrot.slane %v344_v61, 4  ;;  %v2292_v59 = vld [vmem:[%s3278_s20 + $0x88] sm:$0x11] }
  0x60   : > { %2072 = vmatpush.bf16.msra.mxu3 %v3143_v54  ;;  %v3594_v7 = vrot.slane %v358_v62, 4  ;;  %v613_v61 = vshll.u32 %v2292_v59, 16 }
  0x61   : > { %1986 = vmatpush.bf16.msra.mxu0 %v3118_v1  ;;  %v350_v19 = vsel %vm3311_vm2, %v3592_v5, %v349_v11  ;;  %v2603_v1 = vld [vmem:[#allocation2 + $0x60] sm:$0xf] }
  0x62   : > { %2015 = vmatpush.bf16.msra.mxu1 %v3126_v2  ;;  %v364_v20 = vsel %vm3311_vm2, %v3594_v7, %v363_v12  ;;  %379 = vst [vmem:[#allocation2 + $0x68] sm:$0xff] %v350_v19  ;;  %v3018_v2 = vld [vmem:[#allocation2 + $0x6c] sm:$0xf0]  ;;  %v2608_v12 = vor.u32 %v3016_v3, %v2605_v4 }
  0x63   : > { %2044 = vmatpush.bf16.msra.mxu2 %v3134_v60  ;;  %380 = vst [vmem:[#allocation2 + $0x78] sm:$0xff] %v364_v20  ;;  %v599_v60 = vshll.u32 %v2291_v58, 16  ;;  %v2604_v11 = vor.u32 %v3018_v2, %v2603_v1  ;;  %v644_v20 = vsel %vm3311_vm2, %v3592_v5, %v643_v18  ;;  %v2288_v5 = vld [vmem:[%s3278_s20 + $0x100] sm:$0xff] }
  0x64   : > { %2073 = vmatpush.bf16.msra.mxu3 %v3142_v0  ;;  %686 = vst [vmem:[#allocation2 + $0x158] sm:$0xff] %v644_v20  ;;  %v2843_v20 = vld [vmem:[#allocation2 + $0x140] sm:$0xf] }
  0x65   : > { %1987 = vmatpush.bf16.msra.mxu0 %v3117_v29  ;;  %v601_v62 = vrot.slane %v599_v60, 5  ;;  %560 = vst [vmem:[#allocation2 + $0x170] sm:$0xff] %v2288_v5  ;;  %v2827_v60 = vld [vmem:[#allocation2 + $0x120] sm:$0xf] }
  0x66   : > { %2016 = vmatpush.bf16.msra.mxu1 %v3125_v30 }
  0x67   : > { %2045 = vmatpush.bf16.msra.mxu2 %v3133_v27 }
  0x68   : > { %2074 = vmatpush.bf16.msra.mxu3 %v3141_v28 }
  0x69   : > { %1988 = vmatpush.bf16.msra.mxu0 %v3116_v33  ;;  %v2611_v6 = vld [vmem:[#allocation2 + $0x68] sm:$0xf]  ;;  %v3017_v9 = vld [vmem:[#allocation2 + $0x6c] sm:$0xf] }
  0x6a   : > { %2017 = vmatpush.bf16.msra.mxu1 %v3124_v34  ;;  %v3019_v8 = vld [vmem:[#allocation2 + $0x74] sm:$0xf0]  ;;  %v2613_v10 = vld [vmem:[#allocation2 + $0x78] sm:$0xf0] }
  0x6b   : > { %2046 = vmatpush.bf16.msra.mxu2 %v3132_v31  ;;  %v2612_v13 = vor.u32 %v3019_v8, %v2611_v6 }
  0x6c   : > { %1519 = vmatmul.bf16.vlgmr.msrb.gmra.mxu0 %v2556_v40  ;;  %2075 = vmatpush.bf16.msra.mxu3 %v3140_v32  ;;  %v2587_v40 = vld [vmem:[#allocation2 + $0x40] sm:$0xf] }
  0x6d   : > { %1548 = vmatmul.bf16.vlgmr.msrb.gmra.mxu1 %v2560_v41  ;;  %v3014_v41 = vld [vmem:[#allocation2 + $0x4c] sm:$0xf0] }
  0x6e   : > { %1577 = vmatmul.bf16.vlgmr.msrb.gmra.mxu2 %v2564_v42  ;;  %v573_v42 = vrot.slane %v571_v38, 5  ;;  %v2588_v54 = vor.u32 %v3014_v41, %v2587_v40  ;;  %v660_v38 = vshrl.u32 %v2288_v5, 16  ;;  %v2295_v40 = vld [vmem:[%s3278_s20 + $0xe8] sm:$0x11] }
  0x6f   : > { %1606 = vmatmul.bf16.vlgmr.msrb.gmra.mxu3 %v2568_v43  ;;  %v587_v43 = vrot.slane %v585_v39, 5  ;;  %v663_v39 = vshll.u32 %v2288_v5, 16  ;;  %v2296_v41 = vld [vmem:[%s3278_s20 + $0x108] sm:$0x11] }
  0x70   : > { %v574_v52 = vsel %vm3311_vm2, %v3469_v63, %v573_v42  ;;  %v615_v63 = vrot.slane %v613_v61, 5  ;;  %v662_v42 = vrot.slane %v660_v38, 4  ;;  %v669_v45 = vshll.u32 %v2296_v41, 16  ;;  %v3106_v61 = vld [vmem:[#allocation2 + $0x12c] sm:$0xf0] }
  0x71   : > { %v588_v53 = vsel %vm3311_vm2, %v3516_v44, %v587_v43  ;;  %681 = vst [vmem:[#allocation2 + $0x108] sm:$0xff] %v574_v52  ;;  %v602_v44 = vsel %vm3311_vm2, %v3518_v46, %v601_v62  ;;  %v2616_v46 = vor.u32 %v3017_v9, %v2613_v10  ;;  %v655_v43 = vshll.u32 %v2295_v40, 16  ;;  %v3104_v62 = vld [vmem:[#allocation2 + $0x124] sm:$0xf] }
  0x72   : > { %682 = vst [vmem:[#allocation2 + $0x118] sm:$0xff] %v588_v53  ;;  %v616_v0 = vsel %vm3311_vm2, %v3554_v23, %v615_v63  ;;  %v2293_v23 = vld [vmem:[%s3278_s20 + $0xa8] sm:$0x11]  ;;  %v665_v47 = vrot.slane %v663_v39, 5  ;;  %v2829_v63 = vld [vmem:[#allocation2 + $0x130] sm:$0xf0]  ;;  %v2828_v8 = vor.u32 %v3106_v61, %v2827_v60 }
  0x73   : > { %683 = vst [vmem:[#allocation2 + $0x128] sm:$0xff] %v602_v44  ;;  %v627_v15 = vshll.u32 %v2293_v23, 16  ;;  %v657_v50 = vrot.slane %v655_v43, 5 }
  0x74   : > { %684 = vst [vmem:[#allocation2 + $0x138] sm:$0xff] %v616_v0 }
  0x75   : > { %v629_v17 = vrot.slane %v627_v15, 5 }
  0x77   : > { %v630_v19 = vsel %vm3311_vm2, %v3556_v25, %v629_v17 }
  0x78   : > { %685 = vst [vmem:[#allocation2 + $0x148] sm:$0xff] %v630_v19  ;;  %v2819_v27 = vld [vmem:[#allocation2 + $0x108] sm:$0xf]  ;;  %v3101_v29 = vld [vmem:[#allocation2 + $0x10c] sm:$0xf] }
  0x79   : > { %v3103_v28 = vld [vmem:[#allocation2 + $0x114] sm:$0xf0]  ;;  %v2821_v30 = vld [vmem:[#allocation2 + $0x118] sm:$0xf0] }
  0x7a   : > { %v2820_v34 = vor.u32 %v3103_v28, %v2819_v27  ;;  %v2824_v35 = vor.u32 %v3101_v29, %v2821_v30  ;;  %v2835_v44 = vld [vmem:[#allocation2 + $0x128] sm:$0xf]  ;;  %v3105_v2 = vld [vmem:[#allocation2 + $0x12c] sm:$0xf]  ;;  %v3111_v27 = vld [vmem:[#allocation2 + $0x154] sm:$0xf0] }
  0x7b   : > { %v3107_v0 = vld [vmem:[#allocation2 + $0x134] sm:$0xf0]  ;;  %v2837_v3 = vld [vmem:[#allocation2 + $0x138] sm:$0xf0] }
  0x7c   : > { %1524 = vmatmul.bf16.gmra.mxu0 %v2572_v21  ;;  %v2811_v21 = vld [vmem:[#allocation2 + $0x100] sm:$0xf]  ;;  %v2853_v29 = vld [vmem:[#allocation2 + $0x158] sm:$0xf0] }
  0x7d   : > { %1553 = vmatmul.bf16.gmra.mxu1 %v2576_v22  ;;  %v3102_v22 = vld [vmem:[#allocation2 + $0x10c] sm:$0xf0] }
  0x7e   : > { %1582 = vmatmul.bf16.gmra.mxu2 %v2580_v24  ;;  %v3100_v24 = vld [vmem:[#allocation2 + $0x104] sm:$0xf]  ;;  %v2812_v31 = vor.u32 %v3102_v22, %v2811_v21  ;;  %v3110_v21 = vld [vmem:[#allocation2 + $0x14c] sm:$0xf0] }
  0x7f   : > { %1611 = vmatmul.bf16.gmra.mxu3 %v2584_v26  ;;  %v2813_v26 = vld [vmem:[#allocation2 + $0x110] sm:$0xf0]  ;;  %v3108_v22 = vld [vmem:[#allocation2 + $0x144] sm:$0xf]  ;;  %v3109_v28 = vld [vmem:[#allocation2 + $0x14c] sm:$0xf] }
  0x80   : > { %v2816_v32 = vor.u32 %v3100_v24, %v2813_v26  ;;  %v2845_v24 = vld [vmem:[#allocation2 + $0x150] sm:$0xf0]  ;;  %v2851_v26 = vld [vmem:[#allocation2 + $0x148] sm:$0xf] }
  0x81   : > { %v2852_v5 = vor.u32 %v3111_v27, %v2851_v26 }
  0x8c   : > { %1529 = vmatmul.bf16.gmra.mxu0 %v2588_v54  ;;  %v666_v54 = vor.u32 %v665_v47, %v662_v42 }
  0x8d   : > { %1558 = vmatmul.bf16.gmra.mxu1 %v2592_v55  ;;  %v671_v55 = vrot.slane %v669_v45, 5 }
  0x8e   : > { %1587 = vmatmul.bf16.gmra.mxu2 %v2596_v56  ;;  %v667_v59 = vrot.slane %v666_v54, 4 }
  0x8f   : > { %1616 = vmatmul.bf16.gmra.mxu3 %v2600_v57  ;;  %v658_v57 = vsel %vm3311_vm2, %v3594_v7, %v657_v50  ;;  %v2832_v7 = vor.u32 %v3104_v62, %v2829_v63  ;;  %v3114_v50 = vld [vmem:[#allocation2 + $0x16c] sm:$0xf0] }
  0x90   : > { %687 = vst [vmem:[#allocation2 + $0x168] sm:$0xff] %v658_v57  ;;  %v672_v1 = vsel %vm3311_vm2, %v667_v59, %v671_v55 }
  0x91   : > { %688 = vst [vmem:[#allocation2 + $0x178] sm:$0xff] %v672_v1 }
  0x97   : > { %v3113_v55 = vld [vmem:[#allocation2 + $0x16c] sm:$0xf] }
  0x98   : > { %v3115_v54 = vld [vmem:[#allocation2 + $0x174] sm:$0xf0] }
  0x9c   : > { %1534 = vmatmul.bf16.gmra.mxu0 %v2604_v11 }
  0x9d   : > { %1563 = vmatmul.bf16.gmra.mxu1 %v2608_v12  ;;  %v2836_v12 = vor.u32 %v3107_v0, %v2835_v44 }
  0x9e   : > { %1592 = vmatmul.bf16.gmra.mxu2 %v2612_v13  ;;  %v2840_v13 = vor.u32 %v3105_v2, %v2837_v3 }
  0x9f   : > { %1621 = vmatmul.bf16.gmra.mxu3 %v2616_v46 }
  0xa9   : > { %v1132_v25 = vpop.f32.mrf.mxu0 }
  0xaa   : > { %v1161_v33 = vpop.f32.mrf.mxu1 }
  0xab   : > { %v1162_v36 = vadd.f32 %v1161_v33, %v1132_v25  ;;  %v2848_v25 = vor.u32 %v3108_v22, %v2845_v24 }
  0xac   : > { %1989 = vmatmul.bf16.vlgmr.msra.gmra.mxu0 %v2812_v31 }
  0xad   : > { %2018 = vmatmul.bf16.vlgmr.msra.gmra.mxu1 %v2816_v32  ;;  %v2844_v32 = vor.u32 %v3110_v21, %v2843_v20 }
  0xae   : > { %2047 = vmatmul.bf16.vlgmr.msra.gmra.mxu2 %v2820_v34 }
  0xaf   : > { %2076 = vmatmul.bf16.vlgmr.msra.gmra.mxu3 %v2824_v35 }
  0xb1   : > { %v1190_v48 = vpop.f32.mrf.mxu2  ;;  %v1134_v52 = vpop.f32.mrf.mxu0 }
  0xb2   : > { %v1219_v49 = vpop.f32.mrf.mxu3  ;;  %v1191_v51 = vadd.f32 %v1190_v48, %v1162_v36  ;;  %v1163_v53 = vpop.f32.mrf.mxu1  ;;  %v2856_v36 = vor.u32 %v3109_v28, %v2853_v29 }
  0xb3   : > { %v1164_v56 = vadd.f32 %v1163_v53, %v1134_v52  ;;  %v2861_v52 = vld [vmem:[#allocation2 + $0x170] sm:$0xf0]  ;;  %v2867_v53 = vld [vmem:[#allocation2 + $0x168] sm:$0xf] }
  0xb4   : > { %v3656_v58 = vadd.f32 %v1219_v49, %v1191_v51  ;;  %v2859_v49 = vld [vmem:[#allocation2 + $0x160] sm:$0xf]  ;;  %v3112_v51 = vld [vmem:[#allocation2 + $0x164] sm:$0xf]  ;;  %v2868_v0 = vor.u32 %v3115_v54, %v2867_v53 }
  0xb5   : > { %v2860_v60 = vor.u32 %v3114_v50, %v2859_v49  ;;  %v2864_v61 = vor.u32 %v3112_v51, %v2861_v52 }
  0xb9   : > { %v1192_v4 = vpop.f32.mrf.mxu2  ;;  %v1137_v10 = vpop.f32.mrf.mxu0 }
  0xba   : > { %v1221_v6 = vpop.f32.mrf.mxu3  ;;  %v1193_v9 = vadd.f32 %v1192_v4, %v1164_v56  ;;  %v1166_v11 = vpop.f32.mrf.mxu1  ;;  %v2869_v56 = vld [vmem:[#allocation2 + $0x178] sm:$0xf0] }
  0xbb   : > { %v1167_v46 = vadd.f32 %v1166_v11, %v1137_v10  ;;  %v2872_v1 = vor.u32 %v3113_v55, %v2869_v56 }
  0xbc   : > { %v3660_v23 = vadd.f32 %v1221_v6, %v1193_v9  ;;  %1994 = vmatmul.bf16.gmra.mxu0 %v2828_v8 }
  0xbd   : > { %2023 = vmatmul.bf16.gmra.mxu1 %v2832_v7 }
  0xbe   : > { %2052 = vmatmul.bf16.gmra.mxu2 %v2836_v12 }
  0xbf   : > { %2081 = vmatmul.bf16.gmra.mxu3 %v2840_v13 }
  0xc1   : > { %v1195_v37 = vpop.f32.mrf.mxu2  ;;  %v1139_v16 = vpop.f32.mrf.mxu0 }
  0xc2   : > { %v1224_v14 = vpop.f32.mrf.mxu3  ;;  %v1196_v15 = vadd.f32 %v1195_v37, %v1167_v46  ;;  %v1168_v17 = vpop.f32.mrf.mxu1 }
  0xc3   : > { %v1169_v18 = vadd.f32 %v1168_v17, %v1139_v16 }
  0xc4   : > { %v3662_v19 = vadd.f32 %v1224_v14, %v1196_v15 }
  0xc9   : > { %v1197_v30 = vpop.f32.mrf.mxu2  ;;  %v1142_v34 = vpop.f32.mrf.mxu0 }
  0xca   : > { %v1226_v31 = vpop.f32.mrf.mxu3  ;;  %v1198_v33 = vadd.f32 %v1197_v30, %v1169_v18  ;;  %v1171_v35 = vpop.f32.mrf.mxu1 }
  0xcb   : > { %v1172_v38 = vadd.f32 %v1171_v35, %v1142_v34 }
  0xcc   : > { %v3664_v39 = vadd.f32 %v1226_v31, %v1198_v33  ;;  %1999 = vmatmul.bf16.gmra.mxu0 %v2844_v32 }
  0xcd   : > { %2028 = vmatmul.bf16.gmra.mxu1 %v2848_v25 }
  0xce   : > { %2057 = vmatmul.bf16.gmra.mxu2 %v2852_v5 }
  0xcf   : > { %2086 = vmatmul.bf16.gmra.mxu3 %v2856_v36 }
  0xd1   : > { %v1200_v40 = vpop.f32.mrf.mxu2  ;;  %v1144_v43 = vpop.f32.mrf.mxu0 }
  0xd2   : > { %v1229_v41 = vpop.f32.mrf.mxu3  ;;  %v1201_v42 = vadd.f32 %v1200_v40, %v1172_v38  ;;  %v1173_v45 = vpop.f32.mrf.mxu1 }
  0xd3   : > { %v1174_v47 = vadd.f32 %v1173_v45, %v1144_v43 }
  0xd4   : > { %v3666_v48 = vadd.f32 %v1229_v41, %v1201_v42 }
  0xd9   : > { %v1202_v57 = vpop.f32.mrf.mxu2  ;;  %v1147_v63 = vpop.f32.mrf.mxu0 }
  0xda   : > { %v1231_v59 = vpop.f32.mrf.mxu3  ;;  %v1203_v62 = vadd.f32 %v1202_v57, %v1174_v47  ;;  %v1176_v44 = vpop.f32.mrf.mxu1 }
  0xdb   : > { %v1177_v2 = vadd.f32 %v1176_v44, %v1147_v63 }
  0xdc   : > { %v1232_v3 = vadd.f32 %v1231_v59, %v1203_v62  ;;  %2004 = vmatmul.bf16.gmra.mxu0 %v2860_v60 }
  0xdd   : > { %2033 = vmatmul.bf16.gmra.mxu1 %v2864_v61 }
  0xde   : > { %2062 = vmatmul.bf16.gmra.mxu2 %v2868_v0 }
  0xdf   : > { %2091 = vmatmul.bf16.gmra.mxu3 %v2872_v1 }
  0xe1   : > { %v1205_v4 = vpop.f32.mrf.mxu2  ;;  %v1149_v7 = vpop.f32.mrf.mxu0 }
  0xe2   : > { %v1234_v6 = vpop.f32.mrf.mxu3  ;;  %v1206_v8 = vadd.f32 %v1205_v4, %v1177_v2  ;;  %v1178_v9 = vpop.f32.mrf.mxu1 }
  0xe3   : > { %v1179_v10 = vadd.f32 %v1178_v9, %v1149_v7 }
  0xe4   : > { %v1235_v11 = vadd.f32 %v1234_v6, %v1206_v8 }
  0xe9   : > { %v1207_v12 = vpop.f32.mrf.mxu2  ;;  %v1520_v37 = vpop.f32.mrf.mxu0 }
  0xea   : > { %v1236_v13 = vpop.f32.mrf.mxu3  ;;  %v1208_v46 = vadd.f32 %v1207_v12, %v1179_v10  ;;  %v1549_v14 = vpop.f32.mrf.mxu1  ;;  %v1521_v15 = vadd.f32 %v1520_v37, %v3656_v58 }
  0xec   : > { %v1237_v16 = vadd.f32 %v1236_v13, %v1208_v46  ;;  %v1550_v17 = vadd.f32 %v1549_v14, %v1521_v15 }
  0xf1   : > { %v1578_v18 = vpop.f32.mrf.mxu2  ;;  %v1522_v22 = vpop.f32.mrf.mxu0 }
  0xf2   : > { %v1607_v20 = vpop.f32.mrf.mxu3  ;;  %v1579_v21 = vadd.f32 %v1578_v18, %v1550_v17  ;;  %v1551_v24 = vpop.f32.mrf.mxu1  ;;  %v1523_v26 = vadd.f32 %v1522_v22, %v3660_v23 }
  0xf4   : > { %v3670_v27 = vadd.f32 %v1607_v20, %v1579_v21  ;;  %v1552_v28 = vadd.f32 %v1551_v24, %v1523_v26 }
  0xf9   : > { %v1580_v29 = vpop.f32.mrf.mxu2  ;;  %v1525_v32 = vpop.f32.mrf.mxu0 }
  0xfa   : > { %v1609_v30 = vpop.f32.mrf.mxu3  ;;  %v1581_v31 = vadd.f32 %v1580_v29, %v1552_v28  ;;  %v1554_v25 = vpop.f32.mrf.mxu1  ;;  %v1526_v33 = vadd.f32 %v1525_v32, %v3662_v19 }
  0xfc   : > { %v3673_v58 = vadd.f32 %v1609_v30, %v1581_v31  ;;  %v1555_v34 = vadd.f32 %v1554_v25, %v1526_v33 }
 0x101   : > { %v1583_v35 = vpop.f32.mrf.mxu2  ;;  %v1527_v38 = vpop.f32.mrf.mxu0 }
 0x102   : > { %v1612_v5 = vpop.f32.mrf.mxu3  ;;  %v1584_v36 = vadd.f32 %v1583_v35, %v1555_v34  ;;  %v1556_v40 = vpop.f32.mrf.mxu1  ;;  %v1528_v23 = vadd.f32 %v1527_v38, %v3664_v39 }
 0x104   : > { %v3676_v41 = vadd.f32 %v1612_v5, %v1584_v36  ;;  %v1557_v42 = vadd.f32 %v1556_v40, %v1528_v23 }
 0x109   : > { %v1585_v43 = vpop.f32.mrf.mxu2  ;;  %v1530_v49 = vpop.f32.mrf.mxu0 }
 0x10a   : > { %v1614_v45 = vpop.f32.mrf.mxu3  ;;  %v1586_v47 = vadd.f32 %v1585_v43, %v1557_v42  ;;  %v1559_v50 = vpop.f32.mrf.mxu1  ;;  %v1531_v19 = vadd.f32 %v1530_v49, %v3666_v48 }
 0x10c   : > { %v3679_v51 = vadd.f32 %v1614_v45, %v1586_v47  ;;  %v1560_v52 = vadd.f32 %v1559_v50, %v1531_v19 }
 0x111   : > { %v1588_v53 = vpop.f32.mrf.mxu2  ;;  %v1532_v56 = vpop.f32.mrf.mxu0 }
 0x112   : > { %v1617_v54 = vpop.f32.mrf.mxu3  ;;  %v1589_v55 = vadd.f32 %v1588_v53, %v1560_v52  ;;  %v1561_v57 = vpop.f32.mrf.mxu1  ;;  %v1533_v59 = vadd.f32 %v1532_v56, %v1232_v3 }
 0x114   : > { %v3681_v39 = vadd.f32 %v1617_v54, %v1589_v55  ;;  %v1562_v60 = vadd.f32 %v1561_v57, %v1533_v59 }
 0x119   : > { %v1590_v61 = vpop.f32.mrf.mxu2  ;;  %v1535_v44 = vpop.f32.mrf.mxu0 }
 0x11a   : > { %v1619_v62 = vpop.f32.mrf.mxu3  ;;  %v1591_v63 = vadd.f32 %v1590_v61, %v1562_v60  ;;  %v1564_v0 = vpop.f32.mrf.mxu1  ;;  %v1536_v1 = vadd.f32 %v1535_v44, %v1235_v11 }
 0x11c   : > { %v3683_v2 = vadd.f32 %v1619_v62, %v1591_v63  ;;  %v1565_v48 = vadd.f32 %v1564_v0, %v1536_v1 }
 0x121   : > { %v1593_v4 = vpop.f32.mrf.mxu2  ;;  %v1537_v7 = vpop.f32.mrf.mxu0 }
 0x122   : > { %v1622_v6 = vpop.f32.mrf.mxu3  ;;  %v1594_v8 = vadd.f32 %v1593_v4, %v1565_v48  ;;  %v1566_v9 = vpop.f32.mrf.mxu1  ;;  %v1538_v10 = vadd.f32 %v1537_v7, %v1237_v16  ;;  %v3692_v16 = vld [vmem:[%s3743_s2] ss:$0 sm:$0xff] }
 0x124   : > { %v3685_v12 = vadd.f32 %v1622_v6, %v1594_v8  ;;  %v1567_v3 = vadd.f32 %v1566_v9, %v1538_v10 }
 0x129   : > { %v1595_v13 = vpop.f32.mrf.mxu2  ;;  %v1990_v14 = vpop.f32.mrf.mxu0 }
 0x12a   : > { %v1624_v46 = vpop.f32.mrf.mxu3  ;;  %v1596_v37 = vadd.f32 %v1595_v13, %v1567_v3  ;;  %v2019_v15 = vpop.f32.mrf.mxu1 }
 0x12b   : > { %v2020_v11 = vadd.f32 %v2019_v15, %v1990_v14 }
 0x12c   : > { %v3687_v17 = vadd.f32 %v1624_v46, %v1596_v37 }
 0x131   : > { %v2048_v18 = vpop.f32.mrf.mxu2  ;;  %v1992_v22 = vpop.f32.mrf.mxu0 }
 0x132   : > { %v2077_v20 = vpop.f32.mrf.mxu3  ;;  %v2049_v21 = vadd.f32 %v2048_v18, %v2020_v11  ;;  %v2021_v24 = vpop.f32.mrf.mxu1 }
 0x133   : > { %v2022_v30 = vadd.f32 %v2021_v24, %v1992_v22 }
 0x134   : > { %v2078_v26 = vadd.f32 %v2077_v20, %v2049_v21 }
 0x136   : > { %v2097_v28 = vadd.f32 %v2078_v26, %v3670_v27 }
 0x138   : > { %v2109_v29 = vadd.f32 %v3692_v16, %v2097_v28 }
 0x139   : > { %v2050_v31 = vpop.f32.mrf.mxu2  ;;  %v1995_v34 = vpop.f32.mrf.mxu0 }
 0x13a   : > { %v2079_v32 = vpop.f32.mrf.mxu3  ;;  %vm2117_vm3 = vcmp.gt.f32.partialorder %v2109_v29, 0.0  ;;  %v2125_v25 = vmul.f32 0.2, %v2109_v29  ;;  %v2051_v33 = vadd.f32 %v2050_v31, %v2022_v30  ;;  %v2024_v35 = vpop.f32.mrf.mxu1 }
 0x13b   : > { %v2025_v38 = vadd.f32 %v2024_v35, %v1995_v34 }
 0x13c   : > { %v2133_v27 = vsel %vm2117_vm3, %v2109_v29, %v2125_v25  ;;  %v2080_v5 = vadd.f32 %v2079_v32, %v2051_v33 }
 0x13d   : > { %2142 = vst.msk [vmem:[%s3700_s16] sm:$0xff] %vm2141_vm4, %v2133_v27 }
 0x13e   : > { %v2098_v36 = vadd.f32 %v2080_v5, %v3673_v58 }
 0x140   : > { %v2110_v40 = vadd.f32 %v3692_v16, %v2098_v36 }
 0x141   : > { %v2053_v23 = vpop.f32.mrf.mxu2  ;;  %v1997_v47 = vpop.f32.mrf.mxu0 }
 0x142   : > { %v2082_v42 = vpop.f32.mrf.mxu3  ;;  %vm2118_vm5 = vcmp.gt.f32.partialorder %v2110_v40, 0.0  ;;  %v2126_v43 = vmul.f32 0.2, %v2110_v40  ;;  %v2054_v45 = vadd.f32 %v2053_v23, %v2025_v38  ;;  %v2026_v49 = vpop.f32.mrf.mxu1 }
 0x143   : > { %v2027_v58 = vadd.f32 %v2026_v49, %v1997_v47 }
 0x144   : > { %v2134_v50 = vsel %vm2118_vm5, %v2110_v40, %v2126_v43  ;;  %v2083_v19 = vadd.f32 %v2082_v42, %v2054_v45 }
 0x145   : > { %2143 = vst.msk [vmem:[%s3700_s16 + $0x8] sm:$0xff] %vm2141_vm4, %v2134_v50 }
 0x146   : > { %v2099_v52 = vadd.f32 %v2083_v19, %v3676_v41 }
 0x148   : > { %v2111_v53 = vadd.f32 %v3692_v16, %v2099_v52 }
 0x149   : > { %v2055_v54 = vpop.f32.mrf.mxu2  ;;  %v2000_v59 = vpop.f32.mrf.mxu0 }
 0x14a   : > { %v2084_v55 = vpop.f32.mrf.mxu3  ;;  %vm2119_vm6 = vcmp.gt.f32.partialorder %v2111_v53, 0.0  ;;  %v2127_v56 = vmul.f32 0.2, %v2111_v53  ;;  %v2056_v57 = vadd.f32 %v2055_v54, %v2027_v58  ;;  %v2029_v60 = vpop.f32.mrf.mxu1 }
 0x14b   : > { %v2030_v44 = vadd.f32 %v2029_v60, %v2000_v59 }
 0x14c   : > { %v2135_v61 = vsel %vm2119_vm6, %v2111_v53, %v2127_v56  ;;  %v2085_v62 = vadd.f32 %v2084_v55, %v2056_v57 }
 0x14d   : > { %2144 = vst.msk [vmem:[%s3700_s16 + $0x10] sm:$0xff] %vm2141_vm4, %v2135_v61 }
 0x14e   : > { %v2100_v63 = vadd.f32 %v2085_v62, %v3679_v51 }
 0x150   : > { %v2112_v41 = vadd.f32 %v3692_v16, %v2100_v63 }
 0x151   : > { %v2058_v0 = vpop.f32.mrf.mxu2  ;;  %v2002_v6 = vpop.f32.mrf.mxu0 }
 0x152   : > { %v2087_v1 = vpop.f32.mrf.mxu3  ;;  %vm2120_vm7 = vcmp.gt.f32.partialorder %v2112_v41, 0.0  ;;  %v2128_v48 = vmul.f32 0.2, %v2112_v41  ;;  %v2059_v4 = vadd.f32 %v2058_v0, %v2030_v44  ;;  %v2031_v8 = vpop.f32.mrf.mxu1 }
 0x153   : > { %v2032_v51 = vadd.f32 %v2031_v8, %v2002_v6 }
 0x154   : > { %v2136_v7 = vsel %vm2120_vm7, %v2112_v41, %v2128_v48  ;;  %v2088_v9 = vadd.f32 %v2087_v1, %v2059_v4 }
 0x155   : > { %2145 = vst.msk [vmem:[%s3700_s16 + $0x18] sm:$0xff] %vm2141_vm4, %v2136_v7 }
 0x156   : > { %v2101_v10 = vadd.f32 %v2088_v9, %v3681_v39 }
 0x158   : > { %v2113_v3 = vadd.f32 %v3692_v16, %v2101_v10 }
 0x159   : > { %v2060_v13 = vpop.f32.mrf.mxu2  ;;  %v2005_v15 = vpop.f32.mrf.mxu0 }
 0x15a   : > { %v2089_v46 = vpop.f32.mrf.mxu3  ;;  %vm2121_vm8 = vcmp.gt.f32.partialorder %v2113_v3, 0.0  ;;  %v2129_v37 = vmul.f32 0.2, %v2113_v3  ;;  %v2061_v14 = vadd.f32 %v2060_v13, %v2032_v51  ;;  %v2034_v11 = vpop.f32.mrf.mxu1 }
 0x15b   : > { %v2035_v22 = vadd.f32 %v2034_v11, %v2005_v15 }
 0x15c   : > { %v2137_v18 = vsel %vm2121_vm8, %v2113_v3, %v2129_v37  ;;  %v2090_v20 = vadd.f32 %v2089_v46, %v2061_v14 }
 0x15d   : > { %2146 = vst.msk [vmem:[%s3700_s16 + $0x20] sm:$0xff] %vm2141_vm4, %v2137_v18 }
 0x15e   : > { %v2102_v21 = vadd.f32 %v2090_v20, %v3683_v2 }
 0x160   : > { %v2114_v39 = vadd.f32 %v3692_v16, %v2102_v21 }
 0x161   : > { %v2063_v24 = vpop.f32.mrf.mxu2  ;;  %v2007_v32 = vpop.f32.mrf.mxu0 }
 0x162   : > { %v2092_v26 = vpop.f32.mrf.mxu3  ;;  %vm2122_vm9 = vcmp.gt.f32.partialorder %v2114_v39, 0.0  ;;  %v2130_v28 = vmul.f32 0.2, %v2114_v39  ;;  %v2064_v29 = vadd.f32 %v2063_v24, %v2035_v22  ;;  %v2036_v25 = vpop.f32.mrf.mxu1 }
 0x163   : > { %v2037_v34 = vadd.f32 %v2036_v25, %v2007_v32 }
 0x164   : > { %v2138_v30 = vsel %vm2122_vm9, %v2114_v39, %v2130_v28  ;;  %v2093_v31 = vadd.f32 %v2092_v26, %v2064_v29 }
 0x165   : > { %2147 = vst.msk [vmem:[%s3700_s16 + $0x28] sm:$0xff] %vm2141_vm4, %v2138_v30 }
 0x166   : > { %v2103_v33 = vadd.f32 %v2093_v31, %v3685_v12 }
 0x168   : > { %v2115_v2 = vadd.f32 %v3692_v16, %v2103_v33 }
 0x169   : > { %v2065_v35 = vpop.f32.mrf.mxu2 }
 0x16a   : > { %vm2123_vm10 = vcmp.gt.f32.partialorder %v2115_v2, 0.0  ;;  %v2131_v27 = vmul.f32 0.2, %v2115_v2  ;;  %v2066_v5 = vadd.f32 %v2065_v35, %v2037_v34  ;;  %v2094_v36 = vpop.f32.mrf.mxu3 }
 0x16c   : > { %v2139_v38 = vsel %vm2123_vm10, %v2115_v2, %v2131_v27  ;;  %v2095_v40 = vadd.f32 %v2094_v36, %v2066_v5 }
 0x16d   : > { %2148 = vst.msk [vmem:[%s3700_s16 + $0x30] sm:$0xff] %vm2141_vm4, %v2139_v38 }
 0x16e   : > { %v2104_v23 = vadd.f32 %v2095_v40, %v3687_v17 }
 0x170   : > { %v2116_v42 = vadd.f32 %v3692_v16, %v2104_v23 }
 0x172   : > { %vm2124_vm11 = vcmp.gt.f32.partialorder %v2116_v42, 0.0  ;;  %v2132_v43 = vmul.f32 0.2, %v2116_v42 }
 0x174   : > { %v2140_v12 = vsel %vm2124_vm11, %v2116_v42, %v2132_v43 }
 0x175   : > { %2149 = vst.msk [vmem:[%s3700_s16 + $0x38] sm:$0xff] %vm2141_vm4, %v2140_v12 }
 0x176 PF: > { %s13_s14 = sadd.s32 1, %s3196_s14   ;;  %s3747_s12 = smov %s3192_s13 }
 0x177   : > { %p10_p5 = scmp.ge.s32.totalorder %s13_s14, 4   ;;  %s3748_s13 = smov %s3750_s15 }
 0x179   :  { %12 = sbr.rel (!%p10_p5) target bundleno = 2 (0x2), region = 80 }

// kernel: inception_module_d.9
= control target key start
LH: loop header
LB: loop body
LE: loop exit
PB: predicated region body
PF: predicated region fallthrough
CT: control target
= control target key end

     0   :  { %s648_s6 = smov 0   ;;  %s862_s0 = inlined_call_operand.vmem [shape: f32[2,9,2,9,256], index: 0, kind: input, shape index: {}]   ;;  %s863_s1 = inlined_call_operand.vmem [shape: f32[2,8,8,4], index: 1, kind: output, shape index: {}]  }
   0x1 LB: > { %s544_s7 = sadd.s32 4294967295, %s635_s6   ;;  %p548_p0 = scmp.ge.s32.totalorder %s635_s6, 1  ;;  %s635_s6 = sphi %s648_s6, %s11_s6  }
   0x2   : > { %p87_p1 = scmp.lt.s32.totalorder %s635_s6, 3 }
   0x4   : > { %p88_p2 = pnand %p548_p0, %p87_p1 }
   0x5   : > { %p107_p3 = scmp.lt.s32.totalorder (!%p88_p2), %s544_s7, 1 }
   0x6   : > { %91 = sbr.rel (%p88_p2) target bundleno = 67 (0x43), region = 24 }
   0xb   : > { %v125_v0 = vlaneseq  ;;  %v637_v1 = vmov -3.4028235e+38   ;;  %s867_s7 = smov (!%p107_p3, %s544_s7), 1  ;;  %vm213_vm3 = vcmask 1046528   ;;  %vm480_vm4 = vcmask 31744  }
   0xc   : > { %v214_v2 = vrot.slane %v637_v1, 1  ;;  %s619_s8 = smul.u32 576, %s867_s7  ;;  %s618_s12 = sshll.u32 %s867_s7, 6 }
   0xd   : > { %v126_v3 = vshrl.u32 %v125_v0, 7  ;;  %s713_s15 = scalar_lea.vmem %s863_s1, %s618_s12 }
   0xe   : > { %v246_v5 = vmax.f32 %v214_v2, -3.4028235e+38  ;;  %s662_s11 = scalar_lea.vmem %s862_s0, %s619_s8 }
   0xf   : > { %v127_v4 = vmul.u32 2, %v126_v3  ;;  %v552_v7 = vld [vmem:[%s662_s11 + $0x20] sm:$0xff]  ;;  %v560_v8 = vld [vmem:[%s662_s11 + $0x28] sm:$0xff]  ;;  %v569_v11 = vld [vmem:[%s662_s11 + $0x30] sm:$0x1] }
  0x10   : > { %v568_v10 = vld [vmem:[%s662_s11 + $0x20] sm:$0xfe]  ;;  %v328_v14 = vrot.slane %v569_v11, 1  ;;  %v592_v16 = vld [vmem:[%s662_s11 + $0x48] sm:$0xff]  ;;  %v601_v19 = vld [vmem:[%s662_s11 + $0x50] sm:$0x1] }
  0x11   : > { %vm128_vm0 = vcmp.ge.s32.totalorder %v127_v4, 1  ;;  %vm129_vm1 = vcmp.le.s32.totalorder %v127_v4, 16  ;;  %v327_v13 = vrot.slane %v568_v10, 1  ;;  %v584_v15 = vld [vmem:[%s662_s11 + $0x40] sm:$0xff]  ;;  %v441_v24 = vrot.slane %v601_v19, 1  ;;  %v690_v35 = vld [vmem:[%s662_s11 + $0x88] sm:$0xff] }
  0x12   : > { %vm664_vm2 = vmand %vm128_vm0, %vm129_vm1  ;;  %v600_v17 = vld [vmem:[%s662_s11 + $0x40] sm:$0xfe]  ;;  %v168_v27 = vld [vmem:[%s662_s11 + $0x50] sm:$0x1] }
  0x13   : > { %v263_v9 = vsel %vm664_vm2, %v552_v7, -3.4028235e+38  ;;  %v376_v18 = vsel %vm664_vm2, %v584_v15, -3.4028235e+38  ;;  %v440_v20 = vrot.slane %v600_v17, 1  ;;  %v553_v21 = vld [vmem:[%s662_s11 + $0x60] sm:$0xff]  ;;  %v329_v23 = vsel %vm213_vm3, %v327_v13, %v328_v14 }
  0x14   : > { %v271_v12 = vmax.f32 %v246_v5, %v263_v9  ;;  %v158_v25 = vmax.f32 %v376_v18, %v592_v16  ;;  %v167_v26 = vld [vmem:[%s662_s11 + $0x40] sm:$0xfe]  ;;  %v218_v29 = vrot.slane %v168_v27, 1  ;;  %v264_v32 = vsel %vm664_vm2, %v553_v21, -3.4028235e+38  ;;  %v561_v44 = vld [vmem:[%s662_s11 + $0x68] sm:$0xff] }
  0x15   : > { %v217_v28 = vrot.slane %v167_v26, 1  ;;  %v570_v30 = vld [vmem:[%s662_s11 + $0x60] sm:$0xfe]  ;;  %v571_v33 = vld [vmem:[%s662_s11 + $0x70] sm:$0x1]  ;;  %v442_v42 = vsel %vm213_vm3, %v440_v20, %v441_v24  ;;  %v721_v63 = vld [vmem:[%s662_s11 + $0xc8] sm:$0xff] }
  0x16   : > { %v287_v22 = vmax.f32 %v271_v12, %v560_v8  ;;  %v585_v34 = vld [vmem:[%s662_s11 + $0x80] sm:$0xff]  ;;  %v330_v37 = vrot.slane %v570_v30, 1  ;;  %v331_v38 = vrot.slane %v571_v33, 1  ;;  %v603_v45 = vld [vmem:[%s662_s11 + $0x90] sm:$0x1]  ;;  %v562_v5 = vld [vmem:[%s662_s11 + $0xa8] sm:$0xff] }
  0x17   : > { %v219_v36 = vsel %vm213_vm3, %v217_v28, %v218_v29  ;;  %v695_v39 = vsel %vm664_vm2, %v585_v34, -3.4028235e+38  ;;  %v602_v40 = vld [vmem:[%s662_s11 + $0x80] sm:$0xfe]  ;;  %v444_v48 = vrot.slane %v603_v45, 1  ;;  %v740_v19 = vld [vmem:[%s662_s11 + $0x108] sm:$0xff] }
  0x18   : > { %v359_v31 = vmax.f32 %v287_v22, %v329_v23  ;;  %v247_v43 = vmax.f32 %v158_v25, %v219_v36  ;;  %v169_v46 = vld [vmem:[%s662_s11 + $0x80] sm:$0xfe]  ;;  %v443_v47 = vrot.slane %v602_v40, 1  ;;  %v159_v49 = vmax.f32 %v695_v39, %v690_v35  ;;  %v170_v50 = vld [vmem:[%s662_s11 + $0x90] sm:$0x1] }
  0x19   : > { %v220_v51 = vrot.slane %v169_v46, 1  ;;  %v554_v52 = vld [vmem:[%s662_s11 + $0xa0] sm:$0xff]  ;;  %v221_v55 = vrot.slane %v170_v50, 1  ;;  %v573_v57 = vld [vmem:[%s662_s11 + $0xb0] sm:$0x1]  ;;  %v332_v59 = vsel %vm213_vm3, %v330_v37, %v331_v38 }
  0x1a   : > { %v384_v41 = vmax.f32 %v359_v31, %v376_v18  ;;  %v272_v54 = vmax.f32 %v247_v43, %v264_v32  ;;  %v572_v56 = vld [vmem:[%s662_s11 + $0xa0] sm:$0xfe]  ;;  %v334_v61 = vrot.slane %v573_v57, 1  ;;  %v265_v4 = vsel %vm664_vm2, %v554_v52, -3.4028235e+38 }
  0x1b   : > { %v586_v58 = vld [vmem:[%s662_s11 + $0xc0] sm:$0xff]  ;;  %v333_v60 = vrot.slane %v572_v56, 1  ;;  %v222_v3 = vsel %vm213_vm3, %v220_v51, %v221_v55  ;;  %v605_v10 = vld [vmem:[%s662_s11 + $0xd0] sm:$0x1]  ;;  %v445_v20 = vsel %vm213_vm3, %v443_v47, %v444_v48 }
  0x1c   : > { %v400_v53 = vmax.f32 %v384_v41, %v592_v16  ;;  %v718_v62 = vsel %vm664_vm2, %v586_v58, -3.4028235e+38  ;;  %v555_v0 = vld [vmem:[%s662_s11 + $0xe0] sm:$0xff]  ;;  %v288_v2 = vmax.f32 %v272_v54, %v561_v44  ;;  %v248_v9 = vmax.f32 %v159_v49, %v222_v3  ;;  %v172_v13 = vld [vmem:[%s662_s11 + $0xd0] sm:$0x1] }
  0x1d   : > { %v604_v7 = vld [vmem:[%s662_s11 + $0xc0] sm:$0xfe]  ;;  %v160_v12 = vmax.f32 %v718_v62, %v721_v63  ;;  %v224_v17 = vrot.slane %v172_v13, 1  ;;  %v266_v18 = vsel %vm664_vm2, %v555_v0, -3.4028235e+38  ;;  %v335_v22 = vsel %vm213_vm3, %v333_v60, %v334_v61 }
  0x1e   : > { %v472_v1 = vmax.f32 %v400_v53, %v442_v42  ;;  %v171_v8 = vld [vmem:[%s662_s11 + $0xc0] sm:$0xfe]  ;;  %v446_v11 = vrot.slane %v604_v7, 1  ;;  %v360_v15 = vmax.f32 %v288_v2, %v332_v59  ;;  %v273_v21 = vmax.f32 %v248_v9, %v265_v4  ;;  %v575_v24 = vld [vmem:[%s662_s11 + $0xf0] sm:$0x1]  ;;  %v564_v9 = vld [vmem:[%s662_s11 + $0x128] sm:$0xff] }
  0x1f   : > { %v587_v14 = vld [vmem:[%s662_s11 + $0x100] sm:$0xff]  ;;  %v223_v16 = vrot.slane %v171_v8, 1  ;;  %v337_v29 = vrot.slane %v575_v24, 1  ;;  %v607_v31 = vld [vmem:[%s662_s11 + $0x110] sm:$0x1]  ;;  %v447_v33 = vrot.slane %v605_v10, 1 }
  0x20   : > { %481 = vst.msk [vmem:[%s713_s15] sm:$0xff] %vm480_vm4, %v472_v1  ;;  %v574_v23 = vld [vmem:[%s662_s11 + $0xe0] sm:$0xfe]  ;;  %v748_v25 = vsel %vm664_vm2, %v587_v14, -3.4028235e+38  ;;  %v385_v26 = vmax.f32 %v360_v15, %v695_v39  ;;  %v289_v32 = vmax.f32 %v273_v21, %v562_v5  ;;  %v563_v39 = vld [vmem:[%s662_s11 + $0xe8] sm:$0xff] }
  0x21   : > { %v225_v27 = vsel %vm213_vm3, %v223_v16, %v224_v17  ;;  %v336_v28 = vrot.slane %v574_v23, 1  ;;  %v606_v30 = vld [vmem:[%s662_s11 + $0x100] sm:$0xfe]  ;;  %v174_v38 = vld [vmem:[%s662_s11 + $0x110] sm:$0x1]  ;;  %v450_v41 = vrot.slane %v607_v31, 1  ;;  %v161_v42 = vmax.f32 %v748_v25, %v740_v19 }
  0x22   : > { %v249_v34 = vmax.f32 %v160_v12, %v225_v27  ;;  %v449_v36 = vrot.slane %v606_v30, 1  ;;  %v173_v37 = vld [vmem:[%s662_s11 + $0x100] sm:$0xfe]  ;;  %v401_v40 = vmax.f32 %v385_v26, %v690_v35  ;;  %v361_v46 = vmax.f32 %v289_v32, %v335_v22  ;;  %v577_v50 = vld [vmem:[%s662_s11 + $0x130] sm:$0x1]  ;;  %v766_v35 = vld [vmem:[%s662_s11 + $0x148] sm:$0xff] }
  0x23   : > { %v226_v43 = vrot.slane %v173_v37, 1  ;;  %v556_v44 = vld [vmem:[%s662_s11 + $0x120] sm:$0xff]  ;;  %v338_v48 = vsel %vm213_vm3, %v336_v28, %v337_v29  ;;  %v227_v49 = vrot.slane %v174_v38, 1  ;;  %v340_v55 = vrot.slane %v577_v50, 1  ;;  %v609_v61 = vld [vmem:[%s662_s11 + $0x150] sm:$0x1] }
  0x24   : > { %v576_v45 = vld [vmem:[%s662_s11 + $0x120] sm:$0xfe]  ;;  %v274_v47 = vmax.f32 %v249_v34, %v266_v18  ;;  %v473_v52 = vmax.f32 %v401_v40, %v445_v20  ;;  %v267_v53 = vsel %vm664_vm2, %v556_v44, -3.4028235e+38  ;;  %v386_v57 = vmax.f32 %v361_v46, %v718_v62  ;;  %v176_v62 = vld [vmem:[%s662_s11 + $0x150] sm:$0x1] }
  0x25   : > { %v588_v51 = vld [vmem:[%s662_s11 + $0x140] sm:$0xff]  ;;  %v339_v54 = vrot.slane %v576_v45, 1  ;;  %v228_v59 = vsel %vm213_vm3, %v226_v43, %v227_v49  ;;  %v448_v1 = vsel %vm213_vm3, %v446_v11, %v447_v33  ;;  %v453_v4 = vrot.slane %v609_v61, 1  ;;  %v579_v14 = vld [vmem:[%s662_s11 + $0x170] sm:$0x1]  ;;  %v796_v23 = vld [vmem:[%s662_s11 + $0x188] sm:$0xff] }
  0x26   : > { %v608_v56 = vld [vmem:[%s662_s11 + $0x140] sm:$0xfe]  ;;  %v290_v58 = vmax.f32 %v274_v47, %v563_v39  ;;  %v775_v60 = vsel %vm664_vm2, %v588_v51, -3.4028235e+38  ;;  %482 = vst.msk [vmem:[%s713_s15 + $0x8] sm:$0xff] %vm480_vm4, %v473_v52  ;;  %v250_v2 = vmax.f32 %v161_v42, %v228_v59  ;;  %v402_v7 = vmax.f32 %v386_v57, %v721_v63  ;;  %v565_v38 = vld [vmem:[%s662_s11 + $0x168] sm:$0xff] }
  0x27   : > { %v175_v0 = vld [vmem:[%s662_s11 + $0x140] sm:$0xfe]  ;;  %v452_v3 = vrot.slane %v608_v56, 1  ;;  %v162_v10 = vmax.f32 %v775_v60, %v766_v35  ;;  %v341_v15 = vsel %vm213_vm3, %v339_v54, %v340_v55  ;;  %v230_v16 = vrot.slane %v176_v62, 1  ;;  %v178_v34 = vld [vmem:[%s662_s11 + $0x190] sm:$0x1] }
  0x28   : > { %v557_v5 = vld [vmem:[%s662_s11 + $0x160] sm:$0xff]  ;;  %v362_v8 = vmax.f32 %v290_v58, %v338_v48  ;;  %v229_v12 = vrot.slane %v175_v0, 1  ;;  %v275_v11 = vmax.f32 %v250_v2, %v267_v53  ;;  %v474_v18 = vmax.f32 %v402_v7, %v448_v1  ;;  %v581_v42 = vld [vmem:[%s662_s11 + $0x1b0] sm:$0x1]  ;;  %v598_v48 = vld [vmem:[%s662_s11 + $0x1c8] sm:$0xff] }
  0x29   : > { %v578_v13 = vld [vmem:[%s662_s11 + $0x160] sm:$0xfe]  ;;  %v268_v63 = vsel %vm664_vm2, %v557_v5, -3.4028235e+38  ;;  %v343_v22 = vrot.slane %v579_v14, 1  ;;  %v451_v26 = vsel %vm213_vm3, %v449_v36, %v450_v41  ;;  %v454_v32 = vsel %vm213_vm3, %v452_v3, %v453_v4  ;;  %v566_v0 = vld [vmem:[%s662_s11 + $0x1a8] sm:$0xff] }
  0x2a   : > { %v589_v17 = vld [vmem:[%s662_s11 + $0x180] sm:$0xff]  ;;  %v387_v20 = vmax.f32 %v362_v8, %v748_v25  ;;  %v342_v21 = vrot.slane %v578_v13, 1  ;;  %v291_v27 = vmax.f32 %v275_v11, %v564_v9  ;;  %v231_v28 = vsel %vm213_vm3, %v229_v12, %v230_v16  ;;  %483 = vst.msk [vmem:[%s713_s15 + $0x10] sm:$0xff] %vm480_vm4, %v474_v18  ;;  %v611_v46 = vld [vmem:[%s662_s11 + $0x190] sm:$0x1] }
  0x2b   : > { %v558_v24 = vld [vmem:[%s662_s11 + $0x1a0] sm:$0xff]  ;;  %v381_v29 = vsel %vm664_vm2, %v589_v17, -3.4028235e+38  ;;  %v251_v33 = vmax.f32 %v162_v10, %v231_v28  ;;  %v233_v41 = vrot.slane %v178_v34, 1  ;;  %v346_v52 = vrot.slane %v581_v42, 1 }
  0x2c   : > { %v610_v30 = vld [vmem:[%s662_s11 + $0x180] sm:$0xfe]  ;;  %v403_v25 = vmax.f32 %v387_v20, %v740_v19  ;;  %v363_v37 = vmax.f32 %v291_v27, %v341_v15  ;;  %v163_v40 = vmax.f32 %v381_v29, %v796_v23  ;;  %v344_v19 = vsel %vm213_vm3, %v342_v21, %v343_v22  ;;  %v180_v54 = vld [vmem:[%s662_s11 + $0x1d0] sm:$0x1] }
  0x2d   : > { %v177_v31 = vld [vmem:[%s662_s11 + $0x180] sm:$0xfe]  ;;  %v276_v45 = vmax.f32 %v251_v33, %v268_v63  ;;  %v269_v47 = vsel %vm664_vm2, %v558_v24, -3.4028235e+38  ;;  %v455_v56 = vrot.slane %v610_v30, 1  ;;  %v456_v61 = vrot.slane %v611_v46, 1 }
  0x2e   : > { %v580_v36 = vld [vmem:[%s662_s11 + $0x1a0] sm:$0xfe]  ;;  %v232_v39 = vrot.slane %v177_v31, 1  ;;  %v475_v44 = vmax.f32 %v403_v25, %v451_v26  ;;  %v388_v49 = vmax.f32 %v363_v37, %v775_v60  ;;  %v583_v3 = vld [vmem:[%s662_s11 + $0x1f0] sm:$0x1]  ;;  %v236_v9 = vrot.slane %v180_v54, 1 }
  0x2f   : > { %v590_v43 = vld [vmem:[%s662_s11 + $0x1c0] sm:$0xff]  ;;  %v345_v51 = vrot.slane %v580_v36, 1  ;;  %v292_v55 = vmax.f32 %v276_v45, %v565_v38  ;;  %v613_v7 = vld [vmem:[%s662_s11 + $0x1d0] sm:$0x1]  ;;  %v349_v16 = vrot.slane %v583_v3, 1  ;;  %v457_v63 = vsel %vm213_vm3, %v455_v56, %v456_v61  ;;  %v567_v24 = vld [vmem:[%s662_s11 + $0x1e8] sm:$0xff] }
  0x30   : > { %v234_v50 = vsel %vm213_vm3, %v232_v39, %v233_v41  ;;  %v179_v53 = vld [vmem:[%s662_s11 + $0x1c0] sm:$0xfe]  ;;  %484 = vst.msk [vmem:[%s713_s15 + $0x18] sm:$0xff] %vm480_vm4, %v475_v44  ;;  %v382_v58 = vsel %vm664_vm2, %v590_v43, -3.4028235e+38  ;;  %v404_v60 = vmax.f32 %v388_v49, %v766_v35  ;;  %v459_v18 = vrot.slane %v613_v7, 1 }
  0x31   : > { %v252_v57 = vmax.f32 %v163_v40, %v234_v50  ;;  %v559_v59 = vld [vmem:[%s662_s11 + $0x1e0] sm:$0xff]  ;;  %v164_v1 = vmax.f32 %v382_v58, %v598_v48  ;;  %v364_v4 = vmax.f32 %v292_v55, %v344_v19  ;;  %v235_v8 = vrot.slane %v179_v53, 1  ;;  %v599_v39 = vld [vmem:[%s662_s11 + $0x208] sm:$0xff] }
  0x32   : > { %v582_v2 = vld [vmem:[%s662_s11 + $0x1e0] sm:$0xfe]  ;;  %v476_v10 = vmax.f32 %v404_v60, %v454_v32  ;;  %v347_v12 = vsel %vm213_vm3, %v345_v51, %v346_v52  ;;  %v270_v35 = vsel %vm664_vm2, %v559_v59, -3.4028235e+38 }
  0x33   : > { %v277_v62 = vmax.f32 %v252_v57, %v269_v47  ;;  %v612_v5 = vld [vmem:[%s662_s11 + $0x1c0] sm:$0xfe]  ;;  %v348_v13 = vrot.slane %v582_v2, 1  ;;  %v389_v14 = vmax.f32 %v364_v4, %v381_v29  ;;  %v237_v15 = vsel %vm213_vm3, %v235_v8, %v236_v9  ;;  %v615_v29 = vld [vmem:[%s662_s11 + $0x210] sm:$0x1] }
  0x34   : > { %485 = vst.msk [vmem:[%s713_s15 + $0x20] sm:$0xff] %vm480_vm4, %v476_v10  ;;  %v458_v17 = vrot.slane %v612_v5, 1  ;;  %v253_v20 = vmax.f32 %v164_v1, %v237_v15  ;;  %v591_v27 = vld [vmem:[%s662_s11 + $0x200] sm:$0xff]  ;;  %v462_v37 = vrot.slane %v615_v29, 1 }
  0x35   : > { %v293_v11 = vmax.f32 %v277_v62, %v566_v0  ;;  %v405_v21 = vmax.f32 %v389_v14, %v796_v23  ;;  %v614_v28 = vld [vmem:[%s662_s11 + $0x200] sm:$0xfe]  ;;  %v350_v25 = vsel %vm213_vm3, %v348_v13, %v349_v16  ;;  %v383_v23 = vsel %vm664_vm2, %v591_v27, -3.4028235e+38 }
  0x36   : > { %v278_v26 = vmax.f32 %v253_v20, %v270_v35  ;;  %v460_v32 = vsel %vm213_vm3, %v458_v17, %v459_v18  ;;  %v461_v36 = vrot.slane %v614_v28, 1 }
  0x37   : > { %v365_v22 = vmax.f32 %v293_v11, %v347_v12  ;;  %v477_v30 = vmax.f32 %v405_v21, %v457_v63 }
  0x38   : > { %v294_v33 = vmax.f32 %v278_v26, %v567_v24  ;;  %v463_v42 = vsel %vm213_vm3, %v461_v36, %v462_v37 }
  0x39   : > { %v390_v31 = vmax.f32 %v365_v22, %v382_v58  ;;  %486 = vst.msk [vmem:[%s713_s15 + $0x28] sm:$0xff] %vm480_vm4, %v477_v30 }
  0x3a   : > { %v366_v38 = vmax.f32 %v294_v33, %v350_v25 }
  0x3b   : > { %v406_v34 = vmax.f32 %v390_v31, %v598_v48 }
  0x3c   : > { %v391_v41 = vmax.f32 %v366_v38, %v383_v23 }
  0x3d   : > { %v478_v40 = vmax.f32 %v406_v34, %v460_v32 }
  0x3e   : > { %v407_v43 = vmax.f32 %v391_v41, %v599_v39 }
  0x3f   : > { %487 = vst.msk [vmem:[%s713_s15 + $0x30] sm:$0xff] %vm480_vm4, %v478_v40 }
  0x40   : > { %v479_v44 = vmax.f32 %v407_v43, %v463_v42 }
  0x42   : > { %488 = vst.msk [vmem:[%s713_s15 + $0x38] sm:$0xff] %vm480_vm4, %v479_v44 }
  0x43 PF: > { %s11_s6 = sadd.s32 1, %s635_s6  }
  0x44   : > { %p8_p4 = scmp.ge.s32.totalorder %s11_s6, 4  }
  0x46   :  { %10 = sbr.rel (!%p8_p4) target bundleno = 1 (0x1), region = 56 }

// kernel: inception_module_d.7
= control target key start
LH: loop header
LB: loop body
LE: loop exit
PB: predicated region body
PF: predicated region fallthrough
CT: control target
= control target key end

     0   :  { %s6785_s12 = smov 0   ;;  %s6787_s13 = smov 0   ;;  %s8255_s0 = inlined_call_operand.vmem [shape: bf16[2,18,18,128], index: 0, kind: input, shape index: {}]   ;;  %s8256_s1 = inlined_call_operand.vmem [shape: bf16[3,384,128], index: 1, kind: input, shape index: {}]   ;;  %s8257_s2 = inlined_call_operand.vmem [shape: f32[1,128], index: 2, kind: input, shape index: {}]   ;;  %s8258_s3 = inlined_call_operand.vmem [shape: bf16[2,256,128], index: 3, kind: output, shape index: {}]  }
   0x1   :  { %s6789_s14 = smov 0  }
   0x2 LB: > { %s25_s15 = sadd.s32 1, %s6759_s13  ;;  %p5220_p0 = scmp.ge.s32.totalorder %s6763_s14, 1  ;;  %s6763_s14 = sphi %s6789_s14, %s13_s14   ;;  %s6759_s13 = sphi %s6787_s13, %s8321_s13   ;;  %s6755_s12 = sphi %s6785_s12, %s8320_s12  }
   0x3   : > { %p27_p1 = scmp.ge.s32.totalorder %s25_s15, 2  ;;  %p168_p2 = scmp.lt.s32.totalorder %s6763_s14, 3 }
   0x5   : > { %s8323_s15 = smov (%p27_p1, %s25_s15), 0  ;;  %p169_p3 = pnand %p5220_p0, %p168_p2 }
   0x7   : > { %172 = sbr.rel (%p169_p3) target bundleno = 759 (0x2f7), region = 32 }
   0xc   : > { %v6490_v0 = vld [vmem:[%s8256_s1 + $0xf8] sm:$0xff]  ;;  %p202_p4 = scmp.lt.s32.totalorder %s6755_s12, 1  ;;  %v6489_v1 = vld [vmem:[%s8256_s1 + $0xf0] sm:$0xff]  ;;  %v6488_v2 = vld [vmem:[%s8256_s1 + $0xe8] sm:$0xff]  ;;  %vm322_vm0 = vsmask.f32 3328 }
   0xd   : > { %3166 = vmatpush.bf16.msra.mxu0 %v6490_v0  ;;  %6674 = vmatpush.bf16.msra.mxu1 %v6490_v0  ;;  %v6487_v7 = vld [vmem:[%s8256_s1 + $0xe0] sm:$0xff]  ;;  %v6486_v11 = vld [vmem:[%s8256_s1 + $0xd8] sm:$0xff]  ;;  %v6485_v15 = vld [vmem:[%s8256_s1 + $0xd0] sm:$0xff]  ;;  %vm821_vm1 = vcmask 1042432   ;;  %vm323_vm2 = vsmask.f32 7440 }
   0xe   : > { %s8325_s12 = smov (!%p202_p4, %s6755_s12), 1  ;;  %6675 = vmatpush.bf16.msra.mxu2 %v6490_v0  ;;  %6676 = vmatpush.bf16.msra.mxu3 %v6490_v0  ;;  %v6484_v18 = vld [vmem:[%s8256_s1 + $0xc8] sm:$0xff]  ;;  %v6483_v21 = vld [vmem:[%s8256_s1 + $0xc0] sm:$0xff]  ;;  %v6506_v32 = vld [vmem:[%s8256_s1 + $0x178] sm:$0xff]  ;;  %vm822_vm3 = vcmask 1046532  }
   0xf   : > { %s6698_s20 = smul.u32 216, %s8325_s12  ;;  %v6418_v33 = vld [vmem:[%s8256_s1 + $0x38] sm:$0xff]  ;;  %v6505_v42 = vld [vmem:[%s8256_s1 + $0x170] sm:$0xff]  ;;  %v6504_v47 = vld [vmem:[%s8256_s1 + $0x168] sm:$0xff]  ;;  %s6362_s7 = sshll.u32 %s8325_s12, 7 }
  0x10   : > { %v6498_v38 = vld [vmem:[%s8256_s1 + $0x138] sm:$0xff]  ;;  %v6417_v43 = vld [vmem:[%s8256_s1 + $0x30] sm:$0xff]  ;;  %v6416_v48 = vld [vmem:[%s8256_s1 + $0x28] sm:$0xff]  ;;  %s8062_s9 = scalar_lea.vmem %s8258_s3, %s6362_s7 }
  0x11   : > { %3167 = vmatpush.bf16.msra.mxu0 %v6489_v1  ;;  %6677 = vmatpush.bf16.msra.mxu1 %v6489_v1  ;;  %s6818_s25 = scalar_lea.vmem %s8255_s0, %s6698_s20  ;;  %v6426_v39 = vld [vmem:[%s8256_s1 + $0x78] sm:$0xff]  ;;  %v6497_v46 = vld [vmem:[%s8256_s1 + $0x130] sm:$0xff]  ;;  %v6496_v54 = vld [vmem:[%s8256_s1 + $0x128] sm:$0xff] }
  0x12   : > { %6678 = vmatpush.bf16.msra.mxu2 %v6489_v1  ;;  %6679 = vmatpush.bf16.msra.mxu3 %v6489_v1  ;;  %v6821_v3 = vld [vmem:[%s6818_s25 + $0xc] sm:$0xf]  ;;  %v6824_v4 = vld [vmem:[%s6818_s25 + $0x10] sm:$0xf]  ;;  %v6827_v5 = vld [vmem:[%s6818_s25 + $0x3c] sm:$0xf] }
  0x13   : > { %1066 = vst [vmem:[#allocation2 + $0x180] sm:$0xf] %v6821_v3  ;;  %v6832_v6 = vld [vmem:[%s6818_s25 + $0x40] sm:$0xf]  ;;  %v6840_v8 = vld [vmem:[%s6818_s25 + $0x6c] sm:$0xf]  ;;  %vm7074_vm4 = vmor %vm322_vm0, %vm323_vm2 }
  0x14   : > { %1067 = vst [vmem:[#allocation2 + $0x18c] sm:$0xf] %v6824_v4  ;;  %v6843_v9 = vld [vmem:[%s6818_s25 + $0x70] sm:$0xf]  ;;  %v6848_v10 = vld [vmem:[%s6818_s25 + $0x9c] sm:$0xf]  ;;  %vm7085_vm5 = vmor %vm821_vm1, %vm822_vm3 }
  0x15   : > { %3168 = vmatpush.bf16.msra.mxu0 %v6488_v2  ;;  %6680 = vmatpush.bf16.msra.mxu1 %v6488_v2  ;;  %1074 = vst [vmem:[#allocation2 + $0x1e0] sm:$0xf] %v6827_v5  ;;  %v6854_v12 = vld [vmem:[%s6818_s25 + $0xa0] sm:$0xf]  ;;  %v6859_v13 = vld [vmem:[%s6818_s25 + $0x18] sm:$0xf] }
  0x16   : > { %6681 = vmatpush.bf16.msra.mxu2 %v6488_v2  ;;  %6682 = vmatpush.bf16.msra.mxu3 %v6488_v2  ;;  %1075 = vst [vmem:[#allocation2 + $0x1ec] sm:$0xf] %v6832_v6  ;;  %v6862_v14 = vld [vmem:[%s6818_s25 + $0x1c] sm:$0xf]  ;;  %v6870_v16 = vld [vmem:[%s6818_s25 + $0x48] sm:$0xf] }
  0x17   : > { %1082 = vst [vmem:[#allocation2 + $0x240] sm:$0xf] %v6840_v8  ;;  %v6873_v17 = vld [vmem:[%s6818_s25 + $0x4c] sm:$0xf]  ;;  %v6881_v19 = vld [vmem:[%s6818_s25 + $0x78] sm:$0xf] }
  0x18   : > { %1083 = vst [vmem:[#allocation2 + $0x24c] sm:$0xf] %v6843_v9  ;;  %v6884_v20 = vld [vmem:[%s6818_s25 + $0x7c] sm:$0xf]  ;;  %v6892_v26 = vld [vmem:[%s6818_s25 + $0xa8] sm:$0xf] }
  0x19   : > { %3169 = vmatpush.bf16.msra.mxu0 %v6487_v7  ;;  %6683 = vmatpush.bf16.msra.mxu1 %v6487_v7  ;;  %1090 = vst [vmem:[#allocation2 + $0x2a0] sm:$0xf] %v6848_v10  ;;  %v6895_v31 = vld [vmem:[%s6818_s25 + $0xac] sm:$0xf]  ;;  %v6912_v40 = vld [vmem:[%s6818_s25 + $0x24] sm:$0xf] }
  0x1a   : > { %6684 = vmatpush.bf16.msra.mxu2 %v6487_v7  ;;  %6685 = vmatpush.bf16.msra.mxu3 %v6487_v7  ;;  %1091 = vst [vmem:[#allocation2 + $0x2ac] sm:$0xf] %v6854_v12  ;;  %v5450_v22 = vld [vmem:[#allocation2 + $0x180] sm:$0xf]  ;;  %v6915_v41 = vld [vmem:[%s6818_s25 + $0x28] sm:$0xf] }
  0x1b   : > { %1068 = vst [vmem:[#allocation2 + $0x198] sm:$0xf] %v6859_v13  ;;  %v6436_v23 = vld [vmem:[#allocation2 + $0x188] sm:$0xf0]  ;;  %v6926_v44 = vld [vmem:[%s6818_s25 + $0x54] sm:$0xf] }
  0x1c   : > { %1069 = vst [vmem:[#allocation2 + $0x1a4] sm:$0xf] %v6862_v14  ;;  %v5498_v24 = vld [vmem:[#allocation2 + $0x1e0] sm:$0xf]  ;;  %v5451_v34 = vor.u32 %v6436_v23, %v5450_v22  ;;  %v6929_v45 = vld [vmem:[%s6818_s25 + $0x58] sm:$0xf] }
  0x1d   : > { %3170 = vmatpush.bf16.msra.mxu0 %v6486_v11  ;;  %6686 = vmatpush.bf16.msra.mxu1 %v6486_v11  ;;  %1076 = vst [vmem:[#allocation2 + $0x1f8] sm:$0xf] %v6870_v16  ;;  %v6448_v25 = vld [vmem:[#allocation2 + $0x1e8] sm:$0xf0]  ;;  %v6425_v49 = vld [vmem:[%s8256_s1 + $0x70] sm:$0xff]  ;;  %v6503_v57 = vld [vmem:[%s8256_s1 + $0x160] sm:$0xff] }
  0x1e   : > { %6687 = vmatpush.bf16.msra.mxu2 %v6486_v11  ;;  %6688 = vmatpush.bf16.msra.mxu3 %v6486_v11  ;;  %1077 = vst [vmem:[#allocation2 + $0x204] sm:$0xf] %v6873_v17  ;;  %v5546_v27 = vld [vmem:[#allocation2 + $0x240] sm:$0xf]  ;;  %v5499_v35 = vor.u32 %v6448_v25, %v5498_v24  ;;  %v6946_v50 = vld [vmem:[%s6818_s25 + $0x84] sm:$0xf] }
  0x1f   : > { %1084 = vst [vmem:[#allocation2 + $0x258] sm:$0xf] %v6881_v19  ;;  %v6460_v28 = vld [vmem:[#allocation2 + $0x248] sm:$0xf0]  ;;  %v6949_v51 = vld [vmem:[%s6818_s25 + $0x88] sm:$0xf] }
  0x20   : > { %1085 = vst [vmem:[#allocation2 + $0x264] sm:$0xf] %v6884_v20  ;;  %v5594_v29 = vld [vmem:[#allocation2 + $0x2a0] sm:$0xf]  ;;  %v5547_v36 = vor.u32 %v6460_v28, %v5546_v27  ;;  %v6952_v52 = vld [vmem:[%s6818_s25 + $0xb4] sm:$0xf] }
  0x21   : > { %3171 = vmatpush.bf16.msra.mxu0 %v6485_v15  ;;  %6689 = vmatpush.bf16.msra.mxu1 %v6485_v15  ;;  %v6472_v30 = vld [vmem:[#allocation2 + $0x2a8] sm:$0xf0]  ;;  %1092 = vst [vmem:[#allocation2 + $0x2b8] sm:$0xf] %v6892_v26  ;;  %v6957_v53 = vld [vmem:[%s6818_s25 + $0xb8] sm:$0xf] }
  0x22   : > { %6690 = vmatpush.bf16.msra.mxu2 %v6485_v15  ;;  %6691 = vmatpush.bf16.msra.mxu3 %v6485_v15  ;;  %1093 = vst [vmem:[#allocation2 + $0x2c4] sm:$0xf] %v6895_v31  ;;  %v5595_v37 = vor.u32 %v6472_v30, %v5594_v29  ;;  %v6424_v55 = vld [vmem:[%s8256_s1 + $0x68] sm:$0xff]  ;;  %v5462_v56 = vld [vmem:[#allocation2 + $0x198] sm:$0xf]  ;;  %v6415_v58 = vld [vmem:[%s8256_s1 + $0x20] sm:$0xff] }
  0x23   : > { %1070 = vst [vmem:[#allocation2 + $0x1b0] sm:$0xf] %v6912_v40  ;;  %v6439_v59 = vld [vmem:[#allocation2 + $0x1a0] sm:$0xf0]  ;;  %v6502_v11 = vld [vmem:[%s8256_s1 + $0x158] sm:$0xff]  ;;  %v1102_v22 = vshll.u32 %v6821_v3, 16 }
  0x24   : > { %1071 = vst [vmem:[#allocation2 + $0x1bc] sm:$0xf] %v6915_v41  ;;  %v5510_v60 = vld [vmem:[#allocation2 + $0x1f8] sm:$0xf]  ;;  %v6495_v2 = vld [vmem:[%s8256_s1 + $0x120] sm:$0xff]  ;;  %v5463_v23 = vor.u32 %v6439_v59, %v5462_v56  ;;  %v6492_v59 = vld [vmem:[%s8256_s1 + $0x108] sm:$0xff] }
  0x25   : > { %3172 = vmatpush.bf16.msra.mxu0 %v6484_v18  ;;  %6692 = vmatpush.bf16.msra.mxu1 %v6484_v18  ;;  %1078 = vst [vmem:[#allocation2 + $0x210] sm:$0xf] %v6926_v44  ;;  %v6451_v61 = vld [vmem:[#allocation2 + $0x200] sm:$0xf0]  ;;  %v6414_v15 = vld [vmem:[%s8256_s1 + $0x18] sm:$0xff] }
  0x26   : > { %6693 = vmatpush.bf16.msra.mxu2 %v6484_v18  ;;  %6694 = vmatpush.bf16.msra.mxu3 %v6484_v18  ;;  %1079 = vst [vmem:[#allocation2 + $0x21c] sm:$0xf] %v6929_v45  ;;  %v5558_v62 = vld [vmem:[#allocation2 + $0x258] sm:$0xf]  ;;  %v6423_v7 = vld [vmem:[%s8256_s1 + $0x60] sm:$0xff]  ;;  %v5511_v24 = vor.u32 %v6451_v61, %v5510_v60 }
  0x27   : > { %1086 = vst [vmem:[#allocation2 + $0x270] sm:$0xf] %v6946_v50  ;;  %v6463_v63 = vld [vmem:[#allocation2 + $0x260] sm:$0xf0]  ;;  %v6986_v18 = vld [vmem:[%s6818_s25 + $0x30] sm:$0xf] }
  0x28   : > { %1087 = vst [vmem:[#allocation2 + $0x27c] sm:$0xf] %v6949_v51  ;;  %v5606_v0 = vld [vmem:[#allocation2 + $0x2b8] sm:$0xf]  ;;  %v6991_v25 = vld [vmem:[%s6818_s25 + $0x34] sm:$0xf]  ;;  %v5559_v27 = vor.u32 %v6463_v63, %v5558_v62 }
  0x29   : > { %3173 = vmatpush.bf16.msra.mxu0 %v6483_v21  ;;  %6695 = vmatpush.bf16.msra.mxu1 %v6483_v21  ;;  %1094 = vst [vmem:[#allocation2 + $0x2d0] sm:$0xf] %v6952_v52  ;;  %v6475_v1 = vld [vmem:[#allocation2 + $0x2c0] sm:$0xf0]  ;;  %v6494_v29 = vld [vmem:[%s8256_s1 + $0x118] sm:$0xff] }
  0x2a   : > { %6696 = vmatpush.bf16.msra.mxu2 %v6483_v21  ;;  %6697 = vmatpush.bf16.msra.mxu3 %v6483_v21  ;;  %1095 = vst [vmem:[#allocation2 + $0x2dc] sm:$0xf] %v6957_v53  ;;  %v1099_v21 = vshrl.u32 %v6821_v3, 16  ;;  %v5607_v28 = vor.u32 %v6475_v1, %v5606_v0  ;;  %v6422_v3 = vld [vmem:[%s8256_s1 + $0x58] sm:$0xff]  ;;  %v7002_v30 = vld [vmem:[%s6818_s25 + $0x60] sm:$0xf] }
  0x2b   : > { %1072 = vst [vmem:[#allocation2 + $0x1c8] sm:$0xf] %v6986_v18  ;;  %v6499_v63 = vld [vmem:[%s8256_s1 + $0x140] sm:$0xff]  ;;  %v1108_v1 = vshll.u32 %v6824_v4, 16 }
  0x2c   : > { %3174 = vmatmul.bf16.vlgmr.msra.gmra.mxu0 %v5451_v34  ;;  %3194 = vmatmul.bf16.vlgmr.msra.gmra.mxu1 %v5499_v35  ;;  %1073 = vst [vmem:[#allocation2 + $0x1d4] sm:$0xf] %v6991_v25  ;;  %v6413_v34 = vld [vmem:[%s8256_s1 + $0x10] sm:$0xff]  ;;  %v6411_v0 = vld [vmem:[%s8256_s1] sm:$0xff] }
  0x2d   : > { %3214 = vmatmul.bf16.vlgmr.msra.gmra.mxu2 %v5547_v36  ;;  %3234 = vmatmul.bf16.vlgmr.msra.gmra.mxu3 %v5595_v37  ;;  %1080 = vst [vmem:[#allocation2 + $0x228] sm:$0xf] %v7002_v30  ;;  %v7015_v35 = vld [vmem:[%s6818_s25 + $0x90] sm:$0xf]  ;;  %v1101_v36 = vrot.slane %v1099_v21, 4  ;;  %v1104_v37 = vrot.slane %v1102_v22, 5 }
  0x2e   : > { %3344 = vmatpush.bf16.msrb.mxu2 %v6506_v32  ;;  %3833 = vmatpush.bf16.msrb.mxu3 %v6418_v33  ;;  %v7005_v32 = vld [vmem:[%s6818_s25 + $0x64] sm:$0xf]  ;;  %v6501_v33 = vld [vmem:[%s8256_s1 + $0x150] sm:$0xff]  ;;  %1088 = vst [vmem:[#allocation2 + $0x288] sm:$0xf] %v7015_v35  ;;  %v6420_v21 = vld [vmem:[%s8256_s1 + $0x48] sm:$0xff] }
  0x2f   : > { %3255 = vmatpush.bf16.msrb.mxu1 %v6498_v38  ;;  %3922 = vmatpush.bf16.msrb.mxu0 %v6426_v39  ;;  %1081 = vst [vmem:[#allocation2 + $0x234] sm:$0xf] %v7005_v32  ;;  %v7019_v38 = vld [vmem:[%s6818_s25 + $0x94] sm:$0xf]  ;;  %v1112_v39 = vshrl.u32 %v6824_v4, 16 }
  0x30   : > { %1089 = vst [vmem:[#allocation2 + $0x294] sm:$0xf] %v7019_v38  ;;  %v5522_v61 = vld [vmem:[#allocation2 + $0x210] sm:$0xf]  ;;  %v6454_v62 = vld [vmem:[#allocation2 + $0x218] sm:$0xf0] }
  0x31   : > { %v1114_v56 = vrot.slane %v1112_v39, 4 }
  0x32   : > { %3345 = vmatpush.bf16.msrb.mxu2 %v6505_v42  ;;  %3834 = vmatpush.bf16.msrb.mxu3 %v6417_v43  ;;  %v7025_v42 = vld [vmem:[%s6818_s25 + $0xc0] sm:$0xf]  ;;  %v6493_v43 = vld [vmem:[%s8256_s1 + $0x110] sm:$0xff] }
  0x33   : > { %3256 = vmatpush.bf16.msrb.mxu1 %v6497_v46  ;;  %3923 = vmatpush.bf16.msrb.mxu0 %v6425_v49  ;;  %v1123_v46 = vshrl.u32 %v6859_v13, 16  ;;  %1096 = vst [vmem:[#allocation2 + $0x2e8] sm:$0xf] %v7025_v42  ;;  %v1126_v49 = vshll.u32 %v6859_v13, 16  ;;  %v6421_v13 = vld [vmem:[%s8256_s1 + $0x50] sm:$0xff] }
  0x35   : > { %v7053_v60 = vrot.slane %v1123_v46, 4 }
  0x36   : > { %3346 = vmatpush.bf16.msrb.mxu2 %v6504_v47  ;;  %3835 = vmatpush.bf16.msrb.mxu3 %v6416_v48  ;;  %v1105_v47 = vor.u32 %v1104_v37, %v1101_v36  ;;  %v7032_v48 = vld [vmem:[%s6818_s25 + $0xc4] sm:$0xf]  ;;  %v5288_v37 = vld [vmem:[%s6818_s25 + $0xc] sm:$0xe] }
  0x37   : > { %3257 = vmatpush.bf16.msrb.mxu1 %v6496_v54  ;;  %3924 = vmatpush.bf16.msrb.mxu0 %v6424_v55  ;;  %1097 = vst [vmem:[#allocation2 + $0x2f4] sm:$0xf] %v7032_v48  ;;  %v6500_v54 = vld [vmem:[%s8256_s1 + $0x148] sm:$0xff] }
  0x38   : > { %v6412_v55 = vld [vmem:[%s8256_s1 + $0x8] sm:$0xff]  ;;  %v1106_v22 = vrot.slane %v1105_v47, 4 }
  0x3a   : > { %3347 = vmatpush.bf16.msrb.mxu2 %v6503_v57  ;;  %3836 = vmatpush.bf16.msrb.mxu3 %v6415_v58  ;;  %v7043_v57 = vld [vmem:[#allocation2 + $0x1b0] sm:$0xf]  ;;  %v7045_v58 = vld [vmem:[#allocation2 + $0x1b8] sm:$0xf0] }
  0x3b   : > { %3258 = vmatpush.bf16.msrb.mxu1 %v6495_v2  ;;  %3925 = vmatpush.bf16.msrb.mxu0 %v6423_v7  ;;  %v5570_v2 = vld [vmem:[#allocation2 + $0x270] sm:$0xf]  ;;  %v6466_v7 = vld [vmem:[#allocation2 + $0x278] sm:$0xf0] }
  0x3c   : > { %3179 = vmatmul.bf16.gmra.mxu0 %v5463_v23  ;;  %3199 = vmatmul.bf16.gmra.mxu1 %v5511_v24  ;;  %v7065_v23 = vrot.slane %v1126_v49, 5  ;;  %v6491_v24 = vld [vmem:[%s8256_s1 + $0x100] sm:$0xff]  ;;  %v5304_v49 = vrot.slane %v5288_v37, 9  ;;  %v6434_v37 = vld [vmem:[%s8256_s1 + $0xb8] sm:$0xff] }
  0x3d   : > { %3219 = vmatmul.bf16.gmra.mxu2 %v5559_v27  ;;  %3239 = vmatmul.bf16.gmra.mxu3 %v5607_v28  ;;  %v1110_v27 = vrot.slane %v1108_v1, 5  ;;  %v5272_v28 = vld [vmem:[%s6818_s25 + $0x14] sm:$0x1]  ;;  %v258_v1 = vld [vmem:[%s6818_s25 + $0x8] sm:$0x1] }
  0x3e   : > { %3348 = vmatpush.bf16.msrb.mxu2 %v6502_v11  ;;  %3837 = vmatpush.bf16.msrb.mxu3 %v6414_v15  ;;  %v5618_v11 = vld [vmem:[#allocation2 + $0x2d0] sm:$0xf]  ;;  %v6478_v15 = vld [vmem:[#allocation2 + $0x2d8] sm:$0xf0]  ;;  %v1118_v36 = vshll.u32 %v5272_v28, 16  ;;  %v1599_v39 = vrot.slane %v5272_v28, 5 }
  0x3f   : > { %3259 = vmatpush.bf16.msrb.mxu1 %v6494_v29  ;;  %3926 = vmatpush.bf16.msrb.mxu0 %v6422_v3  ;;  %v1596_v29 = vrot.slane %v6824_v4, 5  ;;  %v5475_v3 = vor.u32 %v7045_v58, %v7043_v57  ;;  %v6419_v4 = vld [vmem:[%s8256_s1 + $0x40] sm:$0xff]  ;;  %v1111_v46 = vsel %vm7074_vm4, %v1106_v22, %v1110_v27  ;;  %v5619_v57 = vor.u32 %v6478_v15, %v5618_v11 }
  0x40   : > { %1514 = vst [vmem:[#allocation2 + $0x184] sm:$0xf] %v1111_v46  ;;  %v345_v15 = vshll.u32 %v258_v1, 16  ;;  %v6578_v46 = vld [vmem:[%s8256_s1 + $0x238] sm:$0xff] }
  0x42   : > { %3349 = vmatpush.bf16.msrb.mxu2 %v6501_v33  ;;  %3838 = vmatpush.bf16.msrb.mxu3 %v6413_v34  ;;  %v1115_v34 = vor.u32 %v1114_v56, %v1110_v27  ;;  %v5571_v56 = vor.u32 %v6466_v7, %v5570_v2  ;;  %v1136_v27 = vshrl.u32 %v6862_v14, 16 }
  0x43   : > { %3260 = vmatpush.bf16.msrb.mxu1 %v6493_v43  ;;  %3927 = vmatpush.bf16.msrb.mxu0 %v6421_v13  ;;  %v5523_v43 = vor.u32 %v6454_v62, %v5522_v61  ;;  %v1120_v13 = vrot.slane %v1118_v36, 5  ;;  %v1597_v61 = vsel %vm7085_vm5, %v5304_v49, %v1596_v29  ;;  %v6570_v36 = vld [vmem:[%s8256_s1 + $0x1f8] sm:$0xff]  ;;  %v5273_v49 = vld [vmem:[%s6818_s25 + $0x20] sm:$0x1] }
  0x44   : > { %v1116_v58 = vrot.slane %v1115_v34, 4  ;;  %1738 = vst [vmem:[#allocation2 + $0x188] sm:$0xf] %v1597_v61 }
  0x46   : > { %3350 = vmatpush.bf16.msrb.mxu2 %v6500_v54  ;;  %3839 = vmatpush.bf16.msrb.mxu3 %v6412_v55  ;;  %v1598_v54 = vrot.slane %v1596_v29, 4  ;;  %v226_v55 = vld [vmem:[%s6818_s25] sm:$0xf]  ;;  %v1121_v2 = vsel %vm7074_vm4, %v1116_v58, %v1120_v13  ;;  %v1142_v58 = vshll.u32 %v5273_v49, 16  ;;  %v1603_v13 = vrot.slane %v6862_v14, 5 }
  0x47   : > { %3261 = vmatpush.bf16.msrb.mxu1 %v6492_v59  ;;  %3928 = vmatpush.bf16.msrb.mxu0 %v6420_v21  ;;  %v7091_v59 = vld [vmem:[%s6818_s25 + $0x4] sm:$0xf]  ;;  %290 = vst [vmem:[#allocation2] sm:$0xf] %v226_v55 }
  0x48   : > { %v1600_v62 = vsel %vm7085_vm5, %v1598_v54, %v1599_v39  ;;  %v335_v7 = vshll.u32 %v7091_v59, 16  ;;  %v339_v11 = vshrl.u32 %v7091_v59, 16  ;;  %1515 = vst [vmem:[#allocation2 + $0x190] sm:$0xf] %v1121_v2  ;;  %v1129_v39 = vor.u32 %v7065_v23, %v7053_v60 }
  0x49   : > { %1739 = vst [vmem:[#allocation2 + $0x194] sm:$0xf] %v1600_v62  ;;  %v1147_v60 = vshrl.u32 %v6912_v40, 16  ;;  %v5289_v62 = vld [vmem:[%s6818_s25 + $0x18] sm:$0xe]  ;;  %v1144_v2 = vrot.slane %v1142_v58, 5 }
  0x4a   : > { %3351 = vmatpush.bf16.msrb.mxu2 %v6499_v63  ;;  %3840 = vmatpush.bf16.msrb.mxu3 %v6411_v0  ;;  %v326_v63 = vshrl.u32 %v226_v55, 16  ;;  %v329_v0 = vshll.u32 %v226_v55, 16  ;;  %v337_v28 = vrot.slane %v335_v7, 5  ;;  %v341_v29 = vrot.slane %v339_v11, 4  ;;  %291 = vst [vmem:[#allocation2 + $0xc] sm:$0xf] %v7091_v59 }
  0x4b   : > { %3262 = vmatpush.bf16.msrb.mxu1 %v6491_v24  ;;  %v1132_v24 = vshll.u32 %v6862_v14, 16  ;;  %3929 = vmatpush.bf16.msrb.mxu0 %v6419_v4  ;;  %v347_v4 = vrot.slane %v345_v15, 5  ;;  %v1138_v55 = vrot.slane %v1136_v27, 4  ;;  %v5305_v7 = vrot.slane %v5289_v62, 9  ;;  %v228_v11 = vld [vmem:[%s6818_s25 + $0xc] sm:$0xf] }
  0x4c   : > { %3184 = vmatmul.bf16.gmra.mxu0 %v5475_v3  ;;  %3204 = vmatmul.bf16.gmra.mxu1 %v5523_v43  ;;  %v328_v21 = vrot.slane %v326_v63, 4  ;;  %v331_v22 = vrot.slane %v329_v0, 5  ;;  %v6562_v3 = vld [vmem:[%s8256_s1 + $0x1b8] sm:$0xff]  ;;  %v342_v43 = vor.u32 %v341_v29, %v337_v28  ;;  %v1606_v63 = vrot.slane %v5273_v49, 5  ;;  %v5486_v15 = vld [vmem:[#allocation2 + $0x1c8] sm:$0xf] }
  0x4d   : > { %3224 = vmatmul.bf16.gmra.mxu2 %v5571_v56  ;;  %3244 = vmatmul.bf16.gmra.mxu3 %v5619_v57  ;;  %v1134_v54 = vrot.slane %v1132_v24, 5  ;;  %v1130_v57 = vrot.slane %v1129_v39, 4  ;;  %v6445_v14 = vld [vmem:[#allocation2 + $0x1d0] sm:$0xf0]  ;;  %v1605_v29 = vrot.slane %v1603_v13, 4  ;;  %v1150_v39 = vshll.u32 %v6912_v40, 16 }
  0x4e   : > { %v332_v34 = vor.u32 %v331_v22, %v328_v21  ;;  %4614 = vmatpush.bf16.msra.mxu2 %v6562_v3  ;;  %4703 = vmatpush.bf16.msra.mxu3 %v6570_v36  ;;  %v343_v23 = vrot.slane %v342_v43, 4  ;;  %v5534_v21 = vld [vmem:[#allocation2 + $0x228] sm:$0xf]  ;;  %v6457_v22 = vld [vmem:[#allocation2 + $0x230] sm:$0xf0]  ;;  %v1604_v36 = vsel %vm7085_vm5, %v5305_v7, %v1603_v13  ;;  %v350_v49 = vshrl.u32 %v228_v11, 16 }
  0x4f   : > { %4011 = vmatpush.bf16.msra.mxu1 %v6434_v37  ;;  %4792 = vmatpush.bf16.msra.mxu0 %v6578_v46  ;;  %v1139_v61 = vor.u32 %v1138_v55, %v1134_v54  ;;  %v1135_v1 = vsel %vm7074_vm4, %v1130_v57, %v1134_v54  ;;  %v5630_v3 = vld [vmem:[#allocation2 + $0x2e8] sm:$0xf]  ;;  %v7133_v37 = vld [vmem:[%s6818_s25 + $0x10] sm:$0xf]  ;;  %v6481_v43 = vld [vmem:[#allocation2 + $0x2f0] sm:$0xf0] }
  0x50   : > { %v333_v56 = vrot.slane %v332_v34, 4  ;;  %v348_v24 = vsel %vm7074_vm4, %v343_v23, %v347_v4  ;;  %v5582_v34 = vld [vmem:[#allocation2 + $0x288] sm:$0xf]  ;;  %1516 = vst [vmem:[#allocation2 + $0x19c] sm:$0xf] %v1135_v1  ;;  %v1607_v4 = vsel %vm7085_vm5, %v1605_v29, %v1606_v63  ;;  %v353_v54 = vshll.u32 %v228_v11, 16 }
  0x51   : > { %v1140_v27 = vrot.slane %v1139_v61, 4  ;;  %742 = vst [vmem:[#allocation2 + $0x10] sm:$0xf] %v348_v24  ;;  %v259_v55 = vld [vmem:[%s6818_s25 + $0x14] sm:$0x1]  ;;  %v1149_v57 = vrot.slane %v1147_v60, 4  ;;  %v5487_v23 = vor.u32 %v6445_v14, %v5486_v15  ;;  %v5535_v61 = vor.u32 %v6457_v22, %v5534_v21 }
  0x52   : > { %v338_v0 = vsel %vm7074_vm4, %v333_v56, %v337_v28  ;;  %v6469_v28 = vld [vmem:[#allocation2 + $0x290] sm:$0xf0]  ;;  %v359_v56 = vshll.u32 %v7133_v37, 16  ;;  %1740 = vst [vmem:[#allocation2 + $0x1a0] sm:$0xf] %v1604_v36  ;;  %v352_v58 = vrot.slane %v350_v49, 4 }
  0x53   : > { %741 = vst [vmem:[#allocation2 + $0x4] sm:$0xf] %v338_v0  ;;  %v1145_v46 = vsel %vm7074_vm4, %v1140_v27, %v1144_v2  ;;  %v363_v13 = vshrl.u32 %v7133_v37, 16  ;;  %v369_v40 = vshll.u32 %v259_v55, 16  ;;  %v355_v62 = vrot.slane %v353_v54, 5 }
  0x54   : > { %1517 = vst [vmem:[#allocation2 + $0x1a8] sm:$0xf] %v1145_v46  ;;  %v361_v0 = vrot.slane %v359_v56, 5  ;;  %v1152_v1 = vrot.slane %v1150_v39, 5  ;;  %v5583_v63 = vor.u32 %v6469_v28, %v5582_v34  ;;  %v5631_v2 = vor.u32 %v6481_v43, %v5630_v3  ;;  %v230_v29 = vld [vmem:[%s6818_s25 + $0x18] sm:$0xf] }
  0x55   : > { %1741 = vst [vmem:[#allocation2 + $0x1ac] sm:$0xf] %v1607_v4  ;;  %v365_v7 = vrot.slane %v363_v13, 4  ;;  %v356_v60 = vor.u32 %v355_v62, %v352_v58  ;;  %v1156_v24 = vshll.u32 %v6915_v41, 16  ;;  %v1160_v27 = vshrl.u32 %v6915_v41, 16 }
  0x56   : > { %292 = vst [vmem:[#allocation2 + $0x18] sm:$0xf] %v228_v11  ;;  %v371_v14 = vrot.slane %v369_v40, 5  ;;  %v5274_v28 = vld [vmem:[%s6818_s25 + $0x2c] sm:$0x1]  ;;  %v1153_v3 = vor.u32 %v1152_v1, %v1149_v57  ;;  %v374_v4 = vshrl.u32 %v230_v29, 16 }
  0x57   : > { %293 = vst [vmem:[#allocation2 + $0x24] sm:$0xf] %v7133_v37  ;;  %v366_v15 = vor.u32 %v365_v7, %v361_v0  ;;  %v357_v21 = vrot.slane %v356_v60, 4  ;;  %v1158_v22 = vrot.slane %v1156_v24, 5  ;;  %v1162_v34 = vrot.slane %v1160_v27, 4 }
  0x58   : > { %294 = vst [vmem:[#allocation2 + $0x30] sm:$0xf] %v230_v29  ;;  %v7149_v36 = vld [vmem:[%s6818_s25 + $0x1c] sm:$0xf]  ;;  %v1166_v46 = vshll.u32 %v5274_v28, 16  ;;  %v1154_v54 = vrot.slane %v1153_v3, 4 }
  0x59   : > { %v367_v11 = vrot.slane %v366_v15, 4  ;;  %v362_v39 = vsel %vm7074_vm4, %v357_v21, %v361_v0  ;;  %v1163_v43 = vor.u32 %v1162_v34, %v1158_v22  ;;  %295 = vst [vmem:[#allocation2 + $0x3c] sm:$0xf] %v7149_v36  ;;  %v1610_v55 = vrot.slane %v6915_v41, 5  ;;  %v5290_v40 = vld [vmem:[%s6818_s25 + $0x24] sm:$0xe] }
  0x5a   : > { %743 = vst [vmem:[#allocation2 + $0x1c] sm:$0xf] %v362_v39  ;;  %v1168_v57 = vrot.slane %v1166_v46, 5  ;;  %v1171_v58 = vshrl.u32 %v6986_v18, 16  ;;  %v1159_v13 = vsel %vm7074_vm4, %v1154_v54, %v1158_v22  ;;  %v5306_v0 = vrot.slane %v5290_v40, 9 }
  0x5b   : > { %v372_v49 = vsel %vm7074_vm4, %v367_v11, %v371_v14  ;;  %v1164_v56 = vrot.slane %v1163_v43, 4  ;;  %1518 = vst [vmem:[#allocation2 + $0x1b4] sm:$0xf] %v1159_v13  ;;  %v376_v1 = vrot.slane %v374_v4, 4  ;;  %v5452_v41 = vld [vmem:[#allocation2 + $0x18c] sm:$0xf0] }
  0x5c   : > { %3189 = vmatmul.bf16.gmra.mxu0 %v5487_v23  ;;  %3209 = vmatmul.bf16.gmra.mxu1 %v5535_v61  ;;  %744 = vst [vmem:[#allocation2 + $0x28] sm:$0xf] %v372_v49  ;;  %v1612_v23 = vrot.slane %v1610_v55, 4  ;;  %v1613_v61 = vrot.slane %v5274_v28, 5  ;;  %v6363_v7 = vld [vmem:[#allocation2 + $0x4] sm:$0xf]  ;;  %v1611_v34 = vsel %vm7085_vm5, %v5306_v0, %v1610_v55 }
  0x5d   : > { %3229 = vmatmul.bf16.gmra.mxu2 %v5583_v63  ;;  %3249 = vmatmul.bf16.gmra.mxu3 %v5631_v2  ;;  %v1169_v62 = vsel %vm7074_vm4, %v1164_v56, %v1168_v57  ;;  %v260_v63 = vld [vmem:[%s6818_s25 + $0x20] sm:$0x1]  ;;  %v6435_v2 = vld [vmem:[#allocation2 + $0x184] sm:$0xf]  ;;  %v377_v24 = vshll.u32 %v230_v29, 16  ;;  %v383_v27 = vshll.u32 %v7149_v36, 16 }
  0x5e   : > { %1519 = vst [vmem:[#allocation2 + $0x1c0] sm:$0xf] %v1169_v62  ;;  %v1614_v60 = vsel %vm7085_vm5, %v1612_v23, %v1613_v61  ;;  %v387_v15 = vshrl.u32 %v7149_v36, 16  ;;  %v1174_v14 = vshll.u32 %v6986_v18, 16  ;;  %v5738_v21 = vld [vmem:[#allocation2] sm:$0xf]  ;;  %v5455_v57 = vor.u32 %v6435_v2, %v5452_v41 }
  0x5f   : > { %v5740_v22 = vld [vmem:[#allocation2 + $0xc] sm:$0xf0]  ;;  %1743 = vst [vmem:[#allocation2 + $0x1c4] sm:$0xf] %v1614_v60  ;;  %v393_v11 = vshll.u32 %v260_v63, 16  ;;  %v379_v28 = vrot.slane %v377_v24, 5 }
  0x60   : > { %1742 = vst [vmem:[#allocation2 + $0x1b8] sm:$0xf] %v1611_v34  ;;  %v385_v3 = vrot.slane %v383_v27, 5  ;;  %v389_v39 = vrot.slane %v387_v15, 4  ;;  %v5458_v43 = vld [vmem:[#allocation2 + $0x188] sm:$0xf]  ;;  %v5743_v13 = vor.u32 %v6363_v7, %v5740_v22 }
  0x61   : > { %v6437_v29 = vld [vmem:[#allocation2 + $0x190] sm:$0xf0]  ;;  %v6364_v46 = vld [vmem:[#allocation2 + $0x8] sm:$0xf0]  ;;  %v380_v4 = vor.u32 %v379_v28, %v376_v1  ;;  %v395_v54 = vrot.slane %v393_v11, 5  ;;  %v1173_v56 = vrot.slane %v1171_v58, 4 }
  0x62   : > { %v390_v49 = vor.u32 %v389_v39, %v385_v3  ;;  %v1176_v18 = vrot.slane %v1174_v14, 5  ;;  %v5459_v40 = vor.u32 %v6437_v29, %v5458_v43  ;;  %v5739_v55 = vor.u32 %v6364_v46, %v5738_v21  ;;  %v232_v62 = vld [vmem:[%s6818_s25 + $0x24] sm:$0xf]  ;;  %v7180_v41 = vld [vmem:[%s6818_s25 + $0x28] sm:$0xf]  ;;  %v6561_v7 = vld [vmem:[%s8256_s1 + $0x1b0] sm:$0xff] }
  0x63   : > { %v381_v23 = vrot.slane %v380_v4, 4  ;;  %v1195_v0 = vshrl.u32 %v6827_v5, 16  ;;  %296 = vst [vmem:[#allocation2 + $0x48] sm:$0xf] %v232_v62  ;;  %v1180_v58 = vshll.u32 %v6991_v25, 16  ;;  %v1184_v2 = vshrl.u32 %v6991_v25, 16  ;;  %4615 = vmatpush.bf16.msra.mxu2 %v6561_v7 }
  0x64   : > { %v391_v61 = vrot.slane %v390_v49, 4  ;;  %v6569_v60 = vld [vmem:[%s8256_s1 + $0x1f0] sm:$0xff]  ;;  %v1177_v27 = vor.u32 %v1176_v18, %v1173_v56  ;;  %v398_v15 = vshrl.u32 %v232_v62, 16  ;;  %v5275_v21 = vld [vmem:[%s6818_s25 + $0x38] sm:$0x1]  ;;  %v1617_v11 = vrot.slane %v6991_v25, 5 }
  0x65   : > { %v386_v63 = vsel %vm7074_vm4, %v381_v23, %v385_v3  ;;  %v6433_v24 = vld [vmem:[%s8256_s1 + $0xb0] sm:$0xff]  ;;  %v1182_v22 = vrot.slane %v1180_v58, 5  ;;  %v1186_v34 = vrot.slane %v1184_v2, 4  ;;  %4704 = vmatpush.bf16.msra.mxu3 %v6569_v60  ;;  %v1190_v3 = vshll.u32 %v5275_v21, 16  ;;  %297 = vst [vmem:[#allocation2 + $0x54] sm:$0xf] %v7180_v41 }
  0x66   : > { %v396_v1 = vsel %vm7074_vm4, %v391_v61, %v395_v54  ;;  %745 = vst [vmem:[#allocation2 + $0x34] sm:$0xf] %v386_v63  ;;  %v6577_v14 = vld [vmem:[%s8256_s1 + $0x230] sm:$0xff]  ;;  %v1178_v28 = vrot.slane %v1177_v27, 4  ;;  %4012 = vmatpush.bf16.msra.mxu1 %v6433_v24  ;;  %v1619_v46 = vrot.slane %v1617_v11, 4  ;;  %v1620_v4 = vrot.slane %v5275_v21, 5 }
  0x67   : > { %746 = vst [vmem:[#allocation2 + $0x40] sm:$0xf] %v396_v1  ;;  %v5291_v39 = vld [vmem:[%s6818_s25 + $0x30] sm:$0xe]  ;;  %4793 = vmatpush.bf16.msra.mxu0 %v6577_v14  ;;  %v1187_v43 = vor.u32 %v1186_v34, %v1182_v22  ;;  %v1192_v54 = vrot.slane %v1190_v3, 5  ;;  %v400_v56 = vrot.slane %v398_v15, 4 }
  0x68   : > { %v5307_v29 = vrot.slane %v5291_v39, 9  ;;  %v1183_v49 = vsel %vm7074_vm4, %v1178_v28, %v1182_v22  ;;  %v401_v25 = vshll.u32 %v232_v62, 16  ;;  %v261_v18 = vld [vmem:[%s6818_s25 + $0x2c] sm:$0x1]  ;;  %v6438_v23 = vld [vmem:[#allocation2 + $0x19c] sm:$0xf] }
  0x69   : > { %1520 = vst [vmem:[#allocation2 + $0x1cc] sm:$0xf] %v1183_v49  ;;  %v5464_v61 = vld [vmem:[#allocation2 + $0x1a4] sm:$0xf0]  ;;  %v411_v1 = vshrl.u32 %v7180_v41, 16  ;;  %v417_v60 = vshll.u32 %v261_v18, 16 }
  0x6a   : > { %v403_v63 = vrot.slane %v401_v25, 5  ;;  %v5470_v58 = vld [vmem:[#allocation2 + $0x1a0] sm:$0xf]  ;;  %v6366_v2 = vld [vmem:[#allocation2 + $0x1c] sm:$0xf]  ;;  %v1198_v24 = vshll.u32 %v6827_v5, 16  ;;  %v5467_v39 = vor.u32 %v6438_v23, %v5464_v61 }
  0x6b   : > { %v5752_v27 = vld [vmem:[#allocation2 + $0x24] sm:$0xf0]  ;;  %v413_v14 = vrot.slane %v411_v1, 4  ;;  %v6440_v21 = vld [vmem:[#allocation2 + $0x1a8] sm:$0xf0]  ;;  %v419_v3 = vrot.slane %v417_v60, 5 }
  0x6c   : > { %3263 = vmatmul.bf16.vlgmr.msrb.gmra.mxu1 %v5455_v57  ;;  %3930 = vmatmul.bf16.vlgmr.msrb.gmra.mxu0 %v5743_v13  ;;  %v1188_v57 = vrot.slane %v1187_v43, 4  ;;  %v1618_v13 = vsel %vm7085_vm5, %v5307_v29, %v1617_v11  ;;  %v404_v15 = vor.u32 %v403_v63, %v400_v56  ;;  %v5750_v22 = vld [vmem:[#allocation2 + $0x18] sm:$0xf]  ;;  %v6367_v34 = vld [vmem:[#allocation2 + $0x20] sm:$0xf0]  ;;  %v5755_v43 = vor.u32 %v6366_v2, %v5752_v27 }
  0x6d   : > { %3352 = vmatmul.bf16.vlgmr.msrb.gmra.mxu2 %v5459_v40  ;;  %3841 = vmatmul.bf16.vlgmr.msrb.gmra.mxu3 %v5739_v55  ;;  %v1621_v40 = vsel %vm7085_vm5, %v1619_v46, %v1620_v4  ;;  %v407_v55 = vshll.u32 %v7180_v41, 16  ;;  %1744 = vst [vmem:[#allocation2 + $0x1d0] sm:$0xf] %v1618_v13  ;;  %v5471_v29 = vor.u32 %v6440_v21, %v5470_v58  ;;  %v1200_v56 = vrot.slane %v1198_v24, 5  ;;  %v234_v13 = vld [vmem:[%s6818_s25 + $0x30] sm:$0xf] }
  0x6e   : > { %v1193_v62 = vsel %vm7074_vm4, %v1188_v57, %v1192_v54  ;;  %1745 = vst [vmem:[#allocation2 + $0x1dc] sm:$0xf] %v1621_v40  ;;  %v405_v11 = vrot.slane %v404_v15, 4  ;;  %v5751_v46 = vor.u32 %v6367_v34, %v5750_v22  ;;  %v1197_v54 = vrot.slane %v1195_v0, 4  ;;  %v7220_v40 = vld [vmem:[%s6818_s25 + $0x34] sm:$0xf] }
  0x6f   : > { %v409_v7 = vrot.slane %v407_v55, 5  ;;  %1521 = vst [vmem:[#allocation2 + $0x1d8] sm:$0xf] %v1193_v62  ;;  %v1204_v18 = vshll.u32 %v6832_v6, 16  ;;  %v1208_v57 = vshrl.u32 %v6832_v6, 16  ;;  %v1624_v63 = vrot.slane %v6832_v6, 5 }
  0x70   : > { %v5276_v5 = vld [vmem:[%s6818_s25 + $0x44] sm:$0x1]  ;;  %298 = vst [vmem:[#allocation2 + $0x60] sm:$0xf] %v234_v13  ;;  %v1201_v23 = vor.u32 %v1200_v56, %v1197_v54  ;;  %v422_v1 = vshrl.u32 %v234_v13, 16  ;;  %v425_v62 = vshll.u32 %v234_v13, 16 }
  0x71   : > { %v414_v28 = vor.u32 %v413_v14, %v409_v7  ;;  %v410_v4 = vsel %vm7074_vm4, %v405_v11, %v409_v7  ;;  %v1206_v0 = vrot.slane %v1204_v18, 5  ;;  %v1210_v55 = vrot.slane %v1208_v57, 4  ;;  %299 = vst [vmem:[#allocation2 + $0x6c] sm:$0xf] %v7220_v40  ;;  %v5292_v2 = vld [vmem:[%s6818_s25 + $0x3c] sm:$0xe] }
  0x72   : > { %747 = vst [vmem:[#allocation2 + $0x4c] sm:$0xf] %v410_v4  ;;  %v1214_v61 = vshll.u32 %v5276_v5, 16  ;;  %v431_v7 = vshll.u32 %v7220_v40, 16  ;;  %v1202_v60 = vrot.slane %v1201_v23, 4  ;;  %v5308_v27 = vrot.slane %v5292_v2, 9 }
  0x73   : > { %v415_v49 = vrot.slane %v414_v28, 4  ;;  %v1211_v58 = vor.u32 %v1210_v55, %v1206_v0  ;;  %v1626_v15 = vrot.slane %v1624_v63, 4  ;;  %v262_v14 = vld [vmem:[%s6818_s25 + $0x38] sm:$0x1]  ;;  %v1627_v22 = vrot.slane %v5276_v5, 5 }
  0x74   : > { %v1216_v24 = vrot.slane %v1214_v61, 5  ;;  %v424_v34 = vrot.slane %v422_v1, 4  ;;  %v427_v11 = vrot.slane %v425_v62, 5  ;;  %v1207_v6 = vsel %vm7074_vm4, %v1202_v60, %v1206_v0  ;;  %v6443_v56 = vld [vmem:[#allocation2 + $0x1c0] sm:$0xf0] }
  0x75   : > { %v420_v25 = vsel %vm7074_vm4, %v415_v49, %v419_v3  ;;  %v1212_v21 = vrot.slane %v1211_v58, 4  ;;  %v1625_v28 = vsel %vm7085_vm5, %v5308_v27, %v1624_v63  ;;  %v433_v3 = vrot.slane %v431_v7, 5  ;;  %1522 = vst [vmem:[#allocation2 + $0x1e4] sm:$0xf] %v1207_v6  ;;  %v6370_v18 = vld [vmem:[#allocation2 + $0x38] sm:$0xf0] }
  0x76   : > { %748 = vst [vmem:[#allocation2 + $0x58] sm:$0xf] %v420_v25  ;;  %v1628_v4 = vsel %vm7085_vm5, %v1626_v15, %v1627_v22  ;;  %v428_v49 = vor.u32 %v427_v11, %v424_v34  ;;  %v441_v54 = vshll.u32 %v262_v14, 16  ;;  %v5762_v25 = vld [vmem:[#allocation2 + $0x30] sm:$0xf]  ;;  %v1219_v5 = vshrl.u32 %v6870_v16, 16 }
  0x77   : > { %v6369_v57 = vld [vmem:[#allocation2 + $0x34] sm:$0xf]  ;;  %v5764_v0 = vld [vmem:[#allocation2 + $0x3c] sm:$0xf0]  ;;  %1746 = vst [vmem:[#allocation2 + $0x1e8] sm:$0xf] %v1625_v28 }
  0x78   : > { %v429_v55 = vrot.slane %v428_v49, 4  ;;  %v1222_v23 = vshll.u32 %v6870_v16, 16  ;;  %v5482_v61 = vld [vmem:[#allocation2 + $0x1b8] sm:$0xf]  ;;  %1747 = vst [vmem:[#allocation2 + $0x1f4] sm:$0xf] %v1628_v4  ;;  %v5767_v62 = vor.u32 %v6369_v57, %v5764_v0 }
  0x79   : > { %v443_v1 = vrot.slane %v441_v54, 5  ;;  %v5483_v60 = vor.u32 %v6443_v56, %v5482_v61  ;;  %v236_v27 = vld [vmem:[%s6818_s25 + $0x3c] sm:$0xf]  ;;  %v1221_v15 = vrot.slane %v1219_v5, 4  ;;  %v1232_v22 = vshrl.u32 %v6873_v17, 16  ;;  %v6560_v6 = vld [vmem:[%s8256_s1 + $0x1a8] sm:$0xff] }
  0x7a   : > { %v434_v58 = vsel %vm7074_vm4, %v429_v55, %v433_v3  ;;  %v1224_v14 = vrot.slane %v1222_v23, 5  ;;  %300 = vst [vmem:[#allocation2 + $0x78] sm:$0xf] %v236_v27  ;;  %v446_v34 = vshrl.u32 %v236_v27, 16  ;;  %v449_v11 = vshll.u32 %v236_v27, 16  ;;  %v6568_v28 = vld [vmem:[%s8256_s1 + $0x1e8] sm:$0xff]  ;;  %4616 = vmatpush.bf16.msra.mxu2 %v6560_v6 }
  0x7b   : > { %749 = vst [vmem:[#allocation2 + $0x64] sm:$0xf] %v434_v58  ;;  %v1631_v4 = vrot.slane %v6873_v17, 5  ;;  %4705 = vmatpush.bf16.msra.mxu3 %v6568_v28  ;;  %v263_v55 = vld [vmem:[%s6818_s25 + $0x44] sm:$0x1]  ;;  %v6432_v23 = vld [vmem:[%s8256_s1 + $0xa8] sm:$0xff] }
  0x7c   : > { %3268 = vmatmul.bf16.gmra.mxu1 %v5467_v39  ;;  %3935 = vmatmul.bf16.gmra.mxu0 %v5755_v43  ;;  %v435_v39 = vshrl.u32 %v7220_v40, 16  ;;  %v6441_v43 = vld [vmem:[#allocation2 + $0x1b4] sm:$0xf]  ;;  %v448_v49 = vrot.slane %v446_v34, 4  ;;  %v5774_v34 = vld [vmem:[#allocation2 + $0x48] sm:$0xf] }
  0x7d   : > { %3357 = vmatmul.bf16.gmra.mxu2 %v5471_v29  ;;  %3846 = vmatmul.bf16.gmra.mxu3 %v5751_v46  ;;  %v5476_v29 = vld [vmem:[#allocation2 + $0x1bc] sm:$0xf0]  ;;  %v1217_v46 = vsel %vm7074_vm4, %v1212_v21, %v1216_v24  ;;  %v5763_v24 = vor.u32 %v6370_v18, %v5762_v25  ;;  %v1228_v21 = vshll.u32 %v6873_v17, 16  ;;  %v5293_v25 = vld [vmem:[%s6818_s25 + $0x48] sm:$0xe]  ;;  %v451_v18 = vrot.slane %v449_v11, 5 }
  0x7e   : > { %1523 = vst [vmem:[#allocation2 + $0x1f0] sm:$0xf] %v1217_v46  ;;  %v437_v13 = vrot.slane %v435_v39, 4  ;;  %v5479_v2 = vor.u32 %v6441_v43, %v5476_v29  ;;  %v1234_v39 = vrot.slane %v1232_v22, 4  ;;  %v7253_v43 = vld [vmem:[%s6818_s25 + $0x40] sm:$0xf]  ;;  %v1225_v46 = vor.u32 %v1224_v14, %v1221_v15  ;;  %4013 = vmatpush.bf16.msra.mxu1 %v6432_v23 }
  0x7f   : > { %8270 = vst [vmem:[#allocation3_spill] sm:$0xff] %v7253_v43  ;;  %v5277_v29 = vld [vmem:[%s6818_s25 + $0x50] sm:$0x1]  ;;  %v1633_v5 = vrot.slane %v1631_v4, 4  ;;  %v6576_v17 = vld [vmem:[%s8256_s1 + $0x228] sm:$0xff]  ;;  %v455_v58 = vshll.u32 %v7253_v43, 16 }
  0x80   : > { %v438_v63 = vor.u32 %v437_v13, %v433_v3  ;;  %v1230_v3 = vrot.slane %v1228_v21, 5  ;;  %301 = vst [vmem:[#allocation2 + $0x84] sm:$0xf] %v7253_v43  ;;  %v1238_v56 = vshll.u32 %v5277_v29, 16  ;;  %v1226_v57 = vrot.slane %v1225_v46, 4  ;;  %4794 = vmatpush.bf16.msra.mxu0 %v6576_v17 }
  0x81   : > { %v5309_v13 = vrot.slane %v5293_v25, 9  ;;  %v1634_v0 = vrot.slane %v5277_v29, 5  ;;  %v5488_v21 = vld [vmem:[#allocation2 + $0x1d4] sm:$0xf0]  ;;  %v5494_v22 = vld [vmem:[#allocation2 + $0x1d0] sm:$0xf] }
  0x82   : > { %v439_v7 = vrot.slane %v438_v63, 4  ;;  %v1235_v54 = vor.u32 %v1234_v39, %v1230_v3  ;;  %v1240_v63 = vrot.slane %v1238_v56, 5  ;;  %v6373_v11 = vld [vmem:[#allocation2 + $0x50] sm:$0xf0]  ;;  %v465_v28 = vshll.u32 %v263_v55, 16 }
  0x83   : > { %v1635_v15 = vsel %vm7085_vm5, %v1633_v5, %v1634_v0  ;;  %v5776_v39 = vld [vmem:[#allocation2 + $0x54] sm:$0xf0]  ;;  %v1246_v46 = vshll.u32 %v6926_v44, 16  ;;  %v238_v5 = vld [vmem:[%s6818_s25 + $0x48] sm:$0xf]  ;;  %v1256_v17 = vshrl.u32 %v6929_v45, 16 }
  0x84   : > { %v444_v16 = vsel %vm7074_vm4, %v439_v7, %v443_v1  ;;  %v1236_v61 = vrot.slane %v1235_v54, 4  ;;  %v452_v1 = vor.u32 %v451_v18, %v448_v49  ;;  %v1632_v7 = vsel %vm7085_vm5, %v5309_v13, %v1631_v4  ;;  %v6446_v4 = vld [vmem:[#allocation2 + $0x1d8] sm:$0xf0]  ;;  %1749 = vst [vmem:[#allocation2 + $0x20c] sm:$0xf] %v1635_v15 }
  0x85   : > { %750 = vst [vmem:[#allocation2 + $0x70] sm:$0xf] %v444_v16  ;;  %v457_v16 = vrot.slane %v455_v58, 5  ;;  %v467_v54 = vrot.slane %v465_v28, 5  ;;  %v5775_v13 = vor.u32 %v6373_v11, %v5774_v34  ;;  %v1248_v55 = vrot.slane %v1246_v46, 5 }
  0x86   : > { %v1241_v27 = vsel %vm7074_vm4, %v1236_v61, %v1240_v63  ;;  %v453_v14 = vrot.slane %v452_v1, 4  ;;  %1748 = vst [vmem:[#allocation2 + $0x200] sm:$0xf] %v1632_v7  ;;  %v470_v61 = vshrl.u32 %v238_v5, 16  ;;  %v473_v63 = vshll.u32 %v238_v5, 16 }
  0x87   : > { %1525 = vst [vmem:[#allocation2 + $0x208] sm:$0xf] %v1241_v27  ;;  %v5278_v1 = vld [vmem:[%s6818_s25 + $0x5c] sm:$0x1]  ;;  %v5294_v15 = vld [vmem:[%s6818_s25 + $0x54] sm:$0xe] }
  0x88   : > { %v458_v29 = vsel %vm7074_vm4, %v453_v14, %v457_v16  ;;  %302 = vst [vmem:[#allocation2 + $0x90] sm:$0xf] %v238_v5  ;;  %v472_v14 = vrot.slane %v470_v61, 4  ;;  %v5310_v11 = vrot.slane %v5294_v15, 9  ;;  %v5506_v5 = vld [vmem:[#allocation2 + $0x1e8] sm:$0xf] }
  0x89   : > { %751 = vst [vmem:[#allocation2 + $0x7c] sm:$0xf] %v458_v29 }
  0x8c   : > { %3273 = vmatmul.bf16.gmra.mxu1 %v5479_v2  ;;  %3940 = vmatmul.bf16.gmra.mxu0 %v5767_v62  ;;  %v1243_v2 = vshrl.u32 %v6926_v44, 16  ;;  %v1231_v62 = vsel %vm7074_vm4, %v1226_v57, %v1230_v3  ;;  %v6372_v3 = vld [vmem:[#allocation2 + $0x4c] sm:$0xf]  ;;  %v5495_v57 = vor.u32 %v6446_v4, %v5494_v22  ;;  %v1252_v44 = vshll.u32 %v6929_v45, 16  ;;  %v5788_v61 = vld [vmem:[#allocation2 + $0x6c] sm:$0xf0] }
  0x8d   : > { %3362 = vmatmul.bf16.gmra.mxu2 %v5483_v60  ;;  %3851 = vmatmul.bf16.gmra.mxu3 %v5763_v24  ;;  %v459_v60 = vshrl.u32 %v7253_v43, 16  ;;  %v6444_v24 = vld [vmem:[#allocation2 + $0x1cc] sm:$0xf]  ;;  %1524 = vst [vmem:[#allocation2 + $0x1fc] sm:$0xf] %v1231_v62  ;;  %v5779_v25 = vor.u32 %v6372_v3, %v5776_v39  ;;  %v1641_v3 = vrot.slane %v5278_v1, 5 }
  0x8e   : > { %v5491_v56 = vor.u32 %v6444_v24, %v5488_v21  ;;  %v1245_v0 = vrot.slane %v1243_v2, 4  ;;  %v1254_v58 = vrot.slane %v1252_v44, 5  ;;  %v1258_v2 = vrot.slane %v1256_v17, 4  ;;  %v7287_v62 = vld [vmem:[%s6818_s25 + $0x4c] sm:$0xf] }
  0x8f   : > { %v461_v6 = vrot.slane %v459_v60, 4  ;;  %8271 = vst [vmem:[#allocation4_spill] sm:$0xff] %v7287_v62  ;;  %v1262_v60 = vshll.u32 %v5278_v1, 16  ;;  %v1638_v24 = vrot.slane %v6929_v45, 5  ;;  %v264_v21 = vld [vmem:[%s6818_s25 + $0x50] sm:$0x1] }
  0x90   : > { %v1249_v7 = vor.u32 %v1248_v55, %v1245_v0  ;;  %303 = vst [vmem:[#allocation2 + $0x9c] sm:$0xf] %v7287_v62  ;;  %v1259_v27 = vor.u32 %v1258_v2, %v1254_v58  ;;  %v479_v29 = vshll.u32 %v7287_v62, 16  ;;  %v483_v4 = vshrl.u32 %v7287_v62, 16  ;;  %v5786_v0 = vld [vmem:[#allocation2 + $0x60] sm:$0xf] }
  0x91   : > { %v462_v49 = vor.u32 %v461_v6, %v457_v16  ;;  %v475_v16 = vrot.slane %v473_v63, 5  ;;  %v1264_v34 = vrot.slane %v1262_v60, 5  ;;  %v1640_v6 = vrot.slane %v1638_v24, 4  ;;  %v6376_v55 = vld [vmem:[#allocation2 + $0x68] sm:$0xf0] }
  0x92   : > { %v1250_v22 = vrot.slane %v1249_v7, 4  ;;  %v1260_v28 = vrot.slane %v1259_v27, 4  ;;  %v1639_v45 = vsel %vm7085_vm5, %v5310_v11, %v1638_v24  ;;  %v485_v44 = vrot.slane %v483_v4, 4  ;;  %v6375_v17 = vld [vmem:[#allocation2 + $0x64] sm:$0xf] }
  0x93   : > { %v463_v18 = vrot.slane %v462_v49, 4  ;;  %v476_v39 = vor.u32 %v475_v16, %v472_v14  ;;  %v489_v49 = vshll.u32 %v264_v21, 16  ;;  %1750 = vst [vmem:[#allocation2 + $0x218] sm:$0xf] %v1639_v45  ;;  %v1270_v63 = vshll.u32 %v7002_v30, 16  ;;  %v6567_v45 = vld [vmem:[%s8256_s1 + $0x1e0] sm:$0xff] }
  0x94   : > { %v1255_v46 = vsel %vm7074_vm4, %v1250_v22, %v1254_v58  ;;  %v6449_v1 = vld [vmem:[#allocation2 + $0x1f0] sm:$0xf0]  ;;  %v5791_v24 = vor.u32 %v6375_v17, %v5788_v61  ;;  %v5787_v21 = vor.u32 %v6376_v55, %v5786_v0  ;;  %4706 = vmatpush.bf16.msra.mxu3 %v6567_v45  ;;  %v5295_v0 = vld [vmem:[%s6818_s25 + $0x60] sm:$0xe] }
  0x95   : > { %v468_v23 = vsel %vm7074_vm4, %v463_v18, %v467_v54  ;;  %v1267_v54 = vshrl.u32 %v7002_v30, 16  ;;  %v1265_v18 = vsel %vm7074_vm4, %v1260_v28, %v1264_v34  ;;  %1526 = vst [vmem:[#allocation2 + $0x214] sm:$0xf] %v1255_v46  ;;  %v491_v7 = vrot.slane %v489_v49, 5  ;;  %v240_v22 = vld [vmem:[%s6818_s25 + $0x54] sm:$0xf] }
  0x96   : > { %752 = vst [vmem:[#allocation2 + $0x88] sm:$0xf] %v468_v23  ;;  %v481_v23 = vrot.slane %v479_v29, 5  ;;  %v5507_v16 = vor.u32 %v6449_v1, %v5506_v5  ;;  %v1272_v30 = vrot.slane %v1270_v63, 5  ;;  %v1280_v28 = vshrl.u32 %v7005_v32, 16  ;;  %v6559_v46 = vld [vmem:[%s8256_s1 + $0x1a0] sm:$0xff] }
  0x97   : > { %1527 = vst [vmem:[#allocation2 + $0x220] sm:$0xf] %v1265_v18  ;;  %v1269_v34 = vrot.slane %v1267_v54, 4  ;;  %v1291_v29 = vshrl.u32 %v6840_v8, 16  ;;  %v5279_v54 = vld [vmem:[%s6818_s25 + $0x68] sm:$0x1]  ;;  %4617 = vmatpush.bf16.msra.mxu2 %v6559_v46 }
  0x98   : > { %v486_v2 = vor.u32 %v485_v44, %v481_v23  ;;  %304 = vst [vmem:[#allocation2 + $0xa8] sm:$0xf] %v240_v22  ;;  %v1282_v49 = vrot.slane %v1280_v28, 4  ;;  %v7326_v18 = vld [vmem:[%s6818_s25 + $0x58] sm:$0xf]  ;;  %v1286_v5 = vshll.u32 %v5279_v54, 16 }
  0x99   : > { %8272 = vst [vmem:[#allocation5_spill] sm:$0xff] %v7326_v18  ;;  %v5311_v61 = vrot.slane %v5295_v0, 9  ;;  %v265_v1 = vld [vmem:[%s6818_s25 + $0x5c] sm:$0x1]  ;;  %v5512_v28 = vld [vmem:[#allocation2 + $0x204] sm:$0xf0] }
  0x9a   : > { %v487_v27 = vrot.slane %v486_v2, 4  ;;  %305 = vst [vmem:[#allocation2 + $0xb4] sm:$0xf] %v7326_v18  ;;  %v5518_v45 = vld [vmem:[#allocation2 + $0x200] sm:$0xf] }
  0x9b   : > { %v6452_v0 = vld [vmem:[#allocation2 + $0x208] sm:$0xf0] }
  0x9c   : > { %3278 = vmatmul.bf16.gmra.mxu1 %v5491_v56  ;;  %3945 = vmatmul.bf16.gmra.mxu0 %v5779_v25  ;;  %v6447_v56 = vld [vmem:[#allocation2 + $0x1e4] sm:$0xf]  ;;  %v5500_v25 = vld [vmem:[#allocation2 + $0x1ec] sm:$0xf0]  ;;  %v492_v11 = vsel %vm7074_vm4, %v487_v27, %v491_v7  ;;  %v1288_v27 = vrot.slane %v1286_v5, 5  ;;  %v1304_v5 = vshrl.u32 %v6843_v9, 16 }
  0x9d   : > { %3367 = vmatmul.bf16.gmra.mxu2 %v5495_v57  ;;  %3856 = vmatmul.bf16.gmra.mxu3 %v5775_v13  ;;  %v1642_v57 = vsel %vm7085_vm5, %v1640_v6, %v1641_v3  ;;  %v477_v13 = vrot.slane %v476_v39, 4  ;;  %v5503_v60 = vor.u32 %v6447_v56, %v5500_v25  ;;  %754 = vst [vmem:[#allocation2 + $0xa0] sm:$0xf] %v492_v11  ;;  %v1276_v6 = vshll.u32 %v7005_v32, 16  ;;  %v6431_v7 = vld [vmem:[%s8256_s1 + $0xa0] sm:$0xff] }
  0x9e   : > { %1751 = vst [vmem:[#allocation2 + $0x224] sm:$0xf] %v1642_v57  ;;  %v494_v3 = vshrl.u32 %v240_v22, 16  ;;  %v497_v39 = vshll.u32 %v240_v22, 16  ;;  %v1273_v56 = vor.u32 %v1272_v30, %v1269_v34  ;;  %v1645_v25 = vrot.slane %v7005_v32, 5  ;;  %4014 = vmatpush.bf16.msra.mxu1 %v6431_v7 }
  0x9f   : > { %v482_v58 = vsel %vm7074_vm4, %v477_v13, %v481_v23  ;;  %v1278_v4 = vrot.slane %v1276_v6, 5  ;;  %v1648_v32 = vrot.slane %v5279_v54, 5  ;;  %v1294_v22 = vshll.u32 %v6840_v8, 16  ;;  %v6450_v6 = vld [vmem:[#allocation2 + $0x1fc] sm:$0xf] }
  0xa0   : > { %753 = vst [vmem:[#allocation2 + $0x94] sm:$0xf] %v482_v58  ;;  %v496_v57 = vrot.slane %v494_v3, 4  ;;  %v499_v55 = vrot.slane %v497_v39, 5  ;;  %v1274_v17 = vrot.slane %v1273_v56, 4  ;;  %v1647_v63 = vrot.slane %v1645_v25, 4 }
  0xa1   : > { %v1283_v13 = vor.u32 %v1282_v49, %v1278_v4  ;;  %v1646_v30 = vsel %vm7085_vm5, %v5311_v61, %v1645_v25  ;;  %v507_v11 = vshrl.u32 %v7326_v18, 16  ;;  %v6379_v49 = vld [vmem:[#allocation2 + $0x80] sm:$0xf0]  ;;  %v513_v56 = vshll.u32 %v265_v1, 16  ;;  %v6378_v25 = vld [vmem:[#allocation2 + $0x7c] sm:$0xf] }
  0xa2   : > { %v1279_v34 = vsel %vm7074_vm4, %v1274_v17, %v1278_v4  ;;  %v1649_v39 = vsel %vm7085_vm5, %v1647_v63, %v1648_v32  ;;  %v5798_v4 = vld [vmem:[#allocation2 + $0x78] sm:$0xf]  ;;  %1752 = vst [vmem:[#allocation2 + $0x230] sm:$0xf] %v1646_v30  ;;  %v1293_v61 = vrot.slane %v1291_v29, 4  ;;  %v1296_v63 = vrot.slane %v1294_v22, 5 }
  0xa3   : > { %1528 = vst [vmem:[#allocation2 + $0x22c] sm:$0xf] %v1279_v34  ;;  %v509_v54 = vrot.slane %v507_v11, 4  ;;  %v515_v17 = vrot.slane %v513_v56, 5  ;;  %v5515_v7 = vor.u32 %v6450_v6, %v5512_v28  ;;  %v5799_v34 = vor.u32 %v6379_v49, %v5798_v4  ;;  %v242_v30 = vld [vmem:[%s6818_s25 + $0x60] sm:$0xf] }
  0xa4   : > { %1753 = vst [vmem:[#allocation2 + $0x23c] sm:$0xf] %v1649_v39  ;;  %v1306_v11 = vrot.slane %v1304_v5, 4  ;;  %v1300_v22 = vshll.u32 %v6843_v9, 16  ;;  %v518_v6 = vshrl.u32 %v242_v30, 16  ;;  %v1297_v28 = vor.u32 %v1296_v63, %v1293_v61 }
  0xa5   : > { %306 = vst [vmem:[#allocation2 + $0xc0] sm:$0xf] %v242_v30  ;;  %v521_v39 = vshll.u32 %v242_v30, 16  ;;  %v1652_v49 = vrot.slane %v6843_v9, 5 }
  0xa7   : > { %v1654_v63 = vrot.slane %v1652_v49, 4 }
  0xa9   : > { %v7307_v15 = vpop.f32.mrf.mxu0  ;;  %v7309_v14 = vpop.f32.mrf.mxu1 }
  0xac   : > { %3283 = vmatmul.bf16.gmra.mxu1 %v5503_v60  ;;  %3950 = vmatmul.bf16.gmra.mxu0 %v5791_v24  ;;  %v6575_v60 = vld [vmem:[%s8256_s1 + $0x220] sm:$0xff]  ;;  %v1284_v24 = vrot.slane %v1283_v13, 4 }
  0xad   : > { %3372 = vmatmul.bf16.gmra.mxu2 %v5507_v16  ;;  %3861 = vmatmul.bf16.gmra.mxu3 %v5787_v21  ;;  %v500_v16 = vor.u32 %v499_v55, %v496_v57  ;;  %v503_v21 = vshll.u32 %v7326_v18, 16  ;;  %v5800_v57 = vld [vmem:[#allocation2 + $0x84] sm:$0xf0] }
  0xae   : > { %4795 = vmatpush.bf16.msra.mxu0 %v6575_v60  ;;  %v1289_v3 = vsel %vm7074_vm4, %v1284_v24, %v1288_v27  ;;  %v5803_v60 = vor.u32 %v6378_v25, %v5800_v57  ;;  %v5296_v25 = vld [vmem:[%s6818_s25 + $0x6c] sm:$0xe]  ;;  %v523_v57 = vrot.slane %v521_v39, 5  ;;  %v5524_v39 = vld [vmem:[#allocation2 + $0x21c] sm:$0xf0] }
  0xaf   : > { %v501_v8 = vrot.slane %v500_v16, 4  ;;  %v505_v46 = vrot.slane %v503_v21, 5  ;;  %1529 = vst [vmem:[#allocation2 + $0x238] sm:$0xf] %v1289_v3  ;;  %v5519_v21 = vor.u32 %v6452_v0, %v5518_v45  ;;  %v7372_v3 = vld [vmem:[%s6818_s25 + $0x64] sm:$0xf] }
  0xb0   : > { %v7330_v23 = vpop.f32.mrf.mxu2  ;;  %v7332_v44 = vpop.f32.mrf.mxu3  ;;  %8275 = vst [vmem:[#allocation8_spill] sm:$0xff] %v7372_v3  ;;  %v520_v45 = vrot.slane %v518_v6, 4  ;;  %v5312_v61 = vrot.slane %v5296_v25, 9  ;;  %v1315_v6 = vshrl.u32 %v6881_v19, 16  ;;  %v5810_v25 = vld [vmem:[#allocation2 + $0x90] sm:$0xf] }
  0xb1   : > { %8273 = vst [vmem:[#allocation6_spill] sm:$0xff] %v7332_v44  ;;  %v7335_v58 = vpop.f32.mrf.mxu0  ;;  %v7337_v2 = vpop.f32.mrf.mxu1  ;;  %v506_v13 = vsel %vm7074_vm4, %v501_v8, %v505_v46  ;;  %v510_v55 = vor.u32 %v509_v54, %v505_v46  ;;  %v5280_v8 = vld [vmem:[%s6818_s25 + $0x74] sm:$0x1]  ;;  %v1302_v46 = vrot.slane %v1300_v22, 5  ;;  %v527_v54 = vshll.u32 %v7372_v3, 16 }
  0xb2   : > { %755 = vst [vmem:[#allocation2 + $0xac] sm:$0xf] %v506_v13  ;;  %v1310_v4 = vshll.u32 %v5280_v8, 16  ;;  %v266_v13 = vld [vmem:[%s6818_s25 + $0x68] sm:$0x1] }
  0xb3   : > { %v511_v24 = vrot.slane %v510_v55, 4  ;;  %307 = vst [vmem:[#allocation2 + $0xcc] sm:$0xf] %v7372_v3  ;;  %v1307_v56 = vor.u32 %v1306_v11, %v1302_v46  ;;  %v1298_v55 = vrot.slane %v1297_v28, 4  ;;  %v1653_v11 = vsel %vm7085_vm5, %v5312_v61, %v1652_v49  ;;  %v6453_v28 = vld [vmem:[#allocation2 + $0x214] sm:$0xf] }
  0xb4   : > { %v537_v22 = vshll.u32 %v266_v13, 16  ;;  %v5812_v13 = vld [vmem:[#allocation2 + $0x9c] sm:$0xf0]  ;;  %1754 = vst [vmem:[#allocation2 + $0x248] sm:$0xf] %v1653_v11 }
  0xb5   : > { %v516_v29 = vsel %vm7074_vm4, %v511_v24, %v515_v17  ;;  %v1312_v17 = vrot.slane %v1310_v4, 5  ;;  %v1308_v9 = vrot.slane %v1307_v56, 4  ;;  %v1655_v24 = vrot.slane %v5280_v8, 5  ;;  %v6455_v61 = vld [vmem:[#allocation2 + $0x220] sm:$0xf0] }
  0xb6   : > { %756 = vst [vmem:[#allocation2 + $0xb8] sm:$0xf] %v516_v29  ;;  %v1303_v30 = vsel %vm7074_vm4, %v1298_v55, %v1302_v46  ;;  %v529_v29 = vrot.slane %v527_v54, 5  ;;  %v1318_v56 = vshll.u32 %v6881_v19, 16  ;;  %v5530_v46 = vld [vmem:[#allocation2 + $0x218] sm:$0xf] }
  0xb7   : > { %v1313_v4 = vsel %vm7074_vm4, %v1308_v9, %v1312_v17  ;;  %1530 = vst [vmem:[#allocation2 + $0x244] sm:$0xf] %v1303_v30  ;;  %v1656_v8 = vsel %vm7085_vm5, %v1654_v63, %v1655_v24  ;;  %v6381_v54 = vld [vmem:[#allocation2 + $0x94] sm:$0xf]  ;;  %v539_v63 = vrot.slane %v537_v22, 5  ;;  %v1317_v9 = vrot.slane %v1315_v6, 4 }
  0xb8   : > { %v7359_v32 = vpop.f32.mrf.mxu2  ;;  %v7361_v1 = vpop.f32.mrf.mxu3  ;;  %1531 = vst [vmem:[#allocation2 + $0x250] sm:$0xf] %v1313_v4  ;;  %v1328_v19 = vshrl.u32 %v6884_v20, 16  ;;  %v1320_v24 = vrot.slane %v1318_v56, 5  ;;  %v5527_v30 = vor.u32 %v6453_v28, %v5524_v39  ;;  %v5815_v11 = vor.u32 %v6381_v54, %v5812_v13  ;;  %v7412_v22 = vld [vmem:[%s6818_s25 + $0x70] sm:$0xf] }
  0xb9   : > { %8274 = vst [vmem:[#allocation7_spill] sm:$0xff] %v7361_v1  ;;  %v7363_v27 = vpop.f32.mrf.mxu0  ;;  %v7365_v16 = vpop.f32.mrf.mxu1  ;;  %v5542_v44 = vld [vmem:[#allocation2 + $0x230] sm:$0xf] }
  0xba   : > { %1755 = vst [vmem:[#allocation2 + $0x254] sm:$0xf] %v1656_v8  ;;  %v5531_v8 = vor.u32 %v6455_v61, %v5530_v46  ;;  %v1330_v56 = vrot.slane %v1328_v19, 4  ;;  %v1321_v39 = vor.u32 %v1320_v24, %v1317_v9  ;;  %v551_v46 = vshll.u32 %v7412_v22, 16 }
  0xbb   : > { %8280 = vst [vmem:[#allocation13_spill] sm:$0xff] %v7412_v22  ;;  %v1659_v9 = vrot.slane %v6884_v20, 5 }
  0xbc   : > { %3288 = vmatmul.bf16.gmra.mxu1 %v5515_v7  ;;  %3955 = vmatmul.bf16.gmra.mxu0 %v5803_v60  ;;  %309 = vst [vmem:[#allocation2 + $0xe4] sm:$0xf] %v7412_v22 }
  0xbd   : > { %3377 = vmatmul.bf16.gmra.mxu2 %v5519_v21  ;;  %3866 = vmatmul.bf16.gmra.mxu3 %v5799_v34  ;;  %v524_v21 = vor.u32 %v523_v57, %v520_v45  ;;  %v531_v34 = vshrl.u32 %v7372_v3, 16  ;;  %v6382_v57 = vld [vmem:[#allocation2 + $0x98] sm:$0xf0] }
  0xbf   : > { %v525_v45 = vrot.slane %v524_v21, 4  ;;  %v533_v49 = vrot.slane %v531_v34, 4  ;;  %v5548_v62 = vld [vmem:[#allocation2 + $0x24c] sm:$0xf0] }
  0xc0   : > { %v7380_v5 = vpop.f32.mrf.mxu2  ;;  %v7382_v0 = vpop.f32.mrf.mxu3 }
  0xc1   : > { %8276 = vst [vmem:[#allocation9_spill] sm:$0xff] %v7380_v5  ;;  %v7384_v7 = vpop.f32.mrf.mxu0  ;;  %v7386_v60 = vpop.f32.mrf.mxu1  ;;  %v530_v55 = vsel %vm7074_vm4, %v525_v45, %v529_v29  ;;  %v534_v17 = vor.u32 %v533_v49, %v529_v29  ;;  %v5811_v29 = vor.u32 %v6382_v57, %v5810_v25  ;;  %v244_v49 = vld [vmem:[%s6818_s25 + $0x6c] sm:$0xf]  ;;  %v6558_v25 = vld [vmem:[%s8256_s1 + $0x198] sm:$0xff]  ;;  %v248_v5 = vld [vmem:[%s6818_s25 + $0x84] sm:$0xf] }
  0xc2   : > { %8277 = vst [vmem:[#allocation10_spill] sm:$0xff] %v7382_v0  ;;  %v542_v28 = vshrl.u32 %v244_v49, 16  ;;  %v545_v54 = vshll.u32 %v244_v49, 16  ;;  %v6566_v57 = vld [vmem:[%s8256_s1 + $0x1d8] sm:$0xff]  ;;  %4618 = vmatpush.bf16.msra.mxu2 %v6558_v25 }
  0xc3   : > { %757 = vst [vmem:[#allocation2 + $0xc4] sm:$0xf] %v530_v55  ;;  %v535_v4 = vrot.slane %v534_v17, 4  ;;  %v1324_v55 = vshll.u32 %v6884_v20, 16  ;;  %v1339_v17 = vshrl.u32 %v6946_v50, 16  ;;  %4707 = vmatpush.bf16.msra.mxu3 %v6566_v57  ;;  %v555_v57 = vshrl.u32 %v7412_v22, 16 }
  0xc4   : > { %308 = vst [vmem:[#allocation2 + $0xd8] sm:$0xf] %v244_v49  ;;  %v544_v61 = vrot.slane %v542_v28, 4  ;;  %v547_v19 = vrot.slane %v545_v54, 5  ;;  %v1322_v49 = vrot.slane %v1321_v39, 4 }
  0xc5   : > { %v540_v6 = vsel %vm7074_vm4, %v535_v4, %v539_v63  ;;  %v1326_v13 = vrot.slane %v1324_v55, 5  ;;  %v5281_v63 = vld [vmem:[%s6818_s25 + $0x80] sm:$0x1]  ;;  %v553_v4 = vrot.slane %v551_v46, 5  ;;  %v1661_v55 = vrot.slane %v1659_v9, 4 }
  0xc6   : > { %758 = vst [vmem:[#allocation2 + $0xd0] sm:$0xf] %v540_v6  ;;  %v1662_v28 = vrot.slane %v5281_v63, 5  ;;  %v548_v25 = vor.u32 %v547_v19, %v544_v61  ;;  %v1342_v46 = vshll.u32 %v6946_v50, 16  ;;  %v6574_v61 = vld [vmem:[%s8256_s1 + $0x218] sm:$0xff] }
  0xc7   : > { %v1331_v24 = vor.u32 %v1330_v56, %v1326_v13  ;;  %v1327_v1 = vsel %vm7074_vm4, %v1322_v49, %v1326_v13  ;;  %v6384_v49 = vld [vmem:[#allocation2 + $0xac] sm:$0xf]  ;;  %v5824_v22 = vld [vmem:[#allocation2 + $0xb4] sm:$0xf0]  ;;  %4796 = vmatpush.bf16.msra.mxu0 %v6574_v61  ;;  %312 = vst [vmem:[#allocation2 + $0x108] sm:$0xf] %v248_v5 }
  0xc8   : > { %v7402_v21 = vpop.f32.mrf.mxu2  ;;  %v7404_v34 = vpop.f32.mrf.mxu3  ;;  %1532 = vst [vmem:[#allocation2 + $0x25c] sm:$0xf] %v1327_v1  ;;  %v1663_v50 = vsel %vm7085_vm5, %v1661_v55, %v1662_v28  ;;  %v549_v13 = vrot.slane %v548_v25, 4  ;;  %v6458_v55 = vld [vmem:[#allocation2 + $0x238] sm:$0xf0]  ;;  %v1341_v25 = vrot.slane %v1339_v17, 4 }
  0xc9   : > { %8278 = vst [vmem:[#allocation11_spill] sm:$0xff] %v7402_v21  ;;  %v7406_v0 = vpop.f32.mrf.mxu0  ;;  %v7408_v45 = vpop.f32.mrf.mxu1  ;;  %v1332_v54 = vrot.slane %v1331_v24, 4  ;;  %v557_v24 = vrot.slane %v555_v57, 4  ;;  %v1344_v57 = vrot.slane %v1342_v46, 5  ;;  %v1348_v17 = vshll.u32 %v6949_v51, 16 }
  0xca   : > { %8279 = vst [vmem:[#allocation12_spill] sm:$0xff] %v7404_v34  ;;  %v267_v34 = vld [vmem:[%s6818_s25 + $0x74] sm:$0x1]  ;;  %v7470_v46 = vld [vmem:[%s6818_s25 + $0x7c] sm:$0xf] }
  0xcb   : > { %v558_v1 = vor.u32 %v557_v24, %v553_v4  ;;  %1757 = vst [vmem:[#allocation2 + $0x26c] sm:$0xf] %v1663_v50  ;;  %v246_v24 = vld [vmem:[%s6818_s25 + $0x78] sm:$0xf] }
  0xcc   : > { %3293 = vmatmul.bf16.gmra.mxu1 %v5527_v30  ;;  %3960 = vmatmul.bf16.gmra.mxu0 %v5815_v11  ;;  %v1334_v30 = vshll.u32 %v5281_v63, 16  ;;  %v5297_v11 = vld [vmem:[%s6818_s25 + $0x78] sm:$0xe]  ;;  %v6456_v63 = vld [vmem:[#allocation2 + $0x22c] sm:$0xf]  ;;  %8285 = vst [vmem:[#allocation18_spill] sm:$0xff] %v7470_v46 }
  0xcd   : > { %3382 = vmatmul.bf16.gmra.mxu2 %v5531_v8  ;;  %3871 = vmatmul.bf16.gmra.mxu3 %v5811_v29  ;;  %v5313_v6 = vrot.slane %v5297_v11, 9  ;;  %v561_v11 = vshll.u32 %v267_v34, 16  ;;  %v5822_v34 = vld [vmem:[#allocation2 + $0xa8] sm:$0xf]  ;;  %v559_v28 = vrot.slane %v558_v1, 4  ;;  %v566_v1 = vshrl.u32 %v246_v24, 16 }
  0xce   : > { %v1336_v56 = vrot.slane %v1334_v30, 5  ;;  %v6385_v30 = vld [vmem:[#allocation2 + $0xb0] sm:$0xf0]  ;;  %310 = vst [vmem:[#allocation2 + $0xf0] sm:$0xf] %v246_v24 }
  0xcf   : > { %v1660_v39 = vsel %vm7085_vm5, %v5313_v6, %v1659_v9  ;;  %v5536_v9 = vld [vmem:[#allocation2 + $0x234] sm:$0xf0]  ;;  %v1352_v6 = vshrl.u32 %v6949_v51, 16  ;;  %311 = vst [vmem:[#allocation2 + $0xfc] sm:$0xf] %v7470_v46 }
  0xd0   : > { %v7429_v8 = vpop.f32.mrf.mxu2  ;;  %v7431_v29 = vpop.f32.mrf.mxu3  ;;  %v1337_v19 = vsel %vm7074_vm4, %v1332_v54, %v1336_v56  ;;  %1756 = vst [vmem:[#allocation2 + $0x260] sm:$0xf] %v1660_v39  ;;  %v554_v54 = vsel %vm7074_vm4, %v549_v13, %v553_v4  ;;  %v563_v56 = vrot.slane %v561_v11, 5  ;;  %v5827_v39 = vor.u32 %v6384_v49, %v5824_v22 }
  0xd1   : > { %8281 = vst [vmem:[#allocation14_spill] sm:$0xff] %v7429_v8  ;;  %v7434_v3 = vpop.f32.mrf.mxu0  ;;  %v7436_v20 = vpop.f32.mrf.mxu1  ;;  %v5543_v4 = vor.u32 %v6458_v55, %v5542_v44  ;;  %v5823_v11 = vor.u32 %v6385_v30, %v5822_v34  ;;  %v1345_v22 = vor.u32 %v1344_v57, %v1341_v25  ;;  %v569_v44 = vshll.u32 %v246_v24, 16  ;;  %v5298_v55 = vld [vmem:[%s6818_s25 + $0x84] sm:$0xe]  ;;  %v268_v25 = vld [vmem:[%s6818_s25 + $0x80] sm:$0x1] }
  0xd2   : > { %8282 = vst [vmem:[#allocation15_spill] sm:$0xff] %v7431_v29  ;;  %v6430_v29 = vld [vmem:[%s8256_s1 + $0x98] sm:$0xff]  ;;  %v564_v50 = vsel %vm7074_vm4, %v559_v28, %v563_v56  ;;  %v568_v34 = vrot.slane %v566_v1, 4  ;;  %v1666_v49 = vrot.slane %v6949_v51, 5 }
  0xd3   : > { %1533 = vst [vmem:[#allocation2 + $0x268] sm:$0xf] %v1337_v19  ;;  %4015 = vmatpush.bf16.msra.mxu1 %v6430_v29  ;;  %v5539_v29 = vor.u32 %v6456_v63, %v5536_v9  ;;  %v5282_v63 = vld [vmem:[%s6818_s25 + $0x8c] sm:$0x1]  ;;  %v1350_v9 = vrot.slane %v1348_v17, 5  ;;  %v571_v28 = vrot.slane %v569_v44, 5 }
  0xd4   : > { %759 = vst [vmem:[#allocation2 + $0xdc] sm:$0xf] %v554_v54  ;;  %v1354_v54 = vrot.slane %v1352_v6, 4  ;;  %v1358_v30 = vshll.u32 %v5282_v63, 16  ;;  %v575_v6 = vshll.u32 %v7470_v46, 16  ;;  %v1669_v1 = vrot.slane %v5282_v63, 5 }
  0xd5   : > { %760 = vst [vmem:[#allocation2 + $0xe8] sm:$0xf] %v564_v50  ;;  %v1668_v50 = vrot.slane %v1666_v49, 4 }
  0xd6   : > { %v1355_v56 = vor.u32 %v1354_v54, %v1350_v9  ;;  %v579_v54 = vshrl.u32 %v7470_v46, 16 }
  0xd7   : > { %v1670_v63 = vsel %vm7085_vm5, %v1668_v50, %v1669_v1 }
  0xd8   : > { %v7457_v19 = vpop.f32.mrf.mxu2  ;;  %v7459_v18 = vpop.f32.mrf.mxu3  ;;  %v1356_v51 = vrot.slane %v1355_v56, 4  ;;  %v1366_v56 = vshll.u32 %v7015_v35, 16  ;;  %1759 = vst [vmem:[#allocation2 + $0x284] sm:$0xf] %v1670_v63 }
  0xd9   : > { %8283 = vst [vmem:[#allocation16_spill] sm:$0xff] %v7457_v19  ;;  %v7461_v61 = vpop.f32.mrf.mxu0  ;;  %v7463_v13 = vpop.f32.mrf.mxu1 }
  0xda   : > { %8284 = vst [vmem:[#allocation17_spill] sm:$0xff] %v7459_v18  ;;  %v572_v18 = vor.u32 %v571_v28, %v568_v34  ;;  %v5834_v28 = vld [vmem:[#allocation2 + $0xc0] sm:$0xf] }
  0xdc   : > { %3298 = vmatmul.bf16.gmra.mxu1 %v5539_v29  ;;  %3965 = vmatmul.bf16.gmra.mxu0 %v5827_v39  ;;  %v1346_v39 = vrot.slane %v1345_v22, 4  ;;  %v585_v22 = vshll.u32 %v268_v25, 16  ;;  %v573_v34 = vrot.slane %v572_v18, 4  ;;  %v5836_v25 = vld [vmem:[#allocation2 + $0xcc] sm:$0xf0] }
  0xdd   : > { %3387 = vmatmul.bf16.gmra.mxu2 %v5543_v4  ;;  %3876 = vmatmul.bf16.gmra.mxu3 %v5823_v11  ;;  %v1360_v4 = vrot.slane %v1358_v30, 5  ;;  %v5314_v11 = vrot.slane %v5298_v55, 9  ;;  %v1363_v30 = vshrl.u32 %v7015_v35, 16  ;;  %v6459_v55 = vld [vmem:[#allocation2 + $0x244] sm:$0xf]  ;;  %v1368_v35 = vrot.slane %v1366_v56, 5 }
  0xde   : > { %v1351_v44 = vsel %vm7074_vm4, %v1346_v39, %v1350_v9  ;;  %v5554_v9 = vld [vmem:[#allocation2 + $0x248] sm:$0xf]  ;;  %v6388_v39 = vld [vmem:[#allocation2 + $0xc8] sm:$0xf0]  ;;  %v587_v18 = vrot.slane %v585_v22, 5 }
  0xdf   : > { %v1361_v19 = vsel %vm7074_vm4, %v1356_v51, %v1360_v4  ;;  %1534 = vst [vmem:[#allocation2 + $0x274] sm:$0xf] %v1351_v44  ;;  %v1376_v4 = vshrl.u32 %v7019_v38, 16  ;;  %v6461_v51 = vld [vmem:[#allocation2 + $0x250] sm:$0xf0]  ;;  %v1365_v1 = vrot.slane %v1363_v30, 4  ;;  %v5835_v21 = vor.u32 %v6388_v39, %v5834_v28 }
  0xe0   : > { %v7478_v57 = vpop.f32.mrf.mxu2  ;;  %v7480_v29 = vpop.f32.mrf.mxu3  ;;  %1535 = vst [vmem:[#allocation2 + $0x280] sm:$0xf] %v1361_v19  ;;  %v5555_v43 = vor.u32 %v6461_v51, %v5554_v9  ;;  %v1372_v30 = vshll.u32 %v7019_v38, 16  ;;  %v7512_v56 = vld [vmem:[%s6818_s25 + $0x88] sm:$0xf]  ;;  %v593_v9 = vshll.u32 %v248_v5, 16 }
  0xe1   : > { %8286 = vst [vmem:[#allocation19_spill] sm:$0xff] %v7478_v57  ;;  %v7482_v24 = vpop.f32.mrf.mxu0  ;;  %v7484_v17 = vpop.f32.mrf.mxu1  ;;  %v1667_v57 = vsel %vm7085_vm5, %v5314_v11, %v1666_v49  ;;  %v581_v49 = vrot.slane %v579_v54, 4  ;;  %v5551_v54 = vor.u32 %v6459_v55, %v5548_v62  ;;  %v1378_v63 = vrot.slane %v1376_v4, 4  ;;  %v5283_v39 = vld [vmem:[%s6818_s25 + $0x98] sm:$0x1] }
  0xe2   : > { %8287 = vst [vmem:[#allocation20_spill] sm:$0xff] %v7480_v29  ;;  %v577_v29 = vrot.slane %v575_v6, 5  ;;  %v6387_v6 = vld [vmem:[#allocation2 + $0xc4] sm:$0xf]  ;;  %v590_v62 = vshrl.u32 %v248_v5, 16  ;;  %v1369_v55 = vor.u32 %v1368_v35, %v1365_v1  ;;  %v1387_v5 = vshrl.u32 %v6848_v10, 16 }
  0xe3   : > { %1758 = vst [vmem:[#allocation2 + $0x278] sm:$0xf] %v1667_v57  ;;  %v5839_v57 = vor.u32 %v6387_v6, %v5836_v25  ;;  %v595_v6 = vrot.slane %v593_v9, 5  ;;  %v599_v25 = vshll.u32 %v7512_v56, 16  ;;  %v1676_v35 = vrot.slane %v5283_v39, 5 }
  0xe4   : > { %v578_v11 = vsel %vm7074_vm4, %v573_v34, %v577_v29  ;;  %v582_v50 = vor.u32 %v581_v49, %v577_v29  ;;  %8290 = vst [vmem:[#allocation23_spill] sm:$0xff] %v7512_v56  ;;  %v592_v28 = vrot.slane %v590_v62, 4  ;;  %v1673_v49 = vrot.slane %v7019_v38, 5 }
  0xe5   : > { %761 = vst [vmem:[#allocation2 + $0xf4] sm:$0xf] %v578_v11  ;;  %v5299_v11 = vld [vmem:[%s6818_s25 + $0x90] sm:$0xe] }
  0xe6   : > { %v583_v46 = vrot.slane %v582_v50, 4  ;;  %313 = vst [vmem:[#allocation2 + $0x114] sm:$0xf] %v7512_v56  ;;  %v1370_v50 = vrot.slane %v1369_v55, 4  ;;  %v1675_v1 = vrot.slane %v1673_v49, 4  ;;  %v596_v62 = vor.u32 %v595_v6, %v592_v28  ;;  %v6573_v28 = vld [vmem:[%s8256_s1 + $0x210] sm:$0xff] }
  0xe7   : > { %v601_v55 = vrot.slane %v599_v25, 5  ;;  %v1390_v6 = vshll.u32 %v6848_v10, 16  ;;  %v5566_v25 = vld [vmem:[#allocation2 + $0x260] sm:$0xf]  ;;  %4797 = vmatpush.bf16.msra.mxu0 %v6573_v28  ;;  %v1400_v10 = vshrl.u32 %v6854_v12, 16 }
  0xe8   : > { %v7500_v44 = vpop.f32.mrf.mxu2  ;;  %v7502_v19 = vpop.f32.mrf.mxu3  ;;  %v588_v22 = vsel %vm7074_vm4, %v583_v46, %v587_v18  ;;  %v1374_v46 = vrot.slane %v1372_v30, 5  ;;  %v5315_v18 = vrot.slane %v5299_v11, 9 }
  0xe9   : > { %8288 = vst [vmem:[#allocation21_spill] sm:$0xff] %v7500_v44  ;;  %v3264_v8 = vpop.f32.mrf.mxu1  ;;  %v7504_v34 = vpop.f32.mrf.mxu0  ;;  %v7558_v44 = vld [vmem:[%s6818_s25 + $0x94] sm:$0xf] }
  0xea   : > { %8289 = vst [vmem:[#allocation22_spill] sm:$0xff] %v7502_v19  ;;  %v3265_v29 = vadd.f32 %v3264_v8, %v7307_v15  ;;  %v6557_v15 = vld [vmem:[%s8256_s1 + $0x190] sm:$0xff]  ;;  %v1375_v9 = vsel %vm7074_vm4, %v1370_v50, %v1374_v46  ;;  %v6462_v19 = vld [vmem:[#allocation2 + $0x25c] sm:$0xf]  ;;  %v5848_v50 = vld [vmem:[#allocation2 + $0xe4] sm:$0xf0] }
  0xeb   : > { %762 = vst [vmem:[#allocation2 + $0x100] sm:$0xf] %v588_v22  ;;  %v6565_v8 = vld [vmem:[%s8256_s1 + $0x1d0] sm:$0xff]  ;;  %4619 = vmatpush.bf16.msra.mxu2 %v6557_v15  ;;  %v1674_v15 = vsel %vm7085_vm5, %v5315_v18, %v1673_v49  ;;  %v597_v49 = vrot.slane %v596_v62, 4 }
  0xec   : > { %3303 = vmatmul.bf16.gmra.mxu1 %v5551_v54  ;;  %3970 = vmatmul.bf16.gmra.mxu0 %v5839_v57  ;;  %1536 = vst [vmem:[#allocation2 + $0x28c] sm:$0xf] %v1375_v9 }
  0xed   : > { %3392 = vmatmul.bf16.gmra.mxu2 %v5555_v43  ;;  %3881 = vmatmul.bf16.gmra.mxu3 %v5835_v21  ;;  %v1379_v43 = vor.u32 %v1378_v63, %v1374_v46  ;;  %v1382_v21 = vshll.u32 %v5283_v39, 16  ;;  %v5560_v39 = vld [vmem:[#allocation2 + $0x264] sm:$0xf0]  ;;  %v1677_v46 = vsel %vm7085_vm5, %v1675_v1, %v1676_v35  ;;  %1760 = vst [vmem:[#allocation2 + $0x290] sm:$0xf] %v1674_v15 }
  0xee   : > { %4708 = vmatpush.bf16.msra.mxu3 %v6565_v8  ;;  %v269_v8 = vld [vmem:[%s6818_s25 + $0x8c] sm:$0x1]  ;;  %v602_v18 = vsel %vm7074_vm4, %v597_v49, %v601_v55  ;;  %1761 = vst [vmem:[#allocation2 + $0x29c] sm:$0xf] %v1677_v46  ;;  %v5563_v15 = vor.u32 %v6462_v19, %v5560_v39  ;;  %v1402_v46 = vrot.slane %v1400_v10, 4 }
  0xef   : > { %v1380_v22 = vrot.slane %v1379_v43, 4  ;;  %v1384_v30 = vrot.slane %v1382_v21, 5  ;;  %v5846_v43 = vld [vmem:[#allocation2 + $0xd8] sm:$0xf]  ;;  %v6391_v21 = vld [vmem:[#allocation2 + $0xe0] sm:$0xf0] }
  0xf0   : > { %v3353_v4 = vpop.f32.mrf.mxu2  ;;  %v3842_v51 = vpop.f32.mrf.mxu3  ;;  %v6464_v35 = vld [vmem:[#allocation2 + $0x268] sm:$0xf0]  ;;  %763 = vst [vmem:[#allocation2 + $0x10c] sm:$0xf] %v602_v18  ;;  %v1396_v18 = vshll.u32 %v6854_v12, 16 }
  0xf1   : > { %v3354_v38 = vadd.f32 %v3353_v4, %v3265_v29  ;;  %v3266_v54 = vpop.f32.mrf.mxu1  ;;  %v7526_v57 = vpop.f32.mrf.mxu0  ;;  %v6429_v29 = vld [vmem:[%s8256_s1 + $0x90] sm:$0xff]  ;;  %v6390_v4 = vld [vmem:[#allocation2 + $0xdc] sm:$0xf]  ;;  %315 = vst [vmem:[#allocation2 + $0x12c] sm:$0xf] %v7558_v44 }
  0xf2   : > { %v3267_v63 = vadd.f32 %v3266_v54, %v7335_v58  ;;  %v1385_v58 = vsel %vm7074_vm4, %v1380_v22, %v1384_v30  ;;  %4016 = vmatpush.bf16.msra.mxu1 %v6429_v29  ;;  %v1389_v22 = vrot.slane %v1387_v5, 4  ;;  %v1392_v30 = vrot.slane %v1390_v6, 5  ;;  %v5284_v39 = vld [vmem:[%s6818_s25 + $0xa4] sm:$0x1] }
  0xf3   : > { %v3843_v11 = vadd.f32 %v3842_v51, %v3354_v38  ;;  %1537 = vst [vmem:[#allocation2 + $0x298] sm:$0xf] %v1385_v58  ;;  %v603_v51 = vshrl.u32 %v7512_v56, 16  ;;  %v609_v38 = vshll.u32 %v269_v8, 16  ;;  %v5851_v29 = vor.u32 %v6390_v4, %v5848_v50  ;;  %v250_v56 = vld [vmem:[%s6818_s25 + $0x90] sm:$0xf] }
  0xf4   : > { %314 = vst [vmem:[#allocation2 + $0x120] sm:$0xf] %v250_v56  ;;  %v1393_v19 = vor.u32 %v1392_v30, %v1389_v22  ;;  %v1680_v4 = vrot.slane %v6854_v12, 5  ;;  %v623_v50 = vshll.u32 %v7558_v44, 16 }
  0xf5   : > { %v7549_v1 = vadd.f32 %v7504_v34, %v3843_v11  ;;  %v605_v54 = vrot.slane %v603_v51, 4  ;;  %v5567_v34 = vor.u32 %v6464_v35, %v5566_v25  ;;  %v5847_v11 = vor.u32 %v6391_v21, %v5846_v43 }
  0xf6   : > { %v1398_v25 = vrot.slane %v1396_v18, 5  ;;  %v1406_v21 = vshll.u32 %v5284_v39, 16  ;;  %v1394_v30 = vrot.slane %v1393_v19, 4  ;;  %v6465_v19 = vld [vmem:[#allocation2 + $0x274] sm:$0xf] }
  0xf7   : > { %8291 = vst [vmem:[#allocation24_spill] sm:$0xff] %v7549_v1  ;;  %v606_v28 = vor.u32 %v605_v54, %v601_v55  ;;  %v611_v1 = vrot.slane %v609_v38, 5  ;;  %v617_v55 = vshll.u32 %v250_v56, 16  ;;  %v1411_v38 = vshrl.u32 %v6892_v26, 16 }
  0xf8   : > { %v3355_v62 = vpop.f32.mrf.mxu2  ;;  %v3844_v9 = vpop.f32.mrf.mxu3  ;;  %v1403_v10 = vor.u32 %v1402_v46, %v1398_v25 }
  0xf9   : > { %v3356_v58 = vadd.f32 %v3355_v62, %v3267_v63  ;;  %v3269_v8 = vpop.f32.mrf.mxu1  ;;  %v7552_v49 = vpop.f32.mrf.mxu0  ;;  %v607_v6 = vrot.slane %v606_v28, 4  ;;  %v614_v63 = vshrl.u32 %v250_v56, 16  ;;  %v5300_v56 = vld [vmem:[%s6818_s25 + $0x9c] sm:$0xe]  ;;  %v619_v54 = vrot.slane %v617_v55, 5 }
  0xfa   : > { %v3270_v5 = vadd.f32 %v3269_v8, %v7363_v27  ;;  %v1408_v62 = vrot.slane %v1406_v21, 5  ;;  %v1404_v12 = vrot.slane %v1403_v10, 4  ;;  %v6394_v21 = vld [vmem:[#allocation2 + $0xf8] sm:$0xf0]  ;;  %v6393_v10 = vld [vmem:[#allocation2 + $0xf4] sm:$0xf] }
  0xfb   : > { %v3845_v51 = vadd.f32 %v3844_v9, %v3356_v58  ;;  %v612_v27 = vsel %vm7074_vm4, %v607_v6, %v611_v1  ;;  %v616_v35 = vrot.slane %v614_v63, 4  ;;  %v5316_v9 = vrot.slane %v5300_v56, 9  ;;  %v5572_v63 = vld [vmem:[#allocation2 + $0x27c] sm:$0xf0] }
  0xfc   : > { %3308 = vmatmul.bf16.gmra.mxu1 %v5563_v15  ;;  %3975 = vmatmul.bf16.gmra.mxu0 %v5851_v29  ;;  %764 = vst [vmem:[#allocation2 + $0x118] sm:$0xf] %v612_v27  ;;  %v1683_v58 = vrot.slane %v5284_v39, 5  ;;  %v625_v6 = vrot.slane %v623_v50, 5  ;;  %v5578_v39 = vld [vmem:[#allocation2 + $0x278] sm:$0xf] }
  0xfd   : > { %3397 = vmatmul.bf16.gmra.mxu2 %v5567_v34  ;;  %3886 = vmatmul.bf16.gmra.mxu3 %v5847_v11  ;;  %v7565_v43 = vadd.f32 %v7526_v57, %v3845_v51  ;;  %v1682_v57 = vrot.slane %v1680_v4, 4  ;;  %v620_v8 = vor.u32 %v619_v54, %v616_v35  ;;  %v1399_v11 = vsel %vm7074_vm4, %v1394_v30, %v1398_v25  ;;  %v270_v51 = vld [vmem:[%s6818_s25 + $0x98] sm:$0x1]  ;;  %v5858_v25 = vld [vmem:[#allocation2 + $0xf0] sm:$0xf] }
  0xfe   : > { %v1681_v46 = vsel %vm7085_vm5, %v5316_v9, %v1680_v4  ;;  %1538 = vst [vmem:[#allocation2 + $0x2a4] sm:$0xf] %v1399_v11  ;;  %v627_v4 = vshrl.u32 %v7558_v44, 16  ;;  %v5860_v50 = vld [vmem:[#allocation2 + $0xfc] sm:$0xf0]  ;;  %v633_v35 = vshll.u32 %v270_v51, 16 }
  0xff   : > { %v1684_v55 = vsel %vm7085_vm5, %v1682_v57, %v1683_v58  ;;  %v621_v27 = vrot.slane %v620_v8, 4  ;;  %1762 = vst [vmem:[#allocation2 + $0x2a8] sm:$0xf] %v1681_v46  ;;  %v1413_v30 = vrot.slane %v1411_v38, 4  ;;  %v5859_v46 = vor.u32 %v6394_v21, %v5858_v25 }
 0x100   : > { %v3358_v22 = vpop.f32.mrf.mxu2  ;;  %v3847_v1 = vpop.f32.mrf.mxu3  ;;  %1763 = vst [vmem:[#allocation2 + $0x2b4] sm:$0xf] %v1684_v55  ;;  %v635_v51 = vrot.slane %v633_v35, 5 }
 0x101   : > { %v3359_v15 = vadd.f32 %v3358_v22, %v3270_v5  ;;  %v3271_v29 = vpop.f32.mrf.mxu1  ;;  %v7571_v28 = vpop.f32.mrf.mxu0  ;;  %v1409_v5 = vsel %vm7074_vm4, %v1404_v12, %v1408_v62  ;;  %v626_v56 = vsel %vm7074_vm4, %v621_v27, %v625_v6  ;;  %v1424_v22 = vshrl.u32 %v6895_v31, 16 }
 0x102   : > { %v3272_v34 = vadd.f32 %v3271_v29, %v7384_v7  ;;  %v1414_v7 = vshll.u32 %v6892_v26, 16  ;;  %1539 = vst [vmem:[#allocation2 + $0x2b0] sm:$0xf] %v1409_v5  ;;  %v629_v26 = vrot.slane %v627_v4, 4  ;;  %v5863_v29 = vor.u32 %v6393_v10, %v5860_v50  ;;  %v7597_v4 = vld [vmem:[%s6818_s25 + $0xa0] sm:$0xf] }
 0x103   : > { %v3848_v18 = vadd.f32 %v3847_v1, %v3359_v15  ;;  %v6467_v1 = vld [vmem:[#allocation2 + $0x280] sm:$0xf0]  ;;  %765 = vst [vmem:[#allocation2 + $0x124] sm:$0xf] %v626_v56  ;;  %v5575_v15 = vor.u32 %v6465_v19, %v5572_v63  ;;  %v1426_v5 = vrot.slane %v1424_v22, 4  ;;  %v6556_v63 = vld [vmem:[%s8256_s1 + $0x188] sm:$0xff] }
 0x104   : > { %v1416_v62 = vrot.slane %v1414_v7, 5  ;;  %v630_v12 = vor.u32 %v629_v26, %v625_v6  ;;  %v1420_v7 = vshll.u32 %v6895_v31, 16  ;;  %317 = vst [vmem:[#allocation2 + $0x144] sm:$0xf] %v7597_v4  ;;  %v1435_v10 = vshrl.u32 %v6952_v52, 16  ;;  %4620 = vmatpush.bf16.msra.mxu2 %v6556_v63 }
 0x105   : > { %v7588_v54 = vadd.f32 %v7552_v49, %v3848_v18  ;;  %v5579_v49 = vor.u32 %v6467_v1, %v5578_v39  ;;  %v252_v18 = vld [vmem:[%s6818_s25 + $0x9c] sm:$0xf]  ;;  %v6564_v39 = vld [vmem:[%s8256_s1 + $0x1c8] sm:$0xff]  ;;  %v5285_v50 = vld [vmem:[%s6818_s25 + $0xb0] sm:$0x1]  ;;  %v647_v56 = vshll.u32 %v7597_v4, 16 }
 0x106   : > { %v631_v27 = vrot.slane %v630_v12, 4  ;;  %316 = vst [vmem:[#allocation2 + $0x138] sm:$0xf] %v252_v18  ;;  %v1417_v6 = vor.u32 %v1416_v62, %v1413_v30  ;;  %v641_v19 = vshll.u32 %v252_v18, 16  ;;  %v1422_v25 = vrot.slane %v1420_v7, 5  ;;  %4709 = vmatpush.bf16.msra.mxu3 %v6564_v39 }
 0x107   : > { %v1430_v22 = vshll.u32 %v5285_v50, 16  ;;  %v5301_v1 = vld [vmem:[%s6818_s25 + $0xa8] sm:$0xe]  ;;  %v1687_v26 = vrot.slane %v6895_v31, 5  ;;  %v1438_v39 = vshll.u32 %v6952_v52, 16 }
 0x108   : > { %v3360_v9 = vpop.f32.mrf.mxu2  ;;  %v3849_v57 = vpop.f32.mrf.mxu3  ;;  %v1427_v35 = vor.u32 %v1426_v5, %v1422_v25 }
 0x109   : > { %v3361_v58 = vadd.f32 %v3360_v9, %v3272_v34  ;;  %v3274_v8 = vpop.f32.mrf.mxu1  ;;  %v7591_v11 = vpop.f32.mrf.mxu0  ;;  %v638_v34 = vshrl.u32 %v252_v18, 16 }
 0x10a   : > { %v3275_v55 = vadd.f32 %v3274_v8, %v7406_v0  ;;  %v636_v0 = vsel %vm7074_vm4, %v631_v27, %v635_v51  ;;  %v1689_v51 = vrot.slane %v1687_v26, 4 }
 0x10b   : > { %v3850_v38 = vadd.f32 %v3849_v57, %v3361_v58  ;;  %766 = vst [vmem:[#allocation2 + $0x130] sm:$0xf] %v636_v0  ;;  %v640_v30 = vrot.slane %v638_v34, 4  ;;  %v1418_v57 = vrot.slane %v1417_v6, 4  ;;  %v6468_v6 = vld [vmem:[#allocation2 + $0x28c] sm:$0xf] }
 0x10c   : > { %3313 = vmatmul.bf16.gmra.mxu1 %v5575_v15  ;;  %3980 = vmatmul.bf16.gmra.mxu0 %v5863_v29  ;;  %v1690_v15 = vrot.slane %v5285_v50, 5  ;;  %v643_v29 = vrot.slane %v641_v19, 5  ;;  %v5584_v34 = vld [vmem:[#allocation2 + $0x294] sm:$0xf0]  ;;  %v6428_v19 = vld [vmem:[%s8256_s1 + $0x88] sm:$0xff] }
 0x10d   : > { %3402 = vmatmul.bf16.gmra.mxu2 %v5579_v49  ;;  %3891 = vmatmul.bf16.gmra.mxu3 %v5859_v46  ;;  %v7609_v21 = vadd.f32 %v7571_v28, %v3850_v38  ;;  %v5317_v28 = vrot.slane %v5301_v1, 9  ;;  %v1428_v49 = vrot.slane %v1427_v35, 4  ;;  %v1432_v46 = vrot.slane %v1430_v22, 5  ;;  %v271_v38 = vld [vmem:[%s6818_s25 + $0xa4] sm:$0x1] }
 0x10e   : > { %v1423_v31 = vsel %vm7074_vm4, %v1418_v57, %v1422_v25  ;;  %v644_v27 = vor.u32 %v643_v29, %v640_v30  ;;  %v1691_v63 = vsel %vm7085_vm5, %v1689_v51, %v1690_v15  ;;  %v5590_v25 = vld [vmem:[#allocation2 + $0x290] sm:$0xf]  ;;  %v5870_v50 = vld [vmem:[#allocation2 + $0x108] sm:$0xf]  ;;  %v6397_v35 = vld [vmem:[#allocation2 + $0x110] sm:$0xf0]  ;;  %4017 = vmatpush.bf16.msra.mxu1 %v6428_v19 }
 0x10f   : > { %v1688_v5 = vsel %vm7085_vm5, %v5317_v28, %v1687_v26  ;;  %v1433_v0 = vsel %vm7074_vm4, %v1428_v49, %v1432_v46  ;;  %1540 = vst [vmem:[#allocation2 + $0x2bc] sm:$0xf] %v1423_v31  ;;  %v649_v1 = vrot.slane %v647_v56, 5  ;;  %v651_v26 = vshrl.u32 %v7597_v4, 16  ;;  %v5872_v30 = vld [vmem:[#allocation2 + $0x114] sm:$0xf0] }
 0x110   : > { %v3363_v62 = vpop.f32.mrf.mxu2  ;;  %v3852_v9 = vpop.f32.mrf.mxu3  ;;  %1541 = vst [vmem:[#allocation2 + $0x2c8] sm:$0xf] %v1433_v0  ;;  %v645_v22 = vrot.slane %v644_v27, 4  ;;  %v1448_v57 = vshrl.u32 %v6957_v53, 16  ;;  %v6470_v28 = vld [vmem:[#allocation2 + $0x298] sm:$0xf0]  ;;  %v5587_v49 = vor.u32 %v6468_v6, %v5584_v34  ;;  %v5871_v27 = vor.u32 %v6397_v35, %v5870_v50 }
 0x111   : > { %v3364_v12 = vadd.f32 %v3363_v62, %v3275_v55  ;;  %v3276_v58 = vpop.f32.mrf.mxu1  ;;  %v7616_v8 = vpop.f32.mrf.mxu0  ;;  %v6396_v55 = vld [vmem:[#allocation2 + $0x10c] sm:$0xf]  ;;  %1764 = vst [vmem:[#allocation2 + $0x2c0] sm:$0xf] %v1688_v5  ;;  %v657_v62 = vshll.u32 %v271_v38, 16  ;;  %v653_v15 = vrot.slane %v651_v26, 4  ;;  %v5591_v38 = vor.u32 %v6470_v28, %v5590_v25 }
 0x112   : > { %v3277_v18 = vadd.f32 %v3276_v58, %v7434_v3  ;;  %v6572_v3 = vld [vmem:[%s8256_s1 + $0x208] sm:$0xff]  ;;  %1765 = vst [vmem:[#allocation2 + $0x2cc] sm:$0xf] %v1691_v63  ;;  %v650_v52 = vsel %vm7074_vm4, %v645_v22, %v649_v1  ;;  %v1437_v56 = vrot.slane %v1435_v10, 4  ;;  %v1440_v29 = vrot.slane %v1438_v39, 5 }
 0x113   : > { %v3853_v7 = vadd.f32 %v3852_v9, %v3364_v12  ;;  %4798 = vmatpush.bf16.msra.mxu0 %v6572_v3  ;;  %767 = vst [vmem:[#allocation2 + $0x13c] sm:$0xf] %v650_v52  ;;  %v5875_v46 = vor.u32 %v6396_v55, %v5872_v30  ;;  %v654_v51 = vor.u32 %v653_v15, %v649_v1  ;;  %v254_v19 = vld [vmem:[%s6818_s25 + $0xa8] sm:$0xf]  ;;  %v1450_v3 = vrot.slane %v1448_v57, 4 }
 0x114   : > { %v1444_v39 = vshll.u32 %v6957_v53, 16  ;;  %v7648_v22 = vld [vmem:[%s6818_s25 + $0xac] sm:$0xf]  ;;  %318 = vst [vmem:[#allocation2 + $0x150] sm:$0xf] %v254_v19  ;;  %v1441_v6 = vor.u32 %v1440_v29, %v1437_v56  ;;  %v665_v34 = vshll.u32 %v254_v19, 16 }
 0x115   : > { %v7637_v9 = vadd.f32 %v7591_v11, %v3853_v7  ;;  %v659_v7 = vrot.slane %v657_v62, 5  ;;  %v655_v63 = vrot.slane %v654_v51, 4  ;;  %319 = vst [vmem:[#allocation2 + $0x15c] sm:$0xf] %v7648_v22  ;;  %v5286_v55 = vld [vmem:[%s6818_s25 + $0xbc] sm:$0x1] }
 0x116   : > { %v1446_v25 = vrot.slane %v1444_v39, 5  ;;  %v1454_v35 = vshll.u32 %v5286_v55, 16  ;;  %v1694_v1 = vrot.slane %v6957_v53, 5  ;;  %v671_v26 = vshll.u32 %v7648_v22, 16  ;;  %v5302_v57 = vld [vmem:[%s6818_s25 + $0xb4] sm:$0xe] }
 0x117   : > { %v1459_v30 = vshrl.u32 %v7025_v42, 16  ;;  %v667_v52 = vrot.slane %v665_v34, 5  ;;  %v1442_v29 = vrot.slane %v1441_v6, 4  ;;  %v5596_v39 = vld [vmem:[#allocation2 + $0x2ac] sm:$0xf0] }
 0x118   : > { %v3365_v12 = vpop.f32.mrf.mxu2  ;;  %v3854_v58 = vpop.f32.mrf.mxu3  ;;  %v1451_v62 = vor.u32 %v1450_v3, %v1446_v25  ;;  %v673_v3 = vrot.slane %v671_v26, 5  ;;  %v5602_v34 = vld [vmem:[#allocation2 + $0x2a8] sm:$0xf] }
 0x119   : > { %v3366_v11 = vadd.f32 %v3365_v12, %v3277_v18  ;;  %v3279_v31 = vpop.f32.mrf.mxu1  ;;  %v7642_v5 = vpop.f32.mrf.mxu0  ;;  %v662_v18 = vshrl.u32 %v254_v19, 16  ;;  %v1456_v12 = vrot.slane %v1454_v35, 5  ;;  %v272_v19 = vld [vmem:[%s6818_s25 + $0xb0] sm:$0x1]  ;;  %v675_v35 = vshrl.u32 %v7648_v22, 16 }
 0x11a   : > { %v3280_v10 = vadd.f32 %v3279_v31, %v7461_v61  ;;  %v660_v61 = vsel %vm7074_vm4, %v655_v63, %v659_v7  ;;  %v1452_v53 = vrot.slane %v1451_v62, 4  ;;  %v6471_v63 = vld [vmem:[#allocation2 + $0x2a4] sm:$0xf]  ;;  %v681_v62 = vshll.u32 %v272_v19, 16 }
 0x11b   : > { %v3855_v0 = vadd.f32 %v3854_v58, %v3366_v11  ;;  %768 = vst [vmem:[#allocation2 + $0x148] sm:$0xf] %v660_v61  ;;  %v664_v28 = vrot.slane %v662_v18, 4  ;;  %v5318_v58 = vrot.slane %v5302_v57, 9  ;;  %v1697_v11 = vrot.slane %v5286_v55, 5 }
 0x11c   : > { %3318 = vmatmul.bf16.gmra.mxu1 %v5587_v49  ;;  %3985 = vmatmul.bf16.gmra.mxu0 %v5875_v46  ;;  %v5882_v61 = vld [vmem:[#allocation2 + $0x120] sm:$0xf]  ;;  %v6400_v55 = vld [vmem:[#allocation2 + $0x128] sm:$0xf0] }
 0x11d   : > { %3407 = vmatmul.bf16.gmra.mxu2 %v5591_v38  ;;  %3896 = vmatmul.bf16.gmra.mxu3 %v5871_v27  ;;  %v7655_v50 = vadd.f32 %v7616_v8, %v3855_v0  ;;  %v1696_v8 = vrot.slane %v1694_v1, 4  ;;  %v668_v31 = vor.u32 %v667_v52, %v664_v28  ;;  %v1447_v27 = vsel %vm7074_vm4, %v1442_v29, %v1446_v25  ;;  %v6399_v25 = vld [vmem:[#allocation2 + $0x124] sm:$0xf]  ;;  %v6473_v52 = vld [vmem:[#allocation2 + $0x2b0] sm:$0xf0] }
 0x11e   : > { %v1695_v7 = vsel %vm7085_vm5, %v5318_v58, %v1694_v1  ;;  %1542 = vst [vmem:[#allocation2 + $0x2d4] sm:$0xf] %v1447_v27  ;;  %v5884_v1 = vld [vmem:[#allocation2 + $0x12c] sm:$0xf0]  ;;  %v1472_v28 = vshrl.u32 %v7032_v48, 16  ;;  %v5599_v58 = vor.u32 %v6471_v63, %v5596_v39  ;;  %v683_v27 = vrot.slane %v681_v62, 5 }
 0x11f   : > { %v1698_v6 = vsel %vm7085_vm5, %v1696_v8, %v1697_v11  ;;  %v669_v18 = vrot.slane %v668_v31, 4  ;;  %1766 = vst [vmem:[#allocation2 + $0x2d8] sm:$0xf] %v1695_v7  ;;  %v5887_v8 = vor.u32 %v6399_v25, %v5884_v1  ;;  %v5883_v31 = vor.u32 %v6400_v55, %v5882_v61  ;;  %v256_v7 = vld [vmem:[%s6818_s25 + $0xb4] sm:$0xf] }
 0x120   : > { %v3368_v15 = vpop.f32.mrf.mxu2  ;;  %v3857_v56 = vpop.f32.mrf.mxu3  ;;  %1767 = vst [vmem:[#allocation2 + $0x2e4] sm:$0xf] %v1698_v6  ;;  %v1474_v19 = vrot.slane %v1472_v28, 4  ;;  %v7686_v6 = vld [vmem:[%s6818_s25 + $0xb8] sm:$0xf]  ;;  %v1701_v28 = vrot.slane %v7032_v48, 5 }
 0x121   : > { %v3369_v49 = vadd.f32 %v3368_v15, %v3280_v10  ;;  %v3281_v46 = vpop.f32.mrf.mxu1  ;;  %v7661_v51 = vpop.f32.mrf.mxu0  ;;  %v1457_v10 = vsel %vm7074_vm4, %v1452_v53, %v1456_v12  ;;  %v674_v26 = vsel %vm7074_vm4, %v669_v18, %v673_v3  ;;  %v1461_v15 = vrot.slane %v1459_v30, 4  ;;  %320 = vst [vmem:[#allocation2 + $0x168] sm:$0xf] %v256_v7  ;;  %v6555_v18 = vld [vmem:[%s8256_s1 + $0x180] sm:$0xff]  ;;  %v5287_v25 = vld [vmem:[%s6818_s25 + $0xc8] sm:$0x1] }
 0x122   : > { %v3282_v38 = vadd.f32 %v3281_v46, %v7482_v24  ;;  %v1462_v24 = vshll.u32 %v7025_v42, 16  ;;  %1543 = vst [vmem:[#allocation2 + $0x2e0] sm:$0xf] %v1457_v10  ;;  %v677_v42 = vrot.slane %v675_v35, 4  ;;  %v1468_v30 = vshll.u32 %v7032_v48, 16  ;;  %4621 = vmatpush.bf16.msra.mxu2 %v6555_v18 }
 0x123   : > { %v3858_v0 = vadd.f32 %v3857_v56, %v3369_v49  ;;  %769 = vst [vmem:[#allocation2 + $0x154] sm:$0xf] %v674_v26  ;;  %v695_v35 = vshll.u32 %v7686_v6, 16  ;;  %v1478_v26 = vshll.u32 %v5287_v25, 16  ;;  %v5303_v62 = vld [vmem:[%s6818_s25 + $0xc0] sm:$0xe] }
 0x124   : > { %v1464_v56 = vrot.slane %v1462_v24, 5  ;;  %v678_v49 = vor.u32 %v677_v42, %v673_v3  ;;  %321 = vst [vmem:[#allocation2 + $0x174] sm:$0xf] %v7686_v6  ;;  %v689_v3 = vshll.u32 %v256_v7, 16  ;;  %v6563_v24 = vld [vmem:[%s8256_s1 + $0x1c0] sm:$0xff] }
 0x125   : > { %v7678_v57 = vadd.f32 %v7642_v5, %v3858_v0  ;;  %v5603_v5 = vor.u32 %v6473_v52, %v5602_v34  ;;  %v1470_v34 = vrot.slane %v1468_v30, 5  ;;  %4710 = vmatpush.bf16.msra.mxu3 %v6563_v24  ;;  %v6427_v30 = vld [vmem:[%s8256_s1 + $0x80] sm:$0xff]  ;;  %v5894_v18 = vld [vmem:[#allocation2 + $0x138] sm:$0xf] }
 0x126   : > { %v679_v10 = vrot.slane %v678_v49, 4  ;;  %v1465_v63 = vor.u32 %v1464_v56, %v1461_v15  ;;  %v6403_v24 = vld [vmem:[#allocation2 + $0x140] sm:$0xf0]  ;;  %4018 = vmatpush.bf16.msra.mxu1 %v6427_v30 }
 0x127   : > { %v1475_v1 = vor.u32 %v1474_v19, %v1470_v34  ;;  %v6474_v19 = vld [vmem:[#allocation2 + $0x2bc] sm:$0xf] }
 0x128   : > { %v3370_v29 = vpop.f32.mrf.mxu2  ;;  %v3859_v12 = vpop.f32.mrf.mxu3  ;;  %v684_v39 = vsel %vm7074_vm4, %v679_v10, %v683_v27  ;;  %v1466_v56 = vrot.slane %v1465_v63, 4  ;;  %v6402_v10 = vld [vmem:[#allocation2 + $0x13c] sm:$0xf]  ;;  %v6571_v63 = vld [vmem:[%s8256_s1 + $0x200] sm:$0xff] }
 0x129   : > { %v3371_v46 = vadd.f32 %v3370_v29, %v3282_v38  ;;  %v3284_v53 = vpop.f32.mrf.mxu1  ;;  %v7681_v11 = vpop.f32.mrf.mxu0  ;;  %v686_v38 = vshrl.u32 %v256_v7, 16  ;;  %770 = vst [vmem:[#allocation2 + $0x160] sm:$0xf] %v684_v39  ;;  %v1704_v29 = vrot.slane %v5287_v25, 5  ;;  %v1476_v49 = vrot.slane %v1475_v1, 4  ;;  %4799 = vmatpush.bf16.msra.mxu0 %v6571_v63 }
 0x12a   : > { %v3285_v55 = vadd.f32 %v3284_v53, %v7309_v14  ;;  %v1703_v53 = vrot.slane %v1701_v28, 4  ;;  %v5614_v39 = vld [vmem:[#allocation2 + $0x2c0] sm:$0xf]  ;;  %v699_v25 = vshrl.u32 %v7686_v6, 16  ;;  %v5896_v1 = vld [vmem:[#allocation2 + $0x144] sm:$0xf0] }
 0x12b   : > { %v3860_v0 = vadd.f32 %v3859_v12, %v3371_v46  ;;  %v688_v52 = vrot.slane %v686_v38, 4  ;;  %v691_v12 = vrot.slane %v689_v3, 5  ;;  %v1480_v46 = vrot.slane %v1478_v26, 5  ;;  %v5352_v63 = vld [vmem:[%s6818_s25 + $0x20] sm:$0x1] }
 0x12c   : > { %3323 = vmatmul.bf16.gmra.mxu1 %v5599_v58  ;;  %3990 = vmatmul.bf16.gmra.mxu0 %v5887_v8  ;;  %v1705_v3 = vsel %vm7085_vm5, %v1703_v53, %v1704_v29  ;;  %v5899_v29 = vor.u32 %v6402_v10, %v5896_v1  ;;  %v5895_v53 = vor.u32 %v6403_v24, %v5894_v18 }
 0x12d   : > { %3412 = vmatmul.bf16.gmra.mxu2 %v5603_v5  ;;  %3901 = vmatmul.bf16.gmra.mxu3 %v5883_v31  ;;  %v7698_v61 = vadd.f32 %v7661_v51, %v3860_v0  ;;  %v5319_v51 = vrot.slane %v5303_v62, 9  ;;  %v1471_v5 = vsel %vm7074_vm4, %v1466_v56, %v1470_v34  ;;  %v273_v31 = vld [vmem:[%s6818_s25 + $0xbc] sm:$0x1]  ;;  %v692_v27 = vor.u32 %v691_v12, %v688_v52  ;;  %v5608_v0 = vld [vmem:[#allocation2 + $0x2c4] sm:$0xf0] }
 0x12e   : > { %v1481_v38 = vsel %vm7074_vm4, %v1476_v49, %v1480_v46  ;;  %1544 = vst [vmem:[#allocation2 + $0x2ec] sm:$0xf] %v1471_v5  ;;  %v705_v26 = vshll.u32 %v273_v31, 16  ;;  %v5321_v31 = vld [vmem:[%s6818_s25 + $0x1c] sm:$0xf] }
 0x12f   : > { %v1702_v48 = vsel %vm7085_vm5, %v5319_v51, %v1701_v28  ;;  %1545 = vst [vmem:[#allocation2 + $0x2f8] sm:$0xf] %v1481_v38  ;;  %v693_v34 = vrot.slane %v692_v27, 4  ;;  %v6476_v28 = vld [vmem:[#allocation2 + $0x2c8] sm:$0xf0]  ;;  %v5611_v51 = vor.u32 %v6474_v19, %v5608_v0  ;;  %v826_v27 = vrot.slane %v7091_v59, 5 }
 0x130   : > { %v3373_v42 = vpop.f32.mrf.mxu2  ;;  %v3862_v15 = vpop.f32.mrf.mxu3  ;;  %1768 = vst [vmem:[#allocation2 + $0x2f0] sm:$0xf] %v1702_v48  ;;  %v5615_v46 = vor.u32 %v6476_v28, %v5614_v39  ;;  %v707_v5 = vrot.slane %v705_v26, 5  ;;  %v5320_v48 = vld [vmem:[%s6818_s25 + $0x18] sm:$0xf]  ;;  %v1878_v0 = vshll.u32 %v5321_v31, 16 }
 0x131   : > { %v3374_v14 = vadd.f32 %v3373_v42, %v3285_v55  ;;  %v3286_v58 = vpop.f32.mrf.mxu1  ;;  %v7705_v8 = vpop.f32.mrf.mxu0  ;;  %v697_v55 = vrot.slane %v695_v35, 5  ;;  %1769 = vst [vmem:[#allocation2 + $0x2fc] sm:$0xf] %v1705_v3  ;;  %v701_v42 = vrot.slane %v699_v25, 4  ;;  %v1872_v19 = vshll.u32 %v5320_v48, 16 }
 0x132   : > { %v3287_v35 = vadd.f32 %v3286_v58, %v7337_v2  ;;  %1836 = vst [vmem:[#allocation2 + $0x300] sm:$0xf] %v5320_v48  ;;  %v1869_v58 = vshrl.u32 %v5320_v48, 16  ;;  %v1882_v59 = vshrl.u32 %v5321_v31, 16  ;;  %v828_v3 = vrot.slane %v826_v27, 4 }
 0x133   : > { %v3863_v7 = vadd.f32 %v3862_v15, %v3374_v14  ;;  %v698_v52 = vsel %vm7074_vm4, %v693_v34, %v697_v55  ;;  %v702_v12 = vor.u32 %v701_v42, %v697_v55  ;;  %1837 = vst [vmem:[#allocation2 + $0x30c] sm:$0xf] %v5321_v31  ;;  %v6724_v39 = vld [vmem:[%s6818_s25 + $0x8] sm:$0x1]  ;;  %v1874_v24 = vrot.slane %v1872_v19, 5 }
 0x134   : > { %771 = vst [vmem:[#allocation2 + $0x16c] sm:$0xf] %v698_v52  ;;  %v1871_v30 = vrot.slane %v1869_v58, 4  ;;  %v829_v18 = vrot.slane %v6724_v39, 5  ;;  %v1880_v34 = vrot.slane %v1878_v0, 5  ;;  %v1884_v1 = vrot.slane %v1882_v59, 4 }
 0x135   : > { %v7724_v62 = vadd.f32 %v7681_v11, %v3863_v7  ;;  %v703_v2 = vrot.slane %v702_v12, 4  ;;  %v274_v25 = vld [vmem:[%s6818_s25] sm:$0xe]  ;;  %v1888_v26 = vshll.u32 %v5352_v63, 16  ;;  %v5368_v28 = vld [vmem:[%s6818_s25 + $0x18] sm:$0xe] }
 0x136   : > { %v5620_v19 = vld [vmem:[#allocation2 + $0x2dc] sm:$0xf0]  ;;  %v6406_v0 = vld [vmem:[#allocation2 + $0x158] sm:$0xf0] }
 0x137   : > { %v708_v10 = vsel %vm7074_vm4, %v703_v2, %v707_v5 }
 0x138   : > { %v3375_v15 = vpop.f32.mrf.mxu2  ;;  %v3864_v56 = vpop.f32.mrf.mxu3  ;;  %772 = vst [vmem:[#allocation2 + $0x178] sm:$0xf] %v708_v10 }
 0x139   : > { %v3376_v14 = vadd.f32 %v3375_v15, %v3287_v35  ;;  %v3289_v49 = vpop.f32.mrf.mxu1  ;;  %v7729_v11 = vpop.f32.mrf.mxu0  ;;  %v5224_v35 = vrot.slane %v274_v25, 9  ;;  %v1875_v15 = vor.u32 %v1874_v24, %v1871_v30  ;;  %v6479_v24 = vld [vmem:[#allocation2 + $0x2e0] sm:$0xf0] }
 0x13a   : > { %v3290_v55 = vadd.f32 %v3289_v49, %v7365_v16  ;;  %v830_v16 = vsel %vm7085_vm5, %v828_v3, %v829_v18  ;;  %v5626_v18 = vld [vmem:[#allocation2 + $0x2d8] sm:$0xf] }
 0x13b   : > { %v3865_v7 = vadd.f32 %v3864_v56, %v3376_v14  ;;  %v5384_v56 = vrot.slane %v5368_v28, 9  ;;  %v1885_v14 = vor.u32 %v1884_v1, %v1880_v34  ;;  %v827_v5 = vsel %vm7085_vm5, %v5224_v35, %v826_v27  ;;  %969 = vst [vmem:[#allocation2 + $0x14] sm:$0xf] %v830_v16  ;;  %v6405_v27 = vld [vmem:[#allocation2 + $0x154] sm:$0xf] }
 0x13c   : > { %3328 = vmatmul.bf16.gmra.mxu1 %v5611_v51  ;;  %3995 = vmatmul.bf16.gmra.mxu0 %v5899_v29  ;;  %v2366_v51 = vrot.slane %v5321_v31, 5  ;;  %v1876_v49 = vrot.slane %v1875_v15, 4  ;;  %968 = vst [vmem:[#allocation2 + $0x8] sm:$0xf] %v827_v5  ;;  %v5906_v31 = vld [vmem:[#allocation2 + $0x150] sm:$0xf]  ;;  %v5627_v35 = vor.u32 %v6479_v24, %v5626_v18 }
 0x13d   : > { %3417 = vmatmul.bf16.gmra.mxu2 %v5615_v46  ;;  %3906 = vmatmul.bf16.gmra.mxu3 %v5895_v53  ;;  %v7738_v38 = vadd.f32 %v7705_v8, %v3865_v7  ;;  %v1890_v46 = vrot.slane %v1888_v26, 5  ;;  %v2369_v53 = vrot.slane %v5352_v63, 5  ;;  %v6477_v7 = vld [vmem:[#allocation2 + $0x2d4] sm:$0xf]  ;;  %v1886_v2 = vrot.slane %v1885_v14, 4 }
 0x13e   : > { %v2368_v58 = vrot.slane %v2366_v51, 4  ;;  %v1881_v10 = vsel %vm7074_vm4, %v1876_v49, %v1880_v34  ;;  %v2367_v30 = vsel %vm7085_vm5, %v5384_v56, %v2366_v51  ;;  %v5908_v63 = vld [vmem:[#allocation2 + $0x15c] sm:$0xf0]  ;;  %v5623_v1 = vor.u32 %v6477_v7, %v5620_v19  ;;  %v5323_v56 = vld [vmem:[%s6818_s25 + $0x28] sm:$0xf] }
 0x13f   : > { %v1891_v59 = vsel %vm7074_vm4, %v1886_v2, %v1890_v46  ;;  %2284 = vst [vmem:[#allocation2 + $0x304] sm:$0xf] %v1881_v10  ;;  %v5911_v26 = vor.u32 %v6405_v27, %v5908_v63  ;;  %v5907_v15 = vor.u32 %v6406_v0, %v5906_v31  ;;  %v5353_v5 = vld [vmem:[%s6818_s25 + $0x2c] sm:$0x1]  ;;  %v833_v49 = vrot.slane %v7133_v37, 5 }
 0x140   : > { %v3378_v52 = vpop.f32.mrf.mxu2  ;;  %v3867_v42 = vpop.f32.mrf.mxu3  ;;  %v2370_v3 = vsel %vm7085_vm5, %v2368_v58, %v2369_v53  ;;  %2285 = vst [vmem:[#allocation2 + $0x310] sm:$0xf] %v1891_v59  ;;  %v275_v58 = vld [vmem:[%s6818_s25 + $0xc] sm:$0xe]  ;;  %v1912_v31 = vshll.u32 %v5353_v5, 16  ;;  %v2373_v0 = vrot.slane %v5323_v56, 5 }
 0x141   : > { %v3379_v8 = vadd.f32 %v3378_v52, %v3290_v55  ;;  %v3291_v29 = vpop.f32.mrf.mxu1  ;;  %v3958_v12 = vpop.f32.mrf.mxu0  ;;  %2508 = vst [vmem:[#allocation2 + $0x308] sm:$0xf] %v2367_v30  ;;  %v5225_v27 = vrot.slane %v275_v58, 9  ;;  %v835_v63 = vrot.slane %v833_v49, 4  ;;  %v6725_v59 = vld [vmem:[%s6818_s25 + $0x14] sm:$0x1] }
 0x142   : > { %v3292_v34 = vadd.f32 %v3291_v29, %v7386_v60  ;;  %2509 = vst [vmem:[#allocation2 + $0x314] sm:$0xf] %v2370_v3  ;;  %v1902_v60 = vshll.u32 %v5323_v56, 16  ;;  %v1906_v29 = vshrl.u32 %v5323_v56, 16  ;;  %v836_v3 = vrot.slane %v6725_v59, 5 }
 0x143   : > { %v3868_v48 = vadd.f32 %v3867_v42, %v3379_v8  ;;  %1839 = vst [vmem:[#allocation2 + $0x324] sm:$0xf] %v5323_v56  ;;  %v5369_v18 = vld [vmem:[%s6818_s25 + $0x24] sm:$0xe]  ;;  %v5632_v56 = vld [vmem:[#allocation2 + $0x2f4] sm:$0xf0] }
 0x144   : > { %v1908_v7 = vrot.slane %v1906_v29, 4  ;;  %v6408_v29 = vld [vmem:[#allocation2 + $0x16c] sm:$0xf]  ;;  %v5324_v59 = vld [vmem:[%s6818_s25 + $0x30] sm:$0xf] }
 0x145   : > { %v7757_v39 = vadd.f32 %v7729_v11, %v3868_v48  ;;  %v5322_v11 = vld [vmem:[%s6818_s25 + $0x24] sm:$0xf]  ;;  %v1904_v48 = vrot.slane %v1902_v60, 5  ;;  %v2376_v60 = vrot.slane %v5353_v5, 5  ;;  %1840 = vst [vmem:[#allocation2 + $0x330] sm:$0xf] %v5324_v59 }
 0x146   : > { %1838 = vst [vmem:[#allocation2 + $0x318] sm:$0xf] %v5322_v11  ;;  %v1893_v8 = vshrl.u32 %v5322_v11, 16  ;;  %v1896_v14 = vshll.u32 %v5322_v11, 16  ;;  %v2375_v11 = vrot.slane %v2373_v0, 4 }
 0x147   : > { %v1909_v37 = vor.u32 %v1908_v7, %v1904_v48  ;;  %v5638_v7 = vld [vmem:[#allocation2 + $0x2f0] sm:$0xf] }
 0x148   : > { %v3380_v55 = vpop.f32.mrf.mxu2  ;;  %v3869_v25 = vpop.f32.mrf.mxu3  ;;  %v1895_v46 = vrot.slane %v1893_v8, 4  ;;  %v1898_v53 = vrot.slane %v1896_v14, 5  ;;  %v6409_v8 = vld [vmem:[#allocation2 + $0x170] sm:$0xf0] }
 0x149   : > { %v3381_v28 = vadd.f32 %v3380_v55, %v3292_v34  ;;  %v3294_v52 = vpop.f32.mrf.mxu1  ;;  %v3961_v42 = vpop.f32.mrf.mxu0 }
 0x14a   : > { %v3295_v2 = vadd.f32 %v3294_v52, %v7408_v45  ;;  %v1899_v19 = vor.u32 %v1898_v53, %v1895_v46  ;;  %v834_v45 = vsel %vm7085_vm5, %v5225_v27, %v833_v49  ;;  %v6480_v52 = vld [vmem:[#allocation2 + $0x2ec] sm:$0xf]  ;;  %v5920_v46 = vld [vmem:[#allocation2 + $0x174] sm:$0xf0] }
 0x14b   : > { %v3870_v51 = vadd.f32 %v3869_v25, %v3381_v28  ;;  %v1914_v25 = vrot.slane %v1912_v31, 5  ;;  %970 = vst [vmem:[#allocation2 + $0x20] sm:$0xf] %v834_v45  ;;  %v5635_v31 = vor.u32 %v6480_v52, %v5632_v56  ;;  %v5354_v45 = vld [vmem:[%s6818_s25 + $0x38] sm:$0x1] }
 0x14c   : > { %3333 = vmatmul.bf16.gmra.mxu1 %v5623_v1  ;;  %4000 = vmatmul.bf16.gmra.mxu0 %v5911_v26  ;;  %v1900_v55 = vrot.slane %v1899_v19, 4  ;;  %v837_v1 = vsel %vm7085_vm5, %v835_v63, %v836_v3  ;;  %v5385_v26 = vrot.slane %v5369_v18, 9  ;;  %v5325_v3 = vld [vmem:[%s6818_s25 + $0x34] sm:$0xf]  ;;  %v1936_v56 = vshll.u32 %v5354_v45, 16 }
 0x14d   : > { %3422 = vmatmul.bf16.gmra.mxu2 %v5627_v35  ;;  %3911 = vmatmul.bf16.gmra.mxu3 %v5907_v15  ;;  %v7763_v16 = vadd.f32 %v3958_v12, %v3870_v51  ;;  %v1910_v15 = vrot.slane %v1909_v37, 4  ;;  %v5918_v51 = vld [vmem:[#allocation2 + $0x168] sm:$0xf]  ;;  %971 = vst [vmem:[#allocation2 + $0x2c] sm:$0xf] %v837_v1 }
 0x14e   : > { %v1905_v35 = vsel %vm7074_vm4, %v1900_v55, %v1904_v48  ;;  %v2374_v14 = vsel %vm7085_vm5, %v5385_v26, %v2373_v0  ;;  %v6482_v48 = vld [vmem:[#allocation2 + $0x2f8] sm:$0xf0]  ;;  %v5923_v0 = vor.u32 %v6408_v29, %v5920_v46  ;;  %v5919_v63 = vor.u32 %v6409_v8, %v5918_v51  ;;  %1841 = vst [vmem:[#allocation2 + $0x33c] sm:$0xf] %v5325_v3  ;;  %v6726_v46 = vld [vmem:[%s6818_s25 + $0x20] sm:$0x1] }
 0x14f   : > { %v1915_v53 = vsel %vm7074_vm4, %v1910_v15, %v1914_v25  ;;  %2286 = vst [vmem:[#allocation2 + $0x31c] sm:$0xf] %v1905_v35  ;;  %v5639_v27 = vor.u32 %v6482_v48, %v5638_v7  ;;  %v1920_v55 = vshll.u32 %v5324_v59, 16  ;;  %v840_v26 = vrot.slane %v7149_v36, 5  ;;  %v276_v15 = vld [vmem:[%s6818_s25 + $0x18] sm:$0xe] }
 0x150   : > { %v3383_v10 = vpop.f32.mrf.mxu2  ;;  %v3872_v30 = vpop.f32.mrf.mxu3  ;;  %2287 = vst [vmem:[#allocation2 + $0x328] sm:$0xf] %v1915_v53  ;;  %v2380_v51 = vrot.slane %v5325_v3, 5  ;;  %v843_v53 = vrot.slane %v6726_v46, 5  ;;  %v5370_v7 = vld [vmem:[%s6818_s25 + $0x30] sm:$0xe] }
 0x151   : > { %v3384_v24 = vadd.f32 %v3383_v10, %v3295_v2  ;;  %v3296_v12 = vpop.f32.mrf.mxu1  ;;  %v3963_v34 = vpop.f32.mrf.mxu0  ;;  %v2377_v2 = vsel %vm7085_vm5, %v2375_v11, %v2376_v60  ;;  %2510 = vst [vmem:[#allocation2 + $0x320] sm:$0xf] %v2374_v14  ;;  %v1922_v25 = vrot.slane %v1920_v55, 5  ;;  %v5226_v60 = vrot.slane %v276_v15, 9  ;;  %v5327_v46 = vld [vmem:[%s6818_s25 + $0x40] sm:$0xf] }
 0x152   : > { %v3297_v58 = vadd.f32 %v3296_v12, %v7436_v20  ;;  %2511 = vst [vmem:[#allocation2 + $0x32c] sm:$0xf] %v2377_v2  ;;  %v1926_v20 = vshll.u32 %v5325_v3, 16  ;;  %v1930_v12 = vshrl.u32 %v5325_v3, 16  ;;  %v842_v29 = vrot.slane %v840_v26, 4 }
 0x153   : > { %v3873_v28 = vadd.f32 %v3872_v30, %v3384_v24  ;;  %v1917_v24 = vshrl.u32 %v5324_v59, 16  ;;  %v6365_v59 = vld [vmem:[#allocation2 + $0x10] sm:$0xf0]  ;;  %v6074_v3 = vld [vmem:[#allocation2 + $0x300] sm:$0xf]  ;;  %v2383_v55 = vrot.slane %v5354_v45, 5 }
 0x154   : > { %v1932_v52 = vrot.slane %v1930_v12, 4  ;;  %v6509_v12 = vld [vmem:[#allocation2 + $0x310] sm:$0xf0]  ;;  %1843 = vst [vmem:[#allocation2 + $0x354] sm:$0xf] %v5327_v46 }
 0x155   : > { %v7780_v49 = vadd.f32 %v3961_v42, %v3873_v28  ;;  %v1919_v37 = vrot.slane %v1917_v24, 4  ;;  %v1928_v28 = vrot.slane %v1926_v20, 5  ;;  %v6082_v20 = vld [vmem:[#allocation2 + $0x308] sm:$0xf] }
 0x157   : > { %v1923_v11 = vor.u32 %v1922_v25, %v1919_v37  ;;  %v1933_v36 = vor.u32 %v1932_v52, %v1928_v28 }
 0x158   : > { %v3385_v5 = vpop.f32.mrf.mxu2  ;;  %v3874_v19 = vpop.f32.mrf.mxu3 }
 0x159   : > { %v3386_v10 = vadd.f32 %v3385_v5, %v3297_v58  ;;  %v3299_v30 = vpop.f32.mrf.mxu1  ;;  %v3966_v42 = vpop.f32.mrf.mxu0  ;;  %v1924_v58 = vrot.slane %v1923_v11, 4  ;;  %v1938_v5 = vrot.slane %v1936_v56, 5  ;;  %v6083_v56 = vor.u32 %v6509_v12, %v6082_v20  ;;  %v6727_v20 = vld [vmem:[%s6818_s25 + $0x2c] sm:$0x1] }
 0x15a   : > { %v3300_v35 = vadd.f32 %v3299_v30, %v7463_v13  ;;  %v841_v13 = vsel %vm7085_vm5, %v5226_v60, %v840_v26  ;;  %v6507_v26 = vld [vmem:[#allocation2 + $0x304] sm:$0xf]  ;;  %v850_v12 = vrot.slane %v6727_v20, 5 }
 0x15b   : > { %v3875_v18 = vadd.f32 %v3874_v19, %v3386_v10  ;;  %v844_v19 = vsel %vm7085_vm5, %v842_v29, %v843_v53  ;;  %v5746_v10 = vld [vmem:[#allocation2 + $0x8] sm:$0xf]  ;;  %972 = vst [vmem:[#allocation2 + $0x38] sm:$0xf] %v841_v13  ;;  %v1929_v30 = vsel %vm7074_vm4, %v1924_v58, %v1928_v28  ;;  %v6076_v28 = vld [vmem:[#allocation2 + $0x30c] sm:$0xf0] }
 0x15c   : > { %3338 = vmatmul.bf16.gmra.mxu1 %v5635_v31  ;;  %4005 = vmatmul.bf16.gmra.mxu0 %v5923_v0  ;;  %v5386_v31 = vrot.slane %v5370_v7, 9  ;;  %973 = vst [vmem:[#allocation2 + $0x44] sm:$0xf] %v844_v19  ;;  %v5747_v11 = vor.u32 %v6365_v59, %v5746_v10  ;;  %v6079_v60 = vor.u32 %v6507_v26, %v6076_v28  ;;  %v5326_v29 = vld [vmem:[%s6818_s25 + $0x3c] sm:$0xf]  ;;  %v847_v19 = vrot.slane %v7180_v41, 5 }
 0x15d   : > { %3427 = vmatmul.bf16.gmra.mxu2 %v5639_v27  ;;  %3916 = vmatmul.bf16.gmra.mxu3 %v5919_v63  ;;  %v7788_v1 = vadd.f32 %v3963_v34, %v3875_v18  ;;  %v1934_v27 = vrot.slane %v1933_v36, 4  ;;  %v2382_v63 = vrot.slane %v2380_v51, 4  ;;  %v6508_v18 = vld [vmem:[#allocation2 + $0x308] sm:$0xf0]  ;;  %2288 = vst [vmem:[#allocation2 + $0x334] sm:$0xf] %v1929_v30 }
 0x15e   : > { %v2381_v24 = vsel %vm7085_vm5, %v5386_v31, %v2380_v51  ;;  %1842 = vst [vmem:[#allocation2 + $0x348] sm:$0xf] %v5326_v29  ;;  %v1941_v7 = vshrl.u32 %v5326_v29, 16  ;;  %v277_v30 = vld [vmem:[%s6818_s25 + $0x24] sm:$0xe]  ;;  %v2387_v59 = vrot.slane %v5327_v46, 5 }
 0x15f   : > { %v1939_v37 = vsel %vm7074_vm4, %v1934_v27, %v1938_v5  ;;  %v2384_v52 = vsel %vm7085_vm5, %v2382_v63, %v2383_v55  ;;  %2512 = vst [vmem:[#allocation2 + $0x338] sm:$0xf] %v2381_v24  ;;  %v5355_v5 = vld [vmem:[%s6818_s25 + $0x44] sm:$0x1]  ;;  %v5227_v24 = vrot.slane %v277_v30, 9  ;;  %v849_v55 = vrot.slane %v847_v19, 4 }
 0x160   : > { %v3388_v8 = vpop.f32.mrf.mxu2  ;;  %v3877_v14 = vpop.f32.mrf.mxu3  ;;  %2289 = vst [vmem:[#allocation2 + $0x340] sm:$0xf] %v1939_v37  ;;  %v1943_v58 = vrot.slane %v1941_v7, 4  ;;  %v1960_v63 = vshll.u32 %v5355_v5, 16  ;;  %v5371_v37 = vld [vmem:[%s6818_s25 + $0x3c] sm:$0xe] }
 0x161   : > { %v3389_v48 = vadd.f32 %v3388_v8, %v3300_v35  ;;  %v3301_v34 = vpop.f32.mrf.mxu1  ;;  %v3968_v2 = vpop.f32.mrf.mxu0  ;;  %2513 = vst [vmem:[#allocation2 + $0x344] sm:$0xf] %v2384_v52  ;;  %v2390_v7 = vrot.slane %v5355_v5, 5 }
 0x162   : > { %v3302_v35 = vadd.f32 %v3301_v34, %v7484_v17  ;;  %v1950_v17 = vshll.u32 %v5327_v46, 16  ;;  %v1954_v34 = vshrl.u32 %v5327_v46, 16  ;;  %v6511_v46 = vld [vmem:[#allocation2 + $0x320] sm:$0xf0] }
 0x163   : > { %v3878_v0 = vadd.f32 %v3877_v14, %v3389_v48  ;;  %v6075_v14 = vor.u32 %v6508_v18, %v6074_v3  ;;  %v1944_v48 = vshll.u32 %v5326_v29, 16  ;;  %v6086_v29 = vld [vmem:[#allocation2 + $0x318] sm:$0xf] }
 0x164   : > { %v1952_v31 = vrot.slane %v1950_v17, 5  ;;  %v6512_v17 = vld [vmem:[#allocation2 + $0x328] sm:$0xf0] }
 0x165   : > { %v7805_v25 = vadd.f32 %v3966_v42, %v3878_v0  ;;  %v1946_v36 = vrot.slane %v1944_v48, 5  ;;  %v1956_v0 = vrot.slane %v1954_v34, 4  ;;  %v6094_v48 = vld [vmem:[#allocation2 + $0x320] sm:$0xf] }
 0x167   : > { %v1947_v27 = vor.u32 %v1946_v36, %v1943_v58  ;;  %v1957_v41 = vor.u32 %v1956_v0, %v1952_v31  ;;  %v6510_v36 = vld [vmem:[#allocation2 + $0x31c] sm:$0xf] }
 0x168   : > { %v3390_v45 = vpop.f32.mrf.mxu2  ;;  %v3879_v15 = vpop.f32.mrf.mxu3 }
 0x169   : > { %v3391_v51 = vadd.f32 %v3390_v45, %v3302_v35  ;;  %v3304_v8 = vpop.f32.mrf.mxu1  ;;  %v3971_v42 = vpop.f32.mrf.mxu0  ;;  %v1948_v52 = vrot.slane %v1947_v27, 4  ;;  %v1962_v35 = vrot.slane %v1960_v63, 5  ;;  %v851_v45 = vsel %vm7085_vm5, %v849_v55, %v850_v12  ;;  %v5329_v55 = vld [vmem:[%s6818_s25 + $0x4c] sm:$0xf] }
 0x16a   : > { %v3305_v10 = vadd.f32 %v3304_v8, %v7330_v23  ;;  %v848_v23 = vsel %vm7085_vm5, %v5227_v24, %v847_v19  ;;  %v1958_v8 = vrot.slane %v1957_v41, 4  ;;  %975 = vst [vmem:[#allocation2 + $0x5c] sm:$0xf] %v851_v45  ;;  %v6088_v19 = vld [vmem:[#allocation2 + $0x324] sm:$0xf0]  ;;  %v6095_v27 = vor.u32 %v6512_v17, %v6094_v48 }
 0x16b   : > { %v3880_v53 = vadd.f32 %v3879_v15, %v3391_v51  ;;  %v5387_v15 = vrot.slane %v5371_v37, 9  ;;  %974 = vst [vmem:[#allocation2 + $0x50] sm:$0xf] %v848_v23  ;;  %v1953_v51 = vsel %vm7074_vm4, %v1948_v52, %v1952_v31  ;;  %v5328_v24 = vld [vmem:[%s6818_s25 + $0x48] sm:$0xf]  ;;  %v854_v23 = vrot.slane %v7220_v40, 5 }
 0x16c   : > { %4019 = vmatmul.bf16.vlgmr.msra.gmra.mxu1 %v5747_v11  ;;  %4800 = vmatmul.bf16.vlgmr.msra.gmra.mxu0 %v6083_v56  ;;  %v5758_v56 = vld [vmem:[#allocation2 + $0x20] sm:$0xf]  ;;  %v1963_v34 = vsel %vm7074_vm4, %v1958_v8, %v1962_v35  ;;  %2290 = vst [vmem:[#allocation2 + $0x34c] sm:$0xf] %v1953_v51  ;;  %v1965_v12 = vshrl.u32 %v5328_v24, 16  ;;  %v1968_v37 = vshll.u32 %v5328_v24, 16 }
 0x16d   : > { %4622 = vmatmul.bf16.vlgmr.msra.gmra.mxu2 %v6075_v14  ;;  %4711 = vmatmul.bf16.vlgmr.msra.gmra.mxu3 %v6079_v60  ;;  %v7813_v13 = vadd.f32 %v3968_v2, %v3880_v53  ;;  %v2389_v14 = vrot.slane %v2387_v59, 4  ;;  %v6368_v60 = vld [vmem:[#allocation2 + $0x28] sm:$0xf0]  ;;  %v2388_v53 = vsel %vm7085_vm5, %v5387_v15, %v2387_v59  ;;  %2291 = vst [vmem:[#allocation2 + $0x358] sm:$0xf] %v1963_v34 }
 0x16e   : > { %2514 = vst [vmem:[#allocation2 + $0x350] sm:$0xf] %v2388_v53  ;;  %v5759_v30 = vor.u32 %v6368_v60, %v5758_v56  ;;  %v1970_v52 = vrot.slane %v1968_v37, 5  ;;  %v5356_v41 = vld [vmem:[%s6818_s25 + $0x50] sm:$0x1]  ;;  %v2394_v60 = vrot.slane %v5329_v55, 5 }
 0x16f   : > { %v2391_v31 = vsel %vm7085_vm5, %v2389_v14, %v2390_v7  ;;  %1844 = vst [vmem:[#allocation2 + $0x360] sm:$0xf] %v5328_v24  ;;  %v278_v51 = vld [vmem:[%s6818_s25 + $0x30] sm:$0xe]  ;;  %v1984_v14 = vshll.u32 %v5356_v41, 16  ;;  %v856_v7 = vrot.slane %v854_v23, 4 }
 0x170   : > { %v3393_v3 = vpop.f32.mrf.mxu2  ;;  %v3882_v18 = vpop.f32.mrf.mxu3  ;;  %2515 = vst [vmem:[#allocation2 + $0x35c] sm:$0xf] %v2391_v31  ;;  %v5228_v53 = vrot.slane %v278_v51, 9  ;;  %v6728_v48 = vld [vmem:[%s6818_s25 + $0x38] sm:$0x1]  ;;  %v2397_v37 = vrot.slane %v5356_v41, 5 }
 0x171   : > { %v3394_v26 = vadd.f32 %v3393_v3, %v3305_v10  ;;  %v3306_v2 = vpop.f32.mrf.mxu1  ;;  %v3973_v28 = vpop.f32.mrf.mxu0  ;;  %v6087_v3 = vor.u32 %v6511_v46, %v6086_v29  ;;  %1845 = vst [vmem:[#allocation2 + $0x36c] sm:$0xf] %v5329_v55  ;;  %v857_v17 = vrot.slane %v6728_v48, 5  ;;  %v5372_v34 = vld [vmem:[%s6818_s25 + $0x48] sm:$0xe] }
 0x172   : > { %v3307_v0 = vadd.f32 %v3306_v2, %v7359_v32  ;;  %v1974_v32 = vshll.u32 %v5329_v55, 16  ;;  %v1967_v2 = vrot.slane %v1965_v12, 4  ;;  %v6371_v24 = vld [vmem:[#allocation2 + $0x40] sm:$0xf0]  ;;  %v5331_v48 = vld [vmem:[%s6818_s25 + $0x58] sm:$0xf] }
 0x173   : > { %v3883_v11 = vadd.f32 %v3882_v18, %v3394_v26  ;;  %v6091_v18 = vor.u32 %v6510_v36, %v6088_v19  ;;  %v1978_v26 = vshrl.u32 %v5329_v55, 16  ;;  %v6098_v55 = vld [vmem:[#allocation2 + $0x330] sm:$0xf]  ;;  %1847 = vst [vmem:[#allocation2 + $0x384] sm:$0xf] %v5331_v48 }
 0x174   : > { %v1976_v45 = vrot.slane %v1974_v32, 5  ;;  %v1971_v8 = vor.u32 %v1970_v52, %v1967_v2  ;;  %v6106_v32 = vld [vmem:[#allocation2 + $0x338] sm:$0xf] }
 0x175   : > { %v7830_v58 = vadd.f32 %v3971_v42, %v3883_v11  ;;  %v1980_v15 = vrot.slane %v1978_v26, 4  ;;  %v8292_v11 = vld [vmem:[#allocation9_spill] sm:$0xff]  ;;  %v6515_v26 = vld [vmem:[#allocation2 + $0x340] sm:$0xf0] }
 0x176   : > { %v1972_v31 = vrot.slane %v1971_v8, 4 }
 0x177   : > { %v1981_v40 = vor.u32 %v1980_v15, %v1976_v45 }
 0x178   : > { %v3395_v5 = vpop.f32.mrf.mxu2  ;;  %v3884_v10 = vpop.f32.mrf.mxu3 }
 0x179   : > { %v3396_v63 = vadd.f32 %v3395_v5, %v3307_v0  ;;  %v3309_v59 = vpop.f32.mrf.mxu1  ;;  %v3976_v42 = vpop.f32.mrf.mxu0  ;;  %v1986_v0 = vrot.slane %v1984_v14, 5  ;;  %v855_v5 = vsel %vm7085_vm5, %v5228_v53, %v854_v23  ;;  %v6513_v23 = vld [vmem:[#allocation2 + $0x334] sm:$0xf]  ;;  %v6107_v14 = vor.u32 %v6515_v26, %v6106_v32 }
 0x17a   : > { %v3310_v56 = vadd.f32 %v3309_v59, %v8292_v11  ;;  %976 = vst [vmem:[#allocation2 + $0x68] sm:$0xf] %v855_v5  ;;  %v1977_v59 = vsel %vm7074_vm4, %v1972_v31, %v1976_v45  ;;  %v6100_v45 = vld [vmem:[#allocation2 + $0x33c] sm:$0xf0]  ;;  %v2002_v31 = vshrl.u32 %v5331_v48, 16 }
 0x17b   : > { %v3885_v20 = vadd.f32 %v3884_v10, %v3396_v63  ;;  %v858_v10 = vsel %vm7085_vm5, %v856_v7, %v857_v17  ;;  %v5770_v63 = vld [vmem:[#allocation2 + $0x38] sm:$0xf]  ;;  %2292 = vst [vmem:[#allocation2 + $0x364] sm:$0xf] %v1977_v59  ;;  %v8293_v11 = vld [vmem:[#allocation11_spill] sm:$0xff]  ;;  %v6103_v53 = vor.u32 %v6513_v23, %v6100_v45 }
 0x17c   : > { %4024 = vmatmul.bf16.gmra.mxu1 %v5759_v30  ;;  %4805 = vmatmul.bf16.gmra.mxu0 %v6095_v27  ;;  %v5388_v30 = vrot.slane %v5372_v34, 9  ;;  %977 = vst [vmem:[#allocation2 + $0x74] sm:$0xf] %v858_v10  ;;  %v5771_v8 = vor.u32 %v6371_v24, %v5770_v63  ;;  %v5330_v7 = vld [vmem:[%s6818_s25 + $0x54] sm:$0xf]  ;;  %v2004_v59 = vrot.slane %v2002_v31, 4 }
 0x17d   : > { %4627 = vmatmul.bf16.gmra.mxu2 %v6087_v3  ;;  %4716 = vmatmul.bf16.gmra.mxu3 %v6091_v18  ;;  %v7838_v35 = vadd.f32 %v3973_v28, %v3885_v20  ;;  %v1982_v3 = vrot.slane %v1981_v40, 4  ;;  %v2396_v18 = vrot.slane %v2394_v60, 4  ;;  %v6514_v20 = vld [vmem:[#allocation2 + $0x338] sm:$0xf0]  ;;  %1846 = vst [vmem:[#allocation2 + $0x378] sm:$0xf] %v5330_v7 }
 0x17e   : > { %v2395_v12 = vsel %vm7085_vm5, %v5388_v30, %v2394_v60  ;;  %v1989_v34 = vshrl.u32 %v5330_v7, 16  ;;  %v5357_v5 = vld [vmem:[%s6818_s25 + $0x5c] sm:$0x1]  ;;  %v8294_v30 = vld [vmem:[#allocation3_spill] sm:$0xff]  ;;  %v279_v24 = vld [vmem:[%s6818_s25 + $0x3c] sm:$0xe] }
 0x17f   : > { %v1987_v2 = vsel %vm7074_vm4, %v1982_v3, %v1986_v0  ;;  %v2398_v15 = vsel %vm7085_vm5, %v2396_v18, %v2397_v37  ;;  %2516 = vst [vmem:[#allocation2 + $0x368] sm:$0xf] %v2395_v12  ;;  %v8295_v3 = vld [vmem:[#allocation14_spill] sm:$0xff]  ;;  %v2401_v12 = vrot.slane %v5331_v48, 5  ;;  %v5229_v26 = vrot.slane %v279_v24, 9  ;;  %v8296_v24 = vld [vmem:[#allocation16_spill] sm:$0xff] }
 0x180   : > { %v3398_v29 = vpop.f32.mrf.mxu2  ;;  %v3887_v46 = vpop.f32.mrf.mxu3  ;;  %2293 = vst [vmem:[#allocation2 + $0x370] sm:$0xf] %v1987_v2  ;;  %v1991_v40 = vrot.slane %v1989_v34, 4  ;;  %v6729_v23 = vld [vmem:[%s6818_s25 + $0x44] sm:$0x1] }
 0x181   : > { %v3399_v36 = vadd.f32 %v3398_v29, %v3310_v56  ;;  %v3311_v28 = vpop.f32.mrf.mxu1  ;;  %v3978_v19 = vpop.f32.mrf.mxu0  ;;  %2517 = vst [vmem:[#allocation2 + $0x374] sm:$0xf] %v2398_v15  ;;  %v864_v45 = vrot.slane %v6729_v23, 5  ;;  %v5373_v15 = vld [vmem:[%s6818_s25 + $0x54] sm:$0xe] }
 0x182   : > { %v3312_v56 = vadd.f32 %v3311_v28, %v8293_v11  ;;  %v1998_v28 = vshll.u32 %v5331_v48, 16  ;;  %v6374_v34 = vld [vmem:[#allocation2 + $0x58] sm:$0xf0] }
 0x183   : > { %v3888_v27 = vadd.f32 %v3887_v46, %v3399_v36  ;;  %v6099_v46 = vor.u32 %v6514_v20, %v6098_v55  ;;  %v1992_v36 = vshll.u32 %v5330_v7, 16  ;;  %v2008_v20 = vshll.u32 %v5357_v5, 16 }
 0x184   : > { %v2000_v63 = vrot.slane %v1998_v28, 5  ;;  %v6517_v28 = vld [vmem:[#allocation2 + $0x350] sm:$0xf0] }
 0x185   : > { %v7855_v52 = vadd.f32 %v3976_v42, %v3888_v27  ;;  %v1994_v0 = vrot.slane %v1992_v36, 5  ;;  %v861_v27 = vrot.slane %v8294_v30, 5  ;;  %v6110_v36 = vld [vmem:[#allocation2 + $0x348] sm:$0xf]  ;;  %v6518_v30 = vld [vmem:[#allocation2 + $0x358] sm:$0xf0] }
 0x187   : > { %v1995_v55 = vor.u32 %v1994_v0, %v1991_v40  ;;  %v863_v2 = vrot.slane %v861_v27, 4  ;;  %v2404_v40 = vrot.slane %v5357_v5, 5  ;;  %v6118_v0 = vld [vmem:[#allocation2 + $0x350] sm:$0xf] }
 0x188   : > { %v3400_v41 = vpop.f32.mrf.mxu2  ;;  %v3889_v51 = vpop.f32.mrf.mxu3 }
 0x189   : > { %v3401_v60 = vadd.f32 %v3400_v41, %v3312_v56  ;;  %v3314_v29 = vpop.f32.mrf.mxu1  ;;  %v3981_v42 = vpop.f32.mrf.mxu0  ;;  %v1996_v41 = vrot.slane %v1995_v55, 4 }
 0x18a   : > { %v3315_v18 = vadd.f32 %v3314_v29, %v8295_v3  ;;  %v5389_v29 = vrot.slane %v5373_v15, 9  ;;  %v6516_v3 = vld [vmem:[#allocation2 + $0x34c] sm:$0xf]  ;;  %v5333_v15 = vld [vmem:[%s6818_s25 + $0x64] sm:$0xf] }
 0x18b   : > { %v3890_v17 = vadd.f32 %v3889_v51, %v3401_v60  ;;  %v2005_v51 = vor.u32 %v2004_v59, %v2000_v63  ;;  %v865_v60 = vsel %vm7085_vm5, %v863_v2, %v864_v45  ;;  %v2001_v7 = vsel %vm7074_vm4, %v1996_v41, %v2000_v63  ;;  %v6112_v63 = vld [vmem:[#allocation2 + $0x354] sm:$0xf0]  ;;  %v5332_v45 = vld [vmem:[%s6818_s25 + $0x60] sm:$0xf]  ;;  %1849 = vst [vmem:[#allocation2 + $0x39c] sm:$0xf] %v5333_v15 }
 0x18c   : > { %4029 = vmatmul.bf16.gmra.mxu1 %v5771_v8  ;;  %4810 = vmatmul.bf16.gmra.mxu0 %v6107_v14  ;;  %v2010_v8 = vrot.slane %v2008_v20, 5  ;;  %v862_v14 = vsel %vm7085_vm5, %v5229_v26, %v861_v27  ;;  %979 = vst [vmem:[#allocation2 + $0x8c] sm:$0xf] %v865_v60  ;;  %v2402_v31 = vsel %vm7085_vm5, %v5389_v29, %v2401_v12  ;;  %v2013_v41 = vshrl.u32 %v5332_v45, 16  ;;  %v5358_v29 = vld [vmem:[%s6818_s25 + $0x68] sm:$0x1] }
 0x18d   : > { %4632 = vmatmul.bf16.gmra.mxu2 %v6099_v46  ;;  %4721 = vmatmul.bf16.gmra.mxu3 %v6103_v53  ;;  %v7863_v10 = vadd.f32 %v3978_v19, %v3890_v17  ;;  %v5782_v53 = vld [vmem:[#allocation2 + $0x50] sm:$0xf]  ;;  %978 = vst [vmem:[#allocation2 + $0x80] sm:$0xf] %v862_v14  ;;  %v2006_v48 = vrot.slane %v2005_v51, 4  ;;  %v2403_v17 = vrot.slane %v2401_v12, 4  ;;  %v6111_v2 = vor.u32 %v6517_v28, %v6110_v36 }
 0x18e   : > { %2294 = vst [vmem:[#allocation2 + $0x37c] sm:$0xf] %v2001_v7  ;;  %v5783_v12 = vor.u32 %v6374_v34, %v5782_v53  ;;  %v6115_v23 = vor.u32 %v6516_v3, %v6112_v63  ;;  %v2016_v51 = vshll.u32 %v5332_v45, 16  ;;  %v2015_v14 = vrot.slane %v2013_v41, 4  ;;  %v8297_v53 = vld [vmem:[#allocation4_spill] sm:$0xff]  ;;  %v8298_v34 = vld [vmem:[#allocation19_spill] sm:$0xff] }
 0x18f   : > { %v2011_v27 = vsel %vm7074_vm4, %v2006_v48, %v2010_v8  ;;  %2518 = vst [vmem:[#allocation2 + $0x380] sm:$0xf] %v2402_v31  ;;  %v2026_v8 = vshrl.u32 %v5333_v15, 16  ;;  %v868_v7 = vrot.slane %v8297_v53, 5  ;;  %v280_v28 = vld [vmem:[%s6818_s25 + $0x48] sm:$0xe] }
 0x190   : > { %v3403_v37 = vpop.f32.mrf.mxu2  ;;  %v3892_v32 = vpop.f32.mrf.mxu3  ;;  %2295 = vst [vmem:[#allocation2 + $0x388] sm:$0xf] %v2011_v27  ;;  %v2018_v60 = vrot.slane %v2016_v51, 5  ;;  %v5230_v3 = vrot.slane %v280_v28, 9  ;;  %v2411_v53 = vrot.slane %v5358_v29, 5 }
 0x191   : > { %v3404_v11 = vadd.f32 %v3403_v37, %v3315_v18  ;;  %v3316_v19 = vpop.f32.mrf.mxu1  ;;  %v3983_v56 = vpop.f32.mrf.mxu0  ;;  %v2405_v18 = vsel %vm7085_vm5, %v2403_v17, %v2404_v40  ;;  %v6119_v37 = vor.u32 %v6518_v30, %v6118_v0  ;;  %1848 = vst [vmem:[#allocation2 + $0x390] sm:$0xf] %v5332_v45  ;;  %v2028_v17 = vrot.slane %v2026_v8, 4  ;;  %v6122_v8 = vld [vmem:[#allocation2 + $0x360] sm:$0xf] }
 0x192   : > { %v3317_v55 = vadd.f32 %v3316_v19, %v8296_v24  ;;  %2519 = vst [vmem:[#allocation2 + $0x38c] sm:$0xf] %v2405_v18  ;;  %v2022_v19 = vshll.u32 %v5333_v15, 16  ;;  %v2019_v31 = vor.u32 %v2018_v60, %v2015_v14  ;;  %v2032_v40 = vshll.u32 %v5358_v29, 16  ;;  %v6730_v18 = vld [vmem:[%s6818_s25 + $0x50] sm:$0x1] }
 0x193   : > { %v3893_v46 = vadd.f32 %v3892_v32, %v3404_v11  ;;  %v2408_v0 = vrot.slane %v5333_v15, 5  ;;  %v870_v63 = vrot.slane %v868_v7, 4  ;;  %v871_v24 = vrot.slane %v6730_v18, 5  ;;  %v5794_v15 = vld [vmem:[#allocation2 + $0x68] sm:$0xf] }
 0x194   : > { %v2024_v48 = vrot.slane %v2022_v19, 5  ;;  %v6377_v19 = vld [vmem:[#allocation2 + $0x70] sm:$0xf0]  ;;  %v6520_v14 = vld [vmem:[#allocation2 + $0x368] sm:$0xf0] }
 0x195   : > { %v7880_v59 = vadd.f32 %v3981_v42, %v3893_v46  ;;  %v2410_v51 = vrot.slane %v2408_v0, 4  ;;  %v6519_v28 = vld [vmem:[#allocation2 + $0x364] sm:$0xf] }
 0x198   : > { %v3405_v5 = vpop.f32.mrf.mxu2  ;;  %v3894_v20 = vpop.f32.mrf.mxu3 }
 0x199   : > { %v3406_v32 = vadd.f32 %v3405_v5, %v3317_v55  ;;  %v3319_v26 = vpop.f32.mrf.mxu1  ;;  %v3986_v42 = vpop.f32.mrf.mxu0  ;;  %v5374_v55 = vld [vmem:[%s6818_s25 + $0x60] sm:$0xe] }
 0x19a   : > { %v3320_v36 = vadd.f32 %v3319_v26, %v8298_v34  ;;  %v869_v26 = vsel %vm7085_vm5, %v5230_v3, %v868_v7  ;;  %v6130_v7 = vld [vmem:[#allocation2 + $0x368] sm:$0xf] }
 0x19b   : > { %v3895_v11 = vadd.f32 %v3894_v20, %v3406_v32  ;;  %v2034_v32 = vrot.slane %v2032_v40, 5  ;;  %980 = vst [vmem:[#allocation2 + $0x98] sm:$0xf] %v869_v26  ;;  %v8299_v40 = vld [vmem:[#allocation21_spill] sm:$0xff] }
 0x19c   : > { %4034 = vmatmul.bf16.gmra.mxu1 %v5783_v12  ;;  %4815 = vmatmul.bf16.gmra.mxu0 %v6119_v37  ;;  %v2020_v12 = vrot.slane %v2019_v31, 4  ;;  %v2029_v37 = vor.u32 %v2028_v17, %v2024_v48  ;;  %v6521_v17 = vld [vmem:[#allocation2 + $0x370] sm:$0xf0]  ;;  %v2412_v31 = vsel %vm7085_vm5, %v2410_v51, %v2411_v53 }
 0x19d   : > { %4637 = vmatmul.bf16.gmra.mxu2 %v6111_v2  ;;  %4726 = vmatmul.bf16.gmra.mxu3 %v6115_v23  ;;  %v7888_v46 = vadd.f32 %v3983_v56, %v3895_v11  ;;  %v872_v2 = vsel %vm7085_vm5, %v870_v63, %v871_v24  ;;  %v5390_v23 = vrot.slane %v5374_v55, 9  ;;  %v6131_v3 = vor.u32 %v6521_v17, %v6130_v7  ;;  %v281_v53 = vld [vmem:[%s6818_s25 + $0x54] sm:$0xe] }
 0x19e   : > { %v2025_v11 = vsel %vm7074_vm4, %v2020_v12, %v2024_v48  ;;  %v2030_v41 = vrot.slane %v2029_v37, 4  ;;  %981 = vst [vmem:[#allocation2 + $0xa4] sm:$0xf] %v872_v2  ;;  %v6124_v48 = vld [vmem:[#allocation2 + $0x36c] sm:$0xf0]  ;;  %v6123_v24 = vor.u32 %v6520_v14, %v6122_v8  ;;  %v8301_v14 = vld [vmem:[#allocation6_spill] sm:$0xff] }
 0x19f   : > { %v2409_v60 = vsel %vm7085_vm5, %v5390_v23, %v2408_v0  ;;  %2296 = vst [vmem:[#allocation2 + $0x394] sm:$0xf] %v2025_v11  ;;  %v6127_v55 = vor.u32 %v6519_v28, %v6124_v48  ;;  %v5335_v12 = vld [vmem:[%s6818_s25 + $0x70] sm:$0xf] }
 0x1a0   : > { %v3408_v30 = vpop.f32.mrf.mxu2  ;;  %v3897_v27 = vpop.f32.mrf.mxu3  ;;  %v2035_v34 = vsel %vm7074_vm4, %v2030_v41, %v2034_v32  ;;  %2520 = vst [vmem:[#allocation2 + $0x398] sm:$0xf] %v2409_v60  ;;  %v2050_v2 = vshrl.u32 %v5335_v12, 16  ;;  %v8300_v41 = vld [vmem:[#allocation5_spill] sm:$0xff] }
 0x1a1   : > { %v3409_v5 = vadd.f32 %v3408_v30, %v3320_v36  ;;  %v3321_v56 = vpop.f32.mrf.mxu1  ;;  %v3988_v20 = vpop.f32.mrf.mxu0  ;;  %2297 = vst [vmem:[#allocation2 + $0x3a0] sm:$0xf] %v2035_v34  ;;  %v875_v51 = vrot.slane %v8300_v41, 5  ;;  %v2415_v34 = vrot.slane %v5335_v12, 5  ;;  %v6523_v41 = vld [vmem:[#allocation2 + $0x380] sm:$0xf0] }
 0x1a2   : > { %v3322_v30 = vadd.f32 %v3321_v56, %v8299_v40  ;;  %2521 = vst [vmem:[#allocation2 + $0x3a4] sm:$0xf] %v2412_v31  ;;  %v2046_v56 = vshll.u32 %v5335_v12, 16  ;;  %v2052_v8 = vrot.slane %v2050_v2, 4  ;;  %v5231_v31 = vrot.slane %v281_v53, 9 }
 0x1a3   : > { %v3898_v45 = vadd.f32 %v3897_v27, %v3409_v5  ;;  %v5795_v27 = vor.u32 %v6377_v19, %v5794_v15  ;;  %v5334_v5 = vld [vmem:[%s6818_s25 + $0x6c] sm:$0xf]  ;;  %1851 = vst [vmem:[#allocation2 + $0x3b4] sm:$0xf] %v5335_v12  ;;  %v5359_v15 = vld [vmem:[%s6818_s25 + $0x74] sm:$0x1] }
 0x1a4   : > { %1850 = vst [vmem:[#allocation2 + $0x3a8] sm:$0xf] %v5334_v5  ;;  %v2037_v32 = vshrl.u32 %v5334_v5, 16  ;;  %v2040_v26 = vshll.u32 %v5334_v5, 16  ;;  %v2048_v19 = vrot.slane %v2046_v56, 5  ;;  %v2056_v17 = vshll.u32 %v5359_v15, 16 }
 0x1a5   : > { %v7905_v36 = vadd.f32 %v3986_v42, %v3898_v45  ;;  %v877_v40 = vrot.slane %v875_v51, 4  ;;  %v2417_v2 = vrot.slane %v2415_v34, 4 }
 0x1a6   : > { %v2039_v23 = vrot.slane %v2037_v32, 4  ;;  %v2042_v45 = vrot.slane %v2040_v26, 5  ;;  %v5806_v32 = vld [vmem:[#allocation2 + $0x80] sm:$0xf] }
 0x1a8   : > { %v3410_v29 = vpop.f32.mrf.mxu2  ;;  %v3899_v0 = vpop.f32.mrf.mxu3  ;;  %v2043_v7 = vor.u32 %v2042_v45, %v2039_v23  ;;  %v6380_v23 = vld [vmem:[#allocation2 + $0x88] sm:$0xf0]  ;;  %v6134_v45 = vld [vmem:[#allocation2 + $0x378] sm:$0xf] }
 0x1a9   : > { %v3411_v63 = vadd.f32 %v3410_v29, %v3322_v30  ;;  %v3324_v18 = vpop.f32.mrf.mxu1  ;;  %v3991_v42 = vpop.f32.mrf.mxu0  ;;  %v6731_v30 = vld [vmem:[%s6818_s25 + $0x5c] sm:$0x1] }
 0x1aa   : > { %v3325_v60 = vadd.f32 %v3324_v18, %v8301_v14  ;;  %v878_v29 = vrot.slane %v6731_v30, 5  ;;  %v876_v18 = vsel %vm7085_vm5, %v5231_v31, %v875_v51  ;;  %v2418_v51 = vrot.slane %v5359_v15, 5  ;;  %v6142_v14 = vld [vmem:[#allocation2 + $0x380] sm:$0xf] }
 0x1ab   : > { %v3900_v37 = vadd.f32 %v3899_v0, %v3411_v63  ;;  %v5375_v0 = vld [vmem:[%s6818_s25 + $0x6c] sm:$0xe]  ;;  %v2044_v63 = vrot.slane %v2043_v7, 4  ;;  %982 = vst [vmem:[#allocation2 + $0xb0] sm:$0xf] %v876_v18 }
 0x1ac   : > { %4039 = vmatmul.bf16.gmra.mxu1 %v5795_v27  ;;  %4820 = vmatmul.bf16.gmra.mxu0 %v6131_v3  ;;  %v879_v5 = vsel %vm7085_vm5, %v877_v40, %v878_v29  ;;  %v5391_v12 = vrot.slane %v5375_v0, 9  ;;  %v5807_v40 = vor.u32 %v6380_v23, %v5806_v32  ;;  %v8303_v23 = vld [vmem:[#allocation8_spill] sm:$0xff] }
 0x1ad   : > { %4642 = vmatmul.bf16.gmra.mxu2 %v6123_v24  ;;  %4731 = vmatmul.bf16.gmra.mxu3 %v6127_v55  ;;  %v7913_v11 = vadd.f32 %v3988_v20, %v3900_v37  ;;  %v2053_v24 = vor.u32 %v2052_v8, %v2048_v19  ;;  %v2058_v55 = vrot.slane %v2056_v17, 5  ;;  %v2049_v26 = vsel %vm7074_vm4, %v2044_v63, %v2048_v19  ;;  %v6522_v17 = vld [vmem:[#allocation2 + $0x37c] sm:$0xf]  ;;  %v6136_v19 = vld [vmem:[#allocation2 + $0x384] sm:$0xf0] }
 0x1ae   : > { %983 = vst [vmem:[#allocation2 + $0xbc] sm:$0xf] %v879_v5  ;;  %v2416_v8 = vsel %vm7085_vm5, %v5391_v12, %v2415_v34  ;;  %v6139_v63 = vor.u32 %v6522_v17, %v6136_v19 }
 0x1af   : > { %v2054_v56 = vrot.slane %v2053_v24, 4  ;;  %2298 = vst [vmem:[#allocation2 + $0x3ac] sm:$0xf] %v2049_v26  ;;  %v5336_v24 = vld [vmem:[%s6818_s25 + $0x78] sm:$0xf] }
 0x1b0   : > { %v3413_v28 = vpop.f32.mrf.mxu2  ;;  %v3902_v48 = vpop.f32.mrf.mxu3  ;;  %2522 = vst [vmem:[#allocation2 + $0x3b0] sm:$0xf] %v2416_v8  ;;  %v2061_v5 = vshrl.u32 %v5336_v24, 16  ;;  %v2064_v12 = vshll.u32 %v5336_v24, 16 }
 0x1b1   : > { %v3414_v27 = vadd.f32 %v3413_v28, %v3325_v60  ;;  %v3326_v20 = vpop.f32.mrf.mxu1  ;;  %v3993_v3 = vpop.f32.mrf.mxu0  ;;  %v6524_v60 = vld [vmem:[#allocation2 + $0x388] sm:$0xf0]  ;;  %v2059_v53 = vsel %vm7074_vm4, %v2054_v56, %v2058_v55  ;;  %v2419_v28 = vsel %vm7085_vm5, %v2417_v2, %v2418_v51  ;;  %v5337_v55 = vld [vmem:[%s6818_s25 + $0x7c] sm:$0xf]  ;;  %1852 = vst [vmem:[#allocation2 + $0x3c0] sm:$0xf] %v5336_v24 }
 0x1b2   : > { %2299 = vst [vmem:[#allocation2 + $0x3b8] sm:$0xf] %v2059_v53  ;;  %v6143_v30 = vor.u32 %v6524_v60, %v6142_v14  ;;  %v2063_v32 = vrot.slane %v2061_v5, 4  ;;  %v2066_v26 = vrot.slane %v2064_v12, 5  ;;  %v5360_v56 = vld [vmem:[%s6818_s25 + $0x80] sm:$0x1] }
 0x1b3   : > { %v3903_v37 = vadd.f32 %v3902_v48, %v3414_v27  ;;  %v8302_v48 = vld [vmem:[#allocation7_spill] sm:$0xff]  ;;  %2523 = vst [vmem:[#allocation2 + $0x3bc] sm:$0xf] %v2419_v28  ;;  %v6135_v27 = vor.u32 %v6523_v41, %v6134_v45  ;;  %v882_v45 = vrot.slane %v8303_v23, 5  ;;  %v8304_v51 = vld [vmem:[#allocation10_spill] sm:$0xff]  ;;  %v2080_v17 = vshll.u32 %v5360_v56, 16 }
 0x1b4   : > { %v3327_v31 = vadd.f32 %v3326_v20, %v8302_v48  ;;  %1853 = vst [vmem:[#allocation2 + $0x3cc] sm:$0xf] %v5337_v55  ;;  %v2070_v20 = vshll.u32 %v5337_v55, 16  ;;  %v282_v60 = vld [vmem:[%s6818_s25 + $0x60] sm:$0xe]  ;;  %v2067_v53 = vor.u32 %v2066_v26, %v2063_v32  ;;  %v2422_v19 = vrot.slane %v5337_v55, 5 }
 0x1b5   : > { %v7930_v7 = vadd.f32 %v3991_v42, %v3903_v37  ;;  %v2074_v37 = vshrl.u32 %v5337_v55, 16  ;;  %v6383_v23 = vld [vmem:[#allocation2 + $0xa0] sm:$0xf0] }
 0x1b6   : > { %v2072_v41 = vrot.slane %v2070_v20, 5  ;;  %v5818_v20 = vld [vmem:[#allocation2 + $0x98] sm:$0xf]  ;;  %v2424_v26 = vrot.slane %v2422_v19, 4 }
 0x1b7   : > { %v2076_v8 = vrot.slane %v2074_v37, 4 }
 0x1b8   : > { %v3415_v15 = vpop.f32.mrf.mxu2  ;;  %v3904_v34 = vpop.f32.mrf.mxu3 }
 0x1b9   : > { %v3416_v29 = vadd.f32 %v3415_v15, %v3327_v31  ;;  %v3329_v0 = vpop.f32.mrf.mxu1  ;;  %v3996_v42 = vpop.f32.mrf.mxu0  ;;  %v5232_v31 = vrot.slane %v282_v60, 9  ;;  %v884_v15 = vrot.slane %v882_v45, 4  ;;  %v2077_v24 = vor.u32 %v2076_v8, %v2072_v41  ;;  %v6154_v60 = vld [vmem:[#allocation2 + $0x398] sm:$0xf] }
 0x1ba   : > { %v3330_v14 = vadd.f32 %v3329_v0, %v8304_v51  ;;  %v6146_v51 = vld [vmem:[#allocation2 + $0x390] sm:$0xf] }
 0x1bb   : > { %v3905_v18 = vadd.f32 %v3904_v34, %v3416_v29  ;;  %v6732_v34 = vld [vmem:[%s6818_s25 + $0x68] sm:$0x1]  ;;  %v883_v0 = vsel %vm7085_vm5, %v5232_v31, %v882_v45  ;;  %v2078_v32 = vrot.slane %v2077_v24, 4  ;;  %v2425_v45 = vrot.slane %v5360_v56, 5 }
 0x1bc   : > { %4044 = vmatmul.bf16.gmra.mxu1 %v5807_v40  ;;  %4825 = vmatmul.bf16.gmra.mxu0 %v6143_v30  ;;  %v885_v40 = vrot.slane %v6732_v34, 5  ;;  %v5376_v30 = vld [vmem:[%s6818_s25 + $0x78] sm:$0xe]  ;;  %984 = vst [vmem:[#allocation2 + $0xc8] sm:$0xf] %v883_v0 }
 0x1bd   : > { %4647 = vmatmul.bf16.gmra.mxu2 %v6135_v27  ;;  %4736 = vmatmul.bf16.gmra.mxu3 %v6139_v63  ;;  %v7938_v2 = vadd.f32 %v3993_v3, %v3905_v18  ;;  %v2068_v63 = vrot.slane %v2067_v53, 4  ;;  %v2082_v18 = vrot.slane %v2080_v17, 5  ;;  %v5392_v55 = vrot.slane %v5376_v30, 9  ;;  %v6527_v53 = vld [vmem:[#allocation2 + $0x3a0] sm:$0xf0] }
 0x1be   : > { %v886_v5 = vsel %vm7085_vm5, %v884_v15, %v885_v40  ;;  %v2426_v31 = vsel %vm7085_vm5, %v2424_v26, %v2425_v45  ;;  %v8305_v15 = vld [vmem:[#allocation12_spill] sm:$0xff]  ;;  %v5819_v40 = vor.u32 %v6383_v23, %v5818_v20  ;;  %v6155_v30 = vor.u32 %v6527_v53, %v6154_v60  ;;  %v5338_v0 = vld [vmem:[%s6818_s25 + $0x84] sm:$0xf] }
 0x1bf   : > { %v2073_v37 = vsel %vm7074_vm4, %v2068_v63, %v2072_v41  ;;  %985 = vst [vmem:[#allocation2 + $0xd4] sm:$0xf] %v886_v5  ;;  %v2423_v8 = vsel %vm7085_vm5, %v5392_v55, %v2422_v19  ;;  %v2083_v17 = vsel %vm7074_vm4, %v2078_v32, %v2082_v18  ;;  %v6148_v41 = vld [vmem:[#allocation2 + $0x39c] sm:$0xf0]  ;;  %v5339_v5 = vld [vmem:[%s6818_s25 + $0x88] sm:$0xf] }
 0x1c0   : > { %v3418_v28 = vpop.f32.mrf.mxu2  ;;  %v3907_v48 = vpop.f32.mrf.mxu3  ;;  %2300 = vst [vmem:[#allocation2 + $0x3c4] sm:$0xf] %v2073_v37  ;;  %v2088_v37 = vshll.u32 %v5338_v0, 16  ;;  %v2098_v20 = vshrl.u32 %v5339_v5, 16  ;;  %v5361_v23 = vld [vmem:[%s6818_s25 + $0x8c] sm:$0x1] }
 0x1c1   : > { %v3419_v29 = vadd.f32 %v3418_v28, %v3330_v14  ;;  %v3331_v3 = vpop.f32.mrf.mxu1  ;;  %v3998_v27 = vpop.f32.mrf.mxu0  ;;  %v6526_v14 = vld [vmem:[#allocation2 + $0x398] sm:$0xf0]  ;;  %2301 = vst [vmem:[#allocation2 + $0x3d0] sm:$0xf] %v2083_v17  ;;  %v8307_v53 = vld [vmem:[#allocation15_spill] sm:$0xff] }
 0x1c2   : > { %v3332_v34 = vadd.f32 %v3331_v3, %v8305_v15  ;;  %2524 = vst [vmem:[#allocation2 + $0x3c8] sm:$0xf] %v2423_v8  ;;  %v6147_v24 = vor.u32 %v6526_v14, %v6146_v51  ;;  %v2094_v3 = vshll.u32 %v5339_v5, 16  ;;  %v2090_v26 = vrot.slane %v2088_v37, 5  ;;  %v8306_v14 = vld [vmem:[#allocation13_spill] sm:$0xff] }
 0x1c3   : > { %v3908_v12 = vadd.f32 %v3907_v48, %v3419_v29  ;;  %v6525_v48 = vld [vmem:[#allocation2 + $0x394] sm:$0xf]  ;;  %2525 = vst [vmem:[#allocation2 + $0x3d4] sm:$0xf] %v2426_v31  ;;  %v889_v8 = vrot.slane %v8306_v14, 5  ;;  %v2100_v60 = vrot.slane %v2098_v20, 4 }
 0x1c4   : > { %v6151_v18 = vor.u32 %v6525_v48, %v6148_v41  ;;  %1854 = vst [vmem:[#allocation2 + $0x3d8] sm:$0xf] %v5338_v0  ;;  %v2096_v45 = vrot.slane %v2094_v3, 5  ;;  %v283_v48 = vld [vmem:[%s6818_s25 + $0x6c] sm:$0xe]  ;;  %v2104_v31 = vshll.u32 %v5361_v23, 16 }
 0x1c5   : > { %v7955_v28 = vadd.f32 %v3996_v42, %v3908_v12  ;;  %v2085_v12 = vshrl.u32 %v5338_v0, 16  ;;  %1855 = vst [vmem:[#allocation2 + $0x3e4] sm:$0xf] %v5339_v5  ;;  %v2429_v15 = vrot.slane %v5339_v5, 5 }
 0x1c6   : > { %v2106_v37 = vrot.slane %v2104_v31, 5  ;;  %v6166_v31 = vld [vmem:[#allocation2 + $0x3b0] sm:$0xf] }
 0x1c7   : > { %v2087_v32 = vrot.slane %v2085_v12, 4  ;;  %v2101_v12 = vor.u32 %v2100_v60, %v2096_v45 }
 0x1c8   : > { %v3420_v56 = vpop.f32.mrf.mxu2  ;;  %v3909_v19 = vpop.f32.mrf.mxu3 }
 0x1c9   : > { %v3421_v29 = vadd.f32 %v3420_v56, %v3332_v34  ;;  %v3334_v63 = vpop.f32.mrf.mxu1  ;;  %v4001_v42 = vpop.f32.mrf.mxu0  ;;  %v2091_v41 = vor.u32 %v2090_v26, %v2087_v32  ;;  %v5830_v32 = vld [vmem:[#allocation2 + $0xb0] sm:$0xf]  ;;  %v2102_v14 = vrot.slane %v2101_v12, 4 }
 0x1ca   : > { %v3335_v17 = vadd.f32 %v3334_v63, %v8307_v53  ;;  %v2431_v53 = vrot.slane %v2429_v15, 4 }
 0x1cb   : > { %v3910_v55 = vadd.f32 %v3909_v19, %v3421_v29  ;;  %v5233_v19 = vrot.slane %v283_v48, 9  ;;  %v6158_v48 = vld [vmem:[#allocation2 + $0x3a8] sm:$0xf] }
 0x1cc   : > { %4049 = vmatmul.bf16.gmra.mxu1 %v5819_v40  ;;  %4830 = vmatmul.bf16.gmra.mxu0 %v6155_v30  ;;  %v891_v40 = vrot.slane %v889_v8, 4  ;;  %v6733_v30 = vld [vmem:[%s6818_s25 + $0x74] sm:$0x1] }
 0x1cd   : > { %4652 = vmatmul.bf16.gmra.mxu2 %v6147_v24  ;;  %4741 = vmatmul.bf16.gmra.mxu3 %v6151_v18  ;;  %v7963_v51 = vadd.f32 %v3998_v27, %v3910_v55  ;;  %v892_v29 = vrot.slane %v6733_v30, 5  ;;  %v5377_v24 = vld [vmem:[%s6818_s25 + $0x84] sm:$0xe]  ;;  %v2092_v55 = vrot.slane %v2091_v41, 4  ;;  %v890_v63 = vsel %vm7085_vm5, %v5233_v19, %v889_v8  ;;  %v6529_v41 = vld [vmem:[#allocation2 + $0x3b0] sm:$0xf0] }
 0x1ce   : > { %v5393_v5 = vrot.slane %v5377_v24, 9  ;;  %986 = vst [vmem:[#allocation2 + $0xe0] sm:$0xf] %v890_v63  ;;  %v2432_v8 = vrot.slane %v5361_v23, 5  ;;  %v6159_v63 = vor.u32 %v6529_v41, %v6158_v48  ;;  %v5362_v48 = vld [vmem:[%s6818_s25 + $0x98] sm:$0x1] }
 0x1cf   : > { %v893_v3 = vsel %vm7085_vm5, %v891_v40, %v892_v29  ;;  %v2097_v26 = vsel %vm7074_vm4, %v2092_v55, %v2096_v45  ;;  %v6528_v40 = vld [vmem:[#allocation2 + $0x3ac] sm:$0xf]  ;;  %v6160_v45 = vld [vmem:[#allocation2 + $0x3b4] sm:$0xf0]  ;;  %v8308_v29 = vld [vmem:[#allocation17_spill] sm:$0xff] }
 0x1d0   : > { %v3423_v34 = vpop.f32.mrf.mxu2  ;;  %v3912_v56 = vpop.f32.mrf.mxu3  ;;  %987 = vst [vmem:[#allocation2 + $0xec] sm:$0xf] %v893_v3  ;;  %v2430_v60 = vsel %vm7085_vm5, %v5393_v5, %v2429_v15  ;;  %v2433_v30 = vsel %vm7085_vm5, %v2431_v53, %v2432_v8  ;;  %v6163_v3 = vor.u32 %v6528_v40, %v6160_v45  ;;  %v5340_v5 = vld [vmem:[%s6818_s25 + $0x90] sm:$0xf]  ;;  %v8310_v8 = vld [vmem:[#allocation18_spill] sm:$0xff]  ;;  %v8311_v40 = vld [vmem:[#allocation20_spill] sm:$0xff] }
 0x1d1   : > { %v3424_v18 = vadd.f32 %v3423_v34, %v3335_v17  ;;  %v3336_v27 = vpop.f32.mrf.mxu1  ;;  %v4003_v0 = vpop.f32.mrf.mxu0  ;;  %v6386_v17 = vld [vmem:[#allocation2 + $0xb8] sm:$0xf0]  ;;  %2302 = vst [vmem:[#allocation2 + $0x3dc] sm:$0xf] %v2097_v26  ;;  %v2112_v53 = vshll.u32 %v5340_v5, 16 }
 0x1d2   : > { %v6530_v34 = vld [vmem:[#allocation2 + $0x3b8] sm:$0xf0]  ;;  %v3337_v24 = vadd.f32 %v3336_v27, %v8308_v29  ;;  %2526 = vst [vmem:[#allocation2 + $0x3e0] sm:$0xf] %v2430_v60 }
 0x1d3   : > { %v3913_v20 = vadd.f32 %v3912_v56, %v3424_v18  ;;  %v2107_v56 = vsel %vm7074_vm4, %v2102_v14, %v2106_v37  ;;  %v5831_v18 = vor.u32 %v6386_v17, %v5830_v32  ;;  %v6167_v55 = vor.u32 %v6530_v34, %v6166_v31  ;;  %2527 = vst [vmem:[#allocation2 + $0x3ec] sm:$0xf] %v2433_v30  ;;  %v284_v30 = vld [vmem:[%s6818_s25 + $0x78] sm:$0xe] }
 0x1d4   : > { %2303 = vst [vmem:[#allocation2 + $0x3e8] sm:$0xf] %v2107_v56  ;;  %v2109_v14 = vshrl.u32 %v5340_v5, 16  ;;  %v2114_v60 = vrot.slane %v2112_v53, 5  ;;  %v896_v31 = vrot.slane %v8310_v8, 5 }
 0x1d5   : > { %v7980_v19 = vadd.f32 %v4001_v42, %v3913_v20  ;;  %v5341_v20 = vld [vmem:[%s6818_s25 + $0x94] sm:$0xf]  ;;  %1856 = vst [vmem:[#allocation2 + $0x3f0] sm:$0xf] %v5340_v5  ;;  %v5378_v5 = vld [vmem:[%s6818_s25 + $0x90] sm:$0xe] }
 0x1d6   : > { %1857 = vst [vmem:[#allocation2 + $0x3fc] sm:$0xf] %v5341_v20  ;;  %v2118_v27 = vshll.u32 %v5341_v20, 16  ;;  %v2122_v32 = vshrl.u32 %v5341_v20, 16  ;;  %v2111_v17 = vrot.slane %v2109_v14, 4 }
 0x1d8   : > { %v3425_v23 = vpop.f32.mrf.mxu2  ;;  %v3914_v15 = vpop.f32.mrf.mxu3  ;;  %v2120_v34 = vrot.slane %v2118_v27, 5  ;;  %v2124_v56 = vrot.slane %v2122_v32, 4  ;;  %v2115_v29 = vor.u32 %v2114_v60, %v2111_v17  ;;  %v5842_v60 = vld [vmem:[#allocation2 + $0xc8] sm:$0xf] }
 0x1d9   : > { %v3426_v12 = vadd.f32 %v3425_v23, %v3337_v24  ;;  %v3339_v37 = vpop.f32.mrf.mxu1  ;;  %v4006_v42 = vpop.f32.mrf.mxu0  ;;  %v2128_v24 = vshll.u32 %v5362_v48, 16  ;;  %v2436_v23 = vrot.slane %v5341_v20, 5  ;;  %v5394_v20 = vrot.slane %v5378_v5, 9 }
 0x1da   : > { %v3340_v45 = vadd.f32 %v3339_v37, %v8311_v40  ;;  %v2116_v53 = vrot.slane %v2115_v29, 4  ;;  %v2125_v8 = vor.u32 %v2124_v56, %v2120_v34  ;;  %v6532_v29 = vld [vmem:[#allocation2 + $0x3c8] sm:$0xf0] }
 0x1db   : > { %v3915_v26 = vadd.f32 %v3914_v15, %v3426_v12  ;;  %v898_v12 = vrot.slane %v896_v31, 4  ;;  %v2130_v27 = vrot.slane %v2128_v24, 5  ;;  %v2437_v56 = vsel %vm7085_vm5, %v5394_v20, %v2436_v23  ;;  %v6178_v24 = vld [vmem:[#allocation2 + $0x3c8] sm:$0xf] }
 0x1dc   : > { %4054 = vmatmul.bf16.gmra.mxu1 %v5831_v18  ;;  %4835 = vmatmul.bf16.gmra.mxu0 %v6167_v55  ;;  %v5234_v55 = vrot.slane %v284_v30, 9  ;;  %v2121_v40 = vsel %vm7074_vm4, %v2116_v53, %v2120_v34  ;;  %v2126_v30 = vrot.slane %v2125_v8, 4  ;;  %v6172_v34 = vld [vmem:[#allocation2 + $0x3cc] sm:$0xf0]  ;;  %2528 = vst [vmem:[#allocation2 + $0x3f8] sm:$0xf] %v2437_v56 }
 0x1dd   : > { %4657 = vmatmul.bf16.gmra.mxu2 %v6159_v63  ;;  %4746 = vmatmul.bf16.gmra.mxu3 %v6163_v3  ;;  %v7988_v41 = vadd.f32 %v4003_v0, %v3915_v26  ;;  %v6734_v63 = vld [vmem:[%s6818_s25 + $0x80] sm:$0x1]  ;;  %2304 = vst [vmem:[#allocation2 + $0x3f4] sm:$0xf] %v2121_v40  ;;  %v5342_v40 = vld [vmem:[%s6818_s25 + $0x9c] sm:$0xf] }
 0x1de   : > { %v899_v3 = vrot.slane %v6734_v63, 5  ;;  %v897_v37 = vsel %vm7085_vm5, %v5234_v55, %v896_v31  ;;  %v6170_v63 = vld [vmem:[#allocation2 + $0x3c0] sm:$0xf]  ;;  %v2439_v31 = vrot.slane %v5362_v48, 5  ;;  %v6533_v55 = vld [vmem:[#allocation2 + $0x3d0] sm:$0xf0] }
 0x1df   : > { %8309 = vst [vmem:[#allocation9_spill] sm:$0xff] %v7988_v41  ;;  %v6171_v20 = vor.u32 %v6532_v29, %v6170_v63  ;;  %v5363_v63 = vld [vmem:[%s6818_s25 + $0xa4] sm:$0x1]  ;;  %v8041_v41 = vld [vmem:[%s6818_s25 + $0xac] sm:$0xf] }
 0x1e0   : > { %v3428_v15 = vpop.f32.mrf.mxu2  ;;  %v3917_v18 = vpop.f32.mrf.mxu3  ;;  %v900_v32 = vsel %vm7085_vm5, %v898_v12, %v899_v3  ;;  %988 = vst [vmem:[#allocation2 + $0xf8] sm:$0xf] %v897_v37  ;;  %v6531_v3 = vld [vmem:[#allocation2 + $0x3c4] sm:$0xf]  ;;  %v6179_v37 = vor.u32 %v6533_v55, %v6178_v24 }
 0x1e1   : > { %v3429_v14 = vadd.f32 %v3428_v15, %v3340_v45  ;;  %v3341_v0 = vpop.f32.mrf.mxu1  ;;  %v4008_v26 = vpop.f32.mrf.mxu0  ;;  %v2438_v45 = vrot.slane %v2436_v23, 4  ;;  %v6389_v15 = vld [vmem:[#allocation2 + $0xd0] sm:$0xf0]  ;;  %989 = vst [vmem:[#allocation2 + $0x104] sm:$0xf] %v900_v32 }
 0x1e2   : > { %v5843_v8 = vor.u32 %v6389_v15, %v5842_v60  ;;  %1858 = vst [vmem:[#allocation2 + $0x408] sm:$0xf] %v5342_v40 }
 0x1e3   : > { %v3918_v17 = vadd.f32 %v3917_v18, %v3429_v14  ;;  %v2131_v18 = vsel %vm7074_vm4, %v2126_v30, %v2130_v27  ;;  %v2440_v5 = vsel %vm7085_vm5, %v2438_v45, %v2439_v31  ;;  %v8313_v14 = vld [vmem:[#allocation22_spill] sm:$0xff]  ;;  %v5343_v30 = vld [vmem:[%s6818_s25 + $0xa0] sm:$0xf]  ;;  %v2136_v45 = vshll.u32 %v5342_v40, 16  ;;  %1861 = vst [vmem:[#allocation2 + $0x42c] sm:$0xf] %v8041_v41 }
 0x1e4   : > { %2305 = vst [vmem:[#allocation2 + $0x400] sm:$0xf] %v2131_v18  ;;  %v3342_v53 = vadd.f32 %v3341_v0, %v8313_v14  ;;  %v2142_v0 = vshll.u32 %v5343_v30, 16  ;;  %v2146_v60 = vshrl.u32 %v5343_v30, 16  ;;  %v8315_v31 = vld [vmem:[#allocation23_spill] sm:$0xff]  ;;  %v2152_v14 = vshll.u32 %v5363_v63, 16 }
 0x1e5   : > { %v8005_v12 = vadd.f32 %v4006_v42, %v3918_v17  ;;  %2529 = vst [vmem:[#allocation2 + $0x404] sm:$0xf] %v2440_v5  ;;  %v6175_v17 = vor.u32 %v6531_v3, %v6172_v34  ;;  %v2138_v56 = vrot.slane %v2136_v45, 5  ;;  %v903_v24 = vrot.slane %v8315_v31, 5  ;;  %v285_v34 = vld [vmem:[%s6818_s25 + $0x84] sm:$0xe] }
 0x1e6   : > { %1859 = vst [vmem:[#allocation2 + $0x414] sm:$0xf] %v5343_v30  ;;  %v2144_v55 = vrot.slane %v2142_v0, 5  ;;  %v2148_v3 = vrot.slane %v2146_v60, 4 }
 0x1e7   : > { %8312 = vst [vmem:[#allocation11_spill] sm:$0xff] %v8005_v12  ;;  %v2133_v12 = vshrl.u32 %v5342_v40, 16 }
 0x1e8   : > { %v3430_v48 = vpop.f32.mrf.mxu2  ;;  %v3919_v23 = vpop.f32.mrf.mxu3 }
 0x1e9   : > { %v3431_v27 = vadd.f32 %v3430_v48, %v3342_v53  ;;  %v4020_v32 = vpop.f32.mrf.mxu1  ;;  %v4801_v42 = vpop.f32.mrf.mxu0  ;;  %v2135_v15 = vrot.slane %v2133_v12, 4  ;;  %v2443_v53 = vrot.slane %v5343_v30, 5  ;;  %v5379_v12 = vld [vmem:[%s6818_s25 + $0x9c] sm:$0xe] }
 0x1ea   : > { %v5395_v30 = vrot.slane %v5379_v12, 9  ;;  %v6534_v12 = vld [vmem:[#allocation2 + $0x3dc] sm:$0xf] }
 0x1eb   : > { %v3920_v18 = vadd.f32 %v3919_v23, %v3431_v27  ;;  %v2139_v5 = vor.u32 %v2138_v56, %v2135_v15  ;;  %v6735_v27 = vld [vmem:[%s6818_s25 + $0x8c] sm:$0x1]  ;;  %v5854_v56 = vld [vmem:[#allocation2 + $0xe0] sm:$0xf] }
 0x1ec   : > { %4059 = vmatmul.bf16.gmra.mxu1 %v5843_v8  ;;  %4840 = vmatmul.bf16.gmra.mxu0 %v6179_v37  ;;  %v5235_v8 = vrot.slane %v285_v34, 9  ;;  %v905_v37 = vrot.slane %v903_v24, 4 }
 0x1ed   : > { %4662 = vmatmul.bf16.gmra.mxu2 %v6171_v20  ;;  %4751 = vmatmul.bf16.gmra.mxu3 %v6175_v17  ;;  %v8013_v29 = vadd.f32 %v4008_v26, %v3920_v18  ;;  %v906_v20 = vrot.slane %v6735_v27, 5  ;;  %v2140_v26 = vrot.slane %v2139_v5, 4  ;;  %v2149_v18 = vor.u32 %v2148_v3, %v2144_v55  ;;  %v8029_v3 = vld [vmem:[%s8257_s2] ss:$0 sm:$0xff]  ;;  %v6182_v5 = vld [vmem:[#allocation2 + $0x3d8] sm:$0xf] }
 0x1ee   : > { %v904_v0 = vsel %vm7085_vm5, %v5235_v8, %v903_v24  ;;  %v6392_v24 = vld [vmem:[#allocation2 + $0xe8] sm:$0xf0]  ;;  %v2446_v8 = vrot.slane %v5363_v63, 5 }
 0x1ef   : > { %8314 = vst [vmem:[#allocation3_spill] sm:$0xff] %v8013_v29  ;;  %v2154_v29 = vrot.slane %v2152_v14, 5  ;;  %v907_v60 = vsel %vm7085_vm5, %v905_v37, %v906_v20  ;;  %v2145_v31 = vsel %vm7074_vm4, %v2140_v26, %v2144_v55  ;;  %v2150_v34 = vrot.slane %v2149_v18, 4  ;;  %v6535_v14 = vld [vmem:[#allocation2 + $0x3e0] sm:$0xf0] }
 0x1f0   : > { %v4623_v48 = vpop.f32.mrf.mxu2  ;;  %v4712_v23 = vpop.f32.mrf.mxu3  ;;  %990 = vst [vmem:[#allocation2 + $0x110] sm:$0xf] %v904_v0  ;;  %v6190_v37 = vld [vmem:[#allocation2 + $0x3e0] sm:$0xf]  ;;  %v6536_v20 = vld [vmem:[#allocation2 + $0x3e8] sm:$0xf0] }
 0x1f1   : > { %v4713_v17 = vadd.f32 %v4712_v23, %v4623_v48  ;;  %v4022_v40 = vpop.f32.mrf.mxu1  ;;  %v4803_v45 = vpop.f32.mrf.mxu0  ;;  %v2445_v48 = vrot.slane %v2443_v53, 4  ;;  %v8316_v23 = vld [vmem:[#allocation24_spill] sm:$0xff]  ;;  %991 = vst [vmem:[#allocation2 + $0x11c] sm:$0xf] %v907_v60  ;;  %v2155_v55 = vsel %vm7074_vm4, %v2150_v34, %v2154_v29  ;;  %v6191_v63 = vor.u32 %v6536_v20, %v6190_v37  ;;  %v286_v37 = vld [vmem:[%s6818_s25 + $0x90] sm:$0xe] }
 0x1f2   : > { %v4021_v27 = vadd.f32 %v4020_v32, %v8316_v23  ;;  %2306 = vst [vmem:[#allocation2 + $0x40c] sm:$0xf] %v2145_v31  ;;  %v6183_v29 = vor.u32 %v6535_v14, %v6182_v5  ;;  %v2166_v5 = vshll.u32 %v8041_v41, 16  ;;  %v2170_v14 = vshrl.u32 %v8041_v41, 16 }
 0x1f3   : > { %v4802_v15 = vadd.f32 %v4801_v42, %v4713_v17  ;;  %v2444_v42 = vsel %vm7085_vm5, %v5395_v30, %v2443_v53  ;;  %v6184_v17 = vld [vmem:[#allocation2 + $0x3e4] sm:$0xf0]  ;;  %2307 = vst [vmem:[#allocation2 + $0x418] sm:$0xf] %v2155_v55  ;;  %v2447_v26 = vsel %vm7085_vm5, %v2445_v48, %v2446_v8  ;;  %v5855_v53 = vor.u32 %v6392_v24, %v5854_v56 }
 0x1f4   : > { %2530 = vst [vmem:[#allocation2 + $0x410] sm:$0xf] %v2444_v42  ;;  %v6187_v31 = vor.u32 %v6534_v12, %v6184_v17  ;;  %v2168_v20 = vrot.slane %v2166_v5, 5 }
 0x1f5   : > { %v4881_v32 = vadd.f32 %v4802_v15, %v4021_v27  ;;  %2531 = vst [vmem:[#allocation2 + $0x41c] sm:$0xf] %v2447_v26  ;;  %v5344_v15 = vld [vmem:[%s6818_s25 + $0xa8] sm:$0xf]  ;;  %v4023_v27 = vadd.f32 %v4022_v40, %v7565_v43  ;;  %v910_v40 = vrot.slane %v7558_v44, 5 }
 0x1f6   : > { %1860 = vst [vmem:[#allocation2 + $0x420] sm:$0xf] %v5344_v15  ;;  %v2157_v56 = vshrl.u32 %v5344_v15, 16  ;;  %v2160_v48 = vshll.u32 %v5344_v15, 16  ;;  %v5364_v44 = vld [vmem:[%s6818_s25 + $0xb0] sm:$0x1] }
 0x1f7   : > { %v4917_v34 = vadd.f32 %v8029_v3, %v4881_v32  ;;  %v2172_v32 = vrot.slane %v2170_v14, 4  ;;  %v5866_v14 = vld [vmem:[#allocation2 + $0xf8] sm:$0xf] }
 0x1f8   : > { %v4625_v18 = vpop.f32.mrf.mxu2  ;;  %v4714_v0 = vpop.f32.mrf.mxu3  ;;  %v2162_v42 = vrot.slane %v2160_v48, 5 }
 0x1f9   : > { %v4715_v60 = vadd.f32 %v4714_v0, %v4625_v18  ;;  %v4025_v30 = vpop.f32.mrf.mxu1  ;;  %v4806_v23 = vpop.f32.mrf.mxu0  ;;  %v4981_v43 = vmul.f32 0.2, %v4917_v34  ;;  %vm4949_vm6 = vcmp.gt.f32.partialorder %v4917_v34, 0.0  ;;  %v5236_v18 = vrot.slane %v286_v37, 9  ;;  %v6395_v37 = vld [vmem:[#allocation2 + $0x100] sm:$0xf0] }
 0x1fa   : > { %v4026_v12 = vadd.f32 %v4025_v30, %v7588_v54  ;;  %v912_v0 = vrot.slane %v910_v40, 4  ;;  %v2173_v30 = vor.u32 %v2172_v32, %v2168_v20  ;;  %v2450_v32 = vrot.slane %v8041_v41, 5 }
 0x1fb   : > { %v4804_v55 = vadd.f32 %v4803_v45, %v4715_v60  ;;  %v2159_v45 = vrot.slane %v2157_v56, 4  ;;  %v5013_v56 = vsel %vm4949_vm6, %v4917_v34, %v4981_v43  ;;  %v911_v48 = vsel %vm7085_vm5, %v5236_v18, %v910_v40  ;;  %v6538_v40 = vld [vmem:[#allocation2 + $0x3f8] sm:$0xf0]  ;;  %v6202_v18 = vld [vmem:[#allocation2 + $0x3f8] sm:$0xf] }
 0x1fc   : > { %4064 = vmatmul.bf16.gmra.mxu1 %v5855_v53  ;;  %4845 = vmatmul.bf16.gmra.mxu0 %v6191_v63  ;;  %v6736_v53 = vld [vmem:[%s6818_s25 + $0x98] sm:$0x1]  ;;  %992 = vst [vmem:[#allocation2 + $0x128] sm:$0xf] %v911_v48  ;;  %v2176_v34 = vshll.u32 %v5364_v44, 16 }
 0x1fd   : > { %v4882_v24 = vadd.f32 %v4804_v55, %v4023_v27  ;;  %4667 = vmatmul.bf16.gmra.mxu2 %v6183_v29  ;;  %4756 = vmatmul.bf16.gmra.mxu3 %v6187_v31  ;;  %v913_v63 = vrot.slane %v6736_v53, 5  ;;  %v2163_v27 = vor.u32 %v2162_v42, %v2159_v45  ;;  %v5380_v55 = vld [vmem:[%s6818_s25 + $0xa8] sm:$0xe]  ;;  %v6194_v42 = vld [vmem:[#allocation2 + $0x3f0] sm:$0xf]  ;;  %v2453_v53 = vrot.slane %v5364_v44, 5 }
 0x1ff   : > { %v4918_v8 = vadd.f32 %v8029_v3, %v4882_v24  ;;  %v914_v54 = vsel %vm7085_vm5, %v912_v0, %v913_v63  ;;  %v2164_v45 = vrot.slane %v2163_v27, 4  ;;  %v6539_v0 = vld [vmem:[#allocation2 + $0x400] sm:$0xf0] }
 0x200   : > { %v4628_v17 = vpop.f32.mrf.mxu2  ;;  %v4717_v26 = vpop.f32.mrf.mxu3  ;;  %993 = vst [vmem:[#allocation2 + $0x134] sm:$0xf] %v914_v54  ;;  %v5867_v54 = vor.u32 %v6395_v37, %v5866_v14  ;;  %v5346_v14 = vld [vmem:[%s6818_s25 + $0xb4] sm:$0xf]  ;;  %v8078_v37 = vld [vmem:[%s6818_s25 + $0xb8] sm:$0xf] }
 0x201   : > { %vm4950_vm7 = vcmp.gt.f32.partialorder %v4918_v8, 0.0  ;;  %v4982_v60 = vmul.f32 0.2, %v4918_v8  ;;  %v4718_v29 = vadd.f32 %v4717_v26, %v4628_v17  ;;  %v4027_v31 = vpop.f32.mrf.mxu1  ;;  %v4808_v15 = vpop.f32.mrf.mxu0  ;;  %v2174_v17 = vrot.slane %v2173_v30, 4  ;;  %1862 = vst [vmem:[#allocation2 + $0x438] sm:$0xf] %v5346_v14 }
 0x202   : > { %v5396_v26 = vrot.slane %v5380_v55, 9  ;;  %v6203_v30 = vor.u32 %v6539_v0, %v6202_v18  ;;  %1863 = vst [vmem:[#allocation2 + $0x444] sm:$0xf] %v8078_v37 }
 0x203   : > { %v5014_v24 = vsel %vm4950_vm7, %v4918_v8, %v4982_v60  ;;  %v4807_v5 = vadd.f32 %v4806_v23, %v4718_v29  ;;  %v2169_v8 = vsel %vm7074_vm4, %v2164_v45, %v2168_v20  ;;  %v2178_v23 = vrot.slane %v2176_v34, 5  ;;  %v6537_v60 = vld [vmem:[#allocation2 + $0x3f4] sm:$0xf]  ;;  %v6196_v29 = vld [vmem:[#allocation2 + $0x3fc] sm:$0xf0] }
 0x204   : > { %v6582_v43 = vpack.c.bf16 %v5014_v24, %v5013_v56  ;;  %v2451_v27 = vsel %vm7085_vm5, %v5396_v26, %v2450_v32  ;;  %v2452_v56 = vrot.slane %v2450_v32, 4  ;;  %2308 = vst [vmem:[#allocation2 + $0x424] sm:$0xf] %v2169_v8  ;;  %v6199_v45 = vor.u32 %v6537_v60, %v6196_v29 }
 0x205   : > { %v4883_v63 = vadd.f32 %v4807_v5, %v4026_v12  ;;  %v2179_v55 = vsel %vm7074_vm4, %v2174_v17, %v2178_v23  ;;  %v6195_v5 = vor.u32 %v6538_v40, %v6194_v42  ;;  %2532 = vst [vmem:[#allocation2 + $0x428] sm:$0xf] %v2451_v27  ;;  %v2181_v26 = vshrl.u32 %v5346_v14, 16  ;;  %v8082_v42 = vld [vmem:[%s6818_s25 + $0xbc] sm:$0x1] }
 0x206   : > { %6583 = vst [vmem:[%s8062_s9] sm:$0xff] %v6582_v43   ;;  %v2454_v20 = vsel %vm7085_vm5, %v2452_v56, %v2453_v53  ;;  %v4028_v43 = vadd.f32 %v4027_v31, %v7609_v21  ;;  %v2184_v32 = vshll.u32 %v5346_v14, 16  ;;  %v2190_v21 = vshll.u32 %v8078_v37, 16  ;;  %v287_v53 = vld [vmem:[%s6818_s25 + $0x9c] sm:$0xe] }
 0x207   : > { %2309 = vst [vmem:[#allocation2 + $0x430] sm:$0xf] %v2179_v55  ;;  %v4919_v34 = vadd.f32 %v8029_v3, %v4883_v63  ;;  %v2194_v31 = vshrl.u32 %v8078_v37, 16  ;;  %v2183_v40 = vrot.slane %v2181_v26, 4  ;;  %v5237_v56 = vrot.slane %v287_v53, 9 }
 0x208   : > { %v4630_v41 = vpop.f32.mrf.mxu2  ;;  %v4719_v48 = vpop.f32.mrf.mxu3  ;;  %2533 = vst [vmem:[#allocation2 + $0x434] sm:$0xf] %v2454_v20  ;;  %v2186_v0 = vrot.slane %v2184_v32, 5  ;;  %v2192_v63 = vrot.slane %v2190_v21, 5  ;;  %v6398_v53 = vld [vmem:[#allocation2 + $0x118] sm:$0xf0] }
 0x209   : > { %v4720_v12 = vadd.f32 %v4719_v48, %v4630_v41  ;;  %v4030_v44 = vpop.f32.mrf.mxu1  ;;  %v4811_v24 = vpop.f32.mrf.mxu0  ;;  %vm4951_vm8 = vcmp.gt.f32.partialorder %v4919_v34, 0.0  ;;  %v4983_v8 = vmul.f32 0.2, %v4919_v34  ;;  %v2196_v60 = vrot.slane %v2194_v31, 4  ;;  %v6737_v41 = vld [vmem:[%s6818_s25 + $0xa4] sm:$0x1] }
 0x20a   : > { %v920_v48 = vrot.slane %v6737_v41, 5  ;;  %v5878_v31 = vld [vmem:[#allocation2 + $0x110] sm:$0xf]  ;;  %v6542_v41 = vld [vmem:[#allocation2 + $0x418] sm:$0xf0] }
 0x20b   : > { %v4809_v17 = vadd.f32 %v4808_v15, %v4720_v12  ;;  %v917_v15 = vrot.slane %v7597_v4, 5  ;;  %v2197_v26 = vor.u32 %v2196_v60, %v2192_v63  ;;  %v5015_v32 = vsel %vm4951_vm8, %v4919_v34, %v4983_v8 }
 0x20c   : > { %4069 = vmatmul.bf16.gmra.mxu1 %v5867_v54  ;;  %4850 = vmatmul.bf16.gmra.mxu0 %v6203_v30  ;;  %v2200_v54 = vshll.u32 %v8082_v42, 16  ;;  %v2457_v34 = vrot.slane %v8078_v37, 5 }
 0x20d   : > { %v4884_v18 = vadd.f32 %v4809_v17, %v4028_v43  ;;  %4672 = vmatmul.bf16.gmra.mxu2 %v6195_v5  ;;  %4761 = vmatmul.bf16.gmra.mxu3 %v6199_v45  ;;  %v919_v55 = vrot.slane %v917_v15, 4  ;;  %v2187_v5 = vor.u32 %v2186_v0, %v2183_v40  ;;  %v5381_v45 = vld [vmem:[%s6818_s25 + $0xb4] sm:$0xe]  ;;  %v4031_v43 = vadd.f32 %v4030_v44, %v7637_v9  ;;  %v6206_v0 = vld [vmem:[#allocation2 + $0x408] sm:$0xf] }
 0x20e   : > { %v918_v17 = vsel %vm7085_vm5, %v5237_v56, %v917_v15  ;;  %v2198_v9 = vrot.slane %v2197_v26, 4  ;;  %v2202_v44 = vrot.slane %v2200_v54, 5  ;;  %v5397_v15 = vrot.slane %v5381_v45, 9  ;;  %v6214_v56 = vld [vmem:[#allocation2 + $0x410] sm:$0xf] }
 0x20f   : > { %v4920_v23 = vadd.f32 %v8029_v3, %v4884_v18  ;;  %v921_v14 = vsel %vm7085_vm5, %v919_v55, %v920_v48  ;;  %994 = vst [vmem:[#allocation2 + $0x140] sm:$0xf] %v918_v17  ;;  %v6208_v55 = vld [vmem:[#allocation2 + $0x414] sm:$0xf0]  ;;  %v6215_v45 = vor.u32 %v6542_v41, %v6214_v56  ;;  %v288_v41 = vld [vmem:[%s6818_s25 + $0xa8] sm:$0xe] }
 0x210   : > { %v4633_v29 = vpop.f32.mrf.mxu2  ;;  %v4722_v27 = vpop.f32.mrf.mxu3  ;;  %995 = vst [vmem:[#allocation2 + $0x14c] sm:$0xf] %v921_v14  ;;  %v2203_v48 = vsel %vm7074_vm4, %v2198_v9, %v2202_v44  ;;  %v2458_v54 = vsel %vm7085_vm5, %v5397_v15, %v2457_v34 }
 0x211   : > { %vm4952_vm9 = vcmp.gt.f32.partialorder %v4920_v23, 0.0  ;;  %v4984_v30 = vmul.f32 0.2, %v4920_v23  ;;  %v4723_v4 = vadd.f32 %v4722_v27, %v4633_v29  ;;  %v4032_v20 = vpop.f32.mrf.mxu1  ;;  %v4813_v12 = vpop.f32.mrf.mxu0  ;;  %v2188_v29 = vrot.slane %v2187_v5, 4  ;;  %v6541_v27 = vld [vmem:[#allocation2 + $0x410] sm:$0xf0] }
 0x212   : > { %2311 = vst [vmem:[#allocation2 + $0x448] sm:$0xf] %v2203_v48  ;;  %v6207_v17 = vor.u32 %v6541_v27, %v6206_v0  ;;  %v8117_v27 = vld [vmem:[%s6818_s25 + $0xc8] sm:$0x1]  ;;  %v6738_v48 = vld [vmem:[%s6818_s25 + $0xb0] sm:$0x1] }
 0x213   : > { %v5016_v18 = vsel %vm4952_vm9, %v4920_v23, %v4984_v30  ;;  %v4812_v21 = vadd.f32 %v4811_v24, %v4723_v4  ;;  %v2193_v60 = vsel %vm7074_vm4, %v2188_v29, %v2192_v63  ;;  %v2460_v24 = vrot.slane %v8082_v42, 5  ;;  %v6540_v23 = vld [vmem:[#allocation2 + $0x40c] sm:$0xf]  ;;  %2534 = vst [vmem:[#allocation2 + $0x440] sm:$0xf] %v2458_v54 }
 0x214   : > { %v6587_v40 = vpack.c.bf16 %v5016_v18, %v5015_v32  ;;  %2310 = vst [vmem:[#allocation2 + $0x43c] sm:$0xf] %v2193_v60  ;;  %v2459_v30 = vrot.slane %v2457_v34, 4  ;;  %v5879_v63 = vor.u32 %v6398_v53, %v5878_v31  ;;  %v6211_v14 = vor.u32 %v6540_v23, %v6208_v55  ;;  %v5348_v31 = vld [vmem:[%s6818_s25 + $0xc0] sm:$0xf] }
 0x215   : > { %v4885_v8 = vadd.f32 %v4812_v21, %v4031_v43  ;;  %v4033_v18 = vadd.f32 %v4032_v20, %v7655_v50  ;;  %v8113_v53 = vld [vmem:[%s6818_s25 + $0xc4] sm:$0xf]  ;;  %1864 = vst [vmem:[#allocation2 + $0x450] sm:$0xf] %v5348_v31  ;;  %v2205_v29 = vshrl.u32 %v5348_v31, 16  ;;  %v5238_v23 = vrot.slane %v288_v41, 9 }
 0x216   : > { %6659 = vst [vmem:[%s8062_s9 + $0x8] sm:$0xff] %v6587_v40   ;;  %v2461_v26 = vsel %vm7085_vm5, %v2459_v30, %v2460_v24  ;;  %v2208_v40 = vshll.u32 %v5348_v31, 16  ;;  %v2214_v50 = vshll.u32 %v8113_v53, 16  ;;  %v2218_v20 = vshrl.u32 %v8113_v53, 16  ;;  %v6226_v41 = vld [vmem:[#allocation2 + $0x428] sm:$0xf] }
 0x217   : > { %v4921_v32 = vadd.f32 %v8029_v3, %v4885_v8  ;;  %2535 = vst [vmem:[#allocation2 + $0x44c] sm:$0xf] %v2461_v26  ;;  %v2207_v9 = vrot.slane %v2205_v29, 4  ;;  %v927_v54 = vrot.slane %v6738_v48, 5  ;;  %v2224_v30 = vshll.u32 %v8117_v27, 16 }
 0x218   : > { %v4635_v4 = vpop.f32.mrf.mxu2  ;;  %v4724_v5 = vpop.f32.mrf.mxu3  ;;  %1865 = vst [vmem:[#allocation2 + $0x45c] sm:$0xf] %v8113_v53  ;;  %v2210_v44 = vrot.slane %v2208_v40, 5  ;;  %v2216_v60 = vrot.slane %v2214_v50, 5  ;;  %v2220_v34 = vrot.slane %v2218_v20, 4 }
 0x219   : > { %v4725_v37 = vadd.f32 %v4724_v5, %v4635_v4  ;;  %v4035_v42 = vpop.f32.mrf.mxu1  ;;  %v4816_v43 = vpop.f32.mrf.mxu0  ;;  %vm4953_vm10 = vcmp.gt.f32.partialorder %v4921_v32, 0.0  ;;  %v4985_v15 = vmul.f32 0.2, %v4921_v32  ;;  %v5890_v40 = vld [vmem:[#allocation2 + $0x128] sm:$0xf] }
 0x21b   : > { %v4814_v21 = vadd.f32 %v4813_v12, %v4725_v37  ;;  %v924_v12 = vrot.slane %v7648_v22, 5  ;;  %v5382_v37 = vld [vmem:[%s6818_s25 + $0xc0] sm:$0xe] }
 0x21c   : > { %4074 = vmatmul.bf16.gmra.mxu1 %v5879_v63  ;;  %4855 = vmatmul.bf16.gmra.mxu0 %v6215_v45  ;;  %v2211_v45 = vor.u32 %v2210_v44, %v2207_v9  ;;  %v6218_v9 = vld [vmem:[#allocation2 + $0x420] sm:$0xf]  ;;  %v6544_v44 = vld [vmem:[#allocation2 + $0x428] sm:$0xf0] }
 0x21d   : > { %v4886_v0 = vadd.f32 %v4814_v21, %v4033_v18  ;;  %4677 = vmatmul.bf16.gmra.mxu2 %v6207_v17  ;;  %4766 = vmatmul.bf16.gmra.mxu3 %v6211_v14  ;;  %v926_v55 = vrot.slane %v924_v12, 4  ;;  %v4036_v17 = vadd.f32 %v4035_v42, %v7678_v57  ;;  %v925_v14 = vsel %vm7085_vm5, %v5238_v23, %v924_v12 }
 0x21e   : > { %v2221_v18 = vor.u32 %v2220_v34, %v2216_v60  ;;  %v5017_v21 = vsel %vm4953_vm10, %v4921_v32, %v4985_v15  ;;  %996 = vst [vmem:[#allocation2 + $0x158] sm:$0xf] %v925_v14  ;;  %v2212_v50 = vrot.slane %v2211_v45, 4  ;;  %v2226_v42 = vrot.slane %v2224_v30, 5 }
 0x21f   : > { %v4922_v56 = vadd.f32 %v8029_v3, %v4886_v0  ;;  %v928_v26 = vsel %vm7085_vm5, %v926_v55, %v927_v54  ;;  %v6401_v0 = vld [vmem:[#allocation2 + $0x130] sm:$0xf0]  ;;  %v5398_v12 = vrot.slane %v5382_v37, 9  ;;  %v2464_v32 = vrot.slane %v8113_v53, 5 }
 0x220   : > { %v4638_v24 = vpop.f32.mrf.mxu2  ;;  %v4727_v8 = vpop.f32.mrf.mxu3  ;;  %997 = vst [vmem:[#allocation2 + $0x164] sm:$0xf] %v928_v26  ;;  %v2222_v57 = vrot.slane %v2221_v18, 4  ;;  %v2217_v34 = vsel %vm7074_vm4, %v2212_v50, %v2216_v60  ;;  %v5891_v60 = vor.u32 %v6401_v0, %v5890_v40  ;;  %v6219_v45 = vor.u32 %v6544_v44, %v6218_v9  ;;  %v8154_v50 = vld [vmem:[%s6818_s25 + $0xd4] sm:$0x1] }
 0x221   : > { %vm4954_vm11 = vcmp.gt.f32.partialorder %v4922_v56, 0.0  ;;  %v4986_v4 = vmul.f32 0.2, %v4922_v56  ;;  %v4728_v22 = vadd.f32 %v4727_v8, %v4638_v24  ;;  %v4037_v5 = vpop.f32.mrf.mxu1  ;;  %v4818_v63 = vpop.f32.mrf.mxu0  ;;  %v6545_v24 = vld [vmem:[#allocation2 + $0x430] sm:$0xf0]  ;;  %v2465_v55 = vsel %vm7085_vm5, %v5398_v12, %v2464_v32 }
 0x222   : > { %v6220_v8 = vld [vmem:[#allocation2 + $0x42c] sm:$0xf0]  ;;  %v2227_v23 = vsel %vm7074_vm4, %v2222_v57, %v2226_v42  ;;  %2312 = vst [vmem:[#allocation2 + $0x454] sm:$0xf] %v2217_v34  ;;  %v2466_v48 = vrot.slane %v2464_v32, 4  ;;  %v4038_v26 = vadd.f32 %v4037_v5, %v7698_v61 }
 0x223   : > { %v5018_v31 = vsel %vm4954_vm11, %v4922_v56, %v4986_v4  ;;  %v4817_v29 = vadd.f32 %v4816_v43, %v4728_v22  ;;  %v2467_v43 = vrot.slane %v8117_v27, 5  ;;  %v6543_v56 = vld [vmem:[#allocation2 + $0x424] sm:$0xf]  ;;  %v6227_v4 = vor.u32 %v6545_v24, %v6226_v41  ;;  %2313 = vst [vmem:[#allocation2 + $0x460] sm:$0xf] %v2227_v23 }
 0x224   : > { %v6592_v20 = vpack.c.bf16 %v5018_v31, %v5017_v21  ;;  %v6223_v37 = vor.u32 %v6543_v56, %v6220_v8  ;;  %2536 = vst [vmem:[#allocation2 + $0x458] sm:$0xf] %v2465_v55  ;;  %v5350_v21 = vld [vmem:[%s6818_s25 + $0xcc] sm:$0xf]  ;;  %v8150_v31 = vld [vmem:[%s6818_s25 + $0xd0] sm:$0xf] }
 0x225   : > { %v4887_v15 = vadd.f32 %v4817_v29, %v4036_v17  ;;  %v2468_v17 = vsel %vm7085_vm5, %v2466_v48, %v2467_v43  ;;  %1866 = vst [vmem:[#allocation2 + $0x468] sm:$0xf] %v5350_v21  ;;  %v2229_v29 = vshrl.u32 %v5350_v21, 16  ;;  %v2232_v40 = vshll.u32 %v5350_v21, 16  ;;  %v289_v42 = vld [vmem:[%s6818_s25 + $0xb4] sm:$0xe] }
 0x226   : > { %6660 = vst [vmem:[%s8062_s9 + $0x10] sm:$0xff] %v6592_v20   ;;  %v2238_v61 = vshll.u32 %v8150_v31, 16  ;;  %v2242_v5 = vshrl.u32 %v8150_v31, 16  ;;  %v5239_v32 = vrot.slane %v289_v42, 9  ;;  %v2248_v8 = vshll.u32 %v8154_v50, 16 }
 0x227   : > { %v4923_v14 = vadd.f32 %v8029_v3, %v4887_v15  ;;  %2537 = vst [vmem:[#allocation2 + $0x464] sm:$0xf] %v2468_v17  ;;  %v2231_v20 = vrot.slane %v2229_v29, 4  ;;  %v2234_v9 = vrot.slane %v2232_v40, 5  ;;  %v6739_v15 = vld [vmem:[%s6818_s25 + $0xbc] sm:$0x1] }
 0x228   : > { %v4640_v54 = vpop.f32.mrf.mxu2  ;;  %v4729_v30 = vpop.f32.mrf.mxu3  ;;  %1867 = vst [vmem:[#allocation2 + $0x474] sm:$0xf] %v8150_v31  ;;  %v2240_v12 = vrot.slane %v2238_v61, 5  ;;  %v2244_v41 = vrot.slane %v2242_v5, 4  ;;  %v934_v56 = vrot.slane %v6739_v15, 5  ;;  %v2250_v5 = vrot.slane %v2248_v8, 5 }
 0x229   : > { %v4730_v53 = vadd.f32 %v4729_v30, %v4640_v54  ;;  %v8142_v27 = vpop.f32.mrf.mxu1  ;;  %v4821_v22 = vpop.f32.mrf.mxu0  ;;  %vm4955_vm12 = vcmp.gt.f32.partialorder %v4923_v14, 0.0  ;;  %v4987_v44 = vmul.f32 0.2, %v4923_v14  ;;  %v2235_v54 = vor.u32 %v2234_v9, %v2231_v20  ;;  %v5383_v30 = vld [vmem:[%s6818_s25 + $0xcc] sm:$0xe] }
 0x22a   : > { %v6230_v40 = vld [vmem:[#allocation2 + $0x438] sm:$0xf]  ;;  %v4041_v20 = vadd.f32 %v8142_v27, %v7724_v62  ;;  %v6238_v9 = vld [vmem:[#allocation2 + $0x440] sm:$0xf]  ;;  %v6548_v42 = vld [vmem:[#allocation2 + $0x448] sm:$0xf0] }
 0x22b   : > { %v4819_v18 = vadd.f32 %v4818_v63, %v4730_v53  ;;  %v931_v63 = vrot.slane %v7686_v6, 5  ;;  %v2245_v53 = vor.u32 %v2244_v41, %v2240_v12  ;;  %v2236_v21 = vrot.slane %v2235_v54, 4  ;;  %v6232_v41 = vld [vmem:[#allocation2 + $0x444] sm:$0xf0] }
 0x22c   : > { %4079 = vmatmul.bf16.gmra.mxu1 %v5891_v60  ;;  %4860 = vmatmul.bf16.gmra.mxu0 %v6227_v4 }
 0x22d   : > { %v4888_v0 = vadd.f32 %v4819_v18, %v4038_v26  ;;  %4682 = vmatmul.bf16.gmra.mxu2 %v6219_v45  ;;  %4771 = vmatmul.bf16.gmra.mxu3 %v6223_v37  ;;  %v933_v43 = vrot.slane %v931_v63, 4  ;;  %v932_v60 = vsel %vm7085_vm5, %v5239_v32, %v931_v63  ;;  %v5019_v45 = vsel %vm4955_vm12, %v4923_v14, %v4987_v44  ;;  %v5902_v26 = vld [vmem:[#allocation2 + $0x140] sm:$0xf]  ;;  %v6404_v18 = vld [vmem:[#allocation2 + $0x148] sm:$0xf0] }
 0x22e   : > { %998 = vst [vmem:[#allocation2 + $0x170] sm:$0xf] %v932_v60  ;;  %v2246_v61 = vrot.slane %v2245_v53, 4  ;;  %v5399_v63 = vrot.slane %v5383_v30, 9  ;;  %v2471_v14 = vrot.slane %v8150_v31, 5  ;;  %v2474_v44 = vrot.slane %v8154_v50, 5 }
 0x22f   : > { %v4924_v57 = vadd.f32 %v8029_v3, %v4888_v0  ;;  %v935_v4 = vsel %vm7085_vm5, %v933_v43, %v934_v56  ;;  %v6547_v0 = vld [vmem:[#allocation2 + $0x440] sm:$0xf0]  ;;  %v5903_v15 = vor.u32 %v6404_v18, %v5902_v26 }
 0x230   : > { %v4643_v24 = vpop.f32.mrf.mxu2  ;;  %v4732_v34 = vpop.f32.mrf.mxu3  ;;  %999 = vst [vmem:[#allocation2 + $0x17c] sm:$0xf] %v935_v4  ;;  %v2472_v62 = vsel %vm7085_vm5, %v5399_v63, %v2471_v14  ;;  %v2473_v27 = vrot.slane %v2471_v14, 4  ;;  %v6231_v8 = vor.u32 %v6547_v0, %v6230_v40  ;;  %v6242_v40 = vld [vmem:[#allocation2 + $0x450] sm:$0xf] }
 0x231   : > { %vm4956_vm13 = vcmp.gt.f32.partialorder %v4924_v57, 0.0  ;;  %v4988_v23 = vmul.f32 0.2, %v4924_v57  ;;  %v4733_v6 = vadd.f32 %v4732_v34, %v4643_v24  ;;  %v4042_v55 = vpop.f32.mrf.mxu1  ;;  %v4823_v48 = vpop.f32.mrf.mxu0  ;;  %v2251_v24 = vsel %vm7074_vm4, %v2246_v61, %v2250_v5  ;;  %2538 = vst [vmem:[#allocation2 + $0x470] sm:$0xf] %v2472_v62 }
 0x232   : > { %2315 = vst [vmem:[#allocation2 + $0x478] sm:$0xf] %v2251_v24  ;;  %v2475_v33 = vsel %vm7085_vm5, %v2473_v27, %v2474_v44  ;;  %v4043_v54 = vadd.f32 %v4042_v55, %v7738_v38  ;;  %v6550_v0 = vld [vmem:[#allocation2 + $0x458] sm:$0xf0]  ;;  %v6407_v5 = vld [vmem:[#allocation2 + $0x160] sm:$0xf0] }
 0x233   : > { %v5020_v37 = vsel %vm4956_vm13, %v4924_v57, %v4988_v23  ;;  %v4822_v17 = vadd.f32 %v4821_v22, %v4733_v6  ;;  %v2241_v22 = vsel %vm7074_vm4, %v2236_v21, %v2240_v12  ;;  %v6546_v57 = vld [vmem:[#allocation2 + $0x43c] sm:$0xf]  ;;  %v6239_v12 = vor.u32 %v6548_v42, %v6238_v9  ;;  %2539 = vst [vmem:[#allocation2 + $0x47c] sm:$0xf] %v2475_v33  ;;  %v6250_v63 = vld [vmem:[#allocation2 + $0x458] sm:$0xf] }
 0x234   : > { %v6597_v29 = vpack.c.bf16 %v5020_v37, %v5019_v45  ;;  %2314 = vst [vmem:[#allocation2 + $0x46c] sm:$0xf] %v2241_v22  ;;  %v6235_v23 = vor.u32 %v6546_v57, %v6232_v41  ;;  %v6549_v9 = vld [vmem:[#allocation2 + $0x454] sm:$0xf]  ;;  %v6244_v42 = vld [vmem:[#allocation2 + $0x45c] sm:$0xf0]  ;;  %v6243_v27 = vor.u32 %v6550_v0, %v6242_v40 }
 0x235   : > { %v4889_v34 = vadd.f32 %v4822_v17, %v4041_v20  ;;  %v6551_v20 = vld [vmem:[#allocation2 + $0x460] sm:$0xf0] }
 0x236   : > { %6661 = vst [vmem:[%s8062_s9 + $0x18] sm:$0xff] %v6597_v29   ;;  %v5914_v29 = vld [vmem:[#allocation2 + $0x158] sm:$0xf]  ;;  %v6251_v41 = vor.u32 %v6551_v20, %v6250_v63 }
 0x237   : > { %v4925_v6 = vadd.f32 %v8029_v3, %v4889_v34  ;;  %v5915_v57 = vor.u32 %v6407_v5, %v5914_v29 }
 0x238   : > { %v4645_v32 = vpop.f32.mrf.mxu2  ;;  %v4734_v43 = vpop.f32.mrf.mxu3 }
 0x239   : > { %v4735_v31 = vadd.f32 %v4734_v43, %v4645_v32  ;;  %v4045_v56 = vpop.f32.mrf.mxu1  ;;  %v4826_v50 = vpop.f32.mrf.mxu0  ;;  %v4989_v4 = vmul.f32 0.2, %v4925_v6  ;;  %vm4957_vm14 = vcmp.gt.f32.partialorder %v4925_v6, 0.0  ;;  %v6247_v32 = vor.u32 %v6549_v9, %v6244_v42 }
 0x23a   : > { %v4046_v61 = vadd.f32 %v4045_v56, %v7757_v39 }
 0x23b   : > { %v4824_v30 = vadd.f32 %v4823_v48, %v4735_v31  ;;  %v5021_v38 = vsel %vm4957_vm14, %v4925_v6, %v4989_v4 }
 0x23c   : > { %4084 = vmatmul.bf16.gmra.mxu1 %v5903_v15  ;;  %4865 = vmatmul.bf16.gmra.mxu0 %v6239_v12 }
 0x23d   : > { %v4890_v60 = vadd.f32 %v4824_v30, %v4043_v54  ;;  %4687 = vmatmul.bf16.gmra.mxu2 %v6231_v8  ;;  %4776 = vmatmul.bf16.gmra.mxu3 %v6235_v23 }
 0x23f   : > { %v4926_v53 = vadd.f32 %v8029_v3, %v4890_v60 }
 0x240   : > { %v4648_v45 = vpop.f32.mrf.mxu2  ;;  %v4737_v37 = vpop.f32.mrf.mxu3 }
 0x241   : > { %vm4958_vm15 = vcmp.gt.f32.partialorder %v4926_v53, 0.0  ;;  %v4990_v47 = vmul.f32 0.2, %v4926_v53  ;;  %v4738_v17 = vadd.f32 %v4737_v37, %v4648_v45  ;;  %v4047_v26 = vpop.f32.mrf.mxu1  ;;  %v4828_v18 = vpop.f32.mrf.mxu0  ;;  %v6254_v45 = vld [vmem:[#allocation2 + $0x468] sm:$0xf] }
 0x242   : > { %v4048_v39 = vadd.f32 %v4047_v26, %v7763_v16  ;;  %v6553_v37 = vld [vmem:[#allocation2 + $0x470] sm:$0xf0]  ;;  %v6262_v26 = vld [vmem:[#allocation2 + $0x470] sm:$0xf] }
 0x243   : > { %v5022_v55 = vsel %vm4958_vm15, %v4926_v53, %v4990_v47  ;;  %v4827_v48 = vadd.f32 %v4826_v50, %v4738_v17  ;;  %v5926_v53 = vld [vmem:[#allocation2 + $0x170] sm:$0xf]  ;;  %v6410_v17 = vld [vmem:[#allocation2 + $0x178] sm:$0xf0]  ;;  %v6255_v20 = vor.u32 %v6553_v37, %v6254_v45 }
 0x244   : > { %v6602_v21 = vpack.c.bf16 %v5022_v55, %v5021_v38  ;;  %v6552_v38 = vld [vmem:[#allocation2 + $0x46c] sm:$0xf]  ;;  %v6256_v55 = vld [vmem:[#allocation2 + $0x474] sm:$0xf0]  ;;  %v5927_v40 = vor.u32 %v6410_v17, %v5926_v53 }
 0x245   : > { %v4891_v22 = vadd.f32 %v4827_v48, %v4046_v61  ;;  %v6259_v9 = vor.u32 %v6552_v38, %v6256_v55 }
 0x246   : > { %6662 = vst [vmem:[%s8062_s9 + $0x20] sm:$0xff] %v6602_v21  }
 0x247   : > { %v4927_v43 = vadd.f32 %v8029_v3, %v4891_v22 }
 0x248   : > { %v4650_v14 = vpop.f32.mrf.mxu2  ;;  %v4739_v44 = vpop.f32.mrf.mxu3 }
 0x249   : > { %v4740_v24 = vadd.f32 %v4739_v44, %v4650_v14  ;;  %v4050_v34 = vpop.f32.mrf.mxu1  ;;  %v4831_v62 = vpop.f32.mrf.mxu0  ;;  %v4991_v31 = vmul.f32 0.2, %v4927_v43  ;;  %vm4959_vm0 = vcmp.gt.f32.partialorder %v4927_v43, 0.0 }
 0x24a   : > { %v4051_v47 = vadd.f32 %v4050_v34, %v7780_v49 }
 0x24b   : > { %v4829_v15 = vadd.f32 %v4828_v18, %v4740_v24  ;;  %v5023_v30 = vsel %vm4959_vm0, %v4927_v43, %v4991_v31  ;;  %v6554_v18 = vld [vmem:[#allocation2 + $0x478] sm:$0xf0] }
 0x24c   : > { %4089 = vmatmul.bf16.gmra.mxu1 %v5915_v57  ;;  %4870 = vmatmul.bf16.gmra.mxu0 %v6251_v41  ;;  %v6263_v0 = vor.u32 %v6554_v18, %v6262_v26 }
 0x24d   : > { %v4892_v12 = vadd.f32 %v4829_v15, %v4048_v39  ;;  %4692 = vmatmul.bf16.gmra.mxu2 %v6243_v27  ;;  %4781 = vmatmul.bf16.gmra.mxu3 %v6247_v32 }
 0x24f   : > { %v4928_v56 = vadd.f32 %v8029_v3, %v4892_v12 }
 0x250   : > { %v4653_v50 = vpop.f32.mrf.mxu2  ;;  %v4742_v8 = vpop.f32.mrf.mxu3 }
 0x251   : > { %vm4960_vm1 = vcmp.gt.f32.partialorder %v4928_v56, 0.0  ;;  %v4992_v23 = vmul.f32 0.2, %v4928_v56  ;;  %v4743_v33 = vadd.f32 %v4742_v8, %v4653_v50  ;;  %v4052_v6 = vpop.f32.mrf.mxu1  ;;  %v4833_v54 = vpop.f32.mrf.mxu0 }
 0x252   : > { %v4053_v49 = vadd.f32 %v4052_v6, %v7788_v1 }
 0x253   : > { %v5024_v16 = vsel %vm4960_vm1, %v4928_v56, %v4992_v23  ;;  %v4832_v60 = vadd.f32 %v4831_v62, %v4743_v33 }
 0x254   : > { %v6607_v4 = vpack.c.bf16 %v5024_v16, %v5023_v30 }
 0x255   : > { %v4893_v48 = vadd.f32 %v4832_v60, %v4051_v47 }
 0x256   : > { %6663 = vst [vmem:[%s8062_s9 + $0x28] sm:$0xff] %v6607_v4  }
 0x257   : > { %v4929_v42 = vadd.f32 %v8029_v3, %v4893_v48 }
 0x258   : > { %v4655_v21 = vpop.f32.mrf.mxu2  ;;  %v4744_v29 = vpop.f32.mrf.mxu3 }
 0x259   : > { %v4745_v61 = vadd.f32 %v4744_v29, %v4655_v21  ;;  %v4055_v5 = vpop.f32.mrf.mxu1  ;;  %v4836_v63 = vpop.f32.mrf.mxu0  ;;  %v4993_v44 = vmul.f32 0.2, %v4929_v42  ;;  %vm4961_vm2 = vcmp.gt.f32.partialorder %v4929_v42, 0.0 }
 0x25a   : > { %v4056_v12 = vadd.f32 %v4055_v5, %v7805_v25 }
 0x25b   : > { %v4834_v22 = vadd.f32 %v4833_v54, %v4745_v61  ;;  %v5025_v43 = vsel %vm4961_vm2, %v4929_v42, %v4993_v44 }
 0x25c   : > { %4094 = vmatmul.bf16.gmra.mxu1 %v5927_v40  ;;  %4875 = vmatmul.bf16.gmra.mxu0 %v6263_v0 }
 0x25d   : > { %v4894_v14 = vadd.f32 %v4834_v22, %v4053_v49  ;;  %4697 = vmatmul.bf16.gmra.mxu2 %v6255_v20  ;;  %4786 = vmatmul.bf16.gmra.mxu3 %v6259_v9 }
 0x25f   : > { %v4930_v57 = vadd.f32 %v8029_v3, %v4894_v14 }
 0x260   : > { %v4658_v41 = vpop.f32.mrf.mxu2  ;;  %v4747_v24 = vpop.f32.mrf.mxu3 }
 0x261   : > { %vm4962_vm3 = vcmp.gt.f32.partialorder %v4930_v57, 0.0  ;;  %v4994_v34 = vmul.f32 0.2, %v4930_v57  ;;  %v4748_v62 = vadd.f32 %v4747_v24, %v4658_v41  ;;  %v4057_v27 = vpop.f32.mrf.mxu1  ;;  %v4838_v32 = vpop.f32.mrf.mxu0 }
 0x262   : > { %v4058_v54 = vadd.f32 %v4057_v27, %v7813_v13 }
 0x263   : > { %v5026_v1 = vsel %vm4962_vm3, %v4930_v57, %v4994_v34  ;;  %v4837_v39 = vadd.f32 %v4836_v63, %v4748_v62 }
 0x264   : > { %v6612_v15 = vpack.c.bf16 %v5026_v1, %v5025_v43 }
 0x265   : > { %v4895_v31 = vadd.f32 %v4837_v39, %v4056_v12  ;;  %v8210_v12 = vld [vmem:[%s8257_s2] ss:$0 sm:$0xff] }
 0x266   : > { %6664 = vst [vmem:[%s8062_s9 + $0x30] sm:$0xff] %v6612_v15  }
 0x267   : > { %v4931_v6 = vadd.f32 %v8029_v3, %v4895_v31 }
 0x268   : > { %v4660_v56 = vpop.f32.mrf.mxu2  ;;  %v4749_v50 = vpop.f32.mrf.mxu3 }
 0x269   : > { %v4750_v8 = vadd.f32 %v4749_v50, %v4660_v56  ;;  %v4060_v23 = vpop.f32.mrf.mxu1  ;;  %v4841_v33 = vpop.f32.mrf.mxu0  ;;  %v4995_v60 = vmul.f32 0.2, %v4931_v6  ;;  %vm4963_vm4 = vcmp.gt.f32.partialorder %v4931_v6, 0.0 }
 0x26a   : > { %v4061_v13 = vadd.f32 %v4060_v23, %v7830_v58 }
 0x26b   : > { %v4839_v30 = vadd.f32 %v4838_v32, %v4750_v8  ;;  %v5027_v26 = vsel %vm4963_vm4, %v4931_v6, %v4995_v60 }
 0x26d   : > { %v4896_v16 = vadd.f32 %v4839_v30, %v4058_v54 }
 0x26f   : > { %v4932_v4 = vadd.f32 %v8029_v3, %v4896_v16 }
 0x270   : > { %v4663_v53 = vpop.f32.mrf.mxu2  ;;  %v4752_v25 = vpop.f32.mrf.mxu3 }
 0x271   : > { %vm4964_vm5 = vcmp.gt.f32.partialorder %v4932_v4, 0.0  ;;  %v4996_v45 = vmul.f32 0.2, %v4932_v4  ;;  %v4753_v37 = vadd.f32 %v4752_v25, %v4663_v53  ;;  %v4062_v47 = vpop.f32.mrf.mxu1  ;;  %v4843_v17 = vpop.f32.mrf.mxu0 }
 0x272   : > { %v4063_v63 = vadd.f32 %v4062_v47, %v7838_v35 }
 0x273   : > { %v5028_v18 = vsel %vm4964_vm5, %v4932_v4, %v4996_v45  ;;  %v4842_v38 = vadd.f32 %v4841_v33, %v4753_v37 }
 0x274   : > { %v6617_v55 = vpack.c.bf16 %v5028_v18, %v5027_v26 }
 0x275   : > { %v4897_v48 = vadd.f32 %v4842_v38, %v4061_v13 }
 0x276   : > { %6665 = vst [vmem:[%s8062_s9 + $0x38] sm:$0xff] %v6617_v55  }
 0x277   : > { %v4933_v5 = vadd.f32 %v8029_v3, %v4897_v48 }
 0x278   : > { %v4665_v21 = vpop.f32.mrf.mxu2  ;;  %v4754_v29 = vpop.f32.mrf.mxu3 }
 0x279   : > { %v4755_v40 = vadd.f32 %v4754_v29, %v4665_v21  ;;  %v4065_v0 = vpop.f32.mrf.mxu1  ;;  %v4846_v61 = vpop.f32.mrf.mxu0  ;;  %v4997_v42 = vmul.f32 0.2, %v4933_v5  ;;  %vm4965_vm6 = vcmp.gt.f32.partialorder %v4933_v5, 0.0 }
 0x27a   : > { %v4066_v35 = vadd.f32 %v4065_v0, %v7855_v52 }
 0x27b   : > { %v4844_v20 = vadd.f32 %v4843_v17, %v4755_v40  ;;  %v5029_v24 = vsel %vm4965_vm6, %v4933_v5, %v4997_v42 }
 0x27d   : > { %v4898_v9 = vadd.f32 %v4844_v20, %v4063_v63 }
 0x27f   : > { %v4934_v49 = vadd.f32 %v8029_v3, %v4898_v9 }
 0x280   : > { %v4668_v22 = vpop.f32.mrf.mxu2  ;;  %v4757_v58 = vpop.f32.mrf.mxu3 }
 0x281   : > { %vm4966_vm7 = vcmp.gt.f32.partialorder %v4934_v49, 0.0  ;;  %v4998_v14 = vmul.f32 0.2, %v4934_v49  ;;  %v4758_v44 = vadd.f32 %v4757_v58, %v4668_v22  ;;  %v4067_v57 = vpop.f32.mrf.mxu1  ;;  %v4848_v41 = vpop.f32.mrf.mxu0 }
 0x282   : > { %v4068_v56 = vadd.f32 %v4067_v57, %v7863_v10 }
 0x283   : > { %v5030_v34 = vsel %vm4966_vm7, %v4934_v49, %v4998_v14  ;;  %v4847_v62 = vadd.f32 %v4846_v61, %v4758_v44 }
 0x284   : > { %v6622_v27 = vpack.c.bf16 %v5030_v34, %v5029_v24 }
 0x285   : > { %v4899_v32 = vadd.f32 %v4847_v62, %v4066_v35 }
 0x286   : > { %6666 = vst [vmem:[%s8062_s9 + $0x40] sm:$0xff] %v6622_v27  }
 0x287   : > { %v4935_v31 = vadd.f32 %v8210_v12, %v4899_v32 }
 0x288   : > { %v4670_v43 = vpop.f32.mrf.mxu2  ;;  %v4759_v1 = vpop.f32.mrf.mxu3 }
 0x289   : > { %v4760_v39 = vadd.f32 %v4759_v1, %v4670_v43  ;;  %v4070_v3 = vpop.f32.mrf.mxu1  ;;  %v4851_v15 = vpop.f32.mrf.mxu0  ;;  %v4999_v52 = vmul.f32 0.2, %v4935_v31  ;;  %vm4967_vm8 = vcmp.gt.f32.partialorder %v4935_v31, 0.0 }
 0x28a   : > { %v4071_v10 = vadd.f32 %v4070_v3, %v7880_v59 }
 0x28b   : > { %v4849_v50 = vadd.f32 %v4848_v41, %v4760_v39  ;;  %v5031_v4 = vsel %vm4967_vm8, %v4935_v31, %v4999_v52 }
 0x28d   : > { %v4900_v8 = vadd.f32 %v4849_v50, %v4068_v56 }
 0x28f   : > { %v4936_v23 = vadd.f32 %v8210_v12, %v4900_v8 }
 0x290   : > { %v4673_v33 = vpop.f32.mrf.mxu2  ;;  %v4762_v6 = vpop.f32.mrf.mxu3 }
 0x291   : > { %vm4968_vm9 = vcmp.gt.f32.partialorder %v4936_v23, 0.0  ;;  %v5000_v54 = vmul.f32 0.2, %v4936_v23  ;;  %v4763_v30 = vadd.f32 %v4762_v6, %v4673_v33  ;;  %v4072_v16 = vpop.f32.mrf.mxu1  ;;  %v4853_v60 = vpop.f32.mrf.mxu0 }
 0x292   : > { %v4073_v13 = vadd.f32 %v4072_v16, %v7888_v46 }
 0x293   : > { %v5032_v53 = vsel %vm4968_vm9, %v4936_v23, %v5000_v54  ;;  %v4852_v25 = vadd.f32 %v4851_v15, %v4763_v30 }
 0x294   : > { %v6627_v45 = vpack.c.bf16 %v5032_v53, %v5031_v4 }
 0x295   : > { %v4901_v37 = vadd.f32 %v4852_v25, %v4071_v10 }
 0x296   : > { %6667 = vst [vmem:[%s8062_s9 + $0x48] sm:$0xff] %v6627_v45  }
 0x297   : > { %v4937_v55 = vadd.f32 %v8210_v12, %v4901_v37 }
 0x298   : > { %v4675_v47 = vpop.f32.mrf.mxu2  ;;  %v4764_v17 = vpop.f32.mrf.mxu3 }
 0x299   : > { %v4765_v26 = vadd.f32 %v4764_v17, %v4675_v47  ;;  %v4075_v18 = vpop.f32.mrf.mxu1  ;;  %v4856_v38 = vpop.f32.mrf.mxu0  ;;  %v5001_v29 = vmul.f32 0.2, %v4937_v55  ;;  %vm4969_vm10 = vcmp.gt.f32.partialorder %v4937_v55, 0.0 }
 0x29a   : > { %v4076_v46 = vadd.f32 %v4075_v18, %v7905_v36 }
 0x29b   : > { %v4854_v48 = vadd.f32 %v4853_v60, %v4765_v26  ;;  %v5033_v9 = vsel %vm4969_vm10, %v4937_v55, %v5001_v29 }
 0x29d   : > { %v4902_v21 = vadd.f32 %v4854_v48, %v4073_v13 }
 0x29f   : > { %v4938_v40 = vadd.f32 %v8210_v12, %v4902_v21 }
 0x2a0   : > { %v4678_v0 = vpop.f32.mrf.mxu2  ;;  %v4767_v59 = vpop.f32.mrf.mxu3 }
 0x2a1   : > { %vm4970_vm11 = vcmp.gt.f32.partialorder %v4938_v40, 0.0  ;;  %v5002_v61 = vmul.f32 0.2, %v4938_v40  ;;  %v4768_v5 = vadd.f32 %v4767_v59, %v4678_v0  ;;  %v4077_v63 = vpop.f32.mrf.mxu1  ;;  %v4858_v20 = vpop.f32.mrf.mxu0 }
 0x2a2   : > { %v4078_v62 = vadd.f32 %v4077_v63, %v7913_v11 }
 0x2a3   : > { %v5034_v42 = vsel %vm4970_vm11, %v4938_v40, %v5002_v61  ;;  %v4857_v49 = vadd.f32 %v4856_v38, %v4768_v5 }
 0x2a4   : > { %v6632_v22 = vpack.c.bf16 %v5034_v42, %v5033_v9 }
 0x2a5   : > { %v4903_v58 = vadd.f32 %v4857_v49, %v4076_v46 }
 0x2a6   : > { %6668 = vst [vmem:[%s8062_s9 + $0x50] sm:$0xff] %v6632_v22  }
 0x2a7   : > { %v4939_v34 = vadd.f32 %v8210_v12, %v4903_v58 }
 0x2a8   : > { %v4680_v14 = vpop.f32.mrf.mxu2  ;;  %v4769_v44 = vpop.f32.mrf.mxu3 }
 0x2a9   : > { %v4770_v57 = vadd.f32 %v4769_v44, %v4680_v14  ;;  %v4080_v41 = vpop.f32.mrf.mxu1  ;;  %v4861_v24 = vpop.f32.mrf.mxu0  ;;  %v5003_v32 = vmul.f32 0.2, %v4939_v34  ;;  %vm4971_vm12 = vcmp.gt.f32.partialorder %v4939_v34, 0.0 }
 0x2aa   : > { %v4081_v11 = vadd.f32 %v4080_v41, %v7930_v7 }
 0x2ab   : > { %v4859_v27 = vadd.f32 %v4858_v20, %v4770_v57  ;;  %v5035_v56 = vsel %vm4971_vm12, %v4939_v34, %v5003_v32 }
 0x2ad   : > { %v4904_v35 = vadd.f32 %v4859_v27, %v4078_v62 }
 0x2af   : > { %v4940_v43 = vadd.f32 %v8210_v12, %v4904_v35 }
 0x2b0   : > { %v4683_v1 = vpop.f32.mrf.mxu2  ;;  %v4772_v36 = vpop.f32.mrf.mxu3 }
 0x2b1   : > { %vm4972_vm13 = vcmp.gt.f32.partialorder %v4940_v43, 0.0  ;;  %v5004_v39 = vmul.f32 0.2, %v4940_v43  ;;  %v4773_v3 = vadd.f32 %v4772_v36, %v4683_v1  ;;  %v4082_v15 = vpop.f32.mrf.mxu1  ;;  %v4863_v31 = vpop.f32.mrf.mxu0  ;;  %v8317_v1 = vld [vmem:[#allocation9_spill] sm:$0xff] }
 0x2b2   : > { %v4083_v4 = vadd.f32 %v4082_v15, %v7938_v2 }
 0x2b3   : > { %v5036_v50 = vsel %vm4972_vm13, %v4940_v43, %v5004_v39  ;;  %v4862_v8 = vadd.f32 %v4861_v24, %v4773_v3 }
 0x2b4   : > { %v6637_v52 = vpack.c.bf16 %v5036_v50, %v5035_v56 }
 0x2b5   : > { %v4905_v23 = vadd.f32 %v4862_v8, %v4081_v11 }
 0x2b6   : > { %6669 = vst [vmem:[%s8062_s9 + $0x58] sm:$0xff] %v6637_v52  }
 0x2b7   : > { %v4941_v60 = vadd.f32 %v8210_v12, %v4905_v23 }
 0x2b8   : > { %v4685_v33 = vpop.f32.mrf.mxu2  ;;  %v4774_v6 = vpop.f32.mrf.mxu3 }
 0x2b9   : > { %v4775_v54 = vadd.f32 %v4774_v6, %v4685_v33  ;;  %v4085_v30 = vpop.f32.mrf.mxu1  ;;  %v4866_v16 = vpop.f32.mrf.mxu0  ;;  %v5005_v45 = vmul.f32 0.2, %v4941_v60  ;;  %vm4973_vm14 = vcmp.gt.f32.partialorder %v4941_v60, 0.0 }
 0x2ba   : > { %v4086_v2 = vadd.f32 %v4085_v30, %v7955_v28  ;;  %v8318_v30 = vld [vmem:[#allocation11_spill] sm:$0xff] }
 0x2bb   : > { %v4864_v53 = vadd.f32 %v4863_v31, %v4775_v54  ;;  %v5037_v38 = vsel %vm4973_vm14, %v4941_v60, %v5005_v45 }
 0x2bd   : > { %v4906_v25 = vadd.f32 %v4864_v53, %v4083_v4 }
 0x2bf   : > { %v4942_v10 = vadd.f32 %v8210_v12, %v4906_v25 }
 0x2c0   : > { %v4688_v37 = vpop.f32.mrf.mxu2  ;;  %v4777_v7 = vpop.f32.mrf.mxu3 }
 0x2c1   : > { %vm4974_vm15 = vcmp.gt.f32.partialorder %v4942_v10, 0.0  ;;  %v5006_v47 = vmul.f32 0.2, %v4942_v10  ;;  %v4778_v17 = vadd.f32 %v4777_v7, %v4688_v37  ;;  %v4087_v26 = vpop.f32.mrf.mxu1  ;;  %v4868_v18 = vpop.f32.mrf.mxu0  ;;  %v8319_v7 = vld [vmem:[#allocation3_spill] sm:$0xff] }
 0x2c2   : > { %v4088_v5 = vadd.f32 %v4087_v26, %v7963_v51 }
 0x2c3   : > { %v5038_v55 = vsel %vm4974_vm15, %v4942_v10, %v5006_v47  ;;  %v4867_v13 = vadd.f32 %v4866_v16, %v4778_v17 }
 0x2c4   : > { %v6642_v48 = vpack.c.bf16 %v5038_v55, %v5037_v38 }
 0x2c5   : > { %v4907_v21 = vadd.f32 %v4867_v13, %v4086_v2 }
 0x2c6   : > { %6670 = vst [vmem:[%s8062_s9 + $0x60] sm:$0xff] %v6642_v48  }
 0x2c7   : > { %v4943_v61 = vadd.f32 %v8210_v12, %v4907_v21 }
 0x2c8   : > { %v4690_v29 = vpop.f32.mrf.mxu2  ;;  %v4779_v40 = vpop.f32.mrf.mxu3 }
 0x2c9   : > { %v4780_v0 = vadd.f32 %v4779_v40, %v4690_v29  ;;  %v4090_v59 = vpop.f32.mrf.mxu1  ;;  %v4871_v20 = vpop.f32.mrf.mxu0  ;;  %v5007_v42 = vmul.f32 0.2, %v4943_v61  ;;  %vm4975_vm0 = vcmp.gt.f32.partialorder %v4943_v61, 0.0 }
 0x2ca   : > { %v4091_v51 = vadd.f32 %v4090_v59, %v7980_v19 }
 0x2cb   : > { %v4869_v63 = vadd.f32 %v4868_v18, %v4780_v0  ;;  %v5039_v14 = vsel %vm4975_vm0, %v4943_v61, %v5007_v42 }
 0x2cd   : > { %v4908_v9 = vadd.f32 %v4869_v63, %v4088_v5 }
 0x2cf   : > { %v4944_v49 = vadd.f32 %v8210_v12, %v4908_v9 }
 0x2d0   : > { %v4693_v22 = vpop.f32.mrf.mxu2  ;;  %v4782_v28 = vpop.f32.mrf.mxu3 }
 0x2d1   : > { %vm4976_vm1 = vcmp.gt.f32.partialorder %v4944_v49, 0.0  ;;  %v5008_v46 = vmul.f32 0.2, %v4944_v49  ;;  %v4783_v58 = vadd.f32 %v4782_v28, %v4693_v22  ;;  %v4092_v41 = vpop.f32.mrf.mxu1  ;;  %v4873_v34 = vpop.f32.mrf.mxu0 }
 0x2d2   : > { %v4093_v36 = vadd.f32 %v4092_v41, %v8317_v1 }
 0x2d3   : > { %v5040_v44 = vsel %vm4976_vm1, %v4944_v49, %v5008_v46  ;;  %v4872_v57 = vadd.f32 %v4871_v20, %v4783_v58 }
 0x2d4   : > { %v6647_v24 = vpack.c.bf16 %v5040_v44, %v5039_v14 }
 0x2d5   : > { %v4909_v62 = vadd.f32 %v4872_v57, %v4091_v51 }
 0x2d6   : > { %6671 = vst [vmem:[%s8062_s9 + $0x68] sm:$0xff] %v6647_v24  }
 0x2d7   : > { %v4945_v43 = vadd.f32 %v8210_v12, %v4909_v62 }
 0x2d8   : > { %v4695_v27 = vpop.f32.mrf.mxu2  ;;  %v4784_v35 = vpop.f32.mrf.mxu3 }
 0x2d9   : > { %v4785_v32 = vadd.f32 %v4784_v35, %v4695_v27  ;;  %v4095_v15 = vpop.f32.mrf.mxu1  ;;  %v5009_v31 = vmul.f32 0.2, %v4945_v43  ;;  %v4876_v50 = vpop.f32.mrf.mxu0  ;;  %vm4977_vm2 = vcmp.gt.f32.partialorder %v4945_v43, 0.0 }
 0x2da   : > { %v4096_v16 = vadd.f32 %v4095_v15, %v8318_v30 }
 0x2db   : > { %v4874_v39 = vadd.f32 %v4873_v34, %v4785_v32  ;;  %v5041_v23 = vsel %vm4977_vm2, %v4945_v43, %v5009_v31 }
 0x2dd   : > { %v4910_v3 = vadd.f32 %v4874_v39, %v4093_v36 }
 0x2df   : > { %v4946_v56 = vadd.f32 %v8210_v12, %v4910_v3 }
 0x2e0   : > { %v4698_v19 = vpop.f32.mrf.mxu2  ;;  %v4787_v8 = vpop.f32.mrf.mxu3 }
 0x2e1   : > { %vm4978_vm3 = vcmp.gt.f32.partialorder %v4946_v56, 0.0  ;;  %v5010_v52 = vmul.f32 0.2, %v4946_v56  ;;  %v4788_v11 = vadd.f32 %v4787_v8, %v4698_v19  ;;  %v4097_v4 = vpop.f32.mrf.mxu1  ;;  %v4878_v10 = vpop.f32.mrf.mxu0 }
 0x2e2   : > { %v4098_v47 = vadd.f32 %v4097_v4, %v8319_v7 }
 0x2e3   : > { %v5042_v33 = vsel %vm4978_vm3, %v4946_v56, %v5010_v52  ;;  %v4877_v6 = vadd.f32 %v4876_v50, %v4788_v11 }
 0x2e4   : > { %v6652_v54 = vpack.c.bf16 %v5042_v33, %v5041_v23 }
 0x2e5   : > { %v4911_v60 = vadd.f32 %v4877_v6, %v4096_v16 }
 0x2e6   : > { %6672 = vst [vmem:[%s8062_s9 + $0x70] sm:$0xff] %v6652_v54  }
 0x2e7   : > { %v4947_v37 = vadd.f32 %v8210_v12, %v4911_v60 }
 0x2e8   : > { %v4700_v53 = vpop.f32.mrf.mxu2  ;;  %v4789_v25 = vpop.f32.mrf.mxu3 }
 0x2e9   : > { %v4790_v45 = vadd.f32 %v4789_v25, %v4700_v53  ;;  %v5011_v18 = vmul.f32 0.2, %v4947_v37  ;;  %vm4979_vm4 = vcmp.gt.f32.partialorder %v4947_v37, 0.0 }
 0x2eb   : > { %v4879_v17 = vadd.f32 %v4878_v10, %v4790_v45  ;;  %v5043_v13 = vsel %vm4979_vm4, %v4947_v37, %v5011_v18 }
 0x2ed   : > { %v4912_v26 = vadd.f32 %v4879_v17, %v4098_v47 }
 0x2ef   : > { %v4948_v38 = vadd.f32 %v8210_v12, %v4912_v26 }
 0x2f1   : > { %vm4980_vm5 = vcmp.gt.f32.partialorder %v4948_v38, 0.0  ;;  %v5012_v55 = vmul.f32 0.2, %v4948_v38 }
 0x2f3   : > { %v5044_v48 = vsel %vm4980_vm5, %v4948_v38, %v5012_v55 }
 0x2f4   : > { %v6657_v2 = vpack.c.bf16 %v5044_v48, %v5043_v13 }
 0x2f6   : > { %6673 = vst [vmem:[%s8062_s9 + $0x78] sm:$0xff] %v6657_v2  }
 0x2f7 PF: > { %s13_s14 = sadd.s32 1, %s6763_s14   ;;  %s8320_s12 = smov %s6759_s13 }
 0x2f8   : > { %p10_p5 = scmp.ge.s32.totalorder %s13_s14, 4   ;;  %s8321_s13 = smov %s8323_s15 }
 0x2fa   :  { %12 = sbr.rel (!%p10_p5) target bundleno = 2 (0x2), region = 80 }

// kernel: inception_module_d.5
= control target key start
LH: loop header
LB: loop body
LE: loop exit
PB: predicated region body
PF: predicated region fallthrough
CT: control target
= control target key end

     0   :  { %s4306_s12 = smov 0   ;;  %s4308_s13 = smov 0   ;;  %s5204_s0 = inlined_call_operand.vmem [shape: f32[2,9,2,9,256], index: 0, kind: input, shape index: {}]   ;;  %s5205_s1 = inlined_call_operand.vmem [shape: bf16[3,512,384], index: 1, kind: input, shape index: {}]   ;;  %s5206_s2 = inlined_call_operand.vmem [shape: f32[1,384], index: 2, kind: input, shape index: {}]   ;;  %s5207_s3 = inlined_call_operand.vmem [shape: f32[2,64,384], index: 3, kind: output, shape index: {}]  }
   0x1   :  { %s4310_s14 = smov 0   ;;  %s4312_s15 = smov 0  }
   0x2   :  { %s4314_s16 = smov 0   ;;  %s4316_s17 = smov 0  }
   0x3   :  { %s4318_s18 = smov 0   ;;  %s4320_s19 = smov 0  }
   0x4   :  { %s4322_s20 = smov 0  }
   0x5 LB: > { %s3180_s21 = sadd.s32 4294967295, %s4284_s20   ;;  %s22_s22 = sadd.s32 1, %s4276_s18  ;;  %s4284_s20 = sphi %s4322_s20, %s13_s20   ;;  %s4280_s19 = sphi %s4320_s19, %s5216_s19   ;;  %s4276_s18 = sphi %s4318_s18, %s5215_s18   ;;  %s4272_s17 = sphi %s4316_s17, %s5214_s17   ;;  %s4268_s16 = sphi %s4314_s16, %s5213_s16   ;;  %s4264_s15 = sphi %s4312_s15, %s5212_s15   ;;  %s4260_s14 = sphi %s4310_s14, %s5211_s14   ;;  %s4256_s13 = sphi %s4308_s13, %s5210_s13   ;;  %s4252_s12 = sphi %s4306_s12, %s5209_s12  }
   0x6   : > { %p23_p0 = scmp.ge.s32.totalorder %s22_s22, 3  ;;  %s25_s23 = sadd.s32 1, %s4280_s19 }
   0x7   : > { %s58_s24 = sadd.s32 1, %s4264_s15  ;;  %p65_p1 = scmp.ne.s32.totalorder %s4264_s15, %s4260_s14 }
   0x8   : > { %s5218_s22 = smov (%p23_p0, %s22_s22), 0  ;;  %s5220_s23 = smov (!%p23_p0, %s25_s23), %s4280_s19 }
   0x9   : > { %s55_s25 = ssub.s32 %s4276_s18, %s5218_s22  ;;  %p66_p2 = scmp.eq.s32.totalorder %s4284_s20, 0 }
   0xa   : > { %p27_p3 = scmp.ge.s32.totalorder %s5220_s23, 2  ;;  %p56_p4 = scmp.eq.s32.totalorder %s55_s25, 0 }
   0xb   : > { %p67_p5 = por %p66_p2, %p65_p1  ;;  %s112_s26 = sadd.s32 1, %s4256_s13 }
   0xc   : > { %s5222_s23 = smov (%p27_p3, %s5220_s23), 0  ;;  %p122_p6 = scmp.ne.s32.totalorder %s4256_s13, %s4252_s12 }
   0xd   : > { %s4367_s27 = scalar_select %p56_p4, %s4264_s15, %s58_s24  }
   0xe   : > { %s107_s28 = ssub.s32 %s4280_s19, %s5222_s23  ;;  %p123_p7 = scmp.eq.s32.totalorder %s3180_s21, 5 }
   0xf   : > { %s109_s29 = sor.u32 %s107_s28, %s55_s25  ;;  %p3183_p10 = scmp.ge.s32.totalorder %s4284_s20, 6 }
  0x10   : > { %p110_p8 = scmp.eq.s32.totalorder %s109_s29, 0  ;;  %p4373_p9 = por %p123_p7, %p122_p6 }
  0x11   : > { %145 = sbr.rel (%p3183_p10) target bundleno = 219 (0xdb), region = 16 }
  0x12   : > { %s4378_s4 = scalar_select %p110_p8, %s4256_s13, %s112_s26  }
  0x16   : > { %156 = sbr.rel (!%p67_p5) target bundleno = 219 (0xdb), region = 24  ;;  %s158_s5 = sand.u32 (%p67_p5), 1, %s4264_s15  }
  0x17   : > { %s3184_s6 = sshll.u32 (%p67_p5), %s4276_s18, 2  ;;  %s4137_s7 = smul.u32 (%p67_p5), 768, %s158_s5 }
  0x18   : > { %s4386_s10 = scalar_lea.vmem (%p67_p5), %s5205_s1, %s3184_s6 }
  0x19   : > { %v179_v0 = vld [vmem:[%s4386_s10] sm:$0xf] (%p67_p5)  ;;  %v181_v1 = vld [vmem:[%s4386_s10 + $0xc] sm:$0xf] (%p67_p5)  ;;  %v183_v2 = vld [vmem:[%s4386_s10 + $0x18] sm:$0xf] (%p67_p5) }
  0x1a   : > { %s4391_s11 = scalar_lea.vmem (%p67_p5), [#allocation3], %s4137_s7  ;;  %v185_v3 = vld [vmem:[%s4386_s10 + $0x24] sm:$0xf] (%p67_p5)  ;;  %v187_v4 = vld [vmem:[%s4386_s10 + $0x30] sm:$0xf] (%p67_p5) }
  0x1b   : > { %180 = vst [vmem:[%s4391_s11] sm:$0xf] %v179_v0  ;;  %v189_v5 = vld [vmem:[%s4386_s10 + $0x3c] sm:$0xf]  ;;  %v191_v6 = vld [vmem:[%s4386_s10 + $0x48] sm:$0xf] }
  0x1c   : > { %182 = vst [vmem:[%s4391_s11 + $0x4] sm:$0xf] %v181_v1  ;;  %v193_v7 = vld [vmem:[%s4386_s10 + $0x54] sm:$0xf]  ;;  %v195_v8 = vld [vmem:[%s4386_s10 + $0x60] sm:$0xf] }
  0x1d   : > { %184 = vst [vmem:[%s4391_s11 + $0x8] sm:$0xf] %v183_v2  ;;  %v197_v9 = vld [vmem:[%s4386_s10 + $0x6c] sm:$0xf]  ;;  %v199_v10 = vld [vmem:[%s4386_s10 + $0x78] sm:$0xf] }
  0x1e   : > { %186 = vst [vmem:[%s4391_s11 + $0xc] sm:$0xf] %v185_v3  ;;  %v201_v11 = vld [vmem:[%s4386_s10 + $0x84] sm:$0xf]  ;;  %v203_v12 = vld [vmem:[%s4386_s10 + $0x90] sm:$0xf] }
  0x1f   : > { %188 = vst [vmem:[%s4391_s11 + $0x10] sm:$0xf] %v187_v4  ;;  %v205_v13 = vld [vmem:[%s4386_s10 + $0x9c] sm:$0xf]  ;;  %v207_v14 = vld [vmem:[%s4386_s10 + $0xa8] sm:$0xf] }
  0x20   : > { %190 = vst [vmem:[%s4391_s11 + $0x14] sm:$0xf] %v189_v5  ;;  %v209_v15 = vld [vmem:[%s4386_s10 + $0xb4] sm:$0xf]  ;;  %v211_v16 = vld [vmem:[%s4386_s10 + $0xc0] sm:$0xf] }
  0x21   : > { %192 = vst [vmem:[%s4391_s11 + $0x18] sm:$0xf] %v191_v6  ;;  %v213_v17 = vld [vmem:[%s4386_s10 + $0xcc] sm:$0xf]  ;;  %v215_v18 = vld [vmem:[%s4386_s10 + $0xd8] sm:$0xf] }
  0x22   : > { %194 = vst [vmem:[%s4391_s11 + $0x1c] sm:$0xf] %v193_v7  ;;  %v217_v19 = vld [vmem:[%s4386_s10 + $0xe4] sm:$0xf]  ;;  %v219_v20 = vld [vmem:[%s4386_s10 + $0xf0] sm:$0xf] }
  0x23   : > { %196 = vst [vmem:[%s4391_s11 + $0x20] sm:$0xf] %v195_v8  ;;  %v221_v21 = vld [vmem:[%s4386_s10 + $0xfc] sm:$0xf]  ;;  %v223_v22 = vld [vmem:[%s4386_s10 + $0x108] sm:$0xf] }
  0x24   : > { %198 = vst [vmem:[%s4391_s11 + $0x24] sm:$0xf] %v197_v9  ;;  %v225_v23 = vld [vmem:[%s4386_s10 + $0x114] sm:$0xf]  ;;  %v227_v24 = vld [vmem:[%s4386_s10 + $0x120] sm:$0xf] }
  0x25   : > { %200 = vst [vmem:[%s4391_s11 + $0x28] sm:$0xf] %v199_v10  ;;  %v229_v25 = vld [vmem:[%s4386_s10 + $0x12c] sm:$0xf]  ;;  %v231_v26 = vld [vmem:[%s4386_s10 + $0x138] sm:$0xf] }
  0x26   : > { %202 = vst [vmem:[%s4391_s11 + $0x2c] sm:$0xf] %v201_v11  ;;  %v233_v27 = vld [vmem:[%s4386_s10 + $0x144] sm:$0xf]  ;;  %v235_v28 = vld [vmem:[%s4386_s10 + $0x150] sm:$0xf] }
  0x27   : > { %204 = vst [vmem:[%s4391_s11 + $0x30] sm:$0xf] %v203_v12  ;;  %v237_v29 = vld [vmem:[%s4386_s10 + $0x15c] sm:$0xf]  ;;  %v239_v30 = vld [vmem:[%s4386_s10 + $0x168] sm:$0xf] }
  0x28   : > { %206 = vst [vmem:[%s4391_s11 + $0x34] sm:$0xf] %v205_v13  ;;  %v241_v31 = vld [vmem:[%s4386_s10 + $0x174] sm:$0xf]  ;;  %v243_v32 = vld [vmem:[%s4386_s10 + $0x180] sm:$0xf] }
  0x29   : > { %208 = vst [vmem:[%s4391_s11 + $0x38] sm:$0xf] %v207_v14  ;;  %v245_v33 = vld [vmem:[%s4386_s10 + $0x18c] sm:$0xf]  ;;  %v247_v34 = vld [vmem:[%s4386_s10 + $0x198] sm:$0xf] }
  0x2a   : > { %210 = vst [vmem:[%s4391_s11 + $0x3c] sm:$0xf] %v209_v15  ;;  %v249_v35 = vld [vmem:[%s4386_s10 + $0x1a4] sm:$0xf]  ;;  %v251_v36 = vld [vmem:[%s4386_s10 + $0x1b0] sm:$0xf] }
  0x2b   : > { %212 = vst [vmem:[%s4391_s11 + $0x40] sm:$0xf] %v211_v16  ;;  %v253_v37 = vld [vmem:[%s4386_s10 + $0x1bc] sm:$0xf]  ;;  %v255_v38 = vld [vmem:[%s4386_s10 + $0x1c8] sm:$0xf] }
  0x2c   : > { %214 = vst [vmem:[%s4391_s11 + $0x44] sm:$0xf] %v213_v17  ;;  %v257_v39 = vld [vmem:[%s4386_s10 + $0x1d4] sm:$0xf]  ;;  %v259_v40 = vld [vmem:[%s4386_s10 + $0x1e0] sm:$0xf] }
  0x2d   : > { %216 = vst [vmem:[%s4391_s11 + $0x48] sm:$0xf] %v215_v18  ;;  %v261_v41 = vld [vmem:[%s4386_s10 + $0x1ec] sm:$0xf]  ;;  %v263_v42 = vld [vmem:[%s4386_s10 + $0x1f8] sm:$0xf] }
  0x2e   : > { %218 = vst [vmem:[%s4391_s11 + $0x4c] sm:$0xf] %v217_v19  ;;  %v265_v43 = vld [vmem:[%s4386_s10 + $0x204] sm:$0xf]  ;;  %v267_v44 = vld [vmem:[%s4386_s10 + $0x210] sm:$0xf] }
  0x2f   : > { %220 = vst [vmem:[%s4391_s11 + $0x50] sm:$0xf] %v219_v20  ;;  %v269_v45 = vld [vmem:[%s4386_s10 + $0x21c] sm:$0xf]  ;;  %v271_v46 = vld [vmem:[%s4386_s10 + $0x228] sm:$0xf] }
  0x30   : > { %222 = vst [vmem:[%s4391_s11 + $0x54] sm:$0xf] %v221_v21  ;;  %v273_v47 = vld [vmem:[%s4386_s10 + $0x234] sm:$0xf]  ;;  %v275_v48 = vld [vmem:[%s4386_s10 + $0x240] sm:$0xf] }
  0x31   : > { %224 = vst [vmem:[%s4391_s11 + $0x58] sm:$0xf] %v223_v22  ;;  %v277_v49 = vld [vmem:[%s4386_s10 + $0x24c] sm:$0xf]  ;;  %v279_v50 = vld [vmem:[%s4386_s10 + $0x258] sm:$0xf] }
  0x32   : > { %226 = vst [vmem:[%s4391_s11 + $0x5c] sm:$0xf] %v225_v23  ;;  %v281_v51 = vld [vmem:[%s4386_s10 + $0x264] sm:$0xf]  ;;  %v283_v52 = vld [vmem:[%s4386_s10 + $0x270] sm:$0xf] }
  0x33   : > { %228 = vst [vmem:[%s4391_s11 + $0x60] sm:$0xf] %v227_v24  ;;  %v285_v53 = vld [vmem:[%s4386_s10 + $0x27c] sm:$0xf]  ;;  %v287_v54 = vld [vmem:[%s4386_s10 + $0x288] sm:$0xf] }
  0x34   : > { %230 = vst [vmem:[%s4391_s11 + $0x64] sm:$0xf] %v229_v25  ;;  %v289_v55 = vld [vmem:[%s4386_s10 + $0x294] sm:$0xf]  ;;  %v291_v56 = vld [vmem:[%s4386_s10 + $0x2a0] sm:$0xf] }
  0x35   : > { %232 = vst [vmem:[%s4391_s11 + $0x68] sm:$0xf] %v231_v26  ;;  %v293_v57 = vld [vmem:[%s4386_s10 + $0x2ac] sm:$0xf]  ;;  %v295_v58 = vld [vmem:[%s4386_s10 + $0x2b8] sm:$0xf] }
  0x36   : > { %234 = vst [vmem:[%s4391_s11 + $0x6c] sm:$0xf] %v233_v27  ;;  %v297_v59 = vld [vmem:[%s4386_s10 + $0x2c4] sm:$0xf]  ;;  %v299_v60 = vld [vmem:[%s4386_s10 + $0x2d0] sm:$0xf] }
  0x37   : > { %236 = vst [vmem:[%s4391_s11 + $0x70] sm:$0xf] %v235_v28  ;;  %v301_v61 = vld [vmem:[%s4386_s10 + $0x2dc] sm:$0xf]  ;;  %v303_v62 = vld [vmem:[%s4386_s10 + $0x2e8] sm:$0xf] }
  0x38   : > { %238 = vst [vmem:[%s4391_s11 + $0x74] sm:$0xf] %v237_v29  ;;  %v305_v63 = vld [vmem:[%s4386_s10 + $0x2f4] sm:$0xf]  ;;  %v307_v0 = vld [vmem:[%s4386_s10 + $0x300] sm:$0xf] }
  0x39   : > { %240 = vst [vmem:[%s4391_s11 + $0x78] sm:$0xf] %v239_v30  ;;  %v309_v1 = vld [vmem:[%s4386_s10 + $0x30c] sm:$0xf]  ;;  %v311_v2 = vld [vmem:[%s4386_s10 + $0x318] sm:$0xf] }
  0x3a   : > { %242 = vst [vmem:[%s4391_s11 + $0x7c] sm:$0xf] %v241_v31  ;;  %v313_v3 = vld [vmem:[%s4386_s10 + $0x324] sm:$0xf]  ;;  %v315_v4 = vld [vmem:[%s4386_s10 + $0x330] sm:$0xf] }
  0x3b   : > { %244 = vst [vmem:[%s4391_s11 + $0x80] sm:$0xf] %v243_v32  ;;  %v317_v5 = vld [vmem:[%s4386_s10 + $0x33c] sm:$0xf]  ;;  %v319_v6 = vld [vmem:[%s4386_s10 + $0x348] sm:$0xf] }
  0x3c   : > { %246 = vst [vmem:[%s4391_s11 + $0x84] sm:$0xf] %v245_v33  ;;  %v321_v7 = vld [vmem:[%s4386_s10 + $0x354] sm:$0xf]  ;;  %v323_v8 = vld [vmem:[%s4386_s10 + $0x360] sm:$0xf] }
  0x3d   : > { %248 = vst [vmem:[%s4391_s11 + $0x88] sm:$0xf] %v247_v34  ;;  %v325_v9 = vld [vmem:[%s4386_s10 + $0x36c] sm:$0xf]  ;;  %v327_v10 = vld [vmem:[%s4386_s10 + $0x378] sm:$0xf] }
  0x3e   : > { %250 = vst [vmem:[%s4391_s11 + $0x8c] sm:$0xf] %v249_v35  ;;  %v329_v11 = vld [vmem:[%s4386_s10 + $0x384] sm:$0xf]  ;;  %v331_v12 = vld [vmem:[%s4386_s10 + $0x390] sm:$0xf] }
  0x3f   : > { %252 = vst [vmem:[%s4391_s11 + $0x90] sm:$0xf] %v251_v36  ;;  %v333_v13 = vld [vmem:[%s4386_s10 + $0x39c] sm:$0xf]  ;;  %v335_v14 = vld [vmem:[%s4386_s10 + $0x3a8] sm:$0xf] }
  0x40   : > { %254 = vst [vmem:[%s4391_s11 + $0x94] sm:$0xf] %v253_v37  ;;  %v337_v15 = vld [vmem:[%s4386_s10 + $0x3b4] sm:$0xf]  ;;  %v339_v16 = vld [vmem:[%s4386_s10 + $0x3c0] sm:$0xf] }
  0x41   : > { %256 = vst [vmem:[%s4391_s11 + $0x98] sm:$0xf] %v255_v38  ;;  %v341_v17 = vld [vmem:[%s4386_s10 + $0x3cc] sm:$0xf]  ;;  %v343_v18 = vld [vmem:[%s4386_s10 + $0x3d8] sm:$0xf] }
  0x42   : > { %258 = vst [vmem:[%s4391_s11 + $0x9c] sm:$0xf] %v257_v39  ;;  %v345_v19 = vld [vmem:[%s4386_s10 + $0x3e4] sm:$0xf]  ;;  %v347_v20 = vld [vmem:[%s4386_s10 + $0x3f0] sm:$0xf] }
  0x43   : > { %260 = vst [vmem:[%s4391_s11 + $0xa0] sm:$0xf] %v259_v40  ;;  %v349_v21 = vld [vmem:[%s4386_s10 + $0x3fc] sm:$0xf]  ;;  %v351_v22 = vld [vmem:[%s4386_s10 + $0x408] sm:$0xf] }
  0x44   : > { %262 = vst [vmem:[%s4391_s11 + $0xa4] sm:$0xf] %v261_v41  ;;  %v353_v23 = vld [vmem:[%s4386_s10 + $0x414] sm:$0xf]  ;;  %v355_v24 = vld [vmem:[%s4386_s10 + $0x420] sm:$0xf] }
  0x45   : > { %264 = vst [vmem:[%s4391_s11 + $0xa8] sm:$0xf] %v263_v42  ;;  %v357_v25 = vld [vmem:[%s4386_s10 + $0x42c] sm:$0xf]  ;;  %v359_v26 = vld [vmem:[%s4386_s10 + $0x438] sm:$0xf] }
  0x46   : > { %266 = vst [vmem:[%s4391_s11 + $0xac] sm:$0xf] %v265_v43  ;;  %v361_v27 = vld [vmem:[%s4386_s10 + $0x444] sm:$0xf]  ;;  %v363_v28 = vld [vmem:[%s4386_s10 + $0x450] sm:$0xf] }
  0x47   : > { %268 = vst [vmem:[%s4391_s11 + $0xb0] sm:$0xf] %v267_v44  ;;  %v365_v29 = vld [vmem:[%s4386_s10 + $0x45c] sm:$0xf]  ;;  %v367_v30 = vld [vmem:[%s4386_s10 + $0x468] sm:$0xf] }
  0x48   : > { %270 = vst [vmem:[%s4391_s11 + $0xb4] sm:$0xf] %v269_v45  ;;  %v369_v31 = vld [vmem:[%s4386_s10 + $0x474] sm:$0xf]  ;;  %v371_v32 = vld [vmem:[%s4386_s10 + $0x480] sm:$0xf] }
  0x49   : > { %272 = vst [vmem:[%s4391_s11 + $0xb8] sm:$0xf] %v271_v46  ;;  %v373_v33 = vld [vmem:[%s4386_s10 + $0x48c] sm:$0xf]  ;;  %v375_v34 = vld [vmem:[%s4386_s10 + $0x498] sm:$0xf] }
  0x4a   : > { %274 = vst [vmem:[%s4391_s11 + $0xbc] sm:$0xf] %v273_v47  ;;  %v377_v35 = vld [vmem:[%s4386_s10 + $0x4a4] sm:$0xf]  ;;  %v379_v36 = vld [vmem:[%s4386_s10 + $0x4b0] sm:$0xf] }
  0x4b   : > { %276 = vst [vmem:[%s4391_s11 + $0xc0] sm:$0xf] %v275_v48  ;;  %v381_v37 = vld [vmem:[%s4386_s10 + $0x4bc] sm:$0xf]  ;;  %v383_v38 = vld [vmem:[%s4386_s10 + $0x4c8] sm:$0xf] }
  0x4c   : > { %278 = vst [vmem:[%s4391_s11 + $0xc4] sm:$0xf] %v277_v49  ;;  %v385_v39 = vld [vmem:[%s4386_s10 + $0x4d4] sm:$0xf]  ;;  %v387_v40 = vld [vmem:[%s4386_s10 + $0x4e0] sm:$0xf] }
  0x4d   : > { %280 = vst [vmem:[%s4391_s11 + $0xc8] sm:$0xf] %v279_v50  ;;  %v389_v41 = vld [vmem:[%s4386_s10 + $0x4ec] sm:$0xf]  ;;  %v391_v42 = vld [vmem:[%s4386_s10 + $0x4f8] sm:$0xf] }
  0x4e   : > { %282 = vst [vmem:[%s4391_s11 + $0xcc] sm:$0xf] %v281_v51  ;;  %v393_v43 = vld [vmem:[%s4386_s10 + $0x504] sm:$0xf]  ;;  %v395_v44 = vld [vmem:[%s4386_s10 + $0x510] sm:$0xf] }
  0x4f   : > { %284 = vst [vmem:[%s4391_s11 + $0xd0] sm:$0xf] %v283_v52  ;;  %v397_v45 = vld [vmem:[%s4386_s10 + $0x51c] sm:$0xf]  ;;  %v399_v46 = vld [vmem:[%s4386_s10 + $0x528] sm:$0xf] }
  0x50   : > { %286 = vst [vmem:[%s4391_s11 + $0xd4] sm:$0xf] %v285_v53  ;;  %v401_v47 = vld [vmem:[%s4386_s10 + $0x534] sm:$0xf]  ;;  %v403_v48 = vld [vmem:[%s4386_s10 + $0x540] sm:$0xf] }
  0x51   : > { %288 = vst [vmem:[%s4391_s11 + $0xd8] sm:$0xf] %v287_v54  ;;  %v405_v49 = vld [vmem:[%s4386_s10 + $0x54c] sm:$0xf]  ;;  %v407_v50 = vld [vmem:[%s4386_s10 + $0x558] sm:$0xf] }
  0x52   : > { %290 = vst [vmem:[%s4391_s11 + $0xdc] sm:$0xf] %v289_v55  ;;  %v409_v51 = vld [vmem:[%s4386_s10 + $0x564] sm:$0xf]  ;;  %v411_v52 = vld [vmem:[%s4386_s10 + $0x570] sm:$0xf] }
  0x53   : > { %292 = vst [vmem:[%s4391_s11 + $0xe0] sm:$0xf] %v291_v56  ;;  %v413_v53 = vld [vmem:[%s4386_s10 + $0x57c] sm:$0xf]  ;;  %v415_v54 = vld [vmem:[%s4386_s10 + $0x588] sm:$0xf] }
  0x54   : > { %294 = vst [vmem:[%s4391_s11 + $0xe4] sm:$0xf] %v293_v57  ;;  %v417_v55 = vld [vmem:[%s4386_s10 + $0x594] sm:$0xf]  ;;  %v419_v56 = vld [vmem:[%s4386_s10 + $0x5a0] sm:$0xf] }
  0x55   : > { %296 = vst [vmem:[%s4391_s11 + $0xe8] sm:$0xf] %v295_v58  ;;  %v421_v57 = vld [vmem:[%s4386_s10 + $0x5ac] sm:$0xf]  ;;  %v423_v58 = vld [vmem:[%s4386_s10 + $0x5b8] sm:$0xf] }
  0x56   : > { %298 = vst [vmem:[%s4391_s11 + $0xec] sm:$0xf] %v297_v59  ;;  %v425_v59 = vld [vmem:[%s4386_s10 + $0x5c4] sm:$0xf] }
  0x57   : > { %300 = vst [vmem:[%s4391_s11 + $0xf0] sm:$0xf] %v299_v60  ;;  %v427_v60 = vld [vmem:[%s4386_s10 + $0x5d0] sm:$0xf] }
  0x58   : > { %302 = vst [vmem:[%s4391_s11 + $0xf4] sm:$0xf] %v301_v61  ;;  %v429_v61 = vld [vmem:[%s4386_s10 + $0x5dc] sm:$0xf] }
  0x59   : > { %304 = vst [vmem:[%s4391_s11 + $0xf8] sm:$0xf] %v303_v62  ;;  %v431_v62 = vld [vmem:[%s4386_s10 + $0x5e8] sm:$0xf] }
  0x5a   : > { %306 = vst [vmem:[%s4391_s11 + $0xfc] sm:$0xf] %v305_v63  ;;  %v433_v63 = vld [vmem:[%s4386_s10 + $0x5f4] sm:$0xf] }
  0x5b   : > { %308 = vst [vmem:[%s4391_s11 + $0x100] sm:$0xf] %v307_v0  ;;  %v435_v0 = vld [vmem:[%s4386_s10 + $0x600] sm:$0xf] }
  0x5c   : > { %310 = vst [vmem:[%s4391_s11 + $0x104] sm:$0xf] %v309_v1  ;;  %v437_v1 = vld [vmem:[%s4386_s10 + $0x60c] sm:$0xf] }
  0x5d   : > { %312 = vst [vmem:[%s4391_s11 + $0x108] sm:$0xf] %v311_v2  ;;  %v439_v2 = vld [vmem:[%s4386_s10 + $0x618] sm:$0xf] }
  0x5e   : > { %314 = vst [vmem:[%s4391_s11 + $0x10c] sm:$0xf] %v313_v3  ;;  %v441_v3 = vld [vmem:[%s4386_s10 + $0x624] sm:$0xf] }
  0x5f   : > { %316 = vst [vmem:[%s4391_s11 + $0x110] sm:$0xf] %v315_v4  ;;  %v443_v4 = vld [vmem:[%s4386_s10 + $0x630] sm:$0xf] }
  0x60   : > { %318 = vst [vmem:[%s4391_s11 + $0x114] sm:$0xf] %v317_v5  ;;  %v445_v5 = vld [vmem:[%s4386_s10 + $0x63c] sm:$0xf] }
  0x61   : > { %320 = vst [vmem:[%s4391_s11 + $0x118] sm:$0xf] %v319_v6  ;;  %v447_v6 = vld [vmem:[%s4386_s10 + $0x648] sm:$0xf] }
  0x62   : > { %322 = vst [vmem:[%s4391_s11 + $0x11c] sm:$0xf] %v321_v7  ;;  %v449_v7 = vld [vmem:[%s4386_s10 + $0x654] sm:$0xf] }
  0x63   : > { %324 = vst [vmem:[%s4391_s11 + $0x120] sm:$0xf] %v323_v8  ;;  %v451_v8 = vld [vmem:[%s4386_s10 + $0x660] sm:$0xf] }
  0x64   : > { %326 = vst [vmem:[%s4391_s11 + $0x124] sm:$0xf] %v325_v9  ;;  %v453_v9 = vld [vmem:[%s4386_s10 + $0x66c] sm:$0xf] }
  0x65   : > { %328 = vst [vmem:[%s4391_s11 + $0x128] sm:$0xf] %v327_v10  ;;  %v455_v10 = vld [vmem:[%s4386_s10 + $0x678] sm:$0xf] }
  0x66   : > { %330 = vst [vmem:[%s4391_s11 + $0x12c] sm:$0xf] %v329_v11  ;;  %v457_v11 = vld [vmem:[%s4386_s10 + $0x684] sm:$0xf] }
  0x67   : > { %332 = vst [vmem:[%s4391_s11 + $0x130] sm:$0xf] %v331_v12  ;;  %v459_v12 = vld [vmem:[%s4386_s10 + $0x690] sm:$0xf] }
  0x68   : > { %334 = vst [vmem:[%s4391_s11 + $0x134] sm:$0xf] %v333_v13  ;;  %v461_v13 = vld [vmem:[%s4386_s10 + $0x69c] sm:$0xf] }
  0x69   : > { %336 = vst [vmem:[%s4391_s11 + $0x138] sm:$0xf] %v335_v14  ;;  %v463_v14 = vld [vmem:[%s4386_s10 + $0x6a8] sm:$0xf] }
  0x6a   : > { %338 = vst [vmem:[%s4391_s11 + $0x13c] sm:$0xf] %v337_v15  ;;  %v465_v15 = vld [vmem:[%s4386_s10 + $0x6b4] sm:$0xf] }
  0x6b   : > { %340 = vst [vmem:[%s4391_s11 + $0x140] sm:$0xf] %v339_v16  ;;  %v467_v16 = vld [vmem:[%s4386_s10 + $0x6c0] sm:$0xf] }
  0x6c   : > { %342 = vst [vmem:[%s4391_s11 + $0x144] sm:$0xf] %v341_v17  ;;  %v469_v17 = vld [vmem:[%s4386_s10 + $0x6cc] sm:$0xf] }
  0x6d   : > { %344 = vst [vmem:[%s4391_s11 + $0x148] sm:$0xf] %v343_v18  ;;  %v471_v18 = vld [vmem:[%s4386_s10 + $0x6d8] sm:$0xf] }
  0x6e   : > { %346 = vst [vmem:[%s4391_s11 + $0x14c] sm:$0xf] %v345_v19  ;;  %v473_v19 = vld [vmem:[%s4386_s10 + $0x6e4] sm:$0xf] }
  0x6f   : > { %348 = vst [vmem:[%s4391_s11 + $0x150] sm:$0xf] %v347_v20  ;;  %v475_v20 = vld [vmem:[%s4386_s10 + $0x6f0] sm:$0xf] }
  0x70   : > { %350 = vst [vmem:[%s4391_s11 + $0x154] sm:$0xf] %v349_v21  ;;  %v477_v21 = vld [vmem:[%s4386_s10 + $0x6fc] sm:$0xf] }
  0x71   : > { %352 = vst [vmem:[%s4391_s11 + $0x158] sm:$0xf] %v351_v22  ;;  %v479_v22 = vld [vmem:[%s4386_s10 + $0x708] sm:$0xf] }
  0x72   : > { %354 = vst [vmem:[%s4391_s11 + $0x15c] sm:$0xf] %v353_v23  ;;  %v481_v23 = vld [vmem:[%s4386_s10 + $0x714] sm:$0xf] }
  0x73   : > { %356 = vst [vmem:[%s4391_s11 + $0x160] sm:$0xf] %v355_v24  ;;  %v483_v24 = vld [vmem:[%s4386_s10 + $0x720] sm:$0xf] }
  0x74   : > { %358 = vst [vmem:[%s4391_s11 + $0x164] sm:$0xf] %v357_v25  ;;  %v485_v25 = vld [vmem:[%s4386_s10 + $0x72c] sm:$0xf] }
  0x75   : > { %360 = vst [vmem:[%s4391_s11 + $0x168] sm:$0xf] %v359_v26  ;;  %v487_v26 = vld [vmem:[%s4386_s10 + $0x738] sm:$0xf] }
  0x76   : > { %362 = vst [vmem:[%s4391_s11 + $0x16c] sm:$0xf] %v361_v27  ;;  %v489_v27 = vld [vmem:[%s4386_s10 + $0x744] sm:$0xf] }
  0x77   : > { %364 = vst [vmem:[%s4391_s11 + $0x170] sm:$0xf] %v363_v28  ;;  %v491_v28 = vld [vmem:[%s4386_s10 + $0x750] sm:$0xf] }
  0x78   : > { %366 = vst [vmem:[%s4391_s11 + $0x174] sm:$0xf] %v365_v29  ;;  %v493_v29 = vld [vmem:[%s4386_s10 + $0x75c] sm:$0xf] }
  0x79   : > { %368 = vst [vmem:[%s4391_s11 + $0x178] sm:$0xf] %v367_v30  ;;  %v495_v30 = vld [vmem:[%s4386_s10 + $0x768] sm:$0xf] }
  0x7a   : > { %370 = vst [vmem:[%s4391_s11 + $0x17c] sm:$0xf] %v369_v31  ;;  %v497_v31 = vld [vmem:[%s4386_s10 + $0x774] sm:$0xf] }
  0x7b   : > { %372 = vst [vmem:[%s4391_s11 + $0x180] sm:$0xf] %v371_v32  ;;  %v499_v32 = vld [vmem:[%s4386_s10 + $0x780] sm:$0xf] }
  0x7c   : > { %374 = vst [vmem:[%s4391_s11 + $0x184] sm:$0xf] %v373_v33  ;;  %v501_v33 = vld [vmem:[%s4386_s10 + $0x78c] sm:$0xf] }
  0x7d   : > { %376 = vst [vmem:[%s4391_s11 + $0x188] sm:$0xf] %v375_v34  ;;  %v503_v34 = vld [vmem:[%s4386_s10 + $0x798] sm:$0xf] }
  0x7e   : > { %378 = vst [vmem:[%s4391_s11 + $0x18c] sm:$0xf] %v377_v35  ;;  %v505_v35 = vld [vmem:[%s4386_s10 + $0x7a4] sm:$0xf] }
  0x7f   : > { %380 = vst [vmem:[%s4391_s11 + $0x190] sm:$0xf] %v379_v36  ;;  %v507_v36 = vld [vmem:[%s4386_s10 + $0x7b0] sm:$0xf] }
  0x80   : > { %382 = vst [vmem:[%s4391_s11 + $0x194] sm:$0xf] %v381_v37  ;;  %v509_v37 = vld [vmem:[%s4386_s10 + $0x7bc] sm:$0xf] }
  0x81   : > { %384 = vst [vmem:[%s4391_s11 + $0x198] sm:$0xf] %v383_v38  ;;  %v511_v38 = vld [vmem:[%s4386_s10 + $0x7c8] sm:$0xf] }
  0x82   : > { %386 = vst [vmem:[%s4391_s11 + $0x19c] sm:$0xf] %v385_v39  ;;  %v513_v39 = vld [vmem:[%s4386_s10 + $0x7d4] sm:$0xf] }
  0x83   : > { %388 = vst [vmem:[%s4391_s11 + $0x1a0] sm:$0xf] %v387_v40  ;;  %v515_v40 = vld [vmem:[%s4386_s10 + $0x7e0] sm:$0xf] }
  0x84   : > { %390 = vst [vmem:[%s4391_s11 + $0x1a4] sm:$0xf] %v389_v41  ;;  %v517_v41 = vld [vmem:[%s4386_s10 + $0x7ec] sm:$0xf] }
  0x85   : > { %392 = vst [vmem:[%s4391_s11 + $0x1a8] sm:$0xf] %v391_v42  ;;  %v519_v42 = vld [vmem:[%s4386_s10 + $0x7f8] sm:$0xf] }
  0x86   : > { %394 = vst [vmem:[%s4391_s11 + $0x1ac] sm:$0xf] %v393_v43  ;;  %v521_v43 = vld [vmem:[%s4386_s10 + $0x804] sm:$0xf] }
  0x87   : > { %396 = vst [vmem:[%s4391_s11 + $0x1b0] sm:$0xf] %v395_v44  ;;  %v523_v44 = vld [vmem:[%s4386_s10 + $0x810] sm:$0xf] }
  0x88   : > { %398 = vst [vmem:[%s4391_s11 + $0x1b4] sm:$0xf] %v397_v45  ;;  %v525_v45 = vld [vmem:[%s4386_s10 + $0x81c] sm:$0xf] }
  0x89   : > { %400 = vst [vmem:[%s4391_s11 + $0x1b8] sm:$0xf] %v399_v46  ;;  %v527_v46 = vld [vmem:[%s4386_s10 + $0x828] sm:$0xf] }
  0x8a   : > { %402 = vst [vmem:[%s4391_s11 + $0x1bc] sm:$0xf] %v401_v47  ;;  %v529_v47 = vld [vmem:[%s4386_s10 + $0x834] sm:$0xf] }
  0x8b   : > { %404 = vst [vmem:[%s4391_s11 + $0x1c0] sm:$0xf] %v403_v48  ;;  %v531_v48 = vld [vmem:[%s4386_s10 + $0x840] sm:$0xf] }
  0x8c   : > { %406 = vst [vmem:[%s4391_s11 + $0x1c4] sm:$0xf] %v405_v49  ;;  %v533_v49 = vld [vmem:[%s4386_s10 + $0x84c] sm:$0xf] }
  0x8d   : > { %408 = vst [vmem:[%s4391_s11 + $0x1c8] sm:$0xf] %v407_v50  ;;  %v535_v50 = vld [vmem:[%s4386_s10 + $0x858] sm:$0xf] }
  0x8e   : > { %410 = vst [vmem:[%s4391_s11 + $0x1cc] sm:$0xf] %v409_v51  ;;  %v537_v51 = vld [vmem:[%s4386_s10 + $0x864] sm:$0xf] }
  0x8f   : > { %412 = vst [vmem:[%s4391_s11 + $0x1d0] sm:$0xf] %v411_v52  ;;  %v539_v52 = vld [vmem:[%s4386_s10 + $0x870] sm:$0xf] }
  0x90   : > { %414 = vst [vmem:[%s4391_s11 + $0x1d4] sm:$0xf] %v413_v53  ;;  %v541_v53 = vld [vmem:[%s4386_s10 + $0x87c] sm:$0xf] }
  0x91   : > { %416 = vst [vmem:[%s4391_s11 + $0x1d8] sm:$0xf] %v415_v54  ;;  %v543_v54 = vld [vmem:[%s4386_s10 + $0x888] sm:$0xf] }
  0x92   : > { %418 = vst [vmem:[%s4391_s11 + $0x1dc] sm:$0xf] %v417_v55  ;;  %v545_v55 = vld [vmem:[%s4386_s10 + $0x894] sm:$0xf] }
  0x93   : > { %420 = vst [vmem:[%s4391_s11 + $0x1e0] sm:$0xf] %v419_v56  ;;  %v547_v56 = vld [vmem:[%s4386_s10 + $0x8a0] sm:$0xf] }
  0x94   : > { %422 = vst [vmem:[%s4391_s11 + $0x1e4] sm:$0xf] %v421_v57  ;;  %v549_v57 = vld [vmem:[%s4386_s10 + $0x8ac] sm:$0xf] }
  0x95   : > { %424 = vst [vmem:[%s4391_s11 + $0x1e8] sm:$0xf] %v423_v58  ;;  %v551_v58 = vld [vmem:[%s4386_s10 + $0x8b8] sm:$0xf] }
  0x96   : > { %426 = vst [vmem:[%s4391_s11 + $0x1ec] sm:$0xf] %v425_v59  ;;  %v553_v59 = vld [vmem:[%s4386_s10 + $0x8c4] sm:$0xf] }
  0x97   : > { %428 = vst [vmem:[%s4391_s11 + $0x1f0] sm:$0xf] %v427_v60  ;;  %v555_v60 = vld [vmem:[%s4386_s10 + $0x8d0] sm:$0xf] }
  0x98   : > { %430 = vst [vmem:[%s4391_s11 + $0x1f4] sm:$0xf] %v429_v61  ;;  %v557_v61 = vld [vmem:[%s4386_s10 + $0x8dc] sm:$0xf] }
  0x99   : > { %432 = vst [vmem:[%s4391_s11 + $0x1f8] sm:$0xf] %v431_v62  ;;  %v559_v62 = vld [vmem:[%s4386_s10 + $0x8e8] sm:$0xf] }
  0x9a   : > { %434 = vst [vmem:[%s4391_s11 + $0x1fc] sm:$0xf] %v433_v63  ;;  %v561_v63 = vld [vmem:[%s4386_s10 + $0x8f4] sm:$0xf] }
  0x9b   : > { %436 = vst [vmem:[%s4391_s11 + $0x200] sm:$0xf] %v435_v0 }
  0x9c   : > { %438 = vst [vmem:[%s4391_s11 + $0x204] sm:$0xf] %v437_v1 }
  0x9d   : > { %440 = vst [vmem:[%s4391_s11 + $0x208] sm:$0xf] %v439_v2 }
  0x9e   : > { %442 = vst [vmem:[%s4391_s11 + $0x20c] sm:$0xf] %v441_v3 }
  0x9f   : > { %444 = vst [vmem:[%s4391_s11 + $0x210] sm:$0xf] %v443_v4 }
  0xa0   : > { %446 = vst [vmem:[%s4391_s11 + $0x214] sm:$0xf] %v445_v5 }
  0xa1   : > { %448 = vst [vmem:[%s4391_s11 + $0x218] sm:$0xf] %v447_v6 }
  0xa2   : > { %450 = vst [vmem:[%s4391_s11 + $0x21c] sm:$0xf] %v449_v7 }
  0xa3   : > { %452 = vst [vmem:[%s4391_s11 + $0x220] sm:$0xf] %v451_v8 }
  0xa4   : > { %454 = vst [vmem:[%s4391_s11 + $0x224] sm:$0xf] %v453_v9 }
  0xa5   : > { %456 = vst [vmem:[%s4391_s11 + $0x228] sm:$0xf] %v455_v10 }
  0xa6   : > { %458 = vst [vmem:[%s4391_s11 + $0x22c] sm:$0xf] %v457_v11 }
  0xa7   : > { %460 = vst [vmem:[%s4391_s11 + $0x230] sm:$0xf] %v459_v12 }
  0xa8   : > { %462 = vst [vmem:[%s4391_s11 + $0x234] sm:$0xf] %v461_v13 }
  0xa9   : > { %464 = vst [vmem:[%s4391_s11 + $0x238] sm:$0xf] %v463_v14 }
  0xaa   : > { %466 = vst [vmem:[%s4391_s11 + $0x23c] sm:$0xf] %v465_v15 }
  0xab   : > { %468 = vst [vmem:[%s4391_s11 + $0x240] sm:$0xf] %v467_v16 }
  0xac   : > { %470 = vst [vmem:[%s4391_s11 + $0x244] sm:$0xf] %v469_v17 }
  0xad   : > { %472 = vst [vmem:[%s4391_s11 + $0x248] sm:$0xf] %v471_v18 }
  0xae   : > { %474 = vst [vmem:[%s4391_s11 + $0x24c] sm:$0xf] %v473_v19 }
  0xaf   : > { %476 = vst [vmem:[%s4391_s11 + $0x250] sm:$0xf] %v475_v20 }
  0xb0   : > { %478 = vst [vmem:[%s4391_s11 + $0x254] sm:$0xf] %v477_v21 }
  0xb1   : > { %480 = vst [vmem:[%s4391_s11 + $0x258] sm:$0xf] %v479_v22 }
  0xb2   : > { %482 = vst [vmem:[%s4391_s11 + $0x25c] sm:$0xf] %v481_v23 }
  0xb3   : > { %484 = vst [vmem:[%s4391_s11 + $0x260] sm:$0xf] %v483_v24 }
  0xb4   : > { %486 = vst [vmem:[%s4391_s11 + $0x264] sm:$0xf] %v485_v25 }
  0xb5   : > { %488 = vst [vmem:[%s4391_s11 + $0x268] sm:$0xf] %v487_v26 }
  0xb6   : > { %490 = vst [vmem:[%s4391_s11 + $0x26c] sm:$0xf] %v489_v27 }
  0xb7   : > { %492 = vst [vmem:[%s4391_s11 + $0x270] sm:$0xf] %v491_v28 }
  0xb8   : > { %494 = vst [vmem:[%s4391_s11 + $0x274] sm:$0xf] %v493_v29 }
  0xb9   : > { %496 = vst [vmem:[%s4391_s11 + $0x278] sm:$0xf] %v495_v30 }
  0xba   : > { %498 = vst [vmem:[%s4391_s11 + $0x27c] sm:$0xf] %v497_v31 }
  0xbb   : > { %500 = vst [vmem:[%s4391_s11 + $0x280] sm:$0xf] %v499_v32 }
  0xbc   : > { %502 = vst [vmem:[%s4391_s11 + $0x284] sm:$0xf] %v501_v33 }
  0xbd   : > { %504 = vst [vmem:[%s4391_s11 + $0x288] sm:$0xf] %v503_v34 }
  0xbe   : > { %506 = vst [vmem:[%s4391_s11 + $0x28c] sm:$0xf] %v505_v35 }
  0xbf   : > { %508 = vst [vmem:[%s4391_s11 + $0x290] sm:$0xf] %v507_v36 }
  0xc0   : > { %510 = vst [vmem:[%s4391_s11 + $0x294] sm:$0xf] %v509_v37 }
  0xc1   : > { %512 = vst [vmem:[%s4391_s11 + $0x298] sm:$0xf] %v511_v38 }
  0xc2   : > { %514 = vst [vmem:[%s4391_s11 + $0x29c] sm:$0xf] %v513_v39 }
  0xc3   : > { %516 = vst [vmem:[%s4391_s11 + $0x2a0] sm:$0xf] %v515_v40 }
  0xc4   : > { %518 = vst [vmem:[%s4391_s11 + $0x2a4] sm:$0xf] %v517_v41 }
  0xc5   : > { %520 = vst [vmem:[%s4391_s11 + $0x2a8] sm:$0xf] %v519_v42 }
  0xc6   : > { %522 = vst [vmem:[%s4391_s11 + $0x2ac] sm:$0xf] %v521_v43 }
  0xc7   : > { %524 = vst [vmem:[%s4391_s11 + $0x2b0] sm:$0xf] %v523_v44 }
  0xc8   : > { %526 = vst [vmem:[%s4391_s11 + $0x2b4] sm:$0xf] %v525_v45 }
  0xc9   : > { %528 = vst [vmem:[%s4391_s11 + $0x2b8] sm:$0xf] %v527_v46 }
  0xca   : > { %530 = vst [vmem:[%s4391_s11 + $0x2bc] sm:$0xf] %v529_v47 }
  0xcb   : > { %532 = vst [vmem:[%s4391_s11 + $0x2c0] sm:$0xf] %v531_v48 }
  0xcc   : > { %534 = vst [vmem:[%s4391_s11 + $0x2c4] sm:$0xf] %v533_v49 }
  0xcd   : > { %536 = vst [vmem:[%s4391_s11 + $0x2c8] sm:$0xf] %v535_v50 }
  0xce   : > { %538 = vst [vmem:[%s4391_s11 + $0x2cc] sm:$0xf] %v537_v51 }
  0xcf   : > { %540 = vst [vmem:[%s4391_s11 + $0x2d0] sm:$0xf] %v539_v52 }
  0xd0   : > { %542 = vst [vmem:[%s4391_s11 + $0x2d4] sm:$0xf] %v541_v53 }
  0xd1   : > { %544 = vst [vmem:[%s4391_s11 + $0x2d8] sm:$0xf] %v543_v54 }
  0xd2   : > { %546 = vst [vmem:[%s4391_s11 + $0x2dc] sm:$0xf] %v545_v55 }
  0xd3   : > { %548 = vst [vmem:[%s4391_s11 + $0x2e0] sm:$0xf] %v547_v56 }
  0xd4   : > { %550 = vst [vmem:[%s4391_s11 + $0x2e4] sm:$0xf] %v549_v57 }
  0xd5   : > { %552 = vst [vmem:[%s4391_s11 + $0x2e8] sm:$0xf] %v551_v58 }
  0xd6   : > { %554 = vst [vmem:[%s4391_s11 + $0x2ec] sm:$0xf] %v553_v59 }
  0xd7   : > { %556 = vst [vmem:[%s4391_s11 + $0x2f0] sm:$0xf] %v555_v60 }
  0xd8   : > { %558 = vst [vmem:[%s4391_s11 + $0x2f4] sm:$0xf] %v557_v61 }
  0xd9   : > { %560 = vst [vmem:[%s4391_s11 + $0x2f8] sm:$0xf] %v559_v62 }
  0xda   : > { %562 = vst [vmem:[%s4391_s11 + $0x2fc] sm:$0xf] %v561_v63 }
  0xdb PF: > { %p3185_p11 = scmp.ge.s32.totalorder %s4284_s20, 1  ;;  %p975_p12 = scmp.lt.s32.totalorder %s4284_s20, 7 }
  0xdd   : > { %p976_p13 = pnand %p3185_p11, %p975_p12 }
  0xde   : > { %s982_s21 = sand.u32 (!%p976_p13), 1, %s4260_s14   ;;  %s1009_s24 = sand.u32 (!%p976_p13), 1, %s4252_s12  }
  0xdf   : > { %979 = sbr.rel (%p976_p13) target bundleno = 675 (0x2a3), region = 69  ;;  %s3186_s26 = sshll.u32 (!%p976_p13), %s1009_s24, 6 }
  0xe0   : > { %s4138_s25 = smul.u32 (!%p976_p13), 768, %s982_s21  ;;  %p1012_p0 = scmp.lt.s32.totalorder (!%p976_p13), %s4272_s17, 1 }
  0xe1   : > { %p1017_p1 = scmp.lt.s32.totalorder (!%p976_p13), %s4268_s16, 2  ;;  %s4795_s12 = scalar_lea.vmem (!%p976_p13), [#allocation4], %s3186_s26 }
  0xe2   : > { %s4793_s14 = scalar_lea.vmem (!%p976_p13), [#allocation3], %s4138_s25  ;;  %p3188_p2 = scmp.ne.s32.totalorder (!%p976_p13), %s4268_s16, 0 }
  0xe4   : > { %s1013_s28 = scalar_select %p1012_p0, %s4272_s17, 1 }
  0xe5   : > { %s4782_s29 = scalar_select %p1017_p1, %s4268_s16, 2 }
  0xe6   : > { %s4139_s5 = smul.u32 576, %s1013_s28 }
  0xe7   : > { %s1019_s8 = scalar_lea.vmem %s5206_s2, %s4782_s29  ;;  %1023 = sbr.rel (%p3188_p2) target bundleno = 305 (0x131), region = 77 }
  0xe8   : > { %s4791_s11 = scalar_lea.vmem %s5204_s0, %s4139_s5 }
  0xec   : > { %v1024_v0 = vld [vmem:[%s4791_s11] sm:$0xff]  ;;  %v1025_v1 = vld [vmem:[%s4791_s11 + $0x8] sm:$0xff]  ;;  %vm1120_vm0 = vcmask 1046528   ;;  %v1042_v26 = vld [vmem:[%s4791_s11 + $0x10] sm:$0x1] }
  0xed   : > { %v1026_v2 = vld [vmem:[%s4791_s11 + $0x40] sm:$0xff]  ;;  %v1072_v3 = vpack.c.bf16 %v1025_v1, %v1024_v0  ;;  %v1027_v4 = vld [vmem:[%s4791_s11 + $0x48] sm:$0xff]  ;;  %v1043_v27 = vld [vmem:[%s4791_s11 + $0x18] sm:$0x1]  ;;  %v1122_v29 = vrot.slane %v1042_v26, 1 }
  0xee   : > { %v1028_v5 = vld [vmem:[%s4791_s11 + $0x80] sm:$0xff]  ;;  %v1029_v6 = vld [vmem:[%s4791_s11 + $0x88] sm:$0xff]  ;;  %v4804_v7 = vpack.c.bf16 %v1027_v4, %v1026_v2  ;;  %v1125_v31 = vrot.slane %v1043_v27, 1  ;;  %v1046_v34 = vld [vmem:[%s4791_s11 + $0x50] sm:$0x1] }
  0xef   : > { %v4806_v8 = vpack.c.bf16 %v1029_v6, %v1028_v5  ;;  %v1030_v9 = vld [vmem:[%s4791_s11 + $0xc0] sm:$0xff]  ;;  %v1031_v10 = vld [vmem:[%s4791_s11 + $0xc8] sm:$0xff]  ;;  %1080 = vst [vmem:[#allocation2] sm:$0xff] %v1072_v3  ;;  %v1047_v38 = vld [vmem:[%s4791_s11 + $0x58] sm:$0x1]  ;;  %v1128_v39 = vrot.slane %v1046_v34, 1 }
  0xf0   : > { %v1032_v11 = vld [vmem:[%s4791_s11 + $0x100] sm:$0xff]  ;;  %v4811_v12 = vpack.c.bf16 %v1031_v10, %v1030_v9  ;;  %v1033_v13 = vld [vmem:[%s4791_s11 + $0x108] sm:$0xff]  ;;  %1081 = vst [vmem:[#allocation2 + $0x10] sm:$0xff] %v4804_v7  ;;  %v1131_v42 = vrot.slane %v1047_v38, 1  ;;  %v1050_v46 = vld [vmem:[%s4791_s11 + $0x90] sm:$0x1] }
  0xf1   : > { %v1034_v14 = vld [vmem:[%s4791_s11 + $0x140] sm:$0xff]  ;;  %v1035_v15 = vld [vmem:[%s4791_s11 + $0x148] sm:$0xff]  ;;  %v4817_v16 = vpack.c.bf16 %v1033_v13, %v1032_v11  ;;  %1082 = vst [vmem:[#allocation2 + $0x20] sm:$0xff] %v4806_v8  ;;  %v1051_v47 = vld [vmem:[%s4791_s11 + $0x98] sm:$0x1]  ;;  %v1134_v51 = vrot.slane %v1050_v46, 1 }
  0xf2   : > { %v4819_v17 = vpack.c.bf16 %v1035_v15, %v1034_v14  ;;  %v1036_v18 = vld [vmem:[%s4791_s11 + $0x180] sm:$0xff]  ;;  %v1037_v19 = vld [vmem:[%s4791_s11 + $0x188] sm:$0xff]  ;;  %1083 = vst [vmem:[#allocation2 + $0x30] sm:$0xff] %v4811_v12  ;;  %v1137_v52 = vrot.slane %v1051_v47, 1  ;;  %v1054_v56 = vld [vmem:[%s4791_s11 + $0xd0] sm:$0x1] }
  0xf3   : > { %v1038_v20 = vld [vmem:[%s4791_s11 + $0x1c0] sm:$0xff]  ;;  %v4825_v21 = vpack.c.bf16 %v1037_v19, %v1036_v18  ;;  %v1039_v22 = vld [vmem:[%s4791_s11 + $0x1c8] sm:$0xff]  ;;  %1084 = vst [vmem:[#allocation2 + $0x40] sm:$0xff] %v4817_v16  ;;  %v1055_v57 = vld [vmem:[%s4791_s11 + $0xd8] sm:$0x1]  ;;  %v1140_v61 = vrot.slane %v1054_v56, 1 }
  0xf4   : > { %v1040_v23 = vld [vmem:[%s4791_s11] sm:$0xfe]  ;;  %v1041_v24 = vld [vmem:[%s4791_s11 + $0x8] sm:$0xfe]  ;;  %v4831_v25 = vpack.c.bf16 %v1039_v22, %v1038_v20  ;;  %1085 = vst [vmem:[#allocation2 + $0x50] sm:$0xff] %v4819_v17  ;;  %v1143_v4 = vrot.slane %v1055_v57, 1 }
  0xf5   : > { %v1121_v28 = vrot.slane %v1040_v23, 1  ;;  %v1124_v30 = vrot.slane %v1041_v24, 1  ;;  %v1044_v32 = vld [vmem:[%s4791_s11 + $0x40] sm:$0xfe]  ;;  %v1045_v33 = vld [vmem:[%s4791_s11 + $0x48] sm:$0xfe] }
  0xf6   : > { %v1127_v35 = vrot.slane %v1044_v32, 1  ;;  %1086 = vst [vmem:[#allocation2 + $0x60] sm:$0xff] %v4825_v21  ;;  %v1130_v40 = vrot.slane %v1045_v33, 1  ;;  %v1048_v43 = vld [vmem:[%s4791_s11 + $0x80] sm:$0xfe]  ;;  %v3190_v1 = vld [vmem:[%s4791_s11 + $0x28] sm:$0xff] }
  0xf7   : > { %v1123_v36 = vsel %vm1120_vm0, %v1121_v28, %v1122_v29  ;;  %v1126_v37 = vsel %vm1120_vm0, %v1124_v30, %v1125_v31  ;;  %1087 = vst [vmem:[#allocation2 + $0x70] sm:$0xff] %v4831_v25  ;;  %v1049_v44 = vld [vmem:[%s4791_s11 + $0x88] sm:$0xfe]  ;;  %v1133_v48 = vrot.slane %v1048_v43, 1  ;;  %v1052_v53 = vld [vmem:[%s4791_s11 + $0xc0] sm:$0xfe] }
  0xf8   : > { %v1185_v41 = vpack.c.bf16 %v1126_v37, %v1123_v36  ;;  %v1129_v45 = vsel %vm1120_vm0, %v1127_v35, %v1128_v39  ;;  %v1136_v49 = vrot.slane %v1049_v44, 1  ;;  %v1132_v50 = vsel %vm1120_vm0, %v1130_v40, %v1131_v42  ;;  %v1053_v55 = vld [vmem:[%s4791_s11 + $0xc8] sm:$0xfe]  ;;  %v1056_v62 = vld [vmem:[%s4791_s11 + $0x100] sm:$0xfe]  ;;  %1437 = vst [vmem:[#allocation2 + $0x100] sm:$0xff] %v4804_v7 }
  0xf9   : > { %v1186_v54 = vpack.c.bf16 %v1132_v50, %v1129_v45  ;;  %v1135_v58 = vsel %vm1120_vm0, %v1133_v48, %v1134_v51  ;;  %v1139_v60 = vrot.slane %v1052_v53, 1  ;;  %v1057_v63 = vld [vmem:[%s4791_s11 + $0x108] sm:$0xfe]  ;;  %v3189_v0 = vld [vmem:[%s4791_s11 + $0x20] sm:$0xff]  ;;  %v1142_v3 = vrot.slane %v1053_v55, 1  ;;  %1438 = vst [vmem:[#allocation2 + $0x110] sm:$0xff] %v4806_v8 }
  0xfa   : > { %1193 = vst [vmem:[#allocation2 + $0x8] sm:$0xff] %v1185_v41  ;;  %v1138_v59 = vsel %vm1120_vm0, %v1136_v49, %v1137_v52  ;;  %v1058_v5 = vld [vmem:[%s4791_s11 + $0x110] sm:$0x1]  ;;  %v1145_v6 = vrot.slane %v1056_v62, 1  ;;  %v1059_v10 = vld [vmem:[%s4791_s11 + $0x118] sm:$0x1]  ;;  %v1250_v34 = vpack.c.bf16 %v3190_v1, %v3189_v0 }
  0xfb   : > { %1194 = vst [vmem:[#allocation2 + $0x18] sm:$0xff] %v1186_v54  ;;  %v1187_v2 = vpack.c.bf16 %v1138_v59, %v1135_v58  ;;  %v1141_v9 = vsel %vm1120_vm0, %v1139_v60, %v1140_v61  ;;  %v1146_v11 = vrot.slane %v1058_v5, 1  ;;  %v1148_v13 = vrot.slane %v1057_v63, 1  ;;  %v1060_v14 = vld [vmem:[%s4791_s11 + $0x140] sm:$0xfe]  ;;  %v3192_v55 = vld [vmem:[%s4791_s11 + $0x68] sm:$0xff] }
  0xfc   : > { %v1144_v15 = vsel %vm1120_vm0, %v1142_v3, %v1143_v4  ;;  %v1149_v18 = vrot.slane %v1059_v10, 1  ;;  %v1061_v19 = vld [vmem:[%s4791_s11 + $0x148] sm:$0xfe]  ;;  %v1062_v20 = vld [vmem:[%s4791_s11 + $0x150] sm:$0x1]  ;;  %v1151_v26 = vrot.slane %v1060_v14, 1 }
  0xfd   : > { %1195 = vst [vmem:[#allocation2 + $0x28] sm:$0xff] %v1187_v2  ;;  %v1188_v22 = vpack.c.bf16 %v1144_v15, %v1141_v9  ;;  %v1147_v23 = vsel %vm1120_vm0, %v1145_v6, %v1146_v11  ;;  %v1063_v24 = vld [vmem:[%s4791_s11 + $0x158] sm:$0x1]  ;;  %v1152_v27 = vrot.slane %v1062_v20, 1  ;;  %v1064_v28 = vld [vmem:[%s4791_s11 + $0x180] sm:$0xfe] }
  0xfe   : > { %v1150_v29 = vsel %vm1120_vm0, %v1148_v13, %v1149_v18  ;;  %v1154_v30 = vrot.slane %v1061_v19, 1  ;;  %v1155_v31 = vrot.slane %v1063_v24, 1  ;;  %v1065_v32 = vld [vmem:[%s4791_s11 + $0x188] sm:$0xfe]  ;;  %v1066_v33 = vld [vmem:[%s4791_s11 + $0x190] sm:$0x1] }
  0xff   : > { %1196 = vst [vmem:[#allocation2 + $0x38] sm:$0xff] %v1188_v22  ;;  %v1189_v35 = vpack.c.bf16 %v1150_v29, %v1147_v23  ;;  %v1153_v36 = vsel %vm1120_vm0, %v1151_v26, %v1152_v27  ;;  %v1067_v37 = vld [vmem:[%s4791_s11 + $0x198] sm:$0x1]  ;;  %v1157_v38 = vrot.slane %v1064_v28, 1  ;;  %v1158_v39 = vrot.slane %v1066_v33, 1  ;;  %v3191_v40 = vld [vmem:[%s4791_s11 + $0x60] sm:$0xff] }
 0x100   : > { %v1156_v41 = vsel %vm1120_vm0, %v1154_v30, %v1155_v31  ;;  %v1160_v42 = vrot.slane %v1065_v32, 1  ;;  %v1161_v43 = vrot.slane %v1067_v37, 1  ;;  %v1068_v44 = vld [vmem:[%s4791_s11 + $0x1c0] sm:$0xfe]  ;;  %v1069_v45 = vld [vmem:[%s4791_s11 + $0x1c8] sm:$0xfe]  ;;  %v1251_v58 = vpack.c.bf16 %v3192_v55, %v3191_v40 }
 0x101   : > { %1197 = vst [vmem:[#allocation2 + $0x48] sm:$0xff] %v1189_v35  ;;  %v1190_v46 = vpack.c.bf16 %v1156_v41, %v1153_v36  ;;  %v1159_v47 = vsel %vm1120_vm0, %v1157_v38, %v1158_v39  ;;  %v1070_v48 = vld [vmem:[%s4791_s11 + $0x1d0] sm:$0x1]  ;;  %v1071_v49 = vld [vmem:[%s4791_s11 + $0x1d8] sm:$0x1]  ;;  %v1163_v50 = vrot.slane %v1068_v44, 1 }
 0x102   : > { %v1162_v51 = vsel %vm1120_vm0, %v1160_v42, %v1161_v43  ;;  %v1164_v52 = vrot.slane %v1070_v48, 1  ;;  %v1166_v53 = vrot.slane %v1069_v45, 1  ;;  %v1167_v54 = vrot.slane %v1071_v49, 1  ;;  %1259 = vst [vmem:[#allocation2 + $0x80] sm:$0xff] %v1250_v34  ;;  %v3193_v56 = vld [vmem:[%s4791_s11 + $0xa0] sm:$0xff]  ;;  %v3194_v59 = vld [vmem:[%s4791_s11 + $0xa8] sm:$0xff] }
 0x103   : > { %1198 = vst [vmem:[#allocation2 + $0x58] sm:$0xff] %v1190_v46  ;;  %v1191_v57 = vpack.c.bf16 %v1162_v51, %v1159_v47  ;;  %v3195_v60 = vld [vmem:[%s4791_s11 + $0xe0] sm:$0xff]  ;;  %v3196_v61 = vld [vmem:[%s4791_s11 + $0xe8] sm:$0xff]  ;;  %v1252_v0 = vpack.c.bf16 %v3194_v59, %v3193_v56  ;;  %v3207_v7 = vld [vmem:[%s4791_s11 + $0x30] sm:$0x1] }
 0x104   : > { %v1165_v62 = vsel %vm1120_vm0, %v1163_v50, %v1164_v52  ;;  %v1168_v63 = vsel %vm1120_vm0, %v1166_v53, %v1167_v54  ;;  %v3197_v1 = vld [vmem:[%s4791_s11 + $0x120] sm:$0xff]  ;;  %v3198_v2 = vld [vmem:[%s4791_s11 + $0x128] sm:$0xff]  ;;  %v1253_v5 = vpack.c.bf16 %v3196_v61, %v3195_v60  ;;  %1260 = vst [vmem:[#allocation2 + $0x90] sm:$0xff] %v1251_v58  ;;  %v3208_v23 = vld [vmem:[%s4791_s11 + $0x38] sm:$0x1]  ;;  %v1300_v24 = vrot.slane %v3207_v7, 1 }
 0x105   : > { %v3199_v3 = vld [vmem:[%s4791_s11 + $0x160] sm:$0xff]  ;;  %1199 = vst [vmem:[#allocation2 + $0x68] sm:$0xff] %v1191_v57  ;;  %v1192_v4 = vpack.c.bf16 %v1168_v63, %v1165_v62  ;;  %v3200_v6 = vld [vmem:[%s4791_s11 + $0x168] sm:$0xff]  ;;  %v1254_v11 = vpack.c.bf16 %v3198_v2, %v3197_v1  ;;  %v1303_v28 = vrot.slane %v3208_v23, 1  ;;  %v3211_v32 = vld [vmem:[%s4791_s11 + $0x70] sm:$0x1] }
 0x106   : > { %v3201_v9 = vld [vmem:[%s4791_s11 + $0x1a0] sm:$0xff]  ;;  %v3202_v10 = vld [vmem:[%s4791_s11 + $0x1a8] sm:$0xff]  ;;  %v1255_v18 = vpack.c.bf16 %v3200_v6, %v3199_v3  ;;  %1261 = vst [vmem:[#allocation2 + $0xa0] sm:$0xff] %v1252_v0  ;;  %v3212_v33 = vld [vmem:[%s4791_s11 + $0x78] sm:$0x1]  ;;  %v1306_v36 = vrot.slane %v3211_v32, 1 }
 0x107   : > { %v3203_v13 = vld [vmem:[%s4791_s11 + $0x1e0] sm:$0xff]  ;;  %v3204_v14 = vld [vmem:[%s4791_s11 + $0x1e8] sm:$0xff]  ;;  %1200 = vst [vmem:[#allocation2 + $0x78] sm:$0xff] %v1192_v4  ;;  %v1256_v22 = vpack.c.bf16 %v3202_v10, %v3201_v9  ;;  %v1309_v38 = vrot.slane %v3212_v33, 1  ;;  %v3215_v42 = vld [vmem:[%s4791_s11 + $0xb0] sm:$0x1] }
 0x108   : > { %v3205_v15 = vld [vmem:[%s4791_s11 + $0x20] sm:$0xfe]  ;;  %v3206_v19 = vld [vmem:[%s4791_s11 + $0x28] sm:$0xfe]  ;;  %1262 = vst [vmem:[#allocation2 + $0xb0] sm:$0xff] %v1253_v5  ;;  %v1257_v27 = vpack.c.bf16 %v3204_v14, %v3203_v13  ;;  %v1312_v47 = vrot.slane %v3215_v42, 1 }
 0x109   : > { %v1299_v20 = vrot.slane %v3205_v15, 1  ;;  %v1302_v26 = vrot.slane %v3206_v19, 1  ;;  %v3209_v29 = vld [vmem:[%s4791_s11 + $0x60] sm:$0xfe]  ;;  %v3210_v30 = vld [vmem:[%s4791_s11 + $0x68] sm:$0xfe] }
 0x10a   : > { %1263 = vst [vmem:[#allocation2 + $0xc0] sm:$0xff] %v1254_v11  ;;  %v1305_v34 = vrot.slane %v3209_v29, 1  ;;  %v1308_v37 = vrot.slane %v3210_v30, 1  ;;  %v3213_v39 = vld [vmem:[%s4791_s11 + $0xa0] sm:$0xfe] }
 0x10b   : > { %v1301_v31 = vsel %vm1120_vm0, %v1299_v20, %v1300_v24  ;;  %1264 = vst [vmem:[#allocation2 + $0xd0] sm:$0xff] %v1255_v18  ;;  %v1304_v35 = vsel %vm1120_vm0, %v1302_v26, %v1303_v28  ;;  %v3214_v41 = vld [vmem:[%s4791_s11 + $0xa8] sm:$0xfe]  ;;  %v1311_v43 = vrot.slane %v3213_v39, 1  ;;  %v3216_v46 = vld [vmem:[%s4791_s11 + $0xb8] sm:$0x1] }
 0x10c   : > { %1265 = vst [vmem:[#allocation2 + $0xe0] sm:$0xff] %v1256_v22  ;;  %v1363_v40 = vpack.c.bf16 %v1304_v35, %v1301_v31  ;;  %v1307_v44 = vsel %vm1120_vm0, %v1305_v34, %v1306_v36  ;;  %v1310_v45 = vsel %vm1120_vm0, %v1308_v37, %v1309_v38  ;;  %v1314_v48 = vrot.slane %v3214_v41, 1  ;;  %v3217_v51 = vld [vmem:[%s4791_s11 + $0xe0] sm:$0xfe]  ;;  %v3218_v52 = vld [vmem:[%s4791_s11 + $0xe8] sm:$0xfe] }
 0x10d   : > { %1266 = vst [vmem:[#allocation2 + $0xf0] sm:$0xff] %v1257_v27  ;;  %v1364_v49 = vpack.c.bf16 %v1310_v45, %v1307_v44  ;;  %v1315_v50 = vrot.slane %v3216_v46, 1  ;;  %v1313_v53 = vsel %vm1120_vm0, %v1311_v43, %v1312_v47  ;;  %v3219_v54 = vld [vmem:[%s4791_s11 + $0xf0] sm:$0x1]  ;;  %v3220_v55 = vld [vmem:[%s4791_s11 + $0xf8] sm:$0x1] }
 0x10e   : > { %1371 = vst [vmem:[#allocation2 + $0x88] sm:$0xff] %v1363_v40  ;;  %v1317_v56 = vrot.slane %v3217_v51, 1  ;;  %v1320_v57 = vrot.slane %v3218_v52, 1  ;;  %v1318_v59 = vrot.slane %v3219_v54, 1  ;;  %v1321_v60 = vrot.slane %v3220_v55, 1  ;;  %v3251_v44 = vld [vmem:[%s4791_s11 + $0x200] sm:$0xff] }
 0x10f   : > { %1372 = vst [vmem:[#allocation2 + $0x98] sm:$0xff] %v1364_v49  ;;  %v1316_v58 = vsel %vm1120_vm0, %v1314_v48, %v1315_v50  ;;  %v3221_v61 = vld [vmem:[%s4791_s11 + $0x120] sm:$0xfe]  ;;  %v3222_v63 = vld [vmem:[%s4791_s11 + $0x128] sm:$0xfe] }
 0x110   : > { %v1365_v62 = vpack.c.bf16 %v1316_v58, %v1313_v53  ;;  %v3223_v0 = vld [vmem:[%s4791_s11 + $0x130] sm:$0x1]  ;;  %v3224_v1 = vld [vmem:[%s4791_s11 + $0x138] sm:$0x1]  ;;  %v1319_v2 = vsel %vm1120_vm0, %v1317_v56, %v1318_v59  ;;  %v1322_v3 = vsel %vm1120_vm0, %v1320_v57, %v1321_v60  ;;  %v1323_v4 = vrot.slane %v3221_v61, 1  ;;  %v3252_v48 = vld [vmem:[%s4791_s11 + $0x208] sm:$0xff] }
 0x111   : > { %v1324_v5 = vrot.slane %v3223_v0, 1  ;;  %v3225_v6 = vld [vmem:[%s4791_s11 + $0x160] sm:$0xfe]  ;;  %v3226_v9 = vld [vmem:[%s4791_s11 + $0x168] sm:$0xfe]  ;;  %v1366_v10 = vpack.c.bf16 %v1322_v3, %v1319_v2  ;;  %v1326_v11 = vrot.slane %v3222_v63, 1 }
 0x112   : > { %1373 = vst [vmem:[#allocation2 + $0xa8] sm:$0xff] %v1365_v62  ;;  %v1327_v13 = vrot.slane %v3224_v1, 1  ;;  %v3227_v14 = vld [vmem:[%s4791_s11 + $0x170] sm:$0x1]  ;;  %v1329_v15 = vrot.slane %v3225_v6, 1  ;;  %v1332_v20 = vrot.slane %v3226_v9, 1  ;;  %v1435_v62 = vpack.c.bf16 %v3252_v48, %v3251_v44 }
 0x113   : > { %v1325_v18 = vsel %vm1120_vm0, %v1323_v4, %v1324_v5  ;;  %v3228_v19 = vld [vmem:[%s4791_s11 + $0x178] sm:$0x1]  ;;  %v1330_v7 = vrot.slane %v3227_v14, 1  ;;  %v3229_v22 = vld [vmem:[%s4791_s11 + $0x1a0] sm:$0xfe]  ;;  %1374 = vst [vmem:[#allocation2 + $0xb8] sm:$0xff] %v1366_v10 }
 0x114   : > { %v1328_v23 = vsel %vm1120_vm0, %v1326_v11, %v1327_v13  ;;  %v1333_v24 = vrot.slane %v3228_v19, 1  ;;  %v3230_v26 = vld [vmem:[%s4791_s11 + $0x1a8] sm:$0xfe]  ;;  %v3231_v27 = vld [vmem:[%s4791_s11 + $0x1b0] sm:$0x1]  ;;  %v1335_v31 = vrot.slane %v3229_v22, 1 }
 0x115   : > { %v1367_v28 = vpack.c.bf16 %v1328_v23, %v1325_v18  ;;  %v1331_v29 = vsel %vm1120_vm0, %v1329_v15, %v1330_v7  ;;  %v3232_v30 = vld [vmem:[%s4791_s11 + $0x1b8] sm:$0x1]  ;;  %v1336_v32 = vrot.slane %v3231_v27, 1  ;;  %v3233_v33 = vld [vmem:[%s4791_s11 + $0x1e0] sm:$0xfe]  ;;  %v1338_v35 = vrot.slane %v3230_v26, 1 }
 0x116   : > { %v1334_v34 = vsel %vm1120_vm0, %v1332_v20, %v1333_v24  ;;  %v1339_v36 = vrot.slane %v3232_v30, 1  ;;  %v3234_v37 = vld [vmem:[%s4791_s11 + $0x1e8] sm:$0xfe]  ;;  %v3235_v38 = vld [vmem:[%s4791_s11 + $0x1f0] sm:$0x1]  ;;  %v1341_v42 = vrot.slane %v3233_v33, 1 }
 0x117   : > { %1375 = vst [vmem:[#allocation2 + $0xc8] sm:$0xff] %v1367_v28  ;;  %v1368_v39 = vpack.c.bf16 %v1334_v34, %v1331_v29  ;;  %v1337_v40 = vsel %vm1120_vm0, %v1335_v31, %v1336_v32  ;;  %v3236_v41 = vld [vmem:[%s4791_s11 + $0x1f8] sm:$0x1]  ;;  %v1342_v43 = vrot.slane %v3235_v38, 1  ;;  %v1344_v46 = vrot.slane %v3234_v37, 1 }
 0x118   : > { %v1340_v45 = vsel %vm1120_vm0, %v1338_v35, %v1339_v36  ;;  %v1345_v47 = vrot.slane %v3236_v41, 1  ;;  %v3253_v49 = vld [vmem:[%s4791_s11 + $0x40] sm:$0xfe]  ;;  %v3254_v52 = vld [vmem:[%s4791_s11 + $0x48] sm:$0xfe]  ;;  %1439 = vst [vmem:[#allocation2 + $0x120] sm:$0xff] %v4811_v12 }
 0x119   : > { %1376 = vst [vmem:[#allocation2 + $0xd8] sm:$0xff] %v1368_v39  ;;  %v1369_v50 = vpack.c.bf16 %v1340_v45, %v1337_v40  ;;  %v1343_v51 = vsel %vm1120_vm0, %v1341_v42, %v1342_v43  ;;  %v3255_v53 = vld [vmem:[%s4791_s11 + $0x50] sm:$0x1]  ;;  %v1477_v54 = vrot.slane %v3253_v49, 1  ;;  %v3256_v56 = vld [vmem:[%s4791_s11 + $0x58] sm:$0x1] }
 0x11a   : > { %v1346_v55 = vsel %vm1120_vm0, %v1344_v46, %v1345_v47  ;;  %v1478_v57 = vrot.slane %v3255_v53, 1  ;;  %v1480_v8 = vrot.slane %v3254_v52, 1  ;;  %v1481_v59 = vrot.slane %v3256_v56, 1  ;;  %v3257_v60 = vld [vmem:[%s4791_s11 + $0x80] sm:$0xfe]  ;;  %1440 = vst [vmem:[#allocation2 + $0x130] sm:$0xff] %v4817_v16 }
 0x11b   : > { %1377 = vst [vmem:[#allocation2 + $0xe8] sm:$0xff] %v1369_v50  ;;  %v1370_v58 = vpack.c.bf16 %v1346_v55, %v1343_v51  ;;  %v3258_v61 = vld [vmem:[%s4791_s11 + $0x88] sm:$0xfe]  ;;  %v3259_v0 = vld [vmem:[%s4791_s11 + $0x90] sm:$0x1]  ;;  %v1483_v12 = vrot.slane %v3257_v60, 1 }
 0x11c   : > { %v1479_v63 = vsel %vm1120_vm0, %v1477_v54, %v1478_v57  ;;  %v3260_v1 = vld [vmem:[%s4791_s11 + $0x98] sm:$0x1]  ;;  %v1482_v2 = vsel %vm1120_vm0, %v1480_v8, %v1481_v59  ;;  %v1484_v3 = vrot.slane %v3259_v0, 1  ;;  %v1486_v4 = vrot.slane %v3258_v61, 1  ;;  %v3261_v6 = vld [vmem:[%s4791_s11 + $0xc0] sm:$0xfe] }
 0x11d   : > { %1378 = vst [vmem:[#allocation2 + $0xf8] sm:$0xff] %v1370_v58  ;;  %v1487_v5 = vrot.slane %v3260_v1, 1  ;;  %v1541_v9 = vpack.c.bf16 %v1482_v2, %v1479_v63  ;;  %v3262_v16 = vld [vmem:[%s4791_s11 + $0xc8] sm:$0xfe]  ;;  %v3263_v10 = vld [vmem:[%s4791_s11 + $0xd0] sm:$0x1] }
 0x11e   : > { %1441 = vst [vmem:[#allocation2 + $0x140] sm:$0xff] %v4819_v17  ;;  %v1489_v11 = vrot.slane %v3261_v6, 1  ;;  %v1485_v13 = vsel %vm1120_vm0, %v1483_v12, %v1484_v3  ;;  %v3264_v15 = vld [vmem:[%s4791_s11 + $0xd8] sm:$0x1]  ;;  %v1490_v18 = vrot.slane %v3263_v10, 1  ;;  %v1492_v19 = vrot.slane %v3262_v16, 1 }
 0x11f   : > { %1442 = vst [vmem:[#allocation2 + $0x150] sm:$0xff] %v4825_v21  ;;  %v1488_v14 = vsel %vm1120_vm0, %v1486_v4, %v1487_v5  ;;  %v1493_v17 = vrot.slane %v3264_v15, 1  ;;  %v3265_v20 = vld [vmem:[%s4791_s11 + $0x100] sm:$0xfe]  ;;  %v3266_v22 = vld [vmem:[%s4791_s11 + $0x108] sm:$0xfe] }
 0x120   : > { %1443 = vst [vmem:[#allocation2 + $0x160] sm:$0xff] %v4831_v25  ;;  %v1542_v7 = vpack.c.bf16 %v1488_v14, %v1485_v13  ;;  %v1491_v23 = vsel %vm1120_vm0, %v1489_v11, %v1490_v18  ;;  %v3267_v21 = vld [vmem:[%s4791_s11 + $0x110] sm:$0x1]  ;;  %v3268_v24 = vld [vmem:[%s4791_s11 + $0x118] sm:$0x1]  ;;  %v1495_v26 = vrot.slane %v3265_v20, 1 }
 0x121   : > { %1444 = vst [vmem:[#allocation2 + $0x170] sm:$0xff] %v1435_v62  ;;  %v1494_v27 = vsel %vm1120_vm0, %v1492_v19, %v1493_v17  ;;  %v1496_v28 = vrot.slane %v3267_v21, 1  ;;  %v1498_v29 = vrot.slane %v3266_v22, 1  ;;  %v1499_v25 = vrot.slane %v3268_v24, 1  ;;  %v3269_v30 = vld [vmem:[%s4791_s11 + $0x140] sm:$0xfe] }
 0x122   : > { %1549 = vst [vmem:[#allocation2 + $0x108] sm:$0xff] %v1541_v9  ;;  %v1543_v31 = vpack.c.bf16 %v1494_v27, %v1491_v23  ;;  %v3270_v32 = vld [vmem:[%s4791_s11 + $0x148] sm:$0xfe]  ;;  %v3271_v33 = vld [vmem:[%s4791_s11 + $0x150] sm:$0x1]  ;;  %v1501_v34 = vrot.slane %v3269_v30, 1 }
 0x123   : > { %1550 = vst [vmem:[#allocation2 + $0x118] sm:$0xff] %v1542_v7  ;;  %v1497_v35 = vsel %vm1120_vm0, %v1495_v26, %v1496_v28  ;;  %v1500_v36 = vsel %vm1120_vm0, %v1498_v29, %v1499_v25  ;;  %v3272_v37 = vld [vmem:[%s4791_s11 + $0x158] sm:$0x1]  ;;  %v1502_v38 = vrot.slane %v3271_v33, 1  ;;  %v1504_v39 = vrot.slane %v3270_v32, 1 }
 0x124   : > { %v3273_v40 = vld [vmem:[%s4791_s11 + $0x180] sm:$0xfe]  ;;  %1551 = vst [vmem:[#allocation2 + $0x128] sm:$0xff] %v1543_v31  ;;  %v1544_v41 = vpack.c.bf16 %v1500_v36, %v1497_v35  ;;  %v1505_v42 = vrot.slane %v3272_v37, 1  ;;  %v3274_v43 = vld [vmem:[%s4791_s11 + $0x188] sm:$0xfe] }
 0x125   : > { %v3275_v44 = vld [vmem:[%s4791_s11 + $0x190] sm:$0x1]  ;;  %v1503_v45 = vsel %vm1120_vm0, %v1501_v34, %v1502_v38  ;;  %v3276_v46 = vld [vmem:[%s4791_s11 + $0x198] sm:$0x1]  ;;  %v1507_v47 = vrot.slane %v3273_v40, 1  ;;  %v1510_v49 = vrot.slane %v3274_v43, 1 }
 0x126   : > { %v1508_v48 = vrot.slane %v3275_v44, 1  ;;  %1552 = vst [vmem:[#allocation2 + $0x138] sm:$0xff] %v1544_v41  ;;  %v1506_v50 = vsel %vm1120_vm0, %v1504_v39, %v1505_v42  ;;  %v1511_v51 = vrot.slane %v3276_v46, 1  ;;  %v3277_v52 = vld [vmem:[%s4791_s11 + $0x1c0] sm:$0xfe] }
 0x127   : > { %v3278_v53 = vld [vmem:[%s4791_s11 + $0x1c8] sm:$0xfe]  ;;  %v1545_v54 = vpack.c.bf16 %v1506_v50, %v1503_v45  ;;  %v3279_v56 = vld [vmem:[%s4791_s11 + $0x1d0] sm:$0x1]  ;;  %v3280_v57 = vld [vmem:[%s4791_s11 + $0x1d8] sm:$0x1] }
 0x128   : > { %v1509_v55 = vsel %vm1120_vm0, %v1507_v47, %v1508_v48  ;;  %v1513_v8 = vrot.slane %v3277_v52, 1  ;;  %v1516_v58 = vrot.slane %v3278_v53, 1  ;;  %v1512_v59 = vsel %vm1120_vm0, %v1510_v49, %v1511_v51  ;;  %v3281_v62 = vld [vmem:[%s4791_s11 + $0x200] sm:$0xfe]  ;;  %v3282_v63 = vld [vmem:[%s4791_s11 + $0x208] sm:$0xfe] }
 0x129   : > { %v1514_v60 = vrot.slane %v3279_v56, 1  ;;  %v1517_v61 = vrot.slane %v3280_v57, 1  ;;  %1553 = vst [vmem:[#allocation2 + $0x148] sm:$0xff] %v1545_v54  ;;  %v1546_v0 = vpack.c.bf16 %v1512_v59, %v1509_v55  ;;  %v3283_v1 = vld [vmem:[%s4791_s11 + $0x210] sm:$0x1]  ;;  %v1519_v2 = vrot.slane %v3281_v62, 1 }
 0x12a   : > { %v3284_v12 = vld [vmem:[%s4791_s11 + $0x218] sm:$0x1]  ;;  %v1520_v5 = vrot.slane %v3283_v1, 1  ;;  %v1522_v6 = vrot.slane %v3282_v63, 1 }
 0x12b   : > { %v1515_v3 = vsel %vm1120_vm0, %v1513_v8, %v1514_v60  ;;  %v1518_v4 = vsel %vm1120_vm0, %v1516_v58, %v1517_v61  ;;  %1554 = vst [vmem:[#allocation2 + $0x158] sm:$0xff] %v1546_v0  ;;  %v1523_v16 = vrot.slane %v3284_v12, 1 }
 0x12c   : > { %v1547_v9 = vpack.c.bf16 %v1518_v4, %v1515_v3  ;;  %v1521_v10 = vsel %vm1120_vm0, %v1519_v2, %v1520_v5 }
 0x12d   : > { %v1524_v11 = vsel %vm1120_vm0, %v1522_v6, %v1523_v16 }
 0x12e   : > { %1555 = vst [vmem:[#allocation2 + $0x168] sm:$0xff] %v1547_v9  ;;  %v1548_v13 = vpack.c.bf16 %v1524_v11, %v1521_v10 }
 0x130   : > { %1556 = vst [vmem:[#allocation2 + $0x178] sm:$0xff] %v1548_v13 }
 0x131 PF: > { %v4064_v14 = vld [vmem:[%s4793_s14 + $0x138] sm:$0xff]  ;;  %v4063_v7 = vld [vmem:[%s4793_s14 + $0x130] sm:$0xff]  ;;  %v4062_v23 = vld [vmem:[%s4793_s14 + $0x128] sm:$0xff]  ;;  %s4140_s25 = smul.u32 (%p4373_p9), 24, %s4272_s17 }
 0x132   : > { %v4072_v15 = vld [vmem:[%s4793_s14 + $0x178] sm:$0xff]  ;;  %1991 = vmatpush.bf16.msra.mxu0 %v4064_v14  ;;  %v4071_v17 = vld [vmem:[%s4793_s14 + $0x170] sm:$0xff]  ;;  %v4070_v21 = vld [vmem:[%s4793_s14 + $0x168] sm:$0xff] }
 0x133   : > { %v4080_v18 = vld [vmem:[%s4793_s14 + $0x1b8] sm:$0xff]  ;;  %2020 = vmatpush.bf16.msra.mxu1 %v4072_v15  ;;  %v4079_v20 = vld [vmem:[%s4793_s14 + $0x1b0] sm:$0xff]  ;;  %v4078_v24 = vld [vmem:[%s4793_s14 + $0x1a8] sm:$0xff]  ;;  %s3025_s26 = sadd.s32 (%p4373_p9), %s4268_s16, %s4140_s25 }
 0x134   : > { %v4088_v19 = vld [vmem:[%s4793_s14 + $0x1f8] sm:$0xff]  ;;  %2049 = vmatpush.bf16.msra.mxu2 %v4080_v18  ;;  %v4087_v22 = vld [vmem:[%s4793_s14 + $0x1f0] sm:$0xff]  ;;  %v4086_v26 = vld [vmem:[%s4793_s14 + $0x1e8] sm:$0xff]  ;;  %s3990_s28 = sshll.u32 (%p4373_p9), %s3025_s26, 3 }
 0x135   : > { %2078 = vmatpush.bf16.msra.mxu3 %v4088_v19  ;;  %v4061_v27 = vld [vmem:[%s4793_s14 + $0x120] sm:$0xff]  ;;  %v4060_v30 = vld [vmem:[%s4793_s14 + $0x118] sm:$0xff]  ;;  %v4059_v34 = vld [vmem:[%s4793_s14 + $0x110] sm:$0xff]  ;;  %s3027_s30 = scalar_lea.vmem (%p4373_p9), %s5207_s3, %s3990_s28 }
 0x136   : > { %1992 = vmatpush.bf16.msra.mxu0 %v4063_v7  ;;  %v4069_v28 = vld [vmem:[%s4793_s14 + $0x160] sm:$0xff]  ;;  %v4068_v31 = vld [vmem:[%s4793_s14 + $0x158] sm:$0xff]  ;;  %v4067_v35 = vld [vmem:[%s4793_s14 + $0x150] sm:$0xff] }
 0x137   : > { %2021 = vmatpush.bf16.msra.mxu1 %v4071_v17  ;;  %v4077_v29 = vld [vmem:[%s4793_s14 + $0x1a0] sm:$0xff]  ;;  %v4076_v32 = vld [vmem:[%s4793_s14 + $0x198] sm:$0xff]  ;;  %v4075_v36 = vld [vmem:[%s4793_s14 + $0x190] sm:$0xff] }
 0x138   : > { %2050 = vmatpush.bf16.msra.mxu2 %v4079_v20  ;;  %v4085_v25 = vld [vmem:[%s4793_s14 + $0x1e0] sm:$0xff]  ;;  %v4084_v33 = vld [vmem:[%s4793_s14 + $0x1d8] sm:$0xff]  ;;  %v4083_v37 = vld [vmem:[%s4793_s14 + $0x1d0] sm:$0xff] }
 0x139   : > { %2079 = vmatpush.bf16.msra.mxu3 %v4087_v22  ;;  %v4058_v38 = vld [vmem:[%s4793_s14 + $0x108] sm:$0xff]  ;;  %v4057_v42 = vld [vmem:[%s4793_s14 + $0x100] sm:$0xff]  ;;  %v4043_v47 = vld [vmem:[#allocation2 + $0x8c] sm:$0xf0] }
 0x13a   : > { %1993 = vmatpush.bf16.msra.mxu0 %v4062_v23  ;;  %v4066_v39 = vld [vmem:[%s4793_s14 + $0x148] sm:$0xff]  ;;  %v4065_v43 = vld [vmem:[%s4793_s14 + $0x140] sm:$0xff]  ;;  %v3353_v49 = vld [vmem:[#allocation2 + $0x90] sm:$0xf0] }
 0x13b   : > { %2022 = vmatpush.bf16.msra.mxu1 %v4070_v21  ;;  %v4074_v40 = vld [vmem:[%s4793_s14 + $0x188] sm:$0xff]  ;;  %v4073_v44 = vld [vmem:[%s4793_s14 + $0x180] sm:$0xff]  ;;  %v4044_v51 = vld [vmem:[#allocation2 + $0x94] sm:$0xf0] }
 0x13c   : > { %2051 = vmatpush.bf16.msra.mxu2 %v4078_v24  ;;  %v4082_v41 = vld [vmem:[%s4793_s14 + $0x1c8] sm:$0xff]  ;;  %v4081_v45 = vld [vmem:[%s4793_s14 + $0x1c0] sm:$0xff]  ;;  %v3361_v53 = vld [vmem:[#allocation2 + $0x98] sm:$0xf0] }
 0x13d   : > { %2080 = vmatpush.bf16.msra.mxu3 %v4086_v26  ;;  %v3351_v46 = vld [vmem:[#allocation2 + $0x80] sm:$0xf]  ;;  %v4041_v48 = vld [vmem:[#allocation2 + $0x84] sm:$0xf]  ;;  %v3359_v50 = vld [vmem:[#allocation2 + $0x88] sm:$0xf] }
 0x13e   : > { %1994 = vmatpush.bf16.msra.mxu0 %v4061_v27  ;;  %v4042_v52 = vld [vmem:[#allocation2 + $0x8c] sm:$0xf]  ;;  %v4032_v54 = vld [vmem:[%s4793_s14 + $0xb8] sm:$0xff]  ;;  %v3352_v56 = vor.u32 %v4043_v47, %v3351_v46  ;;  %v3356_v57 = vor.u32 %v4041_v48, %v3353_v49  ;;  %v3360_v8 = vor.u32 %v4044_v51, %v3359_v50  ;;  %v4031_v61 = vld [vmem:[%s4793_s14 + $0xb0] sm:$0xff] }
 0x13f   : > { %2023 = vmatpush.bf16.msra.mxu1 %v4069_v28  ;;  %v4040_v55 = vld [vmem:[%s4793_s14 + $0xf8] sm:$0xff]  ;;  %v3364_v58 = vor.u32 %v4042_v52, %v3361_v53  ;;  %v4039_v62 = vld [vmem:[%s4793_s14 + $0xf0] sm:$0xff]  ;;  %v4030_v1 = vld [vmem:[%s4793_s14 + $0xa8] sm:$0xff] }
 0x140   : > { %2052 = vmatpush.bf16.msra.mxu2 %v4077_v29  ;;  %v4016_v59 = vld [vmem:[%s4793_s14 + $0x38] sm:$0xff]  ;;  %v4015_v63 = vld [vmem:[%s4793_s14 + $0x30] sm:$0xff]  ;;  %v4038_v12 = vld [vmem:[%s4793_s14 + $0xe8] sm:$0xff] }
 0x141   : > { %2081 = vmatpush.bf16.msra.mxu3 %v4085_v25  ;;  %v4024_v60 = vld [vmem:[%s4793_s14 + $0x78] sm:$0xff]  ;;  %v4023_v0 = vld [vmem:[%s4793_s14 + $0x70] sm:$0xff]  ;;  %v4014_v2 = vld [vmem:[%s4793_s14 + $0x28] sm:$0xff] }
 0x142   : > { %1995 = vmatpush.bf16.msra.mxu0 %v4060_v30  ;;  %v4022_v3 = vld [vmem:[%s4793_s14 + $0x68] sm:$0xff]  ;;  %v3367_v4 = vld [vmem:[#allocation2 + $0xa0] sm:$0xf]  ;;  %v4047_v9 = vld [vmem:[#allocation2 + $0xac] sm:$0xf0] }
 0x143   : > { %2024 = vmatpush.bf16.msra.mxu1 %v4068_v31  ;;  %v4029_v5 = vld [vmem:[%s4793_s14 + $0xa0] sm:$0xff]  ;;  %v3369_v10 = vld [vmem:[#allocation2 + $0xb0] sm:$0xf0]  ;;  %v3375_v11 = vld [vmem:[#allocation2 + $0xa8] sm:$0xf]  ;;  %v3368_v20 = vor.u32 %v4047_v9, %v3367_v4 }
 0x144   : > { %2053 = vmatpush.bf16.msra.mxu2 %v4076_v32  ;;  %v4037_v6 = vld [vmem:[%s4793_s14 + $0xe0] sm:$0xff]  ;;  %v4048_v13 = vld [vmem:[#allocation2 + $0xb4] sm:$0xf0]  ;;  %v4046_v14 = vld [vmem:[#allocation2 + $0xac] sm:$0xf] }
 0x145   : > { %2082 = vmatpush.bf16.msra.mxu3 %v4084_v33  ;;  %v4045_v16 = vld [vmem:[#allocation2 + $0xa4] sm:$0xf]  ;;  %v3377_v15 = vld [vmem:[#allocation2 + $0xb8] sm:$0xf0]  ;;  %v3376_v23 = vor.u32 %v4048_v13, %v3375_v11  ;;  %v4027_v27 = vld [vmem:[%s4793_s14 + $0x90] sm:$0xff] }
 0x146   : > { %1996 = vmatpush.bf16.msra.mxu0 %v4059_v34  ;;  %v4013_v18 = vld [vmem:[%s4793_s14 + $0x20] sm:$0xff]  ;;  %v4028_v7 = vld [vmem:[%s4793_s14 + $0x98] sm:$0xff]  ;;  %v3372_v22 = vor.u32 %v4045_v16, %v3369_v10  ;;  %v3380_v21 = vor.u32 %v4046_v14, %v3377_v15  ;;  %v4035_v28 = vld [vmem:[%s4793_s14 + $0xd0] sm:$0xff] }
 0x147   : > { %2025 = vmatpush.bf16.msra.mxu1 %v4067_v35  ;;  %v4021_v19 = vld [vmem:[%s4793_s14 + $0x60] sm:$0xff]  ;;  %v4036_v17 = vld [vmem:[%s4793_s14 + $0xd8] sm:$0xff]  ;;  %v4011_v29 = vld [vmem:[%s4793_s14 + $0x10] sm:$0xff] }
 0x148   : > { %2054 = vmatpush.bf16.msra.mxu2 %v4075_v36  ;;  %v4012_v24 = vld [vmem:[%s4793_s14 + $0x18] sm:$0xff]  ;;  %v4019_v25 = vld [vmem:[%s4793_s14 + $0x50] sm:$0xff]  ;;  %v4026_v30 = vld [vmem:[%s4793_s14 + $0x88] sm:$0xff] }
 0x149   : > { %2083 = vmatpush.bf16.msra.mxu3 %v4083_v37  ;;  %v4020_v26 = vld [vmem:[%s4793_s14 + $0x58] sm:$0xff]  ;;  %v4034_v31 = vld [vmem:[%s4793_s14 + $0xc8] sm:$0xff]  ;;  %v3383_v34 = vld [vmem:[#allocation2 + $0xc0] sm:$0xf] }
 0x14a   : > { %1997 = vmatpush.bf16.msra.mxu0 %v4058_v38  ;;  %v4010_v32 = vld [vmem:[%s4793_s14 + $0x8] sm:$0xff]  ;;  %v4025_v35 = vld [vmem:[%s4793_s14 + $0x80] sm:$0xff]  ;;  %v4051_v37 = vld [vmem:[#allocation2 + $0xcc] sm:$0xf0] }
 0x14b   : > { %2026 = vmatpush.bf16.msra.mxu1 %v4066_v39  ;;  %v4018_v33 = vld [vmem:[%s4793_s14 + $0x48] sm:$0xff]  ;;  %v4033_v36 = vld [vmem:[%s4793_s14 + $0xc0] sm:$0xff]  ;;  %v3385_v39 = vld [vmem:[#allocation2 + $0xd0] sm:$0xf0]  ;;  %v3384_v46 = vor.u32 %v4051_v37, %v3383_v34 }
 0x14c   : > { %2055 = vmatpush.bf16.msra.mxu2 %v4074_v40  ;;  %v4049_v38 = vld [vmem:[#allocation2 + $0xc4] sm:$0xf]  ;;  %v3391_v40 = vld [vmem:[#allocation2 + $0xc8] sm:$0xf]  ;;  %v4128_v50 = vld [vmem:[%s4793_s14 + $0x2b8] sm:$0xff] }
 0x14d   : > { %2084 = vmatpush.bf16.msra.mxu3 %v4082_v41  ;;  %v4052_v41 = vld [vmem:[#allocation2 + $0xd4] sm:$0xf0]  ;;  %v3388_v47 = vor.u32 %v4049_v38, %v3385_v39  ;;  %v4126_v4 = vld [vmem:[%s4793_s14 + $0x2a8] sm:$0xff]  ;;  %v4125_v16 = vld [vmem:[%s4793_s14 + $0x2a0] sm:$0xff] }
 0x14e   : > { %1998 = vmatpush.bf16.msra.mxu0 %v4057_v42  ;;  %v4050_v42 = vld [vmem:[#allocation2 + $0xcc] sm:$0xf]  ;;  %v3392_v48 = vor.u32 %v4052_v41, %v3391_v40  ;;  %v4136_v51 = vld [vmem:[%s4793_s14 + $0x2f8] sm:$0xff]  ;;  %v4133_v10 = vld [vmem:[%s4793_s14 + $0x2e0] sm:$0xff] }
 0x14f   : > { %2027 = vmatpush.bf16.msra.mxu1 %v4065_v43  ;;  %v3393_v43 = vld [vmem:[#allocation2 + $0xd8] sm:$0xf0]  ;;  %v4118_v9 = vld [vmem:[%s4793_s14 + $0x268] sm:$0xff]  ;;  %v4109_v11 = vld [vmem:[%s4793_s14 + $0x220] sm:$0xff] }
 0x150   : > { %2056 = vmatpush.bf16.msra.mxu2 %v4073_v44  ;;  %v4009_v44 = vld [vmem:[%s4793_s14] sm:$0xff]  ;;  %v3396_v49 = vor.u32 %v4050_v42, %v3393_v43  ;;  %v4112_v52 = vld [vmem:[%s4793_s14 + $0x238] sm:$0xff]  ;;  %v3995_v15 = vld [vmem:[#allocation2 + $0xc] sm:$0xf0] }
 0x151   : > { %2085 = vmatpush.bf16.msra.mxu3 %v4081_v45  ;;  %1999 = vmatmul.bf16.vlgmr.msra.gmra.mxu0 %v3352_v56  ;;  %v4017_v45 = vld [vmem:[%s4793_s14 + $0x40] sm:$0xff]  ;;  %v4120_v53 = vld [vmem:[%s4793_s14 + $0x278] sm:$0xff]  ;;  %v4111_v56 = vld [vmem:[%s4793_s14 + $0x230] sm:$0xff] }
 0x152   : > { %2028 = vmatmul.bf16.vlgmr.msra.gmra.mxu1 %v3356_v57  ;;  %2379 = vmatpush.bf16.msrb.mxu0 %v4016_v59  ;;  %v4119_v57 = vld [vmem:[%s4793_s14 + $0x270] sm:$0xff]  ;;  %v4053_v59 = vld [vmem:[#allocation2 + $0xe4] sm:$0xf]  ;;  %v3543_v14 = vld [vmem:[#allocation2] sm:$0xf] }
 0x153   : > { %2057 = vmatmul.bf16.vlgmr.msra.gmra.mxu2 %v3360_v8  ;;  %2408 = vmatpush.bf16.msrb.mxu1 %v4024_v60  ;;  %v3399_v8 = vld [vmem:[#allocation2 + $0xe0] sm:$0xf]  ;;  %v3401_v60 = vld [vmem:[#allocation2 + $0xf0] sm:$0xf0]  ;;  %v3567_v38 = vld [vmem:[#allocation2 + $0x28] sm:$0xf] }
 0x154   : > { %2437 = vmatpush.bf16.msrb.mxu2 %v4032_v54  ;;  %2086 = vmatmul.bf16.vlgmr.msra.gmra.mxu3 %v3364_v58  ;;  %v4127_v54 = vld [vmem:[%s4793_s14 + $0x2b0] sm:$0xff]  ;;  %v4117_v13 = vld [vmem:[%s4793_s14 + $0x260] sm:$0xff]  ;;  %v4000_v39 = vld [vmem:[#allocation2 + $0x34] sm:$0xf0] }
 0x155   : > { %2466 = vmatpush.bf16.msrb.mxu3 %v4040_v55  ;;  %v4135_v55 = vld [vmem:[%s4793_s14 + $0x2f0] sm:$0xff]  ;;  %v3559_v34 = vld [vmem:[#allocation2 + $0x20] sm:$0xf]  ;;  %v3998_v40 = vld [vmem:[#allocation2 + $0x2c] sm:$0xf] }
 0x156   : > { %2380 = vmatpush.bf16.msrb.mxu0 %v4015_v63  ;;  %v4055_v58 = vld [vmem:[#allocation2 + $0xec] sm:$0xf0]  ;;  %v4054_v63 = vld [vmem:[#allocation2 + $0xec] sm:$0xf]  ;;  %v3561_v37 = vld [vmem:[#allocation2 + $0x30] sm:$0xf0] }
 0x157   : > { %2409 = vmatpush.bf16.msrb.mxu1 %v4023_v0  ;;  %v3409_v0 = vld [vmem:[#allocation2 + $0xf8] sm:$0xf0] }
 0x158   : > { %2438 = vmatpush.bf16.msrb.mxu2 %v4031_v61  ;;  %v3407_v61 = vld [vmem:[#allocation2 + $0xe8] sm:$0xf]  ;;  %v3569_v41 = vld [vmem:[#allocation2 + $0x38] sm:$0xf0] }
 0x159   : > { %2467 = vmatpush.bf16.msrb.mxu3 %v4039_v62  ;;  %v4056_v62 = vld [vmem:[#allocation2 + $0xf4] sm:$0xf0] }
 0x15a   : > { %2381 = vmatpush.bf16.msrb.mxu0 %v4014_v2  ;;  %v3408_v2 = vor.u32 %v4056_v62, %v3407_v61 }
 0x15b   : > { %2410 = vmatpush.bf16.msrb.mxu1 %v4022_v3  ;;  %v3412_v3 = vor.u32 %v4054_v63, %v3409_v0 }
 0x15c   : > { %2439 = vmatpush.bf16.msrb.mxu2 %v4030_v1  ;;  %v3400_v1 = vor.u32 %v4055_v58, %v3399_v8  ;;  %v3583_v8 = vld [vmem:[#allocation2 + $0x48] sm:$0xf]  ;;  %v4004_v58 = vld [vmem:[#allocation2 + $0x54] sm:$0xf0] }
 0x15d   : > { %2468 = vmatpush.bf16.msrb.mxu3 %v4038_v12  ;;  %v3404_v12 = vor.u32 %v4053_v59, %v3401_v60  ;;  %v4002_v59 = vld [vmem:[#allocation2 + $0x4c] sm:$0xf]  ;;  %v3585_v60 = vld [vmem:[#allocation2 + $0x58] sm:$0xf0]  ;;  %v3584_v63 = vor.u32 %v4004_v58, %v3583_v8 }
 0x15e   : > { %2382 = vmatpush.bf16.msrb.mxu0 %v4013_v18  ;;  %v3993_v18 = vld [vmem:[#allocation2 + $0x4] sm:$0xf]  ;;  %v3588_v0 = vor.u32 %v4002_v59, %v3585_v60 }
 0x15f   : > { %2411 = vmatpush.bf16.msrb.mxu1 %v4021_v19  ;;  %v3545_v19 = vld [vmem:[#allocation2 + $0x10] sm:$0xf0] }
 0x160   : > { %2440 = vmatpush.bf16.msrb.mxu2 %v4029_v5  ;;  %v4134_v5 = vld [vmem:[%s4793_s14 + $0x2e8] sm:$0xff] }
 0x161   : > { %2469 = vmatpush.bf16.msrb.mxu3 %v4037_v6  ;;  %2004 = vmatmul.bf16.gmra.mxu0 %v3368_v20  ;;  %v4110_v6 = vld [vmem:[%s4793_s14 + $0x228] sm:$0xff] }
 0x162   : > { %2033 = vmatmul.bf16.gmra.mxu1 %v3372_v22  ;;  %2383 = vmatpush.bf16.msrb.mxu0 %v4012_v24  ;;  %v3994_v20 = vld [vmem:[#allocation2 + $0xc] sm:$0xf]  ;;  %v3553_v22 = vld [vmem:[#allocation2 + $0x18] sm:$0xf0] }
 0x163   : > { %2062 = vmatmul.bf16.gmra.mxu2 %v3376_v23  ;;  %2412 = vmatpush.bf16.msrb.mxu1 %v4020_v26  ;;  %v3544_v23 = vor.u32 %v3995_v15, %v3543_v14  ;;  %v3556_v26 = vor.u32 %v3994_v20, %v3553_v22  ;;  %v3799_v14 = vld [vmem:[#allocation2 + $0x100] sm:$0xf]  ;;  %v4091_v15 = vld [vmem:[#allocation2 + $0x10c] sm:$0xf0]  ;;  %v4090_v20 = vld [vmem:[#allocation2 + $0x10c] sm:$0xf] }
 0x164   : > { %2441 = vmatpush.bf16.msrb.mxu2 %v4028_v7  ;;  %2091 = vmatmul.bf16.gmra.mxu3 %v3380_v21  ;;  %v3551_v7 = vld [vmem:[#allocation2 + $0x8] sm:$0xf]  ;;  %v3548_v21 = vor.u32 %v3993_v18, %v3545_v19  ;;  %v4089_v18 = vld [vmem:[#allocation2 + $0x104] sm:$0xf]  ;;  %v3801_v19 = vld [vmem:[#allocation2 + $0x110] sm:$0xf0] }
 0x165   : > { %2470 = vmatpush.bf16.msrb.mxu3 %v4036_v17  ;;  %v3996_v17 = vld [vmem:[#allocation2 + $0x14] sm:$0xf0]  ;;  %v3809_v22 = vld [vmem:[#allocation2 + $0x118] sm:$0xf0] }
 0x166   : > { %2384 = vmatpush.bf16.msrb.mxu0 %v4011_v29  ;;  %v3552_v24 = vor.u32 %v3996_v17, %v3551_v7  ;;  %v4108_v29 = vld [vmem:[%s4793_s14 + $0x218] sm:$0xff]  ;;  %v3807_v7 = vld [vmem:[#allocation2 + $0x108] sm:$0xf] }
 0x167   : > { %2413 = vmatpush.bf16.msrb.mxu1 %v4019_v25  ;;  %v4116_v25 = vld [vmem:[%s4793_s14 + $0x258] sm:$0xff] }
 0x168   : > { %2442 = vmatpush.bf16.msrb.mxu2 %v4027_v27  ;;  %v4124_v27 = vld [vmem:[%s4793_s14 + $0x298] sm:$0xff] }
 0x169   : > { %2471 = vmatpush.bf16.msrb.mxu3 %v4035_v28  ;;  %v4132_v28 = vld [vmem:[%s4793_s14 + $0x2d8] sm:$0xff] }
 0x16a   : > { %2385 = vmatpush.bf16.msrb.mxu0 %v4010_v32  ;;  %v4107_v32 = vld [vmem:[%s4793_s14 + $0x210] sm:$0xff]  ;;  %v4092_v17 = vld [vmem:[#allocation2 + $0x114] sm:$0xf0] }
 0x16b   : > { %2414 = vmatpush.bf16.msrb.mxu1 %v4018_v33  ;;  %v4115_v33 = vld [vmem:[%s4793_s14 + $0x250] sm:$0xff] }
 0x16c   : > { %2443 = vmatpush.bf16.msrb.mxu2 %v4026_v30  ;;  %v4123_v30 = vld [vmem:[%s4793_s14 + $0x290] sm:$0xff] }
 0x16d   : > { %2472 = vmatpush.bf16.msrb.mxu3 %v4034_v31  ;;  %v4131_v31 = vld [vmem:[%s4793_s14 + $0x2d0] sm:$0xff] }
 0x16e   : > { %2386 = vmatpush.bf16.msrb.mxu0 %v4009_v44  ;;  %v3568_v44 = vor.u32 %v4000_v39, %v3567_v38  ;;  %v4093_v38 = vld [vmem:[#allocation2 + $0x124] sm:$0xf]  ;;  %v3817_v39 = vld [vmem:[#allocation2 + $0x130] sm:$0xf0] }
 0x16f   : > { %2415 = vmatpush.bf16.msrb.mxu1 %v4017_v45  ;;  %v3572_v45 = vor.u32 %v3998_v40, %v3569_v41  ;;  %v3823_v40 = vld [vmem:[#allocation2 + $0x128] sm:$0xf]  ;;  %v4096_v41 = vld [vmem:[#allocation2 + $0x134] sm:$0xf0] }
 0x170   : > { %2444 = vmatpush.bf16.msrb.mxu2 %v4025_v35  ;;  %v3999_v35 = vld [vmem:[#allocation2 + $0x2c] sm:$0xf0] }
 0x171   : > { %2473 = vmatpush.bf16.msrb.mxu3 %v4033_v36  ;;  %2009 = vmatmul.bf16.gmra.mxu0 %v3384_v46  ;;  %v3997_v36 = vld [vmem:[#allocation2 + $0x24] sm:$0xf]  ;;  %v3560_v42 = vor.u32 %v3999_v35, %v3559_v34  ;;  %v4122_v46 = vld [vmem:[%s4793_s14 + $0x288] sm:$0xff] }
 0x172   : > { %2038 = vmatmul.bf16.gmra.mxu1 %v3388_v47  ;;  %2849 = vmatpush.bf16.msra.mxu0 %v4112_v52  ;;  %v3564_v43 = vor.u32 %v3997_v36, %v3561_v37  ;;  %v4130_v47 = vld [vmem:[%s4793_s14 + $0x2c8] sm:$0xff]  ;;  %v4105_v52 = vld [vmem:[%s4793_s14 + $0x200] sm:$0xff]  ;;  %v4095_v37 = vld [vmem:[#allocation2 + $0x12c] sm:$0xf0] }
 0x173   : > { %2067 = vmatmul.bf16.gmra.mxu2 %v3392_v48  ;;  %2878 = vmatpush.bf16.msra.mxu1 %v4120_v53  ;;  %v4106_v48 = vld [vmem:[%s4793_s14 + $0x208] sm:$0xff]  ;;  %v4113_v53 = vld [vmem:[%s4793_s14 + $0x240] sm:$0xff] }
 0x174   : > { %2096 = vmatmul.bf16.gmra.mxu3 %v3396_v49  ;;  %2907 = vmatpush.bf16.msra.mxu2 %v4128_v50  ;;  %v4114_v49 = vld [vmem:[%s4793_s14 + $0x248] sm:$0xff]  ;;  %v4121_v50 = vld [vmem:[%s4793_s14 + $0x280] sm:$0xff] }
 0x175   : > { %2936 = vmatpush.bf16.msra.mxu3 %v4136_v51  ;;  %v4129_v51 = vld [vmem:[%s4793_s14 + $0x2c0] sm:$0xff] }
 0x176   : > { %2850 = vmatpush.bf16.msra.mxu0 %v4111_v56  ;;  %v4001_v56 = vld [vmem:[#allocation2 + $0x44] sm:$0xf]  ;;  %v3815_v36 = vld [vmem:[#allocation2 + $0x120] sm:$0xf] }
 0x177   : > { %2879 = vmatpush.bf16.msra.mxu1 %v4119_v57  ;;  %v3577_v57 = vld [vmem:[#allocation2 + $0x50] sm:$0xf0] }
 0x178   : > { %2908 = vmatpush.bf16.msra.mxu2 %v4127_v54  ;;  %v3575_v54 = vld [vmem:[#allocation2 + $0x40] sm:$0xf]  ;;  %v3580_v62 = vor.u32 %v4001_v56, %v3577_v57 }
 0x179   : > { %2937 = vmatpush.bf16.msra.mxu3 %v4135_v55  ;;  %v4003_v55 = vld [vmem:[#allocation2 + $0x4c] sm:$0xf0] }
 0x17a   : > { %2851 = vmatpush.bf16.msra.mxu0 %v4110_v6  ;;  %v3576_v61 = vor.u32 %v4003_v55, %v3575_v54  ;;  %v4006_v6 = vld [vmem:[#allocation2 + $0x6c] sm:$0xf] }
 0x17b   : > { %2880 = vmatpush.bf16.msra.mxu1 %v4118_v9  ;;  %v3601_v9 = vld [vmem:[#allocation2 + $0x78] sm:$0xf0] }
 0x17c   : > { %2909 = vmatpush.bf16.msra.mxu2 %v4126_v4  ;;  %v3599_v4 = vld [vmem:[#allocation2 + $0x68] sm:$0xf] }
 0x17d   : > { %2938 = vmatpush.bf16.msra.mxu3 %v4134_v5  ;;  %v4008_v5 = vld [vmem:[#allocation2 + $0x74] sm:$0xf0] }
 0x17e   : > { %2852 = vmatpush.bf16.msra.mxu0 %v4109_v11  ;;  %v3600_v11 = vor.u32 %v4008_v5, %v3599_v4 }
 0x17f   : > { %2881 = vmatpush.bf16.msra.mxu1 %v4117_v13  ;;  %v3604_v13 = vor.u32 %v4006_v6, %v3601_v9 }
 0x180   : > { %2910 = vmatpush.bf16.msra.mxu2 %v4125_v16 }
 0x181   : > { %2014 = vmatmul.bf16.gmra.mxu0 %v3400_v1  ;;  %2939 = vmatpush.bf16.msra.mxu3 %v4133_v10  ;;  %v3591_v1 = vld [vmem:[#allocation2 + $0x60] sm:$0xf] }
 0x182   : > { %2043 = vmatmul.bf16.gmra.mxu1 %v3404_v12  ;;  %2853 = vmatpush.bf16.msra.mxu0 %v4108_v29  ;;  %v4007_v12 = vld [vmem:[#allocation2 + $0x6c] sm:$0xf0] }
 0x183   : > { %2072 = vmatmul.bf16.gmra.mxu2 %v3408_v2  ;;  %2882 = vmatpush.bf16.msra.mxu1 %v4116_v25  ;;  %v4005_v2 = vld [vmem:[#allocation2 + $0x64] sm:$0xf]  ;;  %v3592_v16 = vor.u32 %v4007_v12, %v3591_v1  ;;  %v3839_v1 = vld [vmem:[#allocation2 + $0x148] sm:$0xf]  ;;  %v4100_v12 = vld [vmem:[#allocation2 + $0x154] sm:$0xf0] }
 0x184   : > { %2101 = vmatmul.bf16.gmra.mxu3 %v3412_v3  ;;  %2911 = vmatpush.bf16.msra.mxu2 %v4124_v27  ;;  %v3593_v3 = vld [vmem:[#allocation2 + $0x70] sm:$0xf0]  ;;  %v3808_v27 = vor.u32 %v4092_v17, %v3807_v7 }
 0x185   : > { %2940 = vmatpush.bf16.msra.mxu3 %v4132_v28  ;;  %v3596_v10 = vor.u32 %v4005_v2, %v3593_v3  ;;  %v3812_v28 = vor.u32 %v4090_v20, %v3809_v22  ;;  %v4098_v2 = vld [vmem:[#allocation2 + $0x14c] sm:$0xf]  ;;  %v3841_v3 = vld [vmem:[#allocation2 + $0x158] sm:$0xf0] }
 0x186   : > { %2854 = vmatpush.bf16.msra.mxu0 %v4107_v32 }
 0x187   : > { %2883 = vmatpush.bf16.msra.mxu1 %v4115_v33 }
 0x188   : > { %2912 = vmatpush.bf16.msra.mxu2 %v4123_v30 }
 0x189   : > { %2941 = vmatpush.bf16.msra.mxu3 %v4131_v31 }
 0x18a   : > { %2855 = vmatpush.bf16.msra.mxu0 %v4106_v48 }
 0x18b   : > { %2884 = vmatpush.bf16.msra.mxu1 %v4114_v49 }
 0x18c   : > { %2913 = vmatpush.bf16.msra.mxu2 %v4122_v46  ;;  %v3816_v46 = vor.u32 %v4095_v37, %v3815_v36 }
 0x18d   : > { %2942 = vmatpush.bf16.msra.mxu3 %v4130_v47  ;;  %v3820_v47 = vor.u32 %v4093_v38, %v3817_v39 }
 0x18e   : > { %2856 = vmatpush.bf16.msra.mxu0 %v4105_v52 }
 0x18f   : > { %2885 = vmatpush.bf16.msra.mxu1 %v4113_v53 }
 0x190   : > { %2914 = vmatpush.bf16.msra.mxu2 %v4121_v50 }
 0x191   : > { %2387 = vmatmul.bf16.vlgmr.msrb.gmra.mxu0 %v3544_v23  ;;  %2943 = vmatpush.bf16.msra.mxu3 %v4129_v51  ;;  %v3800_v23 = vor.u32 %v4091_v15, %v3799_v14  ;;  %v3824_v51 = vor.u32 %v4096_v41, %v3823_v40  ;;  %v3844_v14 = vor.u32 %v4098_v2, %v3841_v3 }
 0x192   : > { %2416 = vmatmul.bf16.vlgmr.msrb.gmra.mxu1 %v3548_v21  ;;  %v3804_v21 = vor.u32 %v4089_v18, %v3801_v19 }
 0x193   : > { %2445 = vmatmul.bf16.vlgmr.msrb.gmra.mxu2 %v3552_v24 }
 0x194   : > { %2474 = vmatmul.bf16.vlgmr.msrb.gmra.mxu3 %v3556_v26 }
 0x1a1   : > { %2392 = vmatmul.bf16.gmra.mxu0 %v3560_v42  ;;  %v4094_v42 = vld [vmem:[#allocation2 + $0x12c] sm:$0xf] }
 0x1a2   : > { %2421 = vmatmul.bf16.gmra.mxu1 %v3564_v43  ;;  %v3825_v43 = vld [vmem:[#allocation2 + $0x138] sm:$0xf0] }
 0x1a3   : > { %2450 = vmatmul.bf16.gmra.mxu2 %v3568_v44  ;;  %v3828_v52 = vor.u32 %v4094_v42, %v3825_v43 }
 0x1a4   : > { %2479 = vmatmul.bf16.gmra.mxu3 %v3572_v45 }
 0x1b1   : > { %2397 = vmatmul.bf16.gmra.mxu0 %v3576_v61  ;;  %v3831_v61 = vld [vmem:[#allocation2 + $0x140] sm:$0xf] }
 0x1b2   : > { %2426 = vmatmul.bf16.gmra.mxu1 %v3580_v62  ;;  %v4099_v62 = vld [vmem:[#allocation2 + $0x14c] sm:$0xf0] }
 0x1b3   : > { %2455 = vmatmul.bf16.gmra.mxu2 %v3584_v63  ;;  %v4097_v63 = vld [vmem:[#allocation2 + $0x144] sm:$0xf]  ;;  %v3832_v6 = vor.u32 %v4099_v62, %v3831_v61 }
 0x1b4   : > { %2484 = vmatmul.bf16.gmra.mxu3 %v3588_v0  ;;  %v3833_v0 = vld [vmem:[#allocation2 + $0x150] sm:$0xf0] }
 0x1b5   : > { %v3836_v9 = vor.u32 %v4097_v63, %v3833_v0 }
 0x1c1   : > { %2402 = vmatmul.bf16.gmra.mxu0 %v3592_v16 }
 0x1c2   : > { %2431 = vmatmul.bf16.gmra.mxu1 %v3596_v10 }
 0x1c3   : > { %2460 = vmatmul.bf16.gmra.mxu2 %v3600_v11 }
 0x1c4   : > { %2489 = vmatmul.bf16.gmra.mxu3 %v3604_v13  ;;  %v3840_v13 = vor.u32 %v4100_v12, %v3839_v1 }
 0x1ce   : > { %v2000_v24 = vpop.f32.mrf.mxu0 }
 0x1cf   : > { %v2029_v26 = vpop.f32.mrf.mxu1 }
 0x1d0   : > { %v2030_v29 = vadd.f32 %v2029_v26, %v2000_v24  ;;  %v3847_v24 = vld [vmem:[#allocation2 + $0x160] sm:$0xf]  ;;  %v4103_v26 = vld [vmem:[#allocation2 + $0x16c] sm:$0xf0] }
 0x1d1   : > { %2857 = vmatmul.bf16.vlgmr.msra.gmra.mxu0 %v3800_v23 }
 0x1d2   : > { %2886 = vmatmul.bf16.vlgmr.msra.gmra.mxu1 %v3804_v21 }
 0x1d3   : > { %2915 = vmatmul.bf16.vlgmr.msra.gmra.mxu2 %v3808_v27  ;;  %v4101_v27 = vld [vmem:[#allocation2 + $0x164] sm:$0xf] }
 0x1d4   : > { %2944 = vmatmul.bf16.vlgmr.msra.gmra.mxu3 %v3812_v28  ;;  %v3849_v28 = vld [vmem:[#allocation2 + $0x170] sm:$0xf0] }
 0x1d5   : > { %v3852_v36 = vor.u32 %v4101_v27, %v3849_v28 }
 0x1d6   : > { %v2058_v25 = vpop.f32.mrf.mxu2  ;;  %v2002_v32 = vpop.f32.mrf.mxu0 }
 0x1d7   : > { %v2087_v30 = vpop.f32.mrf.mxu3  ;;  %v2059_v31 = vadd.f32 %v2058_v25, %v2030_v29  ;;  %v2031_v33 = vpop.f32.mrf.mxu1  ;;  %v3855_v29 = vld [vmem:[#allocation2 + $0x168] sm:$0xf]  ;;  %v4104_v25 = vld [vmem:[#allocation2 + $0x174] sm:$0xf0] }
 0x1d8   : > { %v2032_v34 = vadd.f32 %v2031_v33, %v2002_v32  ;;  %v3856_v40 = vor.u32 %v4104_v25, %v3855_v29 }
 0x1d9   : > { %v5100_v35 = vadd.f32 %v2087_v30, %v2059_v31  ;;  %v4102_v30 = vld [vmem:[#allocation2 + $0x16c] sm:$0xf]  ;;  %v3857_v31 = vld [vmem:[#allocation2 + $0x178] sm:$0xf0] }
 0x1da   : > { %v3860_v41 = vor.u32 %v4102_v30, %v3857_v31 }
 0x1de   : > { %v2060_v44 = vpop.f32.mrf.mxu2  ;;  %v2005_v49 = vpop.f32.mrf.mxu0 }
 0x1df   : > { %v2089_v45 = vpop.f32.mrf.mxu3  ;;  %v2061_v48 = vadd.f32 %v2060_v44, %v2032_v34  ;;  %v2034_v50 = vpop.f32.mrf.mxu1  ;;  %v3848_v34 = vor.u32 %v4103_v26, %v3847_v24 }
 0x1e0   : > { %v2035_v53 = vadd.f32 %v2034_v50, %v2005_v49 }
 0x1e1   : > { %v5102_v54 = vadd.f32 %v2089_v45, %v2061_v48  ;;  %2862 = vmatmul.bf16.gmra.mxu0 %v3816_v46 }
 0x1e2   : > { %2891 = vmatmul.bf16.gmra.mxu1 %v3820_v47 }
 0x1e3   : > { %2920 = vmatmul.bf16.gmra.mxu2 %v3824_v51 }
 0x1e4   : > { %2949 = vmatmul.bf16.gmra.mxu3 %v3828_v52 }
 0x1e6   : > { %v2063_v55 = vpop.f32.mrf.mxu2  ;;  %v2007_v8 = vpop.f32.mrf.mxu0 }
 0x1e7   : > { %v2092_v56 = vpop.f32.mrf.mxu3  ;;  %v2064_v57 = vadd.f32 %v2063_v55, %v2035_v53  ;;  %v2036_v58 = vpop.f32.mrf.mxu1 }
 0x1e8   : > { %v2037_v59 = vadd.f32 %v2036_v58, %v2007_v8 }
 0x1e9   : > { %v5104_v60 = vadd.f32 %v2092_v56, %v2064_v57 }
 0x1ee   : > { %v2065_v4 = vpop.f32.mrf.mxu2  ;;  %v2010_v10 = vpop.f32.mrf.mxu0 }
 0x1ef   : > { %v2094_v5 = vpop.f32.mrf.mxu3  ;;  %v2066_v16 = vadd.f32 %v2065_v4, %v2037_v59  ;;  %v2039_v11 = vpop.f32.mrf.mxu1 }
 0x1f0   : > { %v2040_v15 = vadd.f32 %v2039_v11, %v2010_v10 }
 0x1f1   : > { %v5106_v18 = vadd.f32 %v2094_v5, %v2066_v16  ;;  %2867 = vmatmul.bf16.gmra.mxu0 %v3832_v6 }
 0x1f2   : > { %2896 = vmatmul.bf16.gmra.mxu1 %v3836_v9 }
 0x1f3   : > { %2925 = vmatmul.bf16.gmra.mxu2 %v3840_v13 }
 0x1f4   : > { %2954 = vmatmul.bf16.gmra.mxu3 %v3844_v14 }
 0x1f6   : > { %v2068_v19 = vpop.f32.mrf.mxu2  ;;  %v2012_v20 = vpop.f32.mrf.mxu0 }
 0x1f7   : > { %v2097_v7 = vpop.f32.mrf.mxu3  ;;  %v2069_v17 = vadd.f32 %v2068_v19, %v2040_v15  ;;  %v2041_v22 = vpop.f32.mrf.mxu1 }
 0x1f8   : > { %v2042_v23 = vadd.f32 %v2041_v22, %v2012_v20 }
 0x1f9   : > { %v5108_v21 = vadd.f32 %v2097_v7, %v2069_v17 }
 0x1fe   : > { %v2070_v32 = vpop.f32.mrf.mxu2  ;;  %v2015_v38 = vpop.f32.mrf.mxu0 }
 0x1ff   : > { %v2099_v33 = vpop.f32.mrf.mxu3  ;;  %v2071_v37 = vadd.f32 %v2070_v32, %v2042_v23  ;;  %v2044_v39 = vpop.f32.mrf.mxu1 }
 0x200   : > { %v2045_v42 = vadd.f32 %v2044_v39, %v2015_v38 }
 0x201   : > { %v2100_v43 = vadd.f32 %v2099_v33, %v2071_v37  ;;  %2872 = vmatmul.bf16.gmra.mxu0 %v3848_v34 }
 0x202   : > { %2901 = vmatmul.bf16.gmra.mxu1 %v3852_v36 }
 0x203   : > { %2930 = vmatmul.bf16.gmra.mxu2 %v3856_v40 }
 0x204   : > { %2959 = vmatmul.bf16.gmra.mxu3 %v3860_v41 }
 0x206   : > { %v2073_v44 = vpop.f32.mrf.mxu2  ;;  %v2017_v47 = vpop.f32.mrf.mxu0 }
 0x207   : > { %v2102_v45 = vpop.f32.mrf.mxu3  ;;  %v2074_v46 = vadd.f32 %v2073_v44, %v2045_v42  ;;  %v2046_v48 = vpop.f32.mrf.mxu1 }
 0x208   : > { %v2047_v49 = vadd.f32 %v2046_v48, %v2017_v47 }
 0x209   : > { %v2103_v50 = vadd.f32 %v2102_v45, %v2074_v46 }
 0x20e   : > { %v2075_v51 = vpop.f32.mrf.mxu2  ;;  %v2388_v55 = vpop.f32.mrf.mxu0 }
 0x20f   : > { %v2104_v52 = vpop.f32.mrf.mxu3  ;;  %v2076_v53 = vadd.f32 %v2075_v51, %v2047_v49  ;;  %v2417_v56 = vpop.f32.mrf.mxu1  ;;  %v2389_v57 = vadd.f32 %v2388_v55, %v5100_v35 }
 0x211   : > { %v2105_v8 = vadd.f32 %v2104_v52, %v2076_v53  ;;  %v2418_v58 = vadd.f32 %v2417_v56, %v2389_v57 }
 0x216   : > { %v2446_v59 = vpop.f32.mrf.mxu2  ;;  %v2390_v63 = vpop.f32.mrf.mxu0 }
 0x217   : > { %v2475_v61 = vpop.f32.mrf.mxu3  ;;  %v2447_v62 = vadd.f32 %v2446_v59, %v2418_v58  ;;  %v2419_v0 = vpop.f32.mrf.mxu1  ;;  %v2391_v1 = vadd.f32 %v2390_v63, %v5102_v54 }
 0x219   : > { %v5112_v12 = vadd.f32 %v2475_v61, %v2447_v62  ;;  %v2420_v2 = vadd.f32 %v2419_v0, %v2391_v1 }
 0x21e   : > { %v2448_v3 = vpop.f32.mrf.mxu2  ;;  %v2393_v6 = vpop.f32.mrf.mxu0 }
 0x21f   : > { %v2477_v4 = vpop.f32.mrf.mxu3  ;;  %v2449_v5 = vadd.f32 %v2448_v3, %v2420_v2  ;;  %v2422_v9 = vpop.f32.mrf.mxu1  ;;  %v2394_v16 = vadd.f32 %v2393_v6, %v5104_v60 }
 0x221   : > { %v5115_v35 = vadd.f32 %v2477_v4, %v2449_v5  ;;  %v2423_v10 = vadd.f32 %v2422_v9, %v2394_v16 }
 0x226   : > { %v2451_v11 = vpop.f32.mrf.mxu2  ;;  %v2395_v15 = vpop.f32.mrf.mxu0 }
 0x227   : > { %v2480_v13 = vpop.f32.mrf.mxu3  ;;  %v2452_v14 = vadd.f32 %v2451_v11, %v2423_v10  ;;  %v2424_v19 = vpop.f32.mrf.mxu1  ;;  %v2396_v54 = vadd.f32 %v2395_v15, %v5106_v18 }
 0x229   : > { %v5118_v7 = vadd.f32 %v2480_v13, %v2452_v14  ;;  %v2425_v17 = vadd.f32 %v2424_v19, %v2396_v54 }
 0x22e   : > { %v2453_v20 = vpop.f32.mrf.mxu2  ;;  %v2398_v24 = vpop.f32.mrf.mxu0 }
 0x22f   : > { %v2482_v22 = vpop.f32.mrf.mxu3  ;;  %v2454_v23 = vadd.f32 %v2453_v20, %v2425_v17  ;;  %v2427_v26 = vpop.f32.mrf.mxu1  ;;  %v2399_v60 = vadd.f32 %v2398_v24, %v5108_v21 }
 0x231   : > { %v5121_v27 = vadd.f32 %v2482_v22, %v2454_v23  ;;  %v2428_v28 = vadd.f32 %v2427_v26, %v2399_v60 }
 0x236   : > { %v2456_v29 = vpop.f32.mrf.mxu2  ;;  %v2400_v31 = vpop.f32.mrf.mxu0 }
 0x237   : > { %v2485_v25 = vpop.f32.mrf.mxu3  ;;  %v2457_v30 = vadd.f32 %v2456_v29, %v2428_v28  ;;  %v2429_v32 = vpop.f32.mrf.mxu1  ;;  %v2401_v33 = vadd.f32 %v2400_v31, %v2100_v43 }
 0x239   : > { %v5123_v18 = vadd.f32 %v2485_v25, %v2457_v30  ;;  %v2430_v34 = vadd.f32 %v2429_v32, %v2401_v33 }
 0x23e   : > { %v2458_v36 = vpop.f32.mrf.mxu2  ;;  %v2403_v39 = vpop.f32.mrf.mxu0 }
 0x23f   : > { %v2487_v37 = vpop.f32.mrf.mxu3  ;;  %v2459_v38 = vadd.f32 %v2458_v36, %v2430_v34  ;;  %v2432_v40 = vpop.f32.mrf.mxu1  ;;  %v2404_v41 = vadd.f32 %v2403_v39, %v2103_v50 }
 0x241   : > { %v5125_v42 = vadd.f32 %v2487_v37, %v2459_v38  ;;  %v2433_v21 = vadd.f32 %v2432_v40, %v2404_v41 }
 0x246   : > { %v2461_v44 = vpop.f32.mrf.mxu2  ;;  %v2405_v47 = vpop.f32.mrf.mxu0 }
 0x247   : > { %v2490_v45 = vpop.f32.mrf.mxu3  ;;  %v2462_v46 = vadd.f32 %v2461_v44, %v2433_v21  ;;  %v2434_v48 = vpop.f32.mrf.mxu1  ;;  %v2406_v49 = vadd.f32 %v2405_v47, %v2105_v8  ;;  %v5136_v8 = vld [vmem:[%s1019_s8] ss:$0 sm:$0xff] }
 0x249   : > { %v5127_v43 = vadd.f32 %v2490_v45, %v2462_v46  ;;  %v2435_v51 = vadd.f32 %v2434_v48, %v2406_v49 }
 0x24e   : > { %v2463_v52 = vpop.f32.mrf.mxu2  ;;  %v2858_v56 = vpop.f32.mrf.mxu0 }
 0x24f   : > { %v2492_v53 = vpop.f32.mrf.mxu3  ;;  %v2464_v55 = vadd.f32 %v2463_v52, %v2435_v51  ;;  %v2887_v57 = vpop.f32.mrf.mxu1 }
 0x250   : > { %v2888_v50 = vadd.f32 %v2887_v57, %v2858_v56 }
 0x251   : > { %v5129_v58 = vadd.f32 %v2492_v53, %v2464_v55 }
 0x256   : > { %v2916_v59 = vpop.f32.mrf.mxu2  ;;  %v2860_v63 = vpop.f32.mrf.mxu0 }
 0x257   : > { %v2945_v61 = vpop.f32.mrf.mxu3  ;;  %v2917_v62 = vadd.f32 %v2916_v59, %v2888_v50  ;;  %v2889_v0 = vpop.f32.mrf.mxu1 }
 0x258   : > { %v2890_v4 = vadd.f32 %v2889_v0, %v2860_v63 }
 0x259   : > { %v2946_v1 = vadd.f32 %v2945_v61, %v2917_v62 }
 0x25b   : > { %v2965_v2 = vadd.f32 %v2946_v1, %v5112_v12 }
 0x25d   : > { %v2977_v3 = vadd.f32 %v5136_v8, %v2965_v2 }
 0x25e   : > { %v2918_v5 = vpop.f32.mrf.mxu2  ;;  %v2863_v10 = vpop.f32.mrf.mxu0 }
 0x25f   : > { %v2947_v6 = vpop.f32.mrf.mxu3  ;;  %vm2985_vm1 = vcmp.gt.f32.partialorder %v2977_v3, 0.0  ;;  %v2993_v9 = vmul.f32 0.2, %v2977_v3  ;;  %v2919_v16 = vadd.f32 %v2918_v5, %v2890_v4  ;;  %v2892_v11 = vpop.f32.mrf.mxu1 }
 0x260   : > { %v2893_v19 = vadd.f32 %v2892_v11, %v2863_v10 }
 0x261   : > { %v3001_v13 = vsel %vm2985_vm1, %v2977_v3, %v2993_v9  ;;  %v2948_v14 = vadd.f32 %v2947_v6, %v2919_v16 }
 0x262   : > { %3009 = vst [vmem:[%s4795_s12] sm:$0xff] %v3001_v13 }
 0x263   : > { %v2966_v15 = vadd.f32 %v2948_v14, %v5115_v35 }
 0x265   : > { %v2978_v54 = vadd.f32 %v5136_v8, %v2966_v15 }
 0x266   : > { %v2921_v12 = vpop.f32.mrf.mxu2  ;;  %v2865_v23 = vpop.f32.mrf.mxu0 }
 0x267   : > { %v2950_v17 = vpop.f32.mrf.mxu3  ;;  %vm2986_vm2 = vcmp.gt.f32.partialorder %v2978_v54, 0.0  ;;  %v2994_v20 = vmul.f32 0.2, %v2978_v54  ;;  %v2922_v22 = vadd.f32 %v2921_v12, %v2893_v19  ;;  %v2894_v24 = vpop.f32.mrf.mxu1 }
 0x268   : > { %v2895_v25 = vadd.f32 %v2894_v24, %v2865_v23 }
 0x269   : > { %v3002_v26 = vsel %vm2986_vm2, %v2978_v54, %v2994_v20  ;;  %v2951_v60 = vadd.f32 %v2950_v17, %v2922_v22 }
 0x26a   : > { %3010 = vst [vmem:[%s4795_s12 + $0x8] sm:$0xff] %v3002_v26 }
 0x26b   : > { %v2967_v28 = vadd.f32 %v2951_v60, %v5118_v7 }
 0x26d   : > { %v2979_v29 = vadd.f32 %v5136_v8, %v2967_v28 }
 0x26e   : > { %v2923_v35 = vpop.f32.mrf.mxu2  ;;  %v2868_v33 = vpop.f32.mrf.mxu0 }
 0x26f   : > { %v2952_v30 = vpop.f32.mrf.mxu3  ;;  %vm2987_vm3 = vcmp.gt.f32.partialorder %v2979_v29, 0.0  ;;  %v2995_v31 = vmul.f32 0.2, %v2979_v29  ;;  %v2924_v32 = vadd.f32 %v2923_v35, %v2895_v25  ;;  %v2897_v34 = vpop.f32.mrf.mxu1 }
 0x270   : > { %v2898_v39 = vadd.f32 %v2897_v34, %v2868_v33 }
 0x271   : > { %v3003_v36 = vsel %vm2987_vm3, %v2979_v29, %v2995_v31  ;;  %v2953_v37 = vadd.f32 %v2952_v30, %v2924_v32 }
 0x272   : > { %3011 = vst [vmem:[%s4795_s12 + $0x10] sm:$0xff] %v3003_v36 }
 0x273   : > { %v2968_v38 = vadd.f32 %v2953_v37, %v5121_v27 }
 0x275   : > { %v2980_v40 = vadd.f32 %v5136_v8, %v2968_v38 }
 0x276   : > { %v2926_v7 = vpop.f32.mrf.mxu2  ;;  %v2870_v45 = vpop.f32.mrf.mxu0 }
 0x277   : > { %v2955_v41 = vpop.f32.mrf.mxu3  ;;  %vm2988_vm4 = vcmp.gt.f32.partialorder %v2980_v40, 0.0  ;;  %v2996_v21 = vmul.f32 0.2, %v2980_v40  ;;  %v2927_v44 = vadd.f32 %v2926_v7, %v2898_v39  ;;  %v2899_v46 = vpop.f32.mrf.mxu1 }
 0x278   : > { %v2900_v52 = vadd.f32 %v2899_v46, %v2870_v45 }
 0x279   : > { %v3004_v47 = vsel %vm2988_vm4, %v2980_v40, %v2996_v21  ;;  %v2956_v48 = vadd.f32 %v2955_v41, %v2927_v44 }
 0x27a   : > { %3012 = vst [vmem:[%s4795_s12 + $0x18] sm:$0xff] %v3004_v47 }
 0x27b   : > { %v2969_v49 = vadd.f32 %v2956_v48, %v5123_v18 }
 0x27d   : > { %v2981_v51 = vadd.f32 %v5136_v8, %v2969_v49 }
 0x27e   : > { %v2928_v27 = vpop.f32.mrf.mxu2  ;;  %v2873_v57 = vpop.f32.mrf.mxu0 }
 0x27f   : > { %v2957_v53 = vpop.f32.mrf.mxu3  ;;  %vm2989_vm5 = vcmp.gt.f32.partialorder %v2981_v51, 0.0  ;;  %v2997_v55 = vmul.f32 0.2, %v2981_v51  ;;  %v2929_v56 = vadd.f32 %v2928_v27, %v2900_v52  ;;  %v2902_v50 = vpop.f32.mrf.mxu1 }
 0x280   : > { %v2903_v63 = vadd.f32 %v2902_v50, %v2873_v57 }
 0x281   : > { %v3005_v59 = vsel %vm2989_vm5, %v2981_v51, %v2997_v55  ;;  %v2958_v61 = vadd.f32 %v2957_v53, %v2929_v56  ;;  %v3076_v23 = vld [vmem:[%s4795_s12 + $0x18] sm:$0xff] (%p4373_p9) }
 0x282   : > { %3013 = vst [vmem:[%s4795_s12 + $0x20] sm:$0xff] %v3005_v59 }
 0x283   : > { %v2970_v62 = vadd.f32 %v2958_v61, %v5125_v42  ;;  %3077 = vst [vmem:[%s3027_s30 + $0x48] sm:$0xff] (%p4373_p9), %v3076_v23 }
 0x285   : > { %v2982_v0 = vadd.f32 %v5136_v8, %v2970_v62 }
 0x286   : > { %v2931_v18 = vpop.f32.mrf.mxu2  ;;  %v2875_v6 = vpop.f32.mrf.mxu0 }
 0x287   : > { %v2960_v1 = vpop.f32.mrf.mxu3  ;;  %vm2990_vm6 = vcmp.gt.f32.partialorder %v2982_v0, 0.0  ;;  %v2998_v2 = vmul.f32 0.2, %v2982_v0  ;;  %v2932_v3 = vadd.f32 %v2931_v18, %v2903_v63  ;;  %v2904_v9 = vpop.f32.mrf.mxu1 }
 0x288   : > { %v2905_v42 = vadd.f32 %v2904_v9, %v2875_v6 }
 0x289   : > { %v3006_v4 = vsel %vm2990_vm6, %v2982_v0, %v2998_v2  ;;  %v2961_v5 = vadd.f32 %v2960_v1, %v2932_v3  ;;  %v3078_v24 = vld [vmem:[%s4795_s12 + $0x20] sm:$0xff] (%p4373_p9) }
 0x28a   : > { %3014 = vst [vmem:[%s4795_s12 + $0x28] sm:$0xff] %v3006_v4 }
 0x28b   : > { %v2971_v16 = vadd.f32 %v2961_v5, %v5127_v43  ;;  %v3070_v43 = vld [vmem:[%s4795_s12] sm:$0xff] (%p4373_p9)  ;;  %3079 = vst [vmem:[%s3027_s30 + $0x60] sm:$0xff] (%p4373_p9), %v3078_v24 }
 0x28c   : > { %3071 = vst [vmem:[%s3027_s30] sm:$0xff] (%p4373_p9), %v3070_v43 }
 0x28d   : > { %v2983_v10 = vadd.f32 %v5136_v8, %v2971_v16 }
 0x28e   : > { %v2933_v11 = vpop.f32.mrf.mxu2 }
 0x28f   : > { %vm2991_vm7 = vcmp.gt.f32.partialorder %v2983_v10, 0.0  ;;  %v2999_v13 = vmul.f32 0.2, %v2983_v10  ;;  %v2934_v14 = vadd.f32 %v2933_v11, %v2905_v42  ;;  %v2962_v15 = vpop.f32.mrf.mxu3 }
 0x291   : > { %v3007_v19 = vsel %vm2991_vm7, %v2983_v10, %v2999_v13  ;;  %v2963_v54 = vadd.f32 %v2962_v15, %v2934_v14  ;;  %v3080_v26 = vld [vmem:[%s4795_s12 + $0x28] sm:$0xff] (%p4373_p9) }
 0x292   : > { %3015 = vst [vmem:[%s4795_s12 + $0x30] sm:$0xff] %v3007_v19 }
 0x293   : > { %v2972_v12 = vadd.f32 %v2963_v54, %v5129_v58  ;;  %v3072_v58 = vld [vmem:[%s4795_s12 + $0x8] sm:$0xff] (%p4373_p9)  ;;  %3081 = vst [vmem:[%s3027_s30 + $0x78] sm:$0xff] (%p4373_p9), %v3080_v26 }
 0x294   : > { %3073 = vst [vmem:[%s3027_s30 + $0x18] sm:$0xff] (%p4373_p9), %v3072_v58 }
 0x295   : > { %v2984_v17 = vadd.f32 %v5136_v8, %v2972_v12  ;;  %v3074_v8 = vld [vmem:[%s4795_s12 + $0x10] sm:$0xff] (%p4373_p9) }
 0x296   : > { %3023 = sbr.rel (!%p4373_p9) target bundleno = 675 (0x2a3), region = 81  ;;  %3075 = vst [vmem:[%s3027_s30 + $0x30] sm:$0xff] (%p4373_p9), %v3074_v8 }
 0x297   : > { %vm2992_vm8 = vcmp.gt.f32.partialorder %v2984_v17, 0.0  ;;  %v3000_v20 = vmul.f32 0.2, %v2984_v17 }
 0x299   : > { %v3008_v22 = vsel %vm2992_vm8, %v2984_v17, %v3000_v20  ;;  %v3082_v60 = vld [vmem:[%s4795_s12 + $0x30] sm:$0xff] (%p4373_p9) }
 0x29a   : > { %3016 = vst [vmem:[%s4795_s12 + $0x38] sm:$0xff] %v3008_v22 }
 0x29b   : > { %3083 = vst [vmem:[%s3027_s30 + $0x90] sm:$0xff] %v3082_v60 }
 0x2a1   : > { %v3084_v28 = vld [vmem:[%s4795_s12 + $0x38] sm:$0xff] }
 0x2a2   : > { %3085 = vst [vmem:[%s3027_s30 + $0xa8] sm:$0xff] %v3084_v28 }
 0x2a3 PF: > { %s13_s20 = sadd.s32 1, %s4284_s20   ;;  %s5209_s12 = smov %s4256_s13 }
 0x2a4   : > { %p10_p3 = scmp.ge.s32.totalorder %s13_s20, 8   ;;  %s5210_s13 = smov %s4378_s4 }
 0x2a5   : > { %s5211_s14 = smov %s4264_s15  ;;  %s5212_s15 = smov %s4367_s27 }
 0x2a6   : > { %s5213_s16 = smov %s4276_s18  ;;  %s5214_s17 = smov %s4280_s19 }
 0x2a7   : > { %s5215_s18 = smov %s5218_s22  ;;  %s5216_s19 = smov %s5222_s23 }
 0x2a8   :  { %12 = sbr.rel (!%p10_p3) target bundleno = 5 (0x5), region = 164 }

</bundles_post_ra>
